<compile_context>
chip_gen: v5e
topology: v5e:2x2
jax: 0.10.0
libtpu: 0.0.40
codegen_flags: <defaults>
</compile_context>

<pallas_src>
import functools

import jax
import jax.numpy as jnp
from jax.experimental import pallas as pl
from jax.experimental.pallas import tpu as pltpu


# ----------------------------- fused forward kernel ------------------------------

def gat_forward_kernel(x_ref, adjb_ref,
                       w1_ref, abd1_ref,
                       w2_ref, abd2_ref,
                       wo_ref, bo_ref,
                       o_ref,
                       z1_ref, z2_ref,
                       *, heads: int, h1: int, h2: int):
    adj_bias = adjb_ref[...]                      # (N, N) f32: 0 on edges (j->i), -1e30 elsewhere
    n = adj_bias.shape[0]

    def gat_layer(feat, w_b, abd_b, f_out, out_ref):
        # All-head projection in ONE MXU matmul (bf16 operands, f32 accumulation).
        h_all = jnp.dot(feat.astype(jnp.bfloat16), w_b,
                        preferred_element_type=jnp.float32)              # (N, heads*f_out)
        h_b = h_all.astype(jnp.bfloat16)
        # e_dst / e_src for ALL heads via one block-diagonal matmul on the
        # otherwise-idle MXU:
        #   esd[:, h]       = <h_head_h, a_dst_h>
        #   esd[:, heads+h] = <h_head_h, a_src_h>
        esd = jnp.dot(h_b, abd_b, preferred_element_type=jnp.float32)    # (N, 2*heads)
        esd_t = jnp.transpose(esd)                                       # (2*heads, N): 1 transpose/layer
        ones_col = jnp.ones((n, 1), dtype=jnp.bfloat16)
        for hh in range(heads):                                          # static unroll (8 heads)
            # score for edge j -> i : e_dst[i] + e_src[j]
            s = esd[:, hh:hh + 1] + esd_t[heads + hh:heads + hh + 1, :]  # (N, N)
            s = jnp.maximum(s, 0.2 * s)                                  # LeakyReLU(0.2), no select
            s = s + adj_bias                                             # additive edge mask
            m = jnp.max(s, axis=1, keepdims=True)                        # finite: self-loops present
            p = jnp.exp(s - m).astype(jnp.bfloat16)                      # unnormalized attention
            # Aggregate AND row-sum in one MXU matmul (ones column appended),
            # then normalize the (N, f_out) result -- never touch NxN again.
            hf1 = jnp.concatenate(
                [h_b[:, hh * f_out:(hh + 1) * f_out], ones_col], axis=-1)    # (N, f_out+1)
            agg = jnp.dot(p, hf1, preferred_element_type=jnp.float32)        # (N, f_out+1)
            out_h = agg[:, :f_out] * pl.reciprocal(agg[:, f_out:f_out + 1], approx=True)
            # ReLU + write to this head's static lane offset in VMEM scratch
            # (bounds live ranges; no outs-list / concatenate / spills).
            out_ref[:, hh * f_out:(hh + 1) * f_out] = jnp.maximum(out_h, 0.0)

    # conv1 + relu (dropout = identity, eval mode)
    gat_layer(x_ref[...], w1_ref[...], abd1_ref[...], h1, z1_ref)
    # conv2 + relu (dropout = identity, eval mode)
    gat_layer(z1_ref[...], w2_ref[...], abd2_ref[...], h2, z2_ref)
    # Linear + softmax(dim=1). Classes are lane-padded to 128; padded columns
    # carry a -1e30 bias so their probability is exactly 0.
    logits = jnp.dot(z2_ref[...].astype(jnp.bfloat16), wo_ref[...],
                     preferred_element_type=jnp.float32) + bo_ref[...]       # (N, 128)
    m = jnp.max(logits, axis=1, keepdims=True)
    e = jnp.exp(logits - m)
    o_ref[...] = e / jnp.sum(e, axis=1, keepdims=True)


def gat_forward_pallas(x, adj_bias, p, *, heads, h1, h2, num_classes):
    n, f_in = x.shape
    d1, d2 = heads * h1, heads * h2
    c_pad = p["w_out"].shape[1]      # lane-padded class count (128)

    full = lambda shape: pl.BlockSpec(shape, lambda i: (0, 0))

    out = pl.pallas_call(
        functools.partial(gat_forward_kernel, heads=heads, h1=h1, h2=h2),
        out_shape=jax.ShapeDtypeStruct((n, c_pad), jnp.float32),
        grid=(1,),
        in_specs=[
            full((n, f_in)),          # x        (bf16)
            full((n, n)),             # adj_bias (f32, 0 / -1e30)
            full((f_in, d1)),         # w1       (bf16, heads concatenated)
            full((d1, 2 * heads)),    # abd1     (bf16, block-diag [a_dst | a_src])
            full((d1, d2)),           # w2       (bf16)
            full((d2, 2 * heads)),    # abd2     (bf16)
            full((d2, c_pad)),        # w_out    (bf16, zero-padded to 128 lanes)
            full((1, c_pad)),         # b_out    (f32, -1e30 in padded lanes)
        ],
        out_specs=full((n, c_pad)),
        scratch_shapes=[
            pltpu.VMEM((n, d1), jnp.float32),   # layer-1 output (heads concatenated)
            pltpu.VMEM((n, d2), jnp.float32),   # layer-2 output
        ],
        compiler_params=pltpu.CompilerParams(
            dimension_semantics=("arbitrary",)),
    )(x, adj_bias,
      p["w1"], p["abd1"], p["w2"], p["abd2"], p["w_out"], p["b_out"])
    return out[:, :num_classes]


@jax.jit
def gat_forward(x, adj_bias, params):
    return gat_forward_pallas(x.astype(jnp.bfloat16), adj_bias, params,
                              heads=8, h1=16, h2=8, num_classes=40)


# ------------------------- one-time layout preparation ---------------------------

def prepare_adj_bias(adj):
    # Graph-constant additive mask, hoisted out of the kernel.
    return jnp.where(adj > 0, 0.0, -1e30).astype(jnp.float32)


def prepare_params(raw, *, heads, h1, h2, num_classes, c_pad=128):
    def block_diag(a_dst, a_src, f_out):
        d = heads * f_out
        abd = jnp.zeros((d, 2 * heads), jnp.float32)
        for hh in range(heads):
            abd = abd.at[hh * f_out:(hh + 1) * f_out, hh].set(a_dst[hh])
            abd = abd.at[hh * f_out:(hh + 1) * f_out, heads + hh].set(a_src[hh])
        return abd.astype(jnp.bfloat16)

    d2 = heads * h2
    w_out = jnp.zeros((d2, c_pad), jnp.float32).at[:, :num_classes].set(raw["w_out"])
    b_out = jnp.full((1, c_pad), -1e30, jnp.float32).at[:, :num_classes].set(raw["b_out"])
    return {
        "w1":    raw["w1"].astype(jnp.bfloat16),
        "abd1":  block_diag(raw["a_dst1"], raw["a_src1"], h1),
        "w2":    raw["w2"].astype(jnp.bfloat16),
        "abd2":  block_diag(raw["a_dst2"], raw["a_src2"], h2),
        "w_out": w_out.astype(jnp.bfloat16),
        "b_out": b_out,
    }


# ----------------------------------- main ------------------------------------

if __name__ == "__main__":
    # dataset = 'arxiv' : num_features=128, num_classes=40, heads=8,
    # hidden1 = 128/8 = 16 per head, hidden2 = 64/8 = 8 per head.
    N = 64              # number of graph nodes (small synthetic graph)
    F_IN = 128          # num_features
    HEADS = 8
    H1 = 16             # hidden_channel1 per head
    H2 = 8              # hidden_channel2 per head
    C = 40              # num_classes

    key = jax.random.PRNGKey(0)
    ks = jax.random.split(key, 10)

    # Node features
    x = jax.random.normal(ks[0], (N, F_IN), dtype=jnp.float32)

    # Synthetic edge set: bidirectional ring + a few long-range edges.
    src = jnp.concatenate([jnp.arange(N), (jnp.arange(N) + 1) % N,
                           jnp.arange(0, N, 4)])
    dst = jnp.concatenate([(jnp.arange(N) + 1) % N, jnp.arange(N),
                           (jnp.arange(0, N, 4) + N // 2) % N])
    # Dense adjacency A[target, source] = 1, plus self-loops (GATConv default).
    adj = jnp.zeros((N, N), dtype=jnp.float32).at[dst, src].set(1.0)
    adj = jnp.maximum(adj, jnp.eye(N, dtype=jnp.float32))
    adj_bias = prepare_adj_bias(adj)

    # Deterministic parameter init (Glorot-ish scaling), raw layouts:
    #   w*   : (F_in, heads*F_out)  == concat_h(W_h^T)
    #   a_*  : (heads, F_out)
    #   w_out: (D, C), b_out: (1, C)
    def glorot(k, shape, fan_in):
        return (jax.random.normal(k, shape, dtype=jnp.float32)
                * (1.0 / jnp.sqrt(jnp.float32(fan_in))))

    raw_params = {
        # conv1: GATConv(128 -> 16, heads=8, bias=False)
        "w1":     glorot(ks[1], (F_IN, HEADS * H1), F_IN),
        "a_src1": glorot(ks[2], (HEADS, H1), H1),
        "a_dst1": glorot(ks[3], (HEADS, H1), H1),
        # conv2: GATConv(128 -> 8, heads=8, bias=False)
        "w2":     glorot(ks[4], (HEADS * H1, HEADS * H2), HEADS * H1),
        "a_src2": glorot(ks[5], (HEADS, H2), H2),
        "a_dst2": glorot(ks[6], (HEADS, H2), H2),
        # out: Linear(64 -> 40)
        "w_out":  glorot(ks[7], (HEADS * H2, C), HEADS * H2),
        "b_out":  glorot(ks[8], (1, C), HEADS * H2),
    }
    params = prepare_params(raw_params, heads=HEADS, h1=H1, h2=H2, num_classes=C)

    y = gat_forward(x, adj_bias, params)
    y = jax.block_until_ready(y)

    assert y.shape == (N, C)
    assert bool(jnp.all(jnp.isfinite(y)))
    # softmax rows sum to 1
    assert bool(jnp.allclose(jnp.sum(y, axis=1), 1.0, atol=1e-5))
    print("KERNEL_OK")
</pallas_src>

<mosaic_0001>
module attributes {stable_mosaic.version = 11 : i64} {
  func.func @gat_forward_kernel(%arg0: i32, %arg1: memref<64x128xbf16, #tpu.memory_space<vmem>>, %arg2: memref<64x64xf32, #tpu.memory_space<vmem>>, %arg3: memref<128x128xbf16, #tpu.memory_space<vmem>>, %arg4: memref<128x16xbf16, #tpu.memory_space<vmem>>, %arg5: memref<128x64xbf16, #tpu.memory_space<vmem>>, %arg6: memref<64x16xbf16, #tpu.memory_space<vmem>>, %arg7: memref<64x128xbf16, #tpu.memory_space<vmem>>, %arg8: memref<1x128xf32, #tpu.memory_space<vmem>>, %arg9: memref<64x128xf32, #tpu.memory_space<vmem>>, %arg10: memref<64x128xf32, #tpu.memory_space<vmem>>, %arg11: memref<64x64xf32, #tpu.memory_space<vmem>>) attributes {dimension_semantics = [#tpu.dimension_semantics<arbitrary>], iteration_bounds = array<i64: 1>, scalar_prefetch = 0 : i64, scratch_operands = 2 : i64, tpu.core_type = #tpu.core_type<tc>, window_params = [{pipeline_mode = #tpu.pipeline_mode<synchronous>, transform_indices = @transform_0, window_bounds = array<i64: 64, 128>}, {pipeline_mode = #tpu.pipeline_mode<synchronous>, transform_indices = @transform_1, window_bounds = array<i64: 64, 64>}, {pipeline_mode = #tpu.pipeline_mode<synchronous>, transform_indices = @transform_2, window_bounds = array<i64: 128, 128>}, {pipeline_mode = #tpu.pipeline_mode<synchronous>, transform_indices = @transform_3, window_bounds = array<i64: 128, 16>}, {pipeline_mode = #tpu.pipeline_mode<synchronous>, transform_indices = @transform_4, window_bounds = array<i64: 128, 64>}, {pipeline_mode = #tpu.pipeline_mode<synchronous>, transform_indices = @transform_5, window_bounds = array<i64: 64, 16>}, {pipeline_mode = #tpu.pipeline_mode<synchronous>, transform_indices = @transform_6, window_bounds = array<i64: 64, 128>}, {pipeline_mode = #tpu.pipeline_mode<synchronous>, transform_indices = @transform_7, window_bounds = array<i64: 1, 128>}, {pipeline_mode = #tpu.pipeline_mode<synchronous>, transform_indices = @transform_8, window_bounds = array<i64: 64, 128>}]} {
    %c0 = arith.constant 0 : index
    %c0_0 = arith.constant 0 : index
    %0 = vector.load %arg2[%c0, %c0_0] : memref<64x64xf32, #tpu.memory_space<vmem>>, vector<64x64xf32>
    %c0_1 = arith.constant 0 : index
    %c0_2 = arith.constant 0 : index
    %1 = vector.load %arg1[%c0_1, %c0_2] : memref<64x128xbf16, #tpu.memory_space<vmem>>, vector<64x128xbf16>
    %c0_3 = arith.constant 0 : index
    %c0_4 = arith.constant 0 : index
    %2 = vector.load %arg3[%c0_3, %c0_4] : memref<128x128xbf16, #tpu.memory_space<vmem>>, vector<128x128xbf16>
    %c0_5 = arith.constant 0 : index
    %c0_6 = arith.constant 0 : index
    %3 = vector.load %arg4[%c0_5, %c0_6] : memref<128x16xbf16, #tpu.memory_space<vmem>>, vector<128x16xbf16>
    %cst = arith.constant dense<0.000000e+00> : vector<64x128xf32>
    %4 = tpu.matmul %1, %2, %cst {dimension_numbers = #tpu.dot_dimension_numbers<[1], [0], [0], [1], [0, 0, 1, 1], [], []>} : vector<64x128xbf16>, vector<128x128xbf16>, vector<64x128xf32> -> vector<64x128xf32>
    %5 = arith.truncf %4 : vector<64x128xf32> to vector<64x128xbf16>
    %cst_7 = arith.constant dense<0.000000e+00> : vector<64x16xf32>
    %6 = tpu.matmul %5, %3, %cst_7 {dimension_numbers = #tpu.dot_dimension_numbers<[1], [0], [0], [1], [0, 0, 1, 1], [], []>} : vector<64x128xbf16>, vector<128x16xbf16>, vector<64x16xf32> -> vector<64x16xf32>
    %7 = tpu.transpose %6, [1, 0] : vector<64x16xf32> -> vector<16x64xf32>
    %cst_8 = arith.constant 1.000000e+00 : bf16
    %8 = vector.broadcast %cst_8 : bf16 to vector<64x1xbf16>
    %9 = vector.extract_strided_slice %6 {offsets = [0, 0], sizes = [64, 1], strides = [1, 1]} : vector<64x16xf32> to vector<64x1xf32>
    %10 = vector.extract_strided_slice %7 {offsets = [8, 0], sizes = [1, 64], strides = [1, 1]} : vector<16x64xf32> to vector<1x64xf32>
    %11 = vector.broadcast %9 : vector<64x1xf32> to vector<64x64xf32>
    %12 = vector.broadcast %10 : vector<1x64xf32> to vector<64x64xf32>
    %13 = arith.addf %11, %12 : vector<64x64xf32>
    %cst_9 = arith.constant 2.000000e-01 : f32
    %14 = vector.broadcast %cst_9 : f32 to vector<64x64xf32>
    %15 = arith.mulf %14, %13 : vector<64x64xf32>
    %16 = arith.maximumf %13, %15 : vector<64x64xf32>
    %17 = arith.addf %16, %0 : vector<64x64xf32>
    %cst_10 = arith.constant dense<0xFF800000> : vector<64xf32>
    %18 = vector.multi_reduction <maximumf>, %17, %cst_10 [1] : vector<64x64xf32> to vector<64xf32>
    %19 = vector.shape_cast %18 : vector<64xf32> to vector<64x1xf32>
    %20 = vector.broadcast %19 : vector<64x1xf32> to vector<64x64xf32>
    %21 = arith.subf %17, %20 : vector<64x64xf32>
    %22 = math.exp %21 : vector<64x64xf32>
    %23 = arith.truncf %22 : vector<64x64xf32> to vector<64x64xbf16>
    %24 = vector.extract_strided_slice %5 {offsets = [0, 0], sizes = [64, 16], strides = [1, 1]} : vector<64x128xbf16> to vector<64x16xbf16>
    %25 = tpu.concatenate %24, %8 in 1 : vector<64x16xbf16>, vector<64x1xbf16> -> vector<64x17xbf16>
    %cst_11 = arith.constant dense<0.000000e+00> : vector<64x17xf32>
    %26 = tpu.matmul %23, %25, %cst_11 {dimension_numbers = #tpu.dot_dimension_numbers<[1], [0], [0], [1], [0, 0, 1, 1], [], []>} : vector<64x64xbf16>, vector<64x17xbf16>, vector<64x17xf32> -> vector<64x17xf32>
    %27 = vector.extract_strided_slice %26 {offsets = [0, 0], sizes = [64, 16], strides = [1, 1]} : vector<64x17xf32> to vector<64x16xf32>
    %28 = vector.extract_strided_slice %26 {offsets = [0, 16], sizes = [64, 1], strides = [1, 1]} : vector<64x17xf32> to vector<64x1xf32>
    %29 = tpu.reciprocal %28 {approx = true} : vector<64x1xf32> -> vector<64x1xf32>
    %30 = vector.broadcast %29 : vector<64x1xf32> to vector<64x16xf32>
    %31 = arith.mulf %27, %30 : vector<64x16xf32>
    %cst_12 = arith.constant 0.000000e+00 : f32
    %32 = vector.broadcast %cst_12 : f32 to vector<64x16xf32>
    %33 = arith.maximumf %31, %32 : vector<64x16xf32>
    %c0_13 = arith.constant 0 : index
    %c0_14 = arith.constant 0 : index
    %34 = vector.load %arg10[%c0_13, %c0_14] : memref<64x128xf32, #tpu.memory_space<vmem>>, vector<64x16xf32>
    tpu.vector_store %arg10[%c0_13, %c0_14], %33 {strides = array<i32>} : memref<64x128xf32, #tpu.memory_space<vmem>>, vector<64x16xf32>,
    %35 = vector.extract_strided_slice %6 {offsets = [0, 1], sizes = [64, 1], strides = [1, 1]} : vector<64x16xf32> to vector<64x1xf32>
    %36 = vector.extract_strided_slice %7 {offsets = [9, 0], sizes = [1, 64], strides = [1, 1]} : vector<16x64xf32> to vector<1x64xf32>
    %37 = vector.broadcast %35 : vector<64x1xf32> to vector<64x64xf32>
    %38 = vector.broadcast %36 : vector<1x64xf32> to vector<64x64xf32>
    %39 = arith.addf %37, %38 : vector<64x64xf32>
    %cst_15 = arith.constant 2.000000e-01 : f32
    %40 = vector.broadcast %cst_15 : f32 to vector<64x64xf32>
    %41 = arith.mulf %40, %39 : vector<64x64xf32>
    %42 = arith.maximumf %39, %41 : vector<64x64xf32>
    %43 = arith.addf %42, %0 : vector<64x64xf32>
    %cst_16 = arith.constant dense<0xFF800000> : vector<64xf32>
    %44 = vector.multi_reduction <maximumf>, %43, %cst_16 [1] : vector<64x64xf32> to vector<64xf32>
    %45 = vector.shape_cast %44 : vector<64xf32> to vector<64x1xf32>
    %46 = vector.broadcast %45 : vector<64x1xf32> to vector<64x64xf32>
    %47 = arith.subf %43, %46 : vector<64x64xf32>
    %48 = math.exp %47 : vector<64x64xf32>
    %49 = arith.truncf %48 : vector<64x64xf32> to vector<64x64xbf16>
    %50 = vector.extract_strided_slice %5 {offsets = [0, 16], sizes = [64, 16], strides = [1, 1]} : vector<64x128xbf16> to vector<64x16xbf16>
    %51 = tpu.concatenate %50, %8 in 1 : vector<64x16xbf16>, vector<64x1xbf16> -> vector<64x17xbf16>
    %cst_17 = arith.constant dense<0.000000e+00> : vector<64x17xf32>
    %52 = tpu.matmul %49, %51, %cst_17 {dimension_numbers = #tpu.dot_dimension_numbers<[1], [0], [0], [1], [0, 0, 1, 1], [], []>} : vector<64x64xbf16>, vector<64x17xbf16>, vector<64x17xf32> -> vector<64x17xf32>
    %53 = vector.extract_strided_slice %52 {offsets = [0, 0], sizes = [64, 16], strides = [1, 1]} : vector<64x17xf32> to vector<64x16xf32>
    %54 = vector.extract_strided_slice %52 {offsets = [0, 16], sizes = [64, 1], strides = [1, 1]} : vector<64x17xf32> to vector<64x1xf32>
    %55 = tpu.reciprocal %54 {approx = true} : vector<64x1xf32> -> vector<64x1xf32>
    %56 = vector.broadcast %55 : vector<64x1xf32> to vector<64x16xf32>
    %57 = arith.mulf %53, %56 : vector<64x16xf32>
    %cst_18 = arith.constant 0.000000e+00 : f32
    %58 = vector.broadcast %cst_18 : f32 to vector<64x16xf32>
    %59 = arith.maximumf %57, %58 : vector<64x16xf32>
    %c0_19 = arith.constant 0 : index
    %c16 = arith.constant 16 : index
    %60 = vector.load %arg10[%c0_19, %c16] : memref<64x128xf32, #tpu.memory_space<vmem>>, vector<64x16xf32>
    tpu.vector_store %arg10[%c0_19, %c16], %59 {strides = array<i32>} : memref<64x128xf32, #tpu.memory_space<vmem>>, vector<64x16xf32>,
    %61 = vector.extract_strided_slice %6 {offsets = [0, 2], sizes = [64, 1], strides = [1, 1]} : vector<64x16xf32> to vector<64x1xf32>
    %62 = vector.extract_strided_slice %7 {offsets = [10, 0], sizes = [1, 64], strides = [1, 1]} : vector<16x64xf32> to vector<1x64xf32>
    %63 = vector.broadcast %61 : vector<64x1xf32> to vector<64x64xf32>
    %64 = vector.broadcast %62 : vector<1x64xf32> to vector<64x64xf32>
    %65 = arith.addf %63, %64 : vector<64x64xf32>
    %cst_20 = arith.constant 2.000000e-01 : f32
    %66 = vector.broadcast %cst_20 : f32 to vector<64x64xf32>
    %67 = arith.mulf %66, %65 : vector<64x64xf32>
    %68 = arith.maximumf %65, %67 : vector<64x64xf32>
    %69 = arith.addf %68, %0 : vector<64x64xf32>
    %cst_21 = arith.constant dense<0xFF800000> : vector<64xf32>
    %70 = vector.multi_reduction <maximumf>, %69, %cst_21 [1] : vector<64x64xf32> to vector<64xf32>
    %71 = vector.shape_cast %70 : vector<64xf32> to vector<64x1xf32>
    %72 = vector.broadcast %71 : vector<64x1xf32> to vector<64x64xf32>
    %73 = arith.subf %69, %72 : vector<64x64xf32>
    %74 = math.exp %73 : vector<64x64xf32>
    %75 = arith.truncf %74 : vector<64x64xf32> to vector<64x64xbf16>
    %76 = vector.extract_strided_slice %5 {offsets = [0, 32], sizes = [64, 16], strides = [1, 1]} : vector<64x128xbf16> to vector<64x16xbf16>
    %77 = tpu.concatenate %76, %8 in 1 : vector<64x16xbf16>, vector<64x1xbf16> -> vector<64x17xbf16>
    %cst_22 = arith.constant dense<0.000000e+00> : vector<64x17xf32>
    %78 = tpu.matmul %75, %77, %cst_22 {dimension_numbers = #tpu.dot_dimension_numbers<[1], [0], [0], [1], [0, 0, 1, 1], [], []>} : vector<64x64xbf16>, vector<64x17xbf16>, vector<64x17xf32> -> vector<64x17xf32>
    %79 = vector.extract_strided_slice %78 {offsets = [0, 0], sizes = [64, 16], strides = [1, 1]} : vector<64x17xf32> to vector<64x16xf32>
    %80 = vector.extract_strided_slice %78 {offsets = [0, 16], sizes = [64, 1], strides = [1, 1]} : vector<64x17xf32> to vector<64x1xf32>
    %81 = tpu.reciprocal %80 {approx = true} : vector<64x1xf32> -> vector<64x1xf32>
    %82 = vector.broadcast %81 : vector<64x1xf32> to vector<64x16xf32>
    %83 = arith.mulf %79, %82 : vector<64x16xf32>
    %cst_23 = arith.constant 0.000000e+00 : f32
    %84 = vector.broadcast %cst_23 : f32 to vector<64x16xf32>
    %85 = arith.maximumf %83, %84 : vector<64x16xf32>
    %c0_24 = arith.constant 0 : index
    %c32 = arith.constant 32 : index
    %86 = vector.load %arg10[%c0_24, %c32] : memref<64x128xf32, #tpu.memory_space<vmem>>, vector<64x16xf32>
    tpu.vector_store %arg10[%c0_24, %c32], %85 {strides = array<i32>} : memref<64x128xf32, #tpu.memory_space<vmem>>, vector<64x16xf32>,
    %87 = vector.extract_strided_slice %6 {offsets = [0, 3], sizes = [64, 1], strides = [1, 1]} : vector<64x16xf32> to vector<64x1xf32>
    %88 = vector.extract_strided_slice %7 {offsets = [11, 0], sizes = [1, 64], strides = [1, 1]} : vector<16x64xf32> to vector<1x64xf32>
    %89 = vector.broadcast %87 : vector<64x1xf32> to vector<64x64xf32>
    %90 = vector.broadcast %88 : vector<1x64xf32> to vector<64x64xf32>
    %91 = arith.addf %89, %90 : vector<64x64xf32>
    %cst_25 = arith.constant 2.000000e-01 : f32
    %92 = vector.broadcast %cst_25 : f32 to vector<64x64xf32>
    %93 = arith.mulf %92, %91 : vector<64x64xf32>
    %94 = arith.maximumf %91, %93 : vector<64x64xf32>
    %95 = arith.addf %94, %0 : vector<64x64xf32>
    %cst_26 = arith.constant dense<0xFF800000> : vector<64xf32>
    %96 = vector.multi_reduction <maximumf>, %95, %cst_26 [1] : vector<64x64xf32> to vector<64xf32>
    %97 = vector.shape_cast %96 : vector<64xf32> to vector<64x1xf32>
    %98 = vector.broadcast %97 : vector<64x1xf32> to vector<64x64xf32>
    %99 = arith.subf %95, %98 : vector<64x64xf32>
    %100 = math.exp %99 : vector<64x64xf32>
    %101 = arith.truncf %100 : vector<64x64xf32> to vector<64x64xbf16>
    %102 = vector.extract_strided_slice %5 {offsets = [0, 48], sizes = [64, 16], strides = [1, 1]} : vector<64x128xbf16> to vector<64x16xbf16>
    %103 = tpu.concatenate %102, %8 in 1 : vector<64x16xbf16>, vector<64x1xbf16> -> vector<64x17xbf16>
    %cst_27 = arith.constant dense<0.000000e+00> : vector<64x17xf32>
    %104 = tpu.matmul %101, %103, %cst_27 {dimension_numbers = #tpu.dot_dimension_numbers<[1], [0], [0], [1], [0, 0, 1, 1], [], []>} : vector<64x64xbf16>, vector<64x17xbf16>, vector<64x17xf32> -> vector<64x17xf32>
    %105 = vector.extract_strided_slice %104 {offsets = [0, 0], sizes = [64, 16], strides = [1, 1]} : vector<64x17xf32> to vector<64x16xf32>
    %106 = vector.extract_strided_slice %104 {offsets = [0, 16], sizes = [64, 1], strides = [1, 1]} : vector<64x17xf32> to vector<64x1xf32>
    %107 = tpu.reciprocal %106 {approx = true} : vector<64x1xf32> -> vector<64x1xf32>
    %108 = vector.broadcast %107 : vector<64x1xf32> to vector<64x16xf32>
    %109 = arith.mulf %105, %108 : vector<64x16xf32>
    %cst_28 = arith.constant 0.000000e+00 : f32
    %110 = vector.broadcast %cst_28 : f32 to vector<64x16xf32>
    %111 = arith.maximumf %109, %110 : vector<64x16xf32>
    %c0_29 = arith.constant 0 : index
    %c48 = arith.constant 48 : index
    %112 = vector.load %arg10[%c0_29, %c48] : memref<64x128xf32, #tpu.memory_space<vmem>>, vector<64x16xf32>
    tpu.vector_store %arg10[%c0_29, %c48], %111 {strides = array<i32>} : memref<64x128xf32, #tpu.memory_space<vmem>>, vector<64x16xf32>,
    %113 = vector.extract_strided_slice %6 {offsets = [0, 4], sizes = [64, 1], strides = [1, 1]} : vector<64x16xf32> to vector<64x1xf32>
    %114 = vector.extract_strided_slice %7 {offsets = [12, 0], sizes = [1, 64], strides = [1, 1]} : vector<16x64xf32> to vector<1x64xf32>
    %115 = vector.broadcast %113 : vector<64x1xf32> to vector<64x64xf32>
    %116 = vector.broadcast %114 : vector<1x64xf32> to vector<64x64xf32>
    %117 = arith.addf %115, %116 : vector<64x64xf32>
    %cst_30 = arith.constant 2.000000e-01 : f32
    %118 = vector.broadcast %cst_30 : f32 to vector<64x64xf32>
    %119 = arith.mulf %118, %117 : vector<64x64xf32>
    %120 = arith.maximumf %117, %119 : vector<64x64xf32>
    %121 = arith.addf %120, %0 : vector<64x64xf32>
    %cst_31 = arith.constant dense<0xFF800000> : vector<64xf32>
    %122 = vector.multi_reduction <maximumf>, %121, %cst_31 [1] : vector<64x64xf32> to vector<64xf32>
    %123 = vector.shape_cast %122 : vector<64xf32> to vector<64x1xf32>
    %124 = vector.broadcast %123 : vector<64x1xf32> to vector<64x64xf32>
    %125 = arith.subf %121, %124 : vector<64x64xf32>
    %126 = math.exp %125 : vector<64x64xf32>
    %127 = arith.truncf %126 : vector<64x64xf32> to vector<64x64xbf16>
    %128 = vector.extract_strided_slice %5 {offsets = [0, 64], sizes = [64, 16], strides = [1, 1]} : vector<64x128xbf16> to vector<64x16xbf16>
    %129 = tpu.concatenate %128, %8 in 1 : vector<64x16xbf16>, vector<64x1xbf16> -> vector<64x17xbf16>
    %cst_32 = arith.constant dense<0.000000e+00> : vector<64x17xf32>
    %130 = tpu.matmul %127, %129, %cst_32 {dimension_numbers = #tpu.dot_dimension_numbers<[1], [0], [0], [1], [0, 0, 1, 1], [], []>} : vector<64x64xbf16>, vector<64x17xbf16>, vector<64x17xf32> -> vector<64x17xf32>
    %131 = vector.extract_strided_slice %130 {offsets = [0, 0], sizes = [64, 16], strides = [1, 1]} : vector<64x17xf32> to vector<64x16xf32>
    %132 = vector.extract_strided_slice %130 {offsets = [0, 16], sizes = [64, 1], strides = [1, 1]} : vector<64x17xf32> to vector<64x1xf32>
    %133 = tpu.reciprocal %132 {approx = true} : vector<64x1xf32> -> vector<64x1xf32>
    %134 = vector.broadcast %133 : vector<64x1xf32> to vector<64x16xf32>
    %135 = arith.mulf %131, %134 : vector<64x16xf32>
    %cst_33 = arith.constant 0.000000e+00 : f32
    %136 = vector.broadcast %cst_33 : f32 to vector<64x16xf32>
    %137 = arith.maximumf %135, %136 : vector<64x16xf32>
    %c0_34 = arith.constant 0 : index
    %c64 = arith.constant 64 : index
    %138 = vector.load %arg10[%c0_34, %c64] : memref<64x128xf32, #tpu.memory_space<vmem>>, vector<64x16xf32>
    tpu.vector_store %arg10[%c0_34, %c64], %137 {strides = array<i32>} : memref<64x128xf32, #tpu.memory_space<vmem>>, vector<64x16xf32>,
    %139 = vector.extract_strided_slice %6 {offsets = [0, 5], sizes = [64, 1], strides = [1, 1]} : vector<64x16xf32> to vector<64x1xf32>
    %140 = vector.extract_strided_slice %7 {offsets = [13, 0], sizes = [1, 64], strides = [1, 1]} : vector<16x64xf32> to vector<1x64xf32>
    %141 = vector.broadcast %139 : vector<64x1xf32> to vector<64x64xf32>
    %142 = vector.broadcast %140 : vector<1x64xf32> to vector<64x64xf32>
    %143 = arith.addf %141, %142 : vector<64x64xf32>
    %cst_35 = arith.constant 2.000000e-01 : f32
    %144 = vector.broadcast %cst_35 : f32 to vector<64x64xf32>
    %145 = arith.mulf %144, %143 : vector<64x64xf32>
    %146 = arith.maximumf %143, %145 : vector<64x64xf32>
    %147 = arith.addf %146, %0 : vector<64x64xf32>
    %cst_36 = arith.constant dense<0xFF800000> : vector<64xf32>
    %148 = vector.multi_reduction <maximumf>, %147, %cst_36 [1] : vector<64x64xf32> to vector<64xf32>
    %149 = vector.shape_cast %148 : vector<64xf32> to vector<64x1xf32>
    %150 = vector.broadcast %149 : vector<64x1xf32> to vector<64x64xf32>
    %151 = arith.subf %147, %150 : vector<64x64xf32>
    %152 = math.exp %151 : vector<64x64xf32>
    %153 = arith.truncf %152 : vector<64x64xf32> to vector<64x64xbf16>
    %154 = vector.extract_strided_slice %5 {offsets = [0, 80], sizes = [64, 16], strides = [1, 1]} : vector<64x128xbf16> to vector<64x16xbf16>
    %155 = tpu.concatenate %154, %8 in 1 : vector<64x16xbf16>, vector<64x1xbf16> -> vector<64x17xbf16>
    %cst_37 = arith.constant dense<0.000000e+00> : vector<64x17xf32>
    %156 = tpu.matmul %153, %155, %cst_37 {dimension_numbers = #tpu.dot_dimension_numbers<[1], [0], [0], [1], [0, 0, 1, 1], [], []>} : vector<64x64xbf16>, vector<64x17xbf16>, vector<64x17xf32> -> vector<64x17xf32>
    %157 = vector.extract_strided_slice %156 {offsets = [0, 0], sizes = [64, 16], strides = [1, 1]} : vector<64x17xf32> to vector<64x16xf32>
    %158 = vector.extract_strided_slice %156 {offsets = [0, 16], sizes = [64, 1], strides = [1, 1]} : vector<64x17xf32> to vector<64x1xf32>
    %159 = tpu.reciprocal %158 {approx = true} : vector<64x1xf32> -> vector<64x1xf32>
    %160 = vector.broadcast %159 : vector<64x1xf32> to vector<64x16xf32>
    %161 = arith.mulf %157, %160 : vector<64x16xf32>
    %cst_38 = arith.constant 0.000000e+00 : f32
    %162 = vector.broadcast %cst_38 : f32 to vector<64x16xf32>
    %163 = arith.maximumf %161, %162 : vector<64x16xf32>
    %c0_39 = arith.constant 0 : index
    %c80 = arith.constant 80 : index
    %164 = vector.load %arg10[%c0_39, %c80] : memref<64x128xf32, #tpu.memory_space<vmem>>, vector<64x16xf32>
    tpu.vector_store %arg10[%c0_39, %c80], %163 {strides = array<i32>} : memref<64x128xf32, #tpu.memory_space<vmem>>, vector<64x16xf32>,
    %165 = vector.extract_strided_slice %6 {offsets = [0, 6], sizes = [64, 1], strides = [1, 1]} : vector<64x16xf32> to vector<64x1xf32>
    %166 = vector.extract_strided_slice %7 {offsets = [14, 0], sizes = [1, 64], strides = [1, 1]} : vector<16x64xf32> to vector<1x64xf32>
    %167 = vector.broadcast %165 : vector<64x1xf32> to vector<64x64xf32>
    %168 = vector.broadcast %166 : vector<1x64xf32> to vector<64x64xf32>
    %169 = arith.addf %167, %168 : vector<64x64xf32>
    %cst_40 = arith.constant 2.000000e-01 : f32
    %170 = vector.broadcast %cst_40 : f32 to vector<64x64xf32>
    %171 = arith.mulf %170, %169 : vector<64x64xf32>
    %172 = arith.maximumf %169, %171 : vector<64x64xf32>
    %173 = arith.addf %172, %0 : vector<64x64xf32>
    %cst_41 = arith.constant dense<0xFF800000> : vector<64xf32>
    %174 = vector.multi_reduction <maximumf>, %173, %cst_41 [1] : vector<64x64xf32> to vector<64xf32>
    %175 = vector.shape_cast %174 : vector<64xf32> to vector<64x1xf32>
    %176 = vector.broadcast %175 : vector<64x1xf32> to vector<64x64xf32>
    %177 = arith.subf %173, %176 : vector<64x64xf32>
    %178 = math.exp %177 : vector<64x64xf32>
    %179 = arith.truncf %178 : vector<64x64xf32> to vector<64x64xbf16>
    %180 = vector.extract_strided_slice %5 {offsets = [0, 96], sizes = [64, 16], strides = [1, 1]} : vector<64x128xbf16> to vector<64x16xbf16>
    %181 = tpu.concatenate %180, %8 in 1 : vector<64x16xbf16>, vector<64x1xbf16> -> vector<64x17xbf16>
    %cst_42 = arith.constant dense<0.000000e+00> : vector<64x17xf32>
    %182 = tpu.matmul %179, %181, %cst_42 {dimension_numbers = #tpu.dot_dimension_numbers<[1], [0], [0], [1], [0, 0, 1, 1], [], []>} : vector<64x64xbf16>, vector<64x17xbf16>, vector<64x17xf32> -> vector<64x17xf32>
    %183 = vector.extract_strided_slice %182 {offsets = [0, 0], sizes = [64, 16], strides = [1, 1]} : vector<64x17xf32> to vector<64x16xf32>
    %184 = vector.extract_strided_slice %182 {offsets = [0, 16], sizes = [64, 1], strides = [1, 1]} : vector<64x17xf32> to vector<64x1xf32>
    %185 = tpu.reciprocal %184 {approx = true} : vector<64x1xf32> -> vector<64x1xf32>
    %186 = vector.broadcast %185 : vector<64x1xf32> to vector<64x16xf32>
    %187 = arith.mulf %183, %186 : vector<64x16xf32>
    %cst_43 = arith.constant 0.000000e+00 : f32
    %188 = vector.broadcast %cst_43 : f32 to vector<64x16xf32>
    %189 = arith.maximumf %187, %188 : vector<64x16xf32>
    %c0_44 = arith.constant 0 : index
    %c96 = arith.constant 96 : index
    %190 = vector.load %arg10[%c0_44, %c96] : memref<64x128xf32, #tpu.memory_space<vmem>>, vector<64x16xf32>
    tpu.vector_store %arg10[%c0_44, %c96], %189 {strides = array<i32>} : memref<64x128xf32, #tpu.memory_space<vmem>>, vector<64x16xf32>,
    %191 = vector.extract_strided_slice %6 {offsets = [0, 7], sizes = [64, 1], strides = [1, 1]} : vector<64x16xf32> to vector<64x1xf32>
    %192 = vector.extract_strided_slice %7 {offsets = [15, 0], sizes = [1, 64], strides = [1, 1]} : vector<16x64xf32> to vector<1x64xf32>
    %193 = vector.broadcast %191 : vector<64x1xf32> to vector<64x64xf32>
    %194 = vector.broadcast %192 : vector<1x64xf32> to vector<64x64xf32>
    %195 = arith.addf %193, %194 : vector<64x64xf32>
    %cst_45 = arith.constant 2.000000e-01 : f32
    %196 = vector.broadcast %cst_45 : f32 to vector<64x64xf32>
    %197 = arith.mulf %196, %195 : vector<64x64xf32>
    %198 = arith.maximumf %195, %197 : vector<64x64xf32>
    %199 = arith.addf %198, %0 : vector<64x64xf32>
    %cst_46 = arith.constant dense<0xFF800000> : vector<64xf32>
    %200 = vector.multi_reduction <maximumf>, %199, %cst_46 [1] : vector<64x64xf32> to vector<64xf32>
    %201 = vector.shape_cast %200 : vector<64xf32> to vector<64x1xf32>
    %202 = vector.broadcast %201 : vector<64x1xf32> to vector<64x64xf32>
    %203 = arith.subf %199, %202 : vector<64x64xf32>
    %204 = math.exp %203 : vector<64x64xf32>
    %205 = arith.truncf %204 : vector<64x64xf32> to vector<64x64xbf16>
    %206 = vector.extract_strided_slice %5 {offsets = [0, 112], sizes = [64, 16], strides = [1, 1]} : vector<64x128xbf16> to vector<64x16xbf16>
    %207 = tpu.concatenate %206, %8 in 1 : vector<64x16xbf16>, vector<64x1xbf16> -> vector<64x17xbf16>
    %cst_47 = arith.constant dense<0.000000e+00> : vector<64x17xf32>
    %208 = tpu.matmul %205, %207, %cst_47 {dimension_numbers = #tpu.dot_dimension_numbers<[1], [0], [0], [1], [0, 0, 1, 1], [], []>} : vector<64x64xbf16>, vector<64x17xbf16>, vector<64x17xf32> -> vector<64x17xf32>
    %209 = vector.extract_strided_slice %208 {offsets = [0, 0], sizes = [64, 16], strides = [1, 1]} : vector<64x17xf32> to vector<64x16xf32>
    %210 = vector.extract_strided_slice %208 {offsets = [0, 16], sizes = [64, 1], strides = [1, 1]} : vector<64x17xf32> to vector<64x1xf32>
    %211 = tpu.reciprocal %210 {approx = true} : vector<64x1xf32> -> vector<64x1xf32>
    %212 = vector.broadcast %211 : vector<64x1xf32> to vector<64x16xf32>
    %213 = arith.mulf %209, %212 : vector<64x16xf32>
    %cst_48 = arith.constant 0.000000e+00 : f32
    %214 = vector.broadcast %cst_48 : f32 to vector<64x16xf32>
    %215 = arith.maximumf %213, %214 : vector<64x16xf32>
    %c0_49 = arith.constant 0 : index
    %c112 = arith.constant 112 : index
    %216 = vector.load %arg10[%c0_49, %c112] : memref<64x128xf32, #tpu.memory_space<vmem>>, vector<64x16xf32>
    tpu.vector_store %arg10[%c0_49, %c112], %215 {strides = array<i32>} : memref<64x128xf32, #tpu.memory_space<vmem>>, vector<64x16xf32>,
    %c0_50 = arith.constant 0 : index
    %c0_51 = arith.constant 0 : index
    %217 = vector.load %arg10[%c0_50, %c0_51] : memref<64x128xf32, #tpu.memory_space<vmem>>, vector<64x128xf32>
    %c0_52 = arith.constant 0 : index
    %c0_53 = arith.constant 0 : index
    %218 = vector.load %arg5[%c0_52, %c0_53] : memref<128x64xbf16, #tpu.memory_space<vmem>>, vector<128x64xbf16>
    %c0_54 = arith.constant 0 : index
    %c0_55 = arith.constant 0 : index
    %219 = vector.load %arg6[%c0_54, %c0_55] : memref<64x16xbf16, #tpu.memory_space<vmem>>, vector<64x16xbf16>
    %220 = arith.truncf %217 : vector<64x128xf32> to vector<64x128xbf16>
    %cst_56 = arith.constant dense<0.000000e+00> : vector<64x64xf32>
    %221 = tpu.matmul %220, %218, %cst_56 {dimension_numbers = #tpu.dot_dimension_numbers<[1], [0], [0], [1], [0, 0, 1, 1], [], []>} : vector<64x128xbf16>, vector<128x64xbf16>, vector<64x64xf32> -> vector<64x64xf32>
    %222 = arith.truncf %221 : vector<64x64xf32> to vector<64x64xbf16>
    %cst_57 = arith.constant dense<0.000000e+00> : vector<64x16xf32>
    %223 = tpu.matmul %222, %219, %cst_57 {dimension_numbers = #tpu.dot_dimension_numbers<[1], [0], [0], [1], [0, 0, 1, 1], [], []>} : vector<64x64xbf16>, vector<64x16xbf16>, vector<64x16xf32> -> vector<64x16xf32>
    %224 = tpu.transpose %223, [1, 0] : vector<64x16xf32> -> vector<16x64xf32>
    %cst_58 = arith.constant 1.000000e+00 : bf16
    %225 = vector.broadcast %cst_58 : bf16 to vector<64x1xbf16>
    %226 = vector.extract_strided_slice %223 {offsets = [0, 0], sizes = [64, 1], strides = [1, 1]} : vector<64x16xf32> to vector<64x1xf32>
    %227 = vector.extract_strided_slice %224 {offsets = [8, 0], sizes = [1, 64], strides = [1, 1]} : vector<16x64xf32> to vector<1x64xf32>
    %228 = vector.broadcast %226 : vector<64x1xf32> to vector<64x64xf32>
    %229 = vector.broadcast %227 : vector<1x64xf32> to vector<64x64xf32>
    %230 = arith.addf %228, %229 : vector<64x64xf32>
    %cst_59 = arith.constant 2.000000e-01 : f32
    %231 = vector.broadcast %cst_59 : f32 to vector<64x64xf32>
    %232 = arith.mulf %231, %230 : vector<64x64xf32>
    %233 = arith.maximumf %230, %232 : vector<64x64xf32>
    %234 = arith.addf %233, %0 : vector<64x64xf32>
    %cst_60 = arith.constant dense<0xFF800000> : vector<64xf32>
    %235 = vector.multi_reduction <maximumf>, %234, %cst_60 [1] : vector<64x64xf32> to vector<64xf32>
    %236 = vector.shape_cast %235 : vector<64xf32> to vector<64x1xf32>
    %237 = vector.broadcast %236 : vector<64x1xf32> to vector<64x64xf32>
    %238 = arith.subf %234, %237 : vector<64x64xf32>
    %239 = math.exp %238 : vector<64x64xf32>
    %240 = arith.truncf %239 : vector<64x64xf32> to vector<64x64xbf16>
    %241 = vector.extract_strided_slice %222 {offsets = [0, 0], sizes = [64, 8], strides = [1, 1]} : vector<64x64xbf16> to vector<64x8xbf16>
    %242 = tpu.concatenate %241, %225 in 1 : vector<64x8xbf16>, vector<64x1xbf16> -> vector<64x9xbf16>
    %cst_61 = arith.constant dense<0.000000e+00> : vector<64x9xf32>
    %243 = tpu.matmul %240, %242, %cst_61 {dimension_numbers = #tpu.dot_dimension_numbers<[1], [0], [0], [1], [0, 0, 1, 1], [], []>} : vector<64x64xbf16>, vector<64x9xbf16>, vector<64x9xf32> -> vector<64x9xf32>
    %244 = vector.extract_strided_slice %243 {offsets = [0, 0], sizes = [64, 8], strides = [1, 1]} : vector<64x9xf32> to vector<64x8xf32>
    %245 = vector.extract_strided_slice %243 {offsets = [0, 8], sizes = [64, 1], strides = [1, 1]} : vector<64x9xf32> to vector<64x1xf32>
    %246 = tpu.reciprocal %245 {approx = true} : vector<64x1xf32> -> vector<64x1xf32>
    %247 = vector.broadcast %246 : vector<64x1xf32> to vector<64x8xf32>
    %248 = arith.mulf %244, %247 : vector<64x8xf32>
    %cst_62 = arith.constant 0.000000e+00 : f32
    %249 = vector.broadcast %cst_62 : f32 to vector<64x8xf32>
    %250 = arith.maximumf %248, %249 : vector<64x8xf32>
    %c0_63 = arith.constant 0 : index
    %c0_64 = arith.constant 0 : index
    %251 = vector.load %arg11[%c0_63, %c0_64] : memref<64x64xf32, #tpu.memory_space<vmem>>, vector<64x8xf32>
    tpu.vector_store %arg11[%c0_63, %c0_64], %250 {strides = array<i32>} : memref<64x64xf32, #tpu.memory_space<vmem>>, vector<64x8xf32>,
    %252 = vector.extract_strided_slice %223 {offsets = [0, 1], sizes = [64, 1], strides = [1, 1]} : vector<64x16xf32> to vector<64x1xf32>
    %253 = vector.extract_strided_slice %224 {offsets = [9, 0], sizes = [1, 64], strides = [1, 1]} : vector<16x64xf32> to vector<1x64xf32>
    %254 = vector.broadcast %252 : vector<64x1xf32> to vector<64x64xf32>
    %255 = vector.broadcast %253 : vector<1x64xf32> to vector<64x64xf32>
    %256 = arith.addf %254, %255 : vector<64x64xf32>
    %cst_65 = arith.constant 2.000000e-01 : f32
    %257 = vector.broadcast %cst_65 : f32 to vector<64x64xf32>
    %258 = arith.mulf %257, %256 : vector<64x64xf32>
    %259 = arith.maximumf %256, %258 : vector<64x64xf32>
    %260 = arith.addf %259, %0 : vector<64x64xf32>
    %cst_66 = arith.constant dense<0xFF800000> : vector<64xf32>
    %261 = vector.multi_reduction <maximumf>, %260, %cst_66 [1] : vector<64x64xf32> to vector<64xf32>
    %262 = vector.shape_cast %261 : vector<64xf32> to vector<64x1xf32>
    %263 = vector.broadcast %262 : vector<64x1xf32> to vector<64x64xf32>
    %264 = arith.subf %260, %263 : vector<64x64xf32>
    %265 = math.exp %264 : vector<64x64xf32>
    %266 = arith.truncf %265 : vector<64x64xf32> to vector<64x64xbf16>
    %267 = vector.extract_strided_slice %222 {offsets = [0, 8], sizes = [64, 8], strides = [1, 1]} : vector<64x64xbf16> to vector<64x8xbf16>
    %268 = tpu.concatenate %267, %225 in 1 : vector<64x8xbf16>, vector<64x1xbf16> -> vector<64x9xbf16>
    %cst_67 = arith.constant dense<0.000000e+00> : vector<64x9xf32>
    %269 = tpu.matmul %266, %268, %cst_67 {dimension_numbers = #tpu.dot_dimension_numbers<[1], [0], [0], [1], [0, 0, 1, 1], [], []>} : vector<64x64xbf16>, vector<64x9xbf16>, vector<64x9xf32> -> vector<64x9xf32>
    %270 = vector.extract_strided_slice %269 {offsets = [0, 0], sizes = [64, 8], strides = [1, 1]} : vector<64x9xf32> to vector<64x8xf32>
    %271 = vector.extract_strided_slice %269 {offsets = [0, 8], sizes = [64, 1], strides = [1, 1]} : vector<64x9xf32> to vector<64x1xf32>
    %272 = tpu.reciprocal %271 {approx = true} : vector<64x1xf32> -> vector<64x1xf32>
    %273 = vector.broadcast %272 : vector<64x1xf32> to vector<64x8xf32>
    %274 = arith.mulf %270, %273 : vector<64x8xf32>
    %cst_68 = arith.constant 0.000000e+00 : f32
    %275 = vector.broadcast %cst_68 : f32 to vector<64x8xf32>
    %276 = arith.maximumf %274, %275 : vector<64x8xf32>
    %c0_69 = arith.constant 0 : index
    %c8 = arith.constant 8 : index
    %277 = vector.load %arg11[%c0_69, %c8] : memref<64x64xf32, #tpu.memory_space<vmem>>, vector<64x8xf32>
    tpu.vector_store %arg11[%c0_69, %c8], %276 {strides = array<i32>} : memref<64x64xf32, #tpu.memory_space<vmem>>, vector<64x8xf32>,
    %278 = vector.extract_strided_slice %223 {offsets = [0, 2], sizes = [64, 1], strides = [1, 1]} : vector<64x16xf32> to vector<64x1xf32>
    %279 = vector.extract_strided_slice %224 {offsets = [10, 0], sizes = [1, 64], strides = [1, 1]} : vector<16x64xf32> to vector<1x64xf32>
    %280 = vector.broadcast %278 : vector<64x1xf32> to vector<64x64xf32>
    %281 = vector.broadcast %279 : vector<1x64xf32> to vector<64x64xf32>
    %282 = arith.addf %280, %281 : vector<64x64xf32>
    %cst_70 = arith.constant 2.000000e-01 : f32
    %283 = vector.broadcast %cst_70 : f32 to vector<64x64xf32>
    %284 = arith.mulf %283, %282 : vector<64x64xf32>
    %285 = arith.maximumf %282, %284 : vector<64x64xf32>
    %286 = arith.addf %285, %0 : vector<64x64xf32>
    %cst_71 = arith.constant dense<0xFF800000> : vector<64xf32>
    %287 = vector.multi_reduction <maximumf>, %286, %cst_71 [1] : vector<64x64xf32> to vector<64xf32>
    %288 = vector.shape_cast %287 : vector<64xf32> to vector<64x1xf32>
    %289 = vector.broadcast %288 : vector<64x1xf32> to vector<64x64xf32>
    %290 = arith.subf %286, %289 : vector<64x64xf32>
    %291 = math.exp %290 : vector<64x64xf32>
    %292 = arith.truncf %291 : vector<64x64xf32> to vector<64x64xbf16>
    %293 = vector.extract_strided_slice %222 {offsets = [0, 16], sizes = [64, 8], strides = [1, 1]} : vector<64x64xbf16> to vector<64x8xbf16>
    %294 = tpu.concatenate %293, %225 in 1 : vector<64x8xbf16>, vector<64x1xbf16> -> vector<64x9xbf16>
    %cst_72 = arith.constant dense<0.000000e+00> : vector<64x9xf32>
    %295 = tpu.matmul %292, %294, %cst_72 {dimension_numbers = #tpu.dot_dimension_numbers<[1], [0], [0], [1], [0, 0, 1, 1], [], []>} : vector<64x64xbf16>, vector<64x9xbf16>, vector<64x9xf32> -> vector<64x9xf32>
    %296 = vector.extract_strided_slice %295 {offsets = [0, 0], sizes = [64, 8], strides = [1, 1]} : vector<64x9xf32> to vector<64x8xf32>
    %297 = vector.extract_strided_slice %295 {offsets = [0, 8], sizes = [64, 1], strides = [1, 1]} : vector<64x9xf32> to vector<64x1xf32>
    %298 = tpu.reciprocal %297 {approx = true} : vector<64x1xf32> -> vector<64x1xf32>
    %299 = vector.broadcast %298 : vector<64x1xf32> to vector<64x8xf32>
    %300 = arith.mulf %296, %299 : vector<64x8xf32>
    %cst_73 = arith.constant 0.000000e+00 : f32
    %301 = vector.broadcast %cst_73 : f32 to vector<64x8xf32>
    %302 = arith.maximumf %300, %301 : vector<64x8xf32>
    %c0_74 = arith.constant 0 : index
    %c16_75 = arith.constant 16 : index
    %303 = vector.load %arg11[%c0_74, %c16_75] : memref<64x64xf32, #tpu.memory_space<vmem>>, vector<64x8xf32>
    tpu.vector_store %arg11[%c0_74, %c16_75], %302 {strides = array<i32>} : memref<64x64xf32, #tpu.memory_space<vmem>>, vector<64x8xf32>,
    %304 = vector.extract_strided_slice %223 {offsets = [0, 3], sizes = [64, 1], strides = [1, 1]} : vector<64x16xf32> to vector<64x1xf32>
    %305 = vector.extract_strided_slice %224 {offsets = [11, 0], sizes = [1, 64], strides = [1, 1]} : vector<16x64xf32> to vector<1x64xf32>
    %306 = vector.broadcast %304 : vector<64x1xf32> to vector<64x64xf32>
    %307 = vector.broadcast %305 : vector<1x64xf32> to vector<64x64xf32>
    %308 = arith.addf %306, %307 : vector<64x64xf32>
    %cst_76 = arith.constant 2.000000e-01 : f32
    %309 = vector.broadcast %cst_76 : f32 to vector<64x64xf32>
    %310 = arith.mulf %309, %308 : vector<64x64xf32>
    %311 = arith.maximumf %308, %310 : vector<64x64xf32>
    %312 = arith.addf %311, %0 : vector<64x64xf32>
    %cst_77 = arith.constant dense<0xFF800000> : vector<64xf32>
    %313 = vector.multi_reduction <maximumf>, %312, %cst_77 [1] : vector<64x64xf32> to vector<64xf32>
    %314 = vector.shape_cast %313 : vector<64xf32> to vector<64x1xf32>
    %315 = vector.broadcast %314 : vector<64x1xf32> to vector<64x64xf32>
    %316 = arith.subf %312, %315 : vector<64x64xf32>
    %317 = math.exp %316 : vector<64x64xf32>
    %318 = arith.truncf %317 : vector<64x64xf32> to vector<64x64xbf16>
    %319 = vector.extract_strided_slice %222 {offsets = [0, 24], sizes = [64, 8], strides = [1, 1]} : vector<64x64xbf16> to vector<64x8xbf16>
    %320 = tpu.concatenate %319, %225 in 1 : vector<64x8xbf16>, vector<64x1xbf16> -> vector<64x9xbf16>
    %cst_78 = arith.constant dense<0.000000e+00> : vector<64x9xf32>
    %321 = tpu.matmul %318, %320, %cst_78 {dimension_numbers = #tpu.dot_dimension_numbers<[1], [0], [0], [1], [0, 0, 1, 1], [], []>} : vector<64x64xbf16>, vector<64x9xbf16>, vector<64x9xf32> -> vector<64x9xf32>
    %322 = vector.extract_strided_slice %321 {offsets = [0, 0], sizes = [64, 8], strides = [1, 1]} : vector<64x9xf32> to vector<64x8xf32>
    %323 = vector.extract_strided_slice %321 {offsets = [0, 8], sizes = [64, 1], strides = [1, 1]} : vector<64x9xf32> to vector<64x1xf32>
    %324 = tpu.reciprocal %323 {approx = true} : vector<64x1xf32> -> vector<64x1xf32>
    %325 = vector.broadcast %324 : vector<64x1xf32> to vector<64x8xf32>
    %326 = arith.mulf %322, %325 : vector<64x8xf32>
    %cst_79 = arith.constant 0.000000e+00 : f32
    %327 = vector.broadcast %cst_79 : f32 to vector<64x8xf32>
    %328 = arith.maximumf %326, %327 : vector<64x8xf32>
    %c0_80 = arith.constant 0 : index
    %c24 = arith.constant 24 : index
    %329 = vector.load %arg11[%c0_80, %c24] : memref<64x64xf32, #tpu.memory_space<vmem>>, vector<64x8xf32>
    tpu.vector_store %arg11[%c0_80, %c24], %328 {strides = array<i32>} : memref<64x64xf32, #tpu.memory_space<vmem>>, vector<64x8xf32>,
    %330 = vector.extract_strided_slice %223 {offsets = [0, 4], sizes = [64, 1], strides = [1, 1]} : vector<64x16xf32> to vector<64x1xf32>
    %331 = vector.extract_strided_slice %224 {offsets = [12, 0], sizes = [1, 64], strides = [1, 1]} : vector<16x64xf32> to vector<1x64xf32>
    %332 = vector.broadcast %330 : vector<64x1xf32> to vector<64x64xf32>
    %333 = vector.broadcast %331 : vector<1x64xf32> to vector<64x64xf32>
    %334 = arith.addf %332, %333 : vector<64x64xf32>
    %cst_81 = arith.constant 2.000000e-01 : f32
    %335 = vector.broadcast %cst_81 : f32 to vector<64x64xf32>
    %336 = arith.mulf %335, %334 : vector<64x64xf32>
    %337 = arith.maximumf %334, %336 : vector<64x64xf32>
    %338 = arith.addf %337, %0 : vector<64x64xf32>
    %cst_82 = arith.constant dense<0xFF800000> : vector<64xf32>
    %339 = vector.multi_reduction <maximumf>, %338, %cst_82 [1] : vector<64x64xf32> to vector<64xf32>
    %340 = vector.shape_cast %339 : vector<64xf32> to vector<64x1xf32>
    %341 = vector.broadcast %340 : vector<64x1xf32> to vector<64x64xf32>
    %342 = arith.subf %338, %341 : vector<64x64xf32>
    %343 = math.exp %342 : vector<64x64xf32>
    %344 = arith.truncf %343 : vector<64x64xf32> to vector<64x64xbf16>
    %345 = vector.extract_strided_slice %222 {offsets = [0, 32], sizes = [64, 8], strides = [1, 1]} : vector<64x64xbf16> to vector<64x8xbf16>
    %346 = tpu.concatenate %345, %225 in 1 : vector<64x8xbf16>, vector<64x1xbf16> -> vector<64x9xbf16>
    %cst_83 = arith.constant dense<0.000000e+00> : vector<64x9xf32>
    %347 = tpu.matmul %344, %346, %cst_83 {dimension_numbers = #tpu.dot_dimension_numbers<[1], [0], [0], [1], [0, 0, 1, 1], [], []>} : vector<64x64xbf16>, vector<64x9xbf16>, vector<64x9xf32> -> vector<64x9xf32>
    %348 = vector.extract_strided_slice %347 {offsets = [0, 0], sizes = [64, 8], strides = [1, 1]} : vector<64x9xf32> to vector<64x8xf32>
    %349 = vector.extract_strided_slice %347 {offsets = [0, 8], sizes = [64, 1], strides = [1, 1]} : vector<64x9xf32> to vector<64x1xf32>
    %350 = tpu.reciprocal %349 {approx = true} : vector<64x1xf32> -> vector<64x1xf32>
    %351 = vector.broadcast %350 : vector<64x1xf32> to vector<64x8xf32>
    %352 = arith.mulf %348, %351 : vector<64x8xf32>
    %cst_84 = arith.constant 0.000000e+00 : f32
    %353 = vector.broadcast %cst_84 : f32 to vector<64x8xf32>
    %354 = arith.maximumf %352, %353 : vector<64x8xf32>
    %c0_85 = arith.constant 0 : index
    %c32_86 = arith.constant 32 : index
    %355 = vector.load %arg11[%c0_85, %c32_86] : memref<64x64xf32, #tpu.memory_space<vmem>>, vector<64x8xf32>
    tpu.vector_store %arg11[%c0_85, %c32_86], %354 {strides = array<i32>} : memref<64x64xf32, #tpu.memory_space<vmem>>, vector<64x8xf32>,
    %356 = vector.extract_strided_slice %223 {offsets = [0, 5], sizes = [64, 1], strides = [1, 1]} : vector<64x16xf32> to vector<64x1xf32>
    %357 = vector.extract_strided_slice %224 {offsets = [13, 0], sizes = [1, 64], strides = [1, 1]} : vector<16x64xf32> to vector<1x64xf32>
    %358 = vector.broadcast %356 : vector<64x1xf32> to vector<64x64xf32>
    %359 = vector.broadcast %357 : vector<1x64xf32> to vector<64x64xf32>
    %360 = arith.addf %358, %359 : vector<64x64xf32>
    %cst_87 = arith.constant 2.000000e-01 : f32
    %361 = vector.broadcast %cst_87 : f32 to vector<64x64xf32>
    %362 = arith.mulf %361, %360 : vector<64x64xf32>
    %363 = arith.maximumf %360, %362 : vector<64x64xf32>
    %364 = arith.addf %363, %0 : vector<64x64xf32>
    %cst_88 = arith.constant dense<0xFF800000> : vector<64xf32>
    %365 = vector.multi_reduction <maximumf>, %364, %cst_88 [1] : vector<64x64xf32> to vector<64xf32>
    %366 = vector.shape_cast %365 : vector<64xf32> to vector<64x1xf32>
    %367 = vector.broadcast %366 : vector<64x1xf32> to vector<64x64xf32>
    %368 = arith.subf %364, %367 : vector<64x64xf32>
    %369 = math.exp %368 : vector<64x64xf32>
    %370 = arith.truncf %369 : vector<64x64xf32> to vector<64x64xbf16>
    %371 = vector.extract_strided_slice %222 {offsets = [0, 40], sizes = [64, 8], strides = [1, 1]} : vector<64x64xbf16> to vector<64x8xbf16>
    %372 = tpu.concatenate %371, %225 in 1 : vector<64x8xbf16>, vector<64x1xbf16> -> vector<64x9xbf16>
    %cst_89 = arith.constant dense<0.000000e+00> : vector<64x9xf32>
    %373 = tpu.matmul %370, %372, %cst_89 {dimension_numbers = #tpu.dot_dimension_numbers<[1], [0], [0], [1], [0, 0, 1, 1], [], []>} : vector<64x64xbf16>, vector<64x9xbf16>, vector<64x9xf32> -> vector<64x9xf32>
    %374 = vector.extract_strided_slice %373 {offsets = [0, 0], sizes = [64, 8], strides = [1, 1]} : vector<64x9xf32> to vector<64x8xf32>
    %375 = vector.extract_strided_slice %373 {offsets = [0, 8], sizes = [64, 1], strides = [1, 1]} : vector<64x9xf32> to vector<64x1xf32>
    %376 = tpu.reciprocal %375 {approx = true} : vector<64x1xf32> -> vector<64x1xf32>
    %377 = vector.broadcast %376 : vector<64x1xf32> to vector<64x8xf32>
    %378 = arith.mulf %374, %377 : vector<64x8xf32>
    %cst_90 = arith.constant 0.000000e+00 : f32
    %379 = vector.broadcast %cst_90 : f32 to vector<64x8xf32>
    %380 = arith.maximumf %378, %379 : vector<64x8xf32>
    %c0_91 = arith.constant 0 : index
    %c40 = arith.constant 40 : index
    %381 = vector.load %arg11[%c0_91, %c40] : memref<64x64xf32, #tpu.memory_space<vmem>>, vector<64x8xf32>
    tpu.vector_store %arg11[%c0_91, %c40], %380 {strides = array<i32>} : memref<64x64xf32, #tpu.memory_space<vmem>>, vector<64x8xf32>,
    %382 = vector.extract_strided_slice %223 {offsets = [0, 6], sizes = [64, 1], strides = [1, 1]} : vector<64x16xf32> to vector<64x1xf32>
    %383 = vector.extract_strided_slice %224 {offsets = [14, 0], sizes = [1, 64], strides = [1, 1]} : vector<16x64xf32> to vector<1x64xf32>
    %384 = vector.broadcast %382 : vector<64x1xf32> to vector<64x64xf32>
    %385 = vector.broadcast %383 : vector<1x64xf32> to vector<64x64xf32>
    %386 = arith.addf %384, %385 : vector<64x64xf32>
    %cst_92 = arith.constant 2.000000e-01 : f32
    %387 = vector.broadcast %cst_92 : f32 to vector<64x64xf32>
    %388 = arith.mulf %387, %386 : vector<64x64xf32>
    %389 = arith.maximumf %386, %388 : vector<64x64xf32>
    %390 = arith.addf %389, %0 : vector<64x64xf32>
    %cst_93 = arith.constant dense<0xFF800000> : vector<64xf32>
    %391 = vector.multi_reduction <maximumf>, %390, %cst_93 [1] : vector<64x64xf32> to vector<64xf32>
    %392 = vector.shape_cast %391 : vector<64xf32> to vector<64x1xf32>
    %393 = vector.broadcast %392 : vector<64x1xf32> to vector<64x64xf32>
    %394 = arith.subf %390, %393 : vector<64x64xf32>
    %395 = math.exp %394 : vector<64x64xf32>
    %396 = arith.truncf %395 : vector<64x64xf32> to vector<64x64xbf16>
    %397 = vector.extract_strided_slice %222 {offsets = [0, 48], sizes = [64, 8], strides = [1, 1]} : vector<64x64xbf16> to vector<64x8xbf16>
    %398 = tpu.concatenate %397, %225 in 1 : vector<64x8xbf16>, vector<64x1xbf16> -> vector<64x9xbf16>
    %cst_94 = arith.constant dense<0.000000e+00> : vector<64x9xf32>
    %399 = tpu.matmul %396, %398, %cst_94 {dimension_numbers = #tpu.dot_dimension_numbers<[1], [0], [0], [1], [0, 0, 1, 1], [], []>} : vector<64x64xbf16>, vector<64x9xbf16>, vector<64x9xf32> -> vector<64x9xf32>
    %400 = vector.extract_strided_slice %399 {offsets = [0, 0], sizes = [64, 8], strides = [1, 1]} : vector<64x9xf32> to vector<64x8xf32>
    %401 = vector.extract_strided_slice %399 {offsets = [0, 8], sizes = [64, 1], strides = [1, 1]} : vector<64x9xf32> to vector<64x1xf32>
    %402 = tpu.reciprocal %401 {approx = true} : vector<64x1xf32> -> vector<64x1xf32>
    %403 = vector.broadcast %402 : vector<64x1xf32> to vector<64x8xf32>
    %404 = arith.mulf %400, %403 : vector<64x8xf32>
    %cst_95 = arith.constant 0.000000e+00 : f32
    %405 = vector.broadcast %cst_95 : f32 to vector<64x8xf32>
    %406 = arith.maximumf %404, %405 : vector<64x8xf32>
    %c0_96 = arith.constant 0 : index
    %c48_97 = arith.constant 48 : index
    %407 = vector.load %arg11[%c0_96, %c48_97] : memref<64x64xf32, #tpu.memory_space<vmem>>, vector<64x8xf32>
    tpu.vector_store %arg11[%c0_96, %c48_97], %406 {strides = array<i32>} : memref<64x64xf32, #tpu.memory_space<vmem>>, vector<64x8xf32>,
    %408 = vector.extract_strided_slice %223 {offsets = [0, 7], sizes = [64, 1], strides = [1, 1]} : vector<64x16xf32> to vector<64x1xf32>
    %409 = vector.extract_strided_slice %224 {offsets = [15, 0], sizes = [1, 64], strides = [1, 1]} : vector<16x64xf32> to vector<1x64xf32>
    %410 = vector.broadcast %408 : vector<64x1xf32> to vector<64x64xf32>
    %411 = vector.broadcast %409 : vector<1x64xf32> to vector<64x64xf32>
    %412 = arith.addf %410, %411 : vector<64x64xf32>
    %cst_98 = arith.constant 2.000000e-01 : f32
    %413 = vector.broadcast %cst_98 : f32 to vector<64x64xf32>
    %414 = arith.mulf %413, %412 : vector<64x64xf32>
    %415 = arith.maximumf %412, %414 : vector<64x64xf32>
    %416 = arith.addf %415, %0 : vector<64x64xf32>
    %cst_99 = arith.constant dense<0xFF800000> : vector<64xf32>
    %417 = vector.multi_reduction <maximumf>, %416, %cst_99 [1] : vector<64x64xf32> to vector<64xf32>
    %418 = vector.shape_cast %417 : vector<64xf32> to vector<64x1xf32>
    %419 = vector.broadcast %418 : vector<64x1xf32> to vector<64x64xf32>
    %420 = arith.subf %416, %419 : vector<64x64xf32>
    %421 = math.exp %420 : vector<64x64xf32>
    %422 = arith.truncf %421 : vector<64x64xf32> to vector<64x64xbf16>
    %423 = vector.extract_strided_slice %222 {offsets = [0, 56], sizes = [64, 8], strides = [1, 1]} : vector<64x64xbf16> to vector<64x8xbf16>
    %424 = tpu.concatenate %423, %225 in 1 : vector<64x8xbf16>, vector<64x1xbf16> -> vector<64x9xbf16>
    %cst_100 = arith.constant dense<0.000000e+00> : vector<64x9xf32>
    %425 = tpu.matmul %422, %424, %cst_100 {dimension_numbers = #tpu.dot_dimension_numbers<[1], [0], [0], [1], [0, 0, 1, 1], [], []>} : vector<64x64xbf16>, vector<64x9xbf16>, vector<64x9xf32> -> vector<64x9xf32>
    %426 = vector.extract_strided_slice %425 {offsets = [0, 0], sizes = [64, 8], strides = [1, 1]} : vector<64x9xf32> to vector<64x8xf32>
    %427 = vector.extract_strided_slice %425 {offsets = [0, 8], sizes = [64, 1], strides = [1, 1]} : vector<64x9xf32> to vector<64x1xf32>
    %428 = tpu.reciprocal %427 {approx = true} : vector<64x1xf32> -> vector<64x1xf32>
    %429 = vector.broadcast %428 : vector<64x1xf32> to vector<64x8xf32>
    %430 = arith.mulf %426, %429 : vector<64x8xf32>
    %cst_101 = arith.constant 0.000000e+00 : f32
    %431 = vector.broadcast %cst_101 : f32 to vector<64x8xf32>
    %432 = arith.maximumf %430, %431 : vector<64x8xf32>
    %c0_102 = arith.constant 0 : index
    %c56 = arith.constant 56 : index
    %433 = vector.load %arg11[%c0_102, %c56] : memref<64x64xf32, #tpu.memory_space<vmem>>, vector<64x8xf32>
    tpu.vector_store %arg11[%c0_102, %c56], %432 {strides = array<i32>} : memref<64x64xf32, #tpu.memory_space<vmem>>, vector<64x8xf32>,
    %c0_103 = arith.constant 0 : index
    %c0_104 = arith.constant 0 : index
    %434 = vector.load %arg11[%c0_103, %c0_104] : memref<64x64xf32, #tpu.memory_space<vmem>>, vector<64x64xf32>
    %435 = arith.truncf %434 : vector<64x64xf32> to vector<64x64xbf16>
    %c0_105 = arith.constant 0 : index
    %c0_106 = arith.constant 0 : index
    %436 = vector.load %arg7[%c0_105, %c0_106] : memref<64x128xbf16, #tpu.memory_space<vmem>>, vector<64x128xbf16>
    %cst_107 = arith.constant dense<0.000000e+00> : vector<64x128xf32>
    %437 = tpu.matmul %435, %436, %cst_107 {dimension_numbers = #tpu.dot_dimension_numbers<[1], [0], [0], [1], [0, 0, 1, 1], [], []>} : vector<64x64xbf16>, vector<64x128xbf16>, vector<64x128xf32> -> vector<64x128xf32>
    %c0_108 = arith.constant 0 : index
    %c0_109 = arith.constant 0 : index
    %438 = vector.load %arg8[%c0_108, %c0_109] : memref<1x128xf32, #tpu.memory_space<vmem>>, vector<1x128xf32>
    %439 = vector.broadcast %438 : vector<1x128xf32> to vector<64x128xf32>
    %440 = arith.addf %437, %439 : vector<64x128xf32>
    %cst_110 = arith.constant dense<0xFF800000> : vector<64xf32>
    %441 = vector.multi_reduction <maximumf>, %440, %cst_110 [1] : vector<64x128xf32> to vector<64xf32>
    %442 = vector.shape_cast %441 : vector<64xf32> to vector<64x1xf32>
    %443 = vector.broadcast %442 : vector<64x1xf32> to vector<64x128xf32>
    %444 = arith.subf %440, %443 : vector<64x128xf32>
    %445 = math.exp %444 : vector<64x128xf32>
    %cst_111 = arith.constant dense<0.000000e+00> : vector<64xf32>
    %446 = vector.multi_reduction <add>, %445, %cst_111 [1] : vector<64x128xf32> to vector<64xf32>
    %447 = vector.shape_cast %446 : vector<64xf32> to vector<64x1xf32>
    %448 = vector.broadcast %447 : vector<64x1xf32> to vector<64x128xf32>
    %449 = arith.divf %445, %448 : vector<64x128xf32>
    %c0_112 = arith.constant 0 : index
    %c0_113 = arith.constant 0 : index
    %450 = vector.load %arg9[%c0_112, %c0_113] : memref<64x128xf32, #tpu.memory_space<vmem>>, vector<64x128xf32>
    tpu.vector_store %arg9[%c0_112, %c0_113], %449 {strides = array<i32>} : memref<64x128xf32, #tpu.memory_space<vmem>>, vector<64x128xf32>,
    return
  }
  func.func @transform_0(%arg0: i32) -> (i32, i32) {
    %c0_i32 = arith.constant 0 : i32
    %c0_i32_0 = arith.constant 0 : i32
    %c0_i32_1 = arith.constant 0 : i32
    return %c0_i32, %c0_i32_0 : i32, i32
  }
  func.func @transform_1(%arg0: i32) -> (i32, i32) {
    %c0_i32 = arith.constant 0 : i32
    %c0_i32_0 = arith.constant 0 : i32
    %c0_i32_1 = arith.constant 0 : i32
    return %c0_i32, %c0_i32_0 : i32, i32
  }
  func.func @transform_2(%arg0: i32) -> (i32, i32) {
    %c0_i32 = arith.constant 0 : i32
    %c0_i32_0 = arith.constant 0 : i32
    %c0_i32_1 = arith.constant 0 : i32
    return %c0_i32, %c0_i32_0 : i32, i32
  }
  func.func @transform_3(%arg0: i32) -> (i32, i32) {
    %c0_i32 = arith.constant 0 : i32
    %c0_i32_0 = arith.constant 0 : i32
    %c0_i32_1 = arith.constant 0 : i32
    return %c0_i32, %c0_i32_0 : i32, i32
  }
  func.func @transform_4(%arg0: i32) -> (i32, i32) {
    %c0_i32 = arith.constant 0 : i32
    %c0_i32_0 = arith.constant 0 : i32
    %c0_i32_1 = arith.constant 0 : i32
    return %c0_i32, %c0_i32_0 : i32, i32
  }
  func.func @transform_5(%arg0: i32) -> (i32, i32) {
    %c0_i32 = arith.constant 0 : i32
    %c0_i32_0 = arith.constant 0 : i32
    %c0_i32_1 = arith.constant 0 : i32
    return %c0_i32, %c0_i32_0 : i32, i32
  }
  func.func @transform_6(%arg0: i32) -> (i32, i32) {
    %c0_i32 = arith.constant 0 : i32
    %c0_i32_0 = arith.constant 0 : i32
    %c0_i32_1 = arith.constant 0 : i32
    return %c0_i32, %c0_i32_0 : i32, i32
  }
  func.func @transform_7(%arg0: i32) -> (i32, i32) {
    %c0_i32 = arith.constant 0 : i32
    %c0_i32_0 = arith.constant 0 : i32
    %c0_i32_1 = arith.constant 0 : i32
    return %c0_i32, %c0_i32_0 : i32, i32
  }
  func.func @transform_8(%arg0: i32) -> (i32, i32) {
    %c0_i32 = arith.constant 0 : i32
    %c0_i32_0 = arith.constant 0 : i32
    %c0_i32_1 = arith.constant 0 : i32
    return %c0_i32, %c0_i32_0 : i32, i32
  }
}

</mosaic_0001>

<bundles_post_ra>
// kernel: gat_forward.1
= control target key start
LH: loop header
LB: loop body
LE: loop exit
PB: predicated region body
PF: predicated region fallthrough
CT: control target
= control target key end

     0   :  { %s6265_s22 = smov 112   ;;  %vm447_vm0 = vcmask 130048   ;;  %v9260_v52 = vmov 3   ;;  %v9262_v53 = vmov 0   ;;  %v9258_v54 = vmov 2   ;;  %s6273_s16 = smov 64   ;;  %s9245_s2 = inlined_call_operand.vmem [shape: bf16[128,128], index: 2, kind: input, shape index: {}]   ;;  %s9246_s0 = inlined_call_operand.vmem [shape: bf16[64,128], index: 0, kind: input, shape index: {}]   ;;  %s9247_s3 = inlined_call_operand.vmem [shape: bf16[128,16], index: 3, kind: input, shape index: {}]   ;;  %s9248_s1 = inlined_call_operand.vmem [shape: f32[64,64], index: 1, kind: input, shape index: {}]   ;;  %s9249_s4 = inlined_call_operand.vmem [shape: bf16[128,64], index: 4, kind: input, shape index: {}]   ;;  %s9250_s5 = inlined_call_operand.vmem [shape: bf16[64,16], index: 5, kind: input, shape index: {}]   ;;  %s9251_s6 = inlined_call_operand.vmem [shape: bf16[64,128], index: 6, kind: input, shape index: {}]   ;;  %s9252_s7 = inlined_call_operand.vmem [shape: f32[1,128], index: 7, kind: input, shape index: {}]   ;;  %s9253_s8 = inlined_call_operand.vmem [shape: f32[64,128], index: 8, kind: output, shape index: {}]  }
   0x1   :  { %v5525_v0 = vld [vmem:[%s9245_s2 + $0x38] sm:$0xff]  ;;  %v5524_v1 = vld [vmem:[%s9245_s2 + $0x30] sm:$0xff]  ;;  %v5523_v2 = vld [vmem:[%s9245_s2 + $0x28] sm:$0xff]  ;;  %5583 = vset.pattern.permute.xlu2 %v9260_v52  ;;  %5580 = vset.pattern.permute.xlu1 %v9262_v53  ;;  %v9256_v58 = vmov 1   ;;  %v9254_v61 = vmov 4   ;;  %vm394_vm1 = vcmask 523264  }
   0x2   :  { %151 = vmatpush.bf16.msra.mxu0 %v5525_v0  ;;  %v5522_v3 = vld [vmem:[%s9245_s2 + $0x20] sm:$0xff]  ;;  %v5521_v4 = vld [vmem:[%s9245_s2 + $0x18] sm:$0xff]  ;;  %v5520_v5 = vld [vmem:[%s9245_s2 + $0x10] sm:$0xff]  ;;  %5592 = vset.pattern.permute.xlu0 %v9258_v54  ;;  %s6275_s17 = smov 48   ;;  %s6277_s18 = smov 32   ;;  %vm848_vm2 = vcmask 261248  }
   0x3   :  { %v5519_v6 = vld [vmem:[%s9245_s2 + $0x8] sm:$0xff]  ;;  %v5518_v7 = vld [vmem:[%s9245_s2] sm:$0xff]  ;;  %v5533_v10 = vld [vmem:[%s9247_s3 + $0x38] sm:$0xff]  ;;  %s6278_s19 = smov 16   ;;  %vm1131_vm3 = vcmask 392448   ;;  %vm1414_vm4 = vcmask 523648  }
   0x4   :  { %v5514_v8 = vld [vmem:[%s9246_s0] sm:$0xff]  ;;  %v5515_v9 = vld [vmem:[%s9246_s0 + $0x8] sm:$0xff]  ;;  %260 = vmatpush.bf16.msra.mxu1 %v5533_v10  ;;  %v5532_v11 = vld [vmem:[%s9247_s3 + $0x30] sm:$0xff]  ;;  %vm1697_vm5 = vcmask 654848   ;;  %vm1980_vm6 = vcmask 786048   ;;  %vm2263_vm7 = vcmask 917248  }
   0x5   :  { %v5531_v12 = vld [vmem:[%s9247_s3 + $0x28] sm:$0xff]  ;;  %v5530_v13 = vld [vmem:[%s9247_s3 + $0x20] sm:$0xff]  ;;  %v5516_v14 = vld [vmem:[%s9246_s0 + $0x10] sm:$0xff]  ;;  %vm2546_vm8 = vcmask 1048448   ;;  %s6280_s21 = smov 120   ;;  %vm2918_vm9 = vcmask 64512  }
   0x6   :  { %152 = vmatpush.bf16.msra.mxu0 %v5524_v1  ;;  %v5517_v15 = vld [vmem:[%s9246_s0 + $0x18] sm:$0xff]  ;;  %v5528_v17 = vld [vmem:[%s9247_s3 + $0x10] sm:$0xff]  ;;  %v5527_v18 = vld [vmem:[%s9247_s3 + $0x8] sm:$0xff]  ;;  %s6264_s0 = smov 80   ;;  %s6281_s13 = smov 104   ;;  %vm3314_vm10 = vcmask 130112  }
   0x7   :  { %v5529_v16 = vld [vmem:[%s9247_s3 + $0x18] sm:$0xff]  ;;  %v5526_v19 = vld [vmem:[%s9247_s3] sm:$0xff]  ;;  %s6266_s3 = smov 96   ;;  %s6284_s14 = smov 88   ;;  %vm3597_vm11 = vcmask 195712   ;;  %vm3880_vm12 = vcmask 261312  }
   0x8   :  { %261 = vmatpush.bf16.msra.mxu1 %v5532_v11  ;;  %s6285_s15 = smov 24   ;;  %s6288_s10 = smov 56   ;;  %vm4163_vm13 = vcmask 326912   ;;  %vm4446_vm14 = vcmask 392512   ;;  %vm4729_vm15 = vcmask 458112  }
   0xa   :  { %153 = vmatpush.bf16.msra.mxu0 %v5523_v2 }
   0xc   :  { %262 = vmatpush.bf16.msra.mxu1 %v5531_v12 }
   0xe   :  { %154 = vmatpush.bf16.msra.mxu0 %v5522_v3 }
  0x10   :  { %263 = vmatpush.bf16.msra.mxu1 %v5530_v13 }
  0x12   :  { %155 = vmatpush.bf16.msra.mxu0 %v5521_v4 }
  0x14   :  { %264 = vmatpush.bf16.msra.mxu1 %v5529_v16 }
  0x16   :  { %156 = vmatpush.bf16.msra.mxu0 %v5520_v5 }
  0x18   :  { %265 = vmatpush.bf16.msra.mxu1 %v5528_v17 }
  0x1a   :  { %157 = vmatpush.bf16.msra.mxu0 %v5519_v6 }
  0x1c   :  { %266 = vmatpush.bf16.msra.mxu1 %v5527_v18 }
  0x1e   :  { %158 = vmatpush.bf16.msra.mxu0 %v5518_v7 }
  0x20   :  { %267 = vmatpush.bf16.msra.mxu1 %v5526_v19 }
  0x21   :  { %159 = vmatmul.bf16.vlgmr.msra.gmra.mxu0 %v5514_v8 }
  0x31   :  { %164 = vmatmul.bf16.gmra.mxu0 %v5515_v9 }
  0x41   :  { %169 = vmatmul.bf16.gmra.mxu0 %v5516_v14 }
  0x51   :  { %174 = vmatmul.bf16.gmra.mxu0 %v5517_v15 }
  0x9e   :  { %v160_v20 = vpop.f32.mrf.mxu0 }
  0x9f   :  { %v180_v21 = vpack.c.bf16 %v160_v20, %v160_v20 }
  0xa1   :  { %v196_v24 = vunpack.c.l.b16 %v180_v21 }
  0xa6   :  { %v162_v22 = vpop.f32.mrf.mxu0 }
  0xa7   :  { %v181_v23 = vpack.c.bf16 %v162_v22, %v162_v22 }
  0xa9   :  { %v197_v25 = vunpack.c.l.b16 %v181_v23 }
  0xab   :  { %v6394_v26 = vpack.c.b16 %v197_v25, %v196_v24 }
  0xad   :  { %9319 = vst [vmem:[#allocation4_spill] sm:$0xff] %v6394_v26  ;;  %1257 = vrot.lane.b32.xlu2 %v6394_v26, %s6264_s0  ;;  %691 = vrot.lane.b32.xlu0 %v6394_v26, %s6265_s22  ;;  %v450_v51 = vsel %vm447_vm0, %v6394_v26, 1065369472 }
  0xae   :  { %268 = vmatmul.bf16.vlgmr.msra.gmra.mxu1 %v6394_v26  ;;  %v165_v27 = vpop.f32.mrf.mxu0 }
  0xaf   :  { %v182_v28 = vpack.c.bf16 %v165_v27, %v165_v27 }
  0xb1   :  { %v198_v31 = vunpack.c.l.b16 %v182_v28 }
  0xb5   :  { %974 = vrot.lane.b32.xlu0 %v6394_v26, %s6266_s3 }
  0xb6   :  { %v167_v29 = vpop.f32.mrf.mxu0 }
  0xb7   :  { %v183_v30 = vpack.c.bf16 %v167_v29, %v167_v29 }
  0xb9   :  { %v199_v32 = vunpack.c.l.b16 %v183_v30 }
  0xbb   :  { %v6403_v33 = vpack.c.b16 %v199_v32, %v198_v31 }
  0xbd   :  { %9320 = vst [vmem:[#allocation5_spill] sm:$0xff] %v6403_v33  ;;  %1259 = vrot.lane.b32.xlu0 %v6403_v33, %s6264_s0  ;;  %976 = vrot.lane.b32.xlu1 %v6403_v33, %s6266_s3  ;;  %v453_v50 = vsel %vm447_vm0, %v6403_v33, 1065369472 }
  0xbe   :  { %693 = vrot.lane.b32.xlu2 %v6403_v33, %s6265_s22  ;;  %273 = vmatmul.bf16.gmra.mxu1 %v6403_v33  ;;  %v170_v34 = vpop.f32.mrf.mxu0 }
  0xbf   :  { %v184_v35 = vpack.c.bf16 %v170_v34, %v170_v34 }
  0xc1   :  { %v200_v37 = vunpack.c.l.b16 %v184_v35 }
  0xc6   :  { %v172_v36 = vpop.f32.mrf.mxu0 }
  0xc7   :  { %v185_v38 = vpack.c.bf16 %v172_v36, %v172_v36 }
  0xc9   :  { %v201_v39 = vunpack.c.l.b16 %v185_v38 }
  0xcb   :  { %v6412_v40 = vpack.c.b16 %v201_v39, %v200_v37 }
  0xcd   :  { %9321 = vst [vmem:[#allocation6_spill] sm:$0xff] %v6412_v40  ;;  %695 = vrot.lane.b32.xlu1 %v6412_v40, %s6265_s22  ;;  %978 = vrot.lane.b32.xlu2 %v6412_v40, %s6266_s3  ;;  %v456_v49 = vsel %vm447_vm0, %v6412_v40, 1065369472 }
  0xce   :  { %v175_v41 = vpop.f32.mrf.mxu0  ;;  %278 = vmatmul.bf16.gmra.mxu1 %v6412_v40 }
  0xcf   :  { %v186_v42 = vpack.c.bf16 %v175_v41, %v175_v41 }
  0xd1   :  { %v202_v44 = vunpack.c.l.b16 %v186_v42 }
  0xd5   :  { %1261 = vrot.lane.b32.xlu1 %v6412_v40, %s6264_s0 }
  0xd6   :  { %v177_v43 = vpop.f32.mrf.mxu0 }
  0xd7   :  { %v187_v45 = vpack.c.bf16 %v177_v43, %v177_v43 }
  0xd9   :  { %v203_v46 = vunpack.c.l.b16 %v187_v45 }
  0xdb   :  { %v6421_v47 = vpack.c.b16 %v203_v46, %v202_v44 }
  0xdd   :  { %9322 = vst [vmem:[#allocation7_spill] sm:$0xff] %v6421_v47  ;;  %697 = vrot.lane.b32.xlu0 %v6421_v47, %s6265_s22  ;;  %v459_v48 = vsel %vm447_vm0, %v6421_v47, 1065369472 }
  0xde   :  { %477 = vmatpush.bf16.msra.mxu2 %v459_v48  ;;  %5550 = vmatpush.bf16.msra.mxu3 %v459_v48 }
  0xdf   :  { %283 = vmatmul.bf16.gmra.mxu1 %v6421_v47 }
  0xe2   :  { %478 = vmatpush.bf16.msra.mxu2 %v456_v49  ;;  %5551 = vmatpush.bf16.msra.mxu3 %v456_v49 }
  0xe5   :  { %980 = vrot.lane.b32.xlu0 %v6421_v47, %s6266_s3 }
  0xe6   :  { %479 = vmatpush.bf16.msra.mxu2 %v453_v50  ;;  %5552 = vmatpush.bf16.msra.mxu3 %v453_v50 }
  0xea   :  { %480 = vmatpush.bf16.msra.mxu2 %v450_v51  ;;  %5553 = vmatpush.bf16.msra.mxu3 %v450_v51 }
  0xed   :  { %1263 = vrot.lane.b32.xlu0 %v6421_v47, %s6264_s0 }
 0x107   :  { %v6466_v0 = vpop.permute.xlu2 %1257 }
 0x118   :  { %v694_v3 = vpop.permute.xlu2 %693 }
 0x119   :  { %v703_v8 = vsel %vm447_vm0, %v694_v3, 1065369472  ;;  %v6601_v3 = vld [vmem:[%s9248_s1] sm:$0xff] }
 0x11a   :  { %9332 = vst [vmem:[#allocation17_spill] sm:$0xff] %v6601_v3 }
 0x11f   :  { %v692_v56 = vpop.permute.xlu0 %691 }
 0x120   :  { %v700_v12 = vsel %vm447_vm0, %v692_v56, 1065369472 }
 0x127   :  { %v975_v60 = vpop.permute.xlu0 %974  ;;  %v979_v10 = vpop.permute.xlu2 %978 }
 0x128   :  { %v989_v11 = vsel %vm447_vm0, %v979_v10, 1065369472  ;;  %v983_v14 = vsel %vm447_vm0, %v975_v60, 1065369472 }
 0x12b   :  { %v6441_v55 = vpop.f32.mrf.mxu1 }
 0x12c   :  { %9323 = vst [vmem:[#allocation8_spill] sm:$0xff] %v6441_v55  ;;  %1141 = vperm.xlu2 %5583, %v6441_v55   ;;  %323 = vperm.xlu1 %5580, %v6441_v55  }
 0x12f   :  { %v6462_v62 = vpop.permute.xlu0 %1259  ;;  %v977_v63 = vpop.permute.xlu1 %976 }
 0x130   :  { %v986_v13 = vsel %vm447_vm0, %v977_v63, 1065369472 }
 0x133   :  { %v6445_v57 = vpop.f32.mrf.mxu1 }
 0x134   :  { %9324 = vst [vmem:[#allocation9_spill] sm:$0xff] %v6445_v57  ;;  %5586 = vset.pattern.permute.xlu2 %v9256_v58  ;;  %5581 = vset.pattern.permute.xlu1 %v9256_v58 }
 0x135   :  { %579 = vperm.xlu2 %5586, %v6445_v57   ;;  %575 = vperm.xlu1 %5581, %v6441_v55  }
 0x13b   :  { %v6451_v59 = vpop.f32.mrf.mxu1 }
 0x13c   :  { %9325 = vst [vmem:[#allocation10_spill] sm:$0xff] %v6451_v59  ;;  %866 = vperm.xlu0 %5592, %v6451_v59  }
 0x13d   :  { %5587 = vset.pattern.permute.xlu2 %v9258_v54  ;;  %5582 = vset.pattern.permute.xlu1 %v9258_v54 }
 0x13e   :  { %862 = vperm.xlu2 %5587, %v6445_v57   ;;  %858 = vperm.xlu1 %5582, %v6441_v55  }
 0x13f   :  { %v696_v2 = vpop.permute.xlu1 %695 }
 0x140   :  { %v706_v5 = vsel %vm447_vm0, %v696_v2, 1065369472 }
 0x143   :  { %v6476_v6 = vpop.f32.mrf.mxu1 }
 0x144   :  { %5593 = vset.pattern.permute.xlu0 %v9260_v52  ;;  %9326 = vst [vmem:[#allocation11_spill] sm:$0xff] %v6476_v6 }
 0x145   :  { %1149 = vperm.xlu0 %5593, %v6451_v59  }
 0x146   :  { %5589 = vset.pattern.permute.xlu2 %v9254_v61  ;;  %5584 = vset.pattern.permute.xlu1 %v9254_v61 }
 0x147   :  { %1428 = vperm.xlu2 %5589, %v6445_v57   ;;  %1424 = vperm.xlu1 %5584, %v6441_v55   ;;  %v6547_v19 = vpop.permute.xlu1 %1261 }
 0x14b   :  { %v6496_v15 = vpop.f32.mrf.mxu1 }
 0x14c   :  { %9327 = vst [vmem:[#allocation12_spill] sm:$0xff] %v6496_v15 }
 0x14d   :  { %5594 = vset.pattern.permute.xlu0 %v9254_v61 }
 0x14e   :  { %1432 = vperm.xlu0 %5594, %v6451_v59  }
 0x14f   :  { %5590 = vset.pattern.permute.xlu2 %v9262_v53  ;;  %5585 = vset.pattern.permute.xlu1 %v9262_v53  ;;  %v698_v1 = vpop.permute.xlu0 %697 }
 0x150   :  { %333 = vperm.xlu2 %5590, %v6451_v59   ;;  %328 = vperm.xlu1 %5585, %v6445_v57   ;;  %v709_v4 = vsel %vm447_vm0, %v698_v1, 1065369472 }
 0x151   :  { %727 = vmatpush.bf16.msrb.mxu3 %v709_v4 }
 0x153   :  { %v6508_v16 = vpop.f32.mrf.mxu1 }
 0x154   :  { %9328 = vst [vmem:[#allocation13_spill] sm:$0xff] %v6508_v16 }
 0x155   :  { %728 = vmatpush.bf16.msrb.mxu3 %v706_v5 }
 0x157   :  { %v981_v7 = vpop.permute.xlu0 %980 }
 0x158   :  { %338 = vperm.xlu2 %5590, %v6476_v6   ;;  %5588 = vset.pattern.permute.xlu1 %v9260_v52  ;;  %v992_v9 = vsel %vm447_vm0, %v981_v7, 1065369472 }
 0x159   :  { %1145 = vperm.xlu1 %5588, %v6445_v57   ;;  %729 = vmatpush.bf16.msrb.mxu3 %v703_v8 }
 0x15a   :  { %1010 = vmatpush.bf16.msrb.mxu2 %v992_v9 }
 0x15c   :  { %v6525_v17 = vpop.f32.mrf.mxu1 }
 0x15d   :  { %730 = vmatpush.bf16.msrb.mxu3 %v700_v12  ;;  %9329 = vst [vmem:[#allocation14_spill] sm:$0xff] %v6525_v17 }
 0x15e   :  { %1011 = vmatpush.bf16.msrb.mxu2 %v989_v11 }
 0x15f   :  { %v6553_v29 = vpop.permute.xlu0 %1263 }
 0x160   :  { %5595 = vset.pattern.permute.xlu2 %v9256_v58 }
 0x161   :  { %587 = vperm.xlu2 %5595, %v6476_v6   ;;  %5591 = vset.pattern.permute.xlu1 %v9256_v58 }
 0x162   :  { %583 = vperm.xlu1 %5591, %v6451_v59   ;;  %1012 = vmatpush.bf16.msrb.mxu2 %v986_v13 }
 0x164   :  { %v6532_v18 = vpop.f32.mrf.mxu1 }
 0x165   :  { %9330 = vst [vmem:[#allocation15_spill] sm:$0xff] %v6532_v18 }
 0x166   :  { %1013 = vmatpush.bf16.msrb.mxu2 %v983_v14 }
 0x169   :  { %5597 = vset.pattern.permute.xlu2 %v9260_v52 }
 0x16a   :  { %1153 = vperm.xlu2 %5597, %v6476_v6   ;;  %5596 = vset.pattern.permute.xlu1 %v9258_v54 }
 0x16b   :  { %870 = vperm.xlu1 %5596, %v6476_v6  }
 0x170   :  { %289 = vxpose.xlu0.b32.start [1/8] (short) (narrow) %v6441_v55, 16 }
 0x172   :  { %5601 = vset.pattern.permute.xlu2 %v9258_v54 }
 0x173   :  { %5598 = vset.pattern.permute.xlu1 %v9254_v61  ;;  %874 = vperm.xlu2 %5601, %v6496_v15  }
 0x174   :  { %1436 = vperm.xlu1 %5598, %v6476_v6  }
 0x178   :  { %290 = vxpose.xlu0.b32.cont [2/8] (short) (narrow) %v6445_v57, 16 }
 0x17b   :  { %5603 = vset.pattern.permute.xlu2 %v9254_v61 }
 0x17c   :  { %5599 = vset.pattern.permute.xlu1 %v9262_v53  ;;  %1440 = vperm.xlu2 %5603, %v6496_v15  }
 0x17d   :  { %343 = vperm.xlu1 %5599, %v6496_v15  }
 0x180   :  { %291 = vxpose.xlu0.b32.cont [3/8] (short) (narrow) %v6451_v59, 16 }
 0x184   :  { %5604 = vset.pattern.permute.xlu2 %v9262_v53 }
 0x185   :  { %5600 = vset.pattern.permute.xlu1 %v9256_v58  ;;  %348 = vperm.xlu2 %5604, %v6508_v16  }
 0x186   :  { %591 = vperm.xlu1 %5600, %v6496_v15   ;;  %v1142_v21 = vpop.permute.xlu2 %1141 }
 0x188   :  { %292 = vxpose.xlu0.b32.cont [4/8] (short) (narrow) %v6476_v6, 16 }
 0x18d   :  { %5605 = vset.pattern.permute.xlu2 %v9256_v58 }
 0x18e   :  { %5602 = vset.pattern.permute.xlu1 %v9260_v52  ;;  %595 = vperm.xlu2 %5605, %v6508_v16  }
 0x18f   :  { %1157 = vperm.xlu1 %5602, %v6496_v15   ;;  %v6549_v23 = vpop.permute.xlu2 %579 }
 0x190   :  { %293 = vxpose.xlu0.b32.cont [5/8] (short) (narrow) %v6496_v15, 16 }
 0x196   :  { %5607 = vset.pattern.permute.xlu2 %v9260_v52 }
 0x197   :  { %5606 = vset.pattern.permute.xlu1 %v9258_v54  ;;  %1161 = vperm.xlu2 %5607, %v6508_v16  }
 0x198   :  { %878 = vperm.xlu1 %5606, %v6508_v16   ;;  %294 = vxpose.xlu0.b32.cont [6/8] (short) (narrow) %v6508_v16, 16  ;;  %v863_v25 = vpop.permute.xlu2 %862 }
 0x19e   :  { %v324_v20 = vpop.permute.xlu1 %323 }
 0x19f   :  { %5611 = vset.pattern.permute.xlu2 %v9258_v54 }
 0x1a0   :  { %5608 = vset.pattern.permute.xlu1 %v9254_v61  ;;  %295 = vxpose.xlu0.b32.cont [7/8] (short) (narrow) %v6525_v17, 16 }
 0x1a1   :  { %882 = vperm.xlu2 %5611, %v6525_v17   ;;  %1444 = vperm.xlu1 %5608, %v6508_v16   ;;  %v1429_v28 = vpop.permute.xlu2 %1428 }
 0x1a7   :  { %v576_v22 = vpop.permute.xlu1 %575 }
 0x1a8   :  { %296 = vxpose.xlu0.b32.end [8/8] (short) (narrow) %v6532_v18, 16 }
 0x1a9   :  { %5613 = vset.pattern.permute.xlu2 %v9254_v61  ;;  %5609 = vset.pattern.permute.xlu1 %v9262_v53 }
 0x1aa   :  { %1448 = vperm.xlu2 %5613, %v6525_v17   ;;  %353 = vperm.xlu1 %5609, %v6525_v17   ;;  %v6557_v32 = vpop.permute.xlu2 %333 }
 0x1ae   :  { %v6555_v31 = vpop.permute.xlu0 %866 }
 0x1b0   :  { %v859_v24 = vpop.permute.xlu1 %858 }
 0x1b2   :  { %5614 = vset.pattern.permute.xlu2 %v9262_v53  ;;  %5610 = vset.pattern.permute.xlu1 %v9256_v58  ;;  %v6563_v36 = vpop.permute.xlu2 %338 }
 0x1b3   :  { %358 = vperm.xlu2 %5614, %v6532_v18   ;;  %599 = vperm.xlu1 %5610, %v6525_v17  }
 0x1b7   :  { %v6561_v35 = vpop.permute.xlu0 %1149 }
 0x1b9   :  { %v6551_v27 = vpop.permute.xlu1 %1424 }
 0x1bb   :  { %5615 = vset.pattern.permute.xlu2 %v9256_v58  ;;  %5612 = vset.pattern.permute.xlu1 %v9260_v52  ;;  %v6569_v39 = vpop.permute.xlu2 %587 }
 0x1bc   :  { %603 = vperm.xlu2 %5615, %v6532_v18   ;;  %1165 = vperm.xlu1 %5612, %v6525_v17  }
 0x1c0   :  { %v6567_v38 = vpop.permute.xlu0 %1432 }
 0x1c2   :  { %v329_v30 = vpop.permute.xlu1 %328 }
 0x1c4   :  { %v6575_v43 = vpop.permute.xlu2 %1153 }
 0x1cb   :  { %v6559_v34 = vpop.permute.xlu1 %1145 }
 0x1cd   :  { %v6591_v50 = vpop.permute.xlu2 %874 }
 0x1d4   :  { %v6565_v37 = vpop.permute.xlu1 %583 }
 0x1dd   :  { %v6572_v41 = vpop.permute.xlu1 %870 }
 0x1e6   :  { %v6579_v45 = vpop.permute.xlu1 %1436 }
 0x1ef   :  { %v6606_v10 = vpop.permute.xlu1 %343 }
 0x20f   :  { %5616 = vset.pattern.permute.xlu0 %v9258_v54 }
 0x214   :  { %v305_v42 = vpop.trf.xlu0 }
 0x216   :  { %886 = vperm.xlu0 %5616, %v6532_v18  }
 0x21c   :  { %v6577_v44 = vpop.trf.xlu0 }
 0x21d   :  { %9331 = vst [vmem:[#allocation16_spill] sm:$0xff] %v6577_v44  ;;  %v6582_v46 = vperm.slane %v6577_v44, 0  ;;  %v6585_v48 = vperm.slane %v6577_v44, 1  ;;  %v6588_v49 = vperm.slane %v6577_v44, 3  ;;  %v6604_v4 = vperm.slane %v6577_v44, 2 }
 0x21e   :  { %5617 = vset.pattern.permute.xlu0 %v9260_v52 }
 0x21f   :  { %1169 = vperm.xlu0 %5617, %v6532_v18   ;;  %v1173_v51 = vadd.f32 %v6588_v49, %v1142_v21  ;;  %v362_v56 = vadd.f32 %v6582_v46, %v324_v20  ;;  %v363_v60 = vadd.f32 %v6582_v46, %v329_v30  ;;  %v607_v63 = vadd.f32 %v6585_v48, %v576_v22  ;;  %v6624_v22 = vld [vmem:[%s9248_s1 + $0x8] sm:$0xff] }
 0x220   :  { %v891_v21 = vadd.f32 %v6604_v4, %v863_v25  ;;  %9334 = vst [vmem:[#allocation19_spill] sm:$0xff] %v6624_v22  ;;  %v890_v42 = vadd.f32 %v6604_v4, %v859_v24 }
 0x221   :  { %v1181_v1 = vmul.f32 0.2, %v1173_v51  ;;  %v370_v2 = vmul.f32 0.2, %v362_v56  ;;  %v371_v8 = vmul.f32 0.2, %v363_v60 }
 0x222   :  { %v615_v9 = vmul.f32 0.2, %v607_v63  ;;  %v899_v25 = vmul.f32 0.2, %v891_v21 }
 0x223   :  { %v1189_v5 = vmax.f32 %v1173_v51, %v1181_v1  ;;  %v378_v7 = vmax.f32 %v362_v56, %v370_v2  ;;  %v379_v20 = vmax.f32 %v363_v60, %v371_v8  ;;  %v6627_v51 = vpop.permute.xlu2 %1440  ;;  %v6630_v56 = vperm.slane %v6577_v44, 4 }
 0x224   :  { %v623_v30 = vmax.f32 %v607_v63, %v615_v9  ;;  %v898_v2 = vmul.f32 0.2, %v890_v42  ;;  %v907_v24 = vmax.f32 %v891_v21, %v899_v25 }
 0x225   :  { %v6609_v11 = vadd.f32 %v1189_v5, %v6601_v3  ;;  %v6612_v12 = vadd.f32 %v378_v7, %v6601_v3  ;;  %v6633_v60 = vadd.f32 %v379_v20, %v6624_v22  ;;  %v6638_v5 = vpop.permute.xlu1 %591  ;;  %v1457_v7 = vadd.f32 %v6630_v56, %v1429_v28 }
 0x226   :  { %v6636_v1 = vadd.f32 %v623_v30, %v6601_v3  ;;  %v906_v9 = vmax.f32 %v890_v42, %v898_v2  ;;  %v6650_v20 = vadd.f32 %v907_v24, %v6624_v22  ;;  %v609_v42 = vadd.f32 %v6585_v48, %v6565_v37 }
 0x227   :  { %9333 = vst [vmem:[#allocation18_spill] sm:$0xff] %v6609_v11  ;;  %5618 = vset.pattern.permute.xlu0 %v9254_v61  ;;  %v1205_v13 = vsel %vm394_vm1, %v6609_v11, -inf  ;;  %v395_v14 = vsel %vm394_vm1, %v6612_v12, -inf  ;;  %v398_v63 = vsel %vm394_vm1, %v6633_v60, -inf  ;;  %v1465_v30 = vmul.f32 0.2, %v1457_v7 }
 0x228   :  { %1452 = vperm.xlu0 %5618, %v6532_v18   ;;  %1206 = vmax.xlane.f32.xlu2 %v1205_v13  ;;  %9335 = vst [vmem:[#allocation20_spill] sm:$0xff] %v6636_v1  ;;  %v639_v8 = vsel %vm394_vm1, %v6636_v1, -inf  ;;  %v1456_v13 = vadd.f32 %v6630_v56, %v6551_v27  ;;  %v6653_v61 = vadd.f32 %v906_v9, %v6601_v3  ;;  %v925_v28 = vsel %vm394_vm1, %v6650_v20, -inf }
 0x229   :  { %396 = vmax.xlane.f32.xlu1 %v395_v14  ;;  %v1473_v25 = vmax.f32 %v1457_v7, %v1465_v30  ;;  %v617_v9 = vmul.f32 0.2, %v609_v42  ;;  %v611_v1 = vadd.f32 %v6585_v48, %v6638_v5 }
 0x22a   :  { %v1464_v21 = vmul.f32 0.2, %v1456_v13  ;;  %v922_v27 = vsel %vm394_vm1, %v6653_v61, -inf }
 0x22b   :  { %v6647_v14 = vpop.permute.xlu2 %348 }
 0x22c   :  { %v1472_v2 = vmax.f32 %v1456_v13, %v1464_v21  ;;  %v365_v13 = vadd.f32 %v6582_v46, %v6563_v36  ;;  %v6680_v21 = vld [vmem:[%s9248_s1 + $0x10] sm:$0xff] }
 0x22d   :  { %v1158_v24 = vpop.permute.xlu1 %1157 }
 0x22e   :  { %v6667_v58 = vadd.f32 %v1472_v2, %v6601_v3 }
 0x230   :  { %399 = vmax.xlane.f32.xlu2 %v398_v63  ;;  %v1174_v63 = vadd.f32 %v6588_v49, %v6559_v34  ;;  %9337 = vst [vmem:[#allocation22_spill] sm:$0xff] %v6667_v58  ;;  %v1488_v34 = vsel %vm394_vm1, %v6667_v58, -inf  ;;  %v6732_v58 = vld [vmem:[%s9248_s1 + $0x20] sm:$0xff] }
 0x231   :  { %640 = vmax.xlane.f32.xlu1 %v639_v8  ;;  %v6664_v8 = vadd.f32 %v1473_v25, %v6624_v22 }
 0x232   :  { %v1182_v7 = vmul.f32 0.2, %v1174_v63 }
 0x233   :  { %9336 = vst [vmem:[#allocation21_spill] sm:$0xff] %v6664_v8  ;;  %v6669_v30 = vpop.permute.xlu2 %595  ;;  %v1491_v37 = vsel %vm394_vm1, %v6664_v8, -inf }
 0x234   :  { %v1190_v25 = vmax.f32 %v1174_v63, %v1182_v7  ;;  %v1176_v7 = vadd.f32 %v6588_v49, %v6575_v43 }
 0x235   :  { %v6686_v2 = vpop.permute.xlu1 %878 }
 0x238   :  { %926 = vmax.xlane.f32.xlu2 %v925_v28  ;;  %v625_v28 = vmax.f32 %v609_v42, %v617_v9  ;;  %v608_v42 = vadd.f32 %v6585_v48, %v6549_v23  ;;  %v373_v9 = vmul.f32 0.2, %v365_v13 }
 0x239   :  { %923 = vmax.xlane.f32.xlu1 %v922_v27  ;;  %v893_v27 = vadd.f32 %v6604_v4, %v6572_v41 }
 0x23a   :  { %v6689_v36 = vadd.f32 %v625_v28, %v6680_v21  ;;  %v616_v52 = vmul.f32 0.2, %v608_v42  ;;  %v381_v41 = vmax.f32 %v365_v13, %v373_v9  ;;  %v6703_v28 = vld [vmem:[%s9248_s1 + $0x18] sm:$0xff]  ;;  %v364_v13 = vadd.f32 %v6582_v46, %v6557_v32 }
 0x23b   :  { %v901_v54 = vmul.f32 0.2, %v893_v27  ;;  %v1162_v53 = vpop.permute.xlu2 %1161  ;;  %v1184_v9 = vmul.f32 0.2, %v1176_v7  ;;  %v894_v32 = vadd.f32 %v6604_v4, %v6591_v50  ;;  %v892_v50 = vadd.f32 %v6604_v4, %v6555_v31 }
 0x23c   :  { %9338 = vst [vmem:[#allocation23_spill] sm:$0xff] %v6689_v36  ;;  %v645_v63 = vsel %vm394_vm1, %v6689_v36, -inf  ;;  %v624_v11 = vmax.f32 %v608_v42, %v616_v52  ;;  %v6710_v43 = vadd.f32 %v381_v41, %v6703_v28  ;;  %v367_v31 = vadd.f32 %v6582_v46, %v6647_v14 }
 0x23d   :  { %v6715_v3 = vpop.permute.xlu1 %1444  ;;  %v1175_v36 = vadd.f32 %v6588_v49, %v6561_v35  ;;  %v1178_v35 = vadd.f32 %v6588_v49, %v1162_v53  ;;  %v6781_v53 = vld [vmem:[%s9248_s1 + $0x30] sm:$0xff] }
 0x23e   :  { %v404_v52 = vsel %vm394_vm1, %v6710_v43, -inf  ;;  %v375_v14 = vmul.f32 0.2, %v367_v31 }
 0x240   :  { %1492 = vmax.xlane.f32.xlu2 %v1491_v37  ;;  %v6692_v37 = vadd.f32 %v1190_v25, %v6624_v22  ;;  %v366_v25 = vadd.f32 %v6582_v46, %v6606_v10  ;;  %v1192_v10 = vmax.f32 %v1176_v7, %v1184_v9 }
 0x241   :  { %1489 = vmax.xlane.f32.xlu1 %v1488_v34  ;;  %v909_v34 = vmax.f32 %v893_v27, %v901_v54  ;;  %v6718_v54 = vadd.f32 %v624_v11, %v6624_v22  ;;  %v372_v27 = vmul.f32 0.2, %v364_v13 }
 0x242   :  { %9339 = vst [vmem:[#allocation24_spill] sm:$0xff] %v6692_v37  ;;  %v1208_v23 = vsel %vm394_vm1, %v6692_v37, -inf  ;;  %v374_v37 = vmul.f32 0.2, %v366_v25  ;;  %v6737_v9 = vadd.f32 %v1192_v10, %v6703_v28 }
 0x243   :  { %v642_v11 = vsel %vm394_vm1, %v6718_v54, -inf  ;;  %v380_v7 = vmax.f32 %v364_v13, %v372_v27 }
 0x244   :  { %v382_v41 = vmax.f32 %v366_v25, %v374_v37  ;;  %9340 = vst [vmem:[#allocation25_spill] sm:$0xff] %v6737_v9  ;;  %v902_v37 = vmul.f32 0.2, %v894_v32  ;;  %v1214_v13 = vsel %vm394_vm1, %v6737_v9, -inf }
 0x245   :  { %v354_v8 = vpop.permute.xlu1 %353 }
 0x246   :  { %v910_v27 = vmax.f32 %v894_v32, %v902_v37 }
 0x248   :  { %646 = vmax.xlane.f32.xlu2 %v645_v63  ;;  %v6713_v63 = vadd.f32 %v909_v34, %v6703_v28  ;;  %v883_v34 = vpop.permute.xlu2 %882  ;;  %v6757_v37 = vadd.f32 %v910_v27, %v6732_v58 }
 0x249   :  { %1209 = vmax.xlane.f32.xlu1 %v1208_v23  ;;  %v1177_v23 = vadd.f32 %v6588_v49, %v1158_v24  ;;  %v6740_v24 = vadd.f32 %v382_v41, %v6732_v58  ;;  %v368_v41 = vadd.f32 %v6582_v46, %v354_v8 }
 0x24a   :  { %v931_v42 = vsel %vm394_vm1, %v6713_v63, -inf }
 0x24b   :  { %v1185_v25 = vmul.f32 0.2, %v1177_v23  ;;  %v407_v10 = vsel %vm394_vm1, %v6740_v24, -inf }
 0x250   :  { %405 = vmax.xlane.f32.xlu2 %v404_v52  ;;  %v6743_v52 = vadd.f32 %v380_v7, %v6680_v21  ;;  %v1449_v32 = vpop.permute.xlu2 %1448 }
 0x251   :  { %932 = vmax.xlane.f32.xlu1 %v931_v42  ;;  %v900_v42 = vmul.f32 0.2, %v892_v50  ;;  %v1462_v5 = vadd.f32 %v6630_v56, %v1449_v32 }
 0x252   :  { %643 = vmax.xlane.f32.xlu0 %v642_v11  ;;  %v1193_v11 = vmax.f32 %v1177_v23, %v1185_v25  ;;  %v401_v7 = vsel %vm394_vm1, %v6743_v52, -inf  ;;  %v376_v23 = vmul.f32 0.2, %v368_v41  ;;  %v1183_v25 = vmul.f32 0.2, %v1175_v36 }
 0x253   :  { %v908_v22 = vmax.f32 %v892_v50, %v900_v42  ;;  %v934_v50 = vsel %vm394_vm1, %v6757_v37, -inf  ;;  %v383_v42 = vmax.f32 %v367_v31, %v375_v14  ;;  %v610_v14 = vadd.f32 %v6585_v48, %v6569_v39 }
 0x254   :  { %v1191_v31 = vmax.f32 %v1175_v36, %v1183_v25  ;;  %v1459_v39 = vadd.f32 %v6630_v56, %v6579_v45  ;;  %v1470_v32 = vmul.f32 0.2, %v1462_v5 }
 0x255   :  { %v6763_v8 = vadd.f32 %v908_v22, %v6680_v21  ;;  %v896_v22 = vadd.f32 %v6604_v4, %v883_v34  ;;  %v618_v9 = vmul.f32 0.2, %v610_v14 }
 0x256   :  { %v1467_v45 = vmul.f32 0.2, %v1459_v39 }
 0x257   :  { %v626_v44 = vmax.f32 %v610_v14, %v618_v9 }
 0x258   :  { %1215 = vmax.xlane.f32.xlu2 %v1214_v13  ;;  %v6760_v13 = vadd.f32 %v1193_v11, %v6732_v58  ;;  %v384_v11 = vmax.f32 %v368_v41, %v376_v23  ;;  %v1186_v41 = vmul.f32 0.2, %v1178_v35  ;;  %v904_v23 = vmul.f32 0.2, %v896_v22 }
 0x259   :  { %408 = vmax.xlane.f32.xlu1 %v407_v10  ;;  %v6773_v10 = vld [vmem:[%s9248_s1 + $0x28] sm:$0xff]  ;;  %v1475_v14 = vmax.f32 %v1459_v39, %v1467_v45 }
 0x25a   :  { %402 = vmax.xlane.f32.xlu0 %v401_v7  ;;  %9341 = vst [vmem:[#allocation26_spill] sm:$0xff] %v6760_v13  ;;  %v1217_v27 = vsel %vm394_vm1, %v6760_v13, -inf  ;;  %v928_v7 = vsel %vm394_vm1, %v6763_v8, -inf  ;;  %v6789_v34 = vadd.f32 %v384_v11, %v6781_v53  ;;  %v6792_v13 = vadd.f32 %v1191_v31, %v6680_v21 }
 0x25b   :  { %v1194_v25 = vmax.f32 %v1178_v35, %v1186_v41  ;;  %v1460_v11 = vadd.f32 %v6630_v56, %v6627_v51  ;;  %v619_v51 = vmul.f32 0.2, %v611_v1  ;;  %v6826_v39 = vadd.f32 %v1475_v14, %v6703_v28 }
 0x25c   :  { %9342 = vst [vmem:[#allocation27_spill] sm:$0xff] %v6792_v13  ;;  %v1211_v31 = vsel %vm394_vm1, %v6792_v13, -inf  ;;  %v612_v13 = vadd.f32 %v6585_v48, %v6669_v30 }
 0x25d   :  { %v6807_v35 = vadd.f32 %v1194_v25, %v6773_v10 }
 0x25f   :  { %9343 = vst [vmem:[#allocation28_spill] sm:$0xff] %v6807_v35  ;;  %v1220_v9 = vsel %vm394_vm1, %v6807_v35, -inf }
 0x260   :  { %935 = vmax.xlane.f32.xlu2 %v934_v50  ;;  %v6786_v50 = vadd.f32 %v383_v42, %v6773_v10  ;;  %v413_v42 = vsel %vm394_vm1, %v6789_v34, -inf }
 0x261   :  { %1218 = vmax.xlane.f32.xlu1 %v1217_v27  ;;  %v359_v27 = vpop.permute.xlu2 %358 }
 0x262   :  { %929 = vmax.xlane.f32.xlu0 %v928_v7  ;;  %v410_v36 = vsel %vm394_vm1, %v6786_v50, -inf  ;;  %v912_v7 = vmax.f32 %v896_v22, %v904_v23  ;;  %v1468_v22 = vmul.f32 0.2, %v1460_v11  ;;  %v6813_v23 = vadd.f32 %v626_v44, %v6703_v28 }
 0x264   :  { %v6810_v41 = vadd.f32 %v912_v7, %v6781_v53  ;;  %v648_v44 = vsel %vm394_vm1, %v6813_v23, -inf }
 0x266   :  { %v940_v25 = vsel %vm394_vm1, %v6810_v41, -inf }
 0x268   :  { %411 = vmax.xlane.f32.xlu2 %v410_v36 }
 0x269   :  { %414 = vmax.xlane.f32.xlu1 %v413_v42  ;;  %v604_v36 = vpop.permute.xlu2 %603  ;;  %v1476_v42 = vmax.f32 %v1460_v11, %v1468_v22  ;;  %v620_v22 = vmul.f32 0.2, %v612_v13 }
 0x26a   :  { %1212 = vmax.xlane.f32.xlu0 %v1211_v31  ;;  %v614_v7 = vadd.f32 %v6585_v48, %v604_v36  ;;  %v627_v31 = vmax.f32 %v611_v1, %v619_v51  ;;  %v1497_v36 = vsel %vm394_vm1, %v6826_v39, -inf  ;;  %v1478_v1 = vmax.f32 %v1462_v5, %v1470_v32 }
 0x26b   :  { %v6829_v45 = vadd.f32 %v1476_v42, %v6732_v58  ;;  %v369_v51 = vadd.f32 %v6582_v46, %v359_v27  ;;  %v6844_v42 = vld [vmem:[%s9248_s1 + $0x38] sm:$0xff]  ;;  %v895_v5 = vadd.f32 %v6604_v4, %v6686_v2  ;;  %v600_v46 = vpop.permute.xlu1 %599 }
 0x26c   :  { %v6832_v11 = vadd.f32 %v627_v31, %v6732_v58  ;;  %v6849_v27 = vadd.f32 %v1478_v1, %v6781_v53 }
 0x26d   :  { %v1500_v30 = vsel %vm394_vm1, %v6829_v45, -inf  ;;  %v377_v31 = vmul.f32 0.2, %v369_v51 }
 0x26e   :  { %9344 = vst [vmem:[#allocation29_spill] sm:$0xff] %v6849_v27 }
 0x270   :  { %1221 = vmax.xlane.f32.xlu2 %v1220_v9  ;;  %v622_v9 = vmul.f32 0.2, %v614_v7 }
 0x271   :  { %941 = vmax.xlane.f32.xlu1 %v940_v25  ;;  %v651_v25 = vsel %vm394_vm1, %v6832_v11, -inf }
 0x272   :  { %649 = vmax.xlane.f32.xlu0 %v648_v44  ;;  %v630_v14 = vmax.f32 %v614_v7, %v622_v9  ;;  %v628_v44 = vmax.f32 %v612_v13, %v620_v22  ;;  %v903_v9 = vmul.f32 0.2, %v895_v5  ;;  %v385_v13 = vmax.f32 %v369_v51, %v377_v31 }
 0x273   :  { %v613_v22 = vadd.f32 %v6585_v48, %v600_v46 }
 0x274   :  { %v6852_v7 = vadd.f32 %v630_v14, %v6844_v42  ;;  %v6855_v32 = vadd.f32 %v628_v44, %v6773_v10  ;;  %v6865_v14 = vadd.f32 %v385_v13, %v6844_v42  ;;  %v1166_v44 = vpop.permute.xlu1 %1165 }
 0x275   :  { %v1179_v31 = vadd.f32 %v6588_v49, %v1166_v44 }
 0x276   :  { %v660_v2 = vsel %vm394_vm1, %v6852_v7, -inf  ;;  %v654_v1 = vsel %vm394_vm1, %v6855_v32, -inf  ;;  %v416_v51 = vsel %vm394_vm1, %v6865_v14, -inf }
 0x277   :  { %v1187_v13 = vmul.f32 0.2, %v1179_v31 }
 0x278   :  { %1498 = vmax.xlane.f32.xlu2 %v1497_v36  ;;  %v1506_v36 = vsel %vm394_vm1, %v6849_v27, -inf }
 0x279   :  { %1501 = vmax.xlane.f32.xlu1 %v1500_v30  ;;  %v911_v30 = vmax.f32 %v895_v5, %v903_v9  ;;  %v1195_v35 = vmax.f32 %v1179_v31, %v1187_v13  ;;  %v1461_v13 = vadd.f32 %v6630_v56, %v6715_v3 }
 0x27a   :  { %652 = vmax.xlane.f32.xlu0 %v651_v25  ;;  %v621_v25 = vmul.f32 0.2, %v613_v22 }
 0x27b   :  { %v6868_v27 = vadd.f32 %v911_v30, %v6773_v10 }
 0x27c   :  { %v629_v46 = vmax.f32 %v613_v22, %v621_v25  ;;  %v1458_v25 = vadd.f32 %v6630_v56, %v6567_v38 }
 0x27d   :  { %v937_v5 = vsel %vm394_vm1, %v6868_v27, -inf }
 0x280   :  { %1507 = vmax.xlane.f32.xlu2 %v1506_v36 }
 0x281   :  { %661 = vmax.xlane.f32.xlu1 %v660_v2 }
 0x282   :  { %655 = vmax.xlane.f32.xlu0 %v654_v1  ;;  %v6877_v1 = vadd.f32 %v629_v46, %v6781_v53  ;;  %v6893_v46 = vadd.f32 %v1195_v35, %v6781_v53 }
 0x284   :  { %v657_v22 = vsel %vm394_vm1, %v6877_v1, -inf  ;;  %9345 = vst [vmem:[#allocation30_spill] sm:$0xff] %v6893_v46  ;;  %v1223_v38 = vsel %vm394_vm1, %v6893_v46, -inf }
 0x288   :  { %417 = vmax.xlane.f32.xlu2 %v416_v51  ;;  %v887_v48 = vpop.permute.xlu0 %886 }
 0x289   :  { %v897_v36 = vadd.f32 %v6604_v4, %v887_v48  ;;  %v9279_v48 = vmov 5  }
 0x28a   :  { %938 = vmax.xlane.f32.xlu0 %v937_v5  ;;  %5620 = vset.pattern.permute.xlu2 %v9279_v48 }
 0x28b   :  { %v905_v9 = vmul.f32 0.2, %v897_v36  ;;  %5619 = vset.pattern.permute.xlu1 %v9279_v48  ;;  %5621 = vset.pattern.permute.xlu0 %v9279_v48 }
 0x28d   :  { %v913_v2 = vmax.f32 %v897_v36, %v905_v9  ;;  %v1466_v36 = vmul.f32 0.2, %v1458_v25 }
 0x28f   :  { %v6880_v30 = vadd.f32 %v913_v2, %v6844_v42 }
 0x291   :  { %v1170_v44 = vpop.permute.xlu0 %1169  ;;  %v943_v4 = vsel %vm394_vm1, %v6880_v30, -inf }
 0x292   :  { %v1180_v51 = vadd.f32 %v6588_v49, %v1170_v44  ;;  %658 = vmax.xlane.f32.xlu0 %v657_v22  ;;  %944 = vmax.xlane.f32.xlu2 %v943_v4  ;;  %v1474_v49 = vmax.f32 %v1458_v25, %v1466_v36 }
 0x294   :  { %v1188_v31 = vmul.f32 0.2, %v1180_v51 }
 0x296   :  { %v1196_v5 = vmax.f32 %v1180_v51, %v1188_v31  ;;  %v6908_v31 = vadd.f32 %v1474_v49, %v6680_v21 }
 0x298   :  { %v6896_v9 = vadd.f32 %v1196_v5, %v6844_v42  ;;  %v1469_v5 = vmul.f32 0.2, %v1461_v13  ;;  %v1494_v3 = vsel %vm394_vm1, %v6908_v31, -inf }
 0x29a   :  { %9346 = vst [vmem:[#allocation31_spill] sm:$0xff] %v6896_v9  ;;  %1224 = vmax.xlane.f32.xlu0 %v1223_v38  ;;  %v1453_v2 = vpop.permute.xlu0 %1452  ;;  %v1226_v44 = vsel %vm394_vm1, %v6896_v9, -inf  ;;  %v1477_v48 = vmax.f32 %v1461_v13, %v1469_v5 }
 0x29b   :  { %v1463_v35 = vadd.f32 %v6630_v56, %v1453_v2  ;;  %v6905_v22 = vpop.xlane.xlu2 %1206  ;;  %1227 = vmax.xlane.f32.xlu1 %v1226_v44 }
 0x29c   :  { %v397_v4 = vpop.xlane.xlu1 %396 }
 0x29d   :  { %v1471_v51 = vmul.f32 0.2, %v1463_v35  ;;  %v419_v36 = vsub.f32 %v6612_v12, %v397_v4  ;;  %v6922_v12 = vadd.f32 %v1477_v48, %v6773_v10 }
 0x29f   :  { %v1479_v25 = vmax.f32 %v1463_v35, %v1471_v51  ;;  %v427_v56 = vmul.f32 1.442695, %v419_v36  ;;  %v1503_v13 = vsel %vm394_vm1, %v6922_v12, -inf }
 0x2a1   :  { %v6914_v38 = vadd.f32 %v1479_v25, %v6844_v42  ;;  %5696 = vpow2.f32 %v427_v56 }
 0x2a2   :  { %1495 = vmax.xlane.f32.xlu0 %v1494_v3 }
 0x2a3   :  { %v400_v2 = vpop.xlane.xlu2 %399  ;;  %v1509_v44 = vsel %vm394_vm1, %v6914_v38, -inf }
 0x2a4   :  { %v420_v49 = vsub.f32 %v6633_v60, %v400_v2  ;;  %v6919_v9 = vpop.xlane.xlu1 %640  ;;  %1510 = vmax.xlane.f32.xlu1 %v1509_v44 }
 0x2a6   :  { %v429_v35 = vmul.f32 1.442695, %v420_v49 }
 0x2a7   :  { %v5697_v60 = vpop.eup %5696 }
 0x2a8   :  { %5698 = vpow2.f32 %v429_v35 }
 0x2aa   :  { %1504 = vmax.xlane.f32.xlu0 %v1503_v13  ;;  %1542 = vrot.lane.b32.xlu2 %v6403_v33, %s6273_s16 }
 0x2ab   :  { %v927_v4 = vpop.xlane.xlu2 %926 }
 0x2ac   :  { %v924_v51 = vpop.xlane.xlu1 %923 }
 0x2ae   :  { %v5699_v5 = vpop.eup %5698 }
 0x2af   :  { %v443_v25 = vpack.c.bf16 %v5699_v5, %v5697_v60 }
 0x2b1   :  { %5378 = vmatmul.msk.bf16.vlgmr.msra.gmra.mxu2 %vm394_vm1, %v443_v25 }
 0x2b2   :  { %1711 = vperm.xlu2 %5620, %v6445_v57  }
 0x2b3   :  { %v6930_v48 = vpop.xlane.xlu2 %1492 }
 0x2b4   :  { %v6932_v36 = vpop.xlane.xlu1 %1489 }
 0x2ba   :  { %1723 = vperm.xlu2 %5620, %v6496_v15  }
 0x2bb   :  { %v6935_v3 = vpop.xlane.xlu2 %646 }
 0x2bc   :  { %v6941_v56 = vpop.xlane.xlu1 %1209 }
 0x2bd   :  { %1544 = vrot.lane.b32.xlu1 %v6412_v40, %s6273_s16 }
 0x2be   :  { %1540 = vrot.lane.b32.xlu0 %v6394_v26, %s6273_s16 }
 0x2c2   :  { %1731 = vperm.xlu2 %5620, %v6525_v17  }
 0x2c3   :  { %v406_v2 = vpop.xlane.xlu2 %405 }
 0x2c4   :  { %v422_v49 = vsub.f32 %v6710_v43, %v406_v2  ;;  %v933_v35 = vpop.xlane.xlu1 %932  ;;  %v946_v2 = vsub.f32 %v6653_v61, %v924_v51 }
 0x2c5   :  { %1707 = vperm.xlu1 %5619, %v6441_v55   ;;  %v6945_v44 = vpop.xlane.xlu0 %643  ;;  %v947_v55 = vsub.f32 %v6650_v20, %v927_v4 }
 0x2c6   :  { %1546 = vrot.lane.b32.xlu0 %v6421_v47, %s6273_s16  ;;  %v433_v60 = vmul.f32 1.442695, %v422_v49 }
 0x2c8   :  { %5700 = vpow2.f32 %v433_v60 }
 0x2cb   :  { %v6950_v13 = vpop.xlane.xlu2 %1215 }
 0x2cc   :  { %v409_v46 = vpop.xlane.xlu1 %408 }
 0x2cd   :  { %1719 = vperm.xlu1 %5619, %v6476_v6   ;;  %v403_v5 = vpop.xlane.xlu0 %402  ;;  %v423_v6 = vsub.f32 %v6740_v24, %v409_v46 }
 0x2ce   :  { %v421_v25 = vsub.f32 %v6743_v52, %v403_v5  ;;  %1715 = vperm.xlu0 %5621, %v6451_v59   ;;  %v5701_v49 = vpop.eup %5700  ;;  %v956_v5 = vmul.f32 1.442695, %v947_v55 }
 0x2cf   :  { %v435_v60 = vmul.f32 1.442695, %v423_v6 }
 0x2d0   :  { %v431_v17 = vmul.f32 1.442695, %v421_v25  ;;  %v954_v25 = vmul.f32 1.442695, %v946_v2 }
 0x2d2   :  { %5702 = vpow2.f32 %v431_v17 }
 0x2d3   :  { %v936_v15 = vpop.xlane.xlu2 %935  ;;  %5704 = vpow2.f32 %v956_v5 }
 0x2d4   :  { %5706 = vpow2.f32 %v954_v25  ;;  %v6973_v5 = vpop.xlane.xlu1 %1218 }
 0x2d5   :  { %1727 = vperm.xlu1 %5619, %v6508_v16   ;;  %v930_v43 = vpop.xlane.xlu0 %929  ;;  %5708 = vpow2.f32 %v435_v60 }
 0x2d6   :  { %1735 = vperm.xlu0 %5621, %v6532_v18  }
 0x2d8   :  { %v5703_v52 = vpop.eup %5702 }
 0x2d9   :  { %v444_v59 = vpack.c.bf16 %v5701_v49, %v5703_v52  ;;  %v5705_v51 = vpop.eup %5704  ;;  %v949_v52 = vsub.f32 %v6713_v63, %v933_v35 }
 0x2da   :  { %v5707_v24 = vpop.eup %5706 }
 0x2db   :  { %v412_v17 = vpop.xlane.xlu2 %411  ;;  %5379 = vmatmul.msk.bf16.gmra.mxu2 %vm394_vm1, %v444_v59  ;;  %v5709_v55 = vpop.eup %5708  ;;  %v948_v59 = vsub.f32 %v6763_v8, %v930_v43  ;;  %v970_v49 = vpack.c.bf16 %v5705_v51, %v5707_v24  ;;  %v960_v43 = vmul.f32 1.442695, %v949_v52 }
 0x2dc   :  { %v424_v20 = vsub.f32 %v6786_v50, %v412_v17  ;;  %v1275_v50 = vsel %vm447_vm0, %v6553_v29, 1065369472  ;;  %v1272_v17 = vsel %vm447_vm0, %v6547_v19, 1065369472  ;;  %v1269_v29 = vsel %vm447_vm0, %v6462_v62, 1065369472  ;;  %v415_v35 = vpop.xlane.xlu1 %414 }
 0x2dd   :  { %v6962_v4 = vpop.xlane.xlu0 %1212  ;;  %v958_v60 = vmul.f32 1.442695, %v948_v59  ;;  %v425_v19 = vsub.f32 %v6789_v34, %v415_v35 }
 0x2de   :  { %v437_v61 = vmul.f32 1.442695, %v424_v20  ;;  %v1266_v20 = vsel %vm447_vm0, %v6466_v0, 1065369472 }
 0x2e0   :  { %5710 = vpow2.f32 %v437_v61 }
 0x2e1   :  { %5712 = vpow2.f32 %v958_v60 }
 0x2e2   :  { %5714 = vpow2.f32 %v960_v43  ;;  %v664_v43 = vsub.f32 %v6718_v54, %v6945_v44 }
 0x2e3   :  { %v6964_v16 = vpop.xlane.xlu2 %1221 }
 0x2e4   :  { %v942_v34 = vpop.xlane.xlu1 %941 }
 0x2e5   :  { %v6966_v46 = vpop.xlane.xlu0 %649 }
 0x2e6   :  { %v5711_v6 = vpop.eup %5710 }
 0x2e7   :  { %v445_v2 = vpack.c.bf16 %v5711_v6, %v5709_v55  ;;  %v5713_v51 = vpop.eup %5712  ;;  %v950_v55 = vsub.f32 %v6757_v37, %v936_v15 }
 0x2e8   :  { %v5715_v24 = vpop.eup %5714 }
 0x2e9   :  { %5380 = vmatmul.msk.bf16.vlgmr.msra.gmra.mxu3 %vm394_vm1, %v445_v2  ;;  %v971_v6 = vpack.c.bf16 %v5715_v24, %v5713_v51  ;;  %v439_v2 = vmul.f32 1.442695, %v425_v19  ;;  %v673_v24 = vmul.f32 1.442695, %v664_v43  ;;  %v9349_v43 = vld [vmem:[#allocation23_spill] sm:$0xff] }
 0x2ea   :  { %1293 = vmatpush.bf16.msra.mxu3 %v1275_v50  ;;  %v962_v50 = vmul.f32 1.442695, %v950_v55  ;;  %v952_v55 = vsub.f32 %v6810_v41, %v942_v34  ;;  %v666_v34 = vsub.f32 %v6813_v23, %v6966_v46 }
 0x2eb   :  { %v6975_v25 = vpop.xlane.xlu2 %1498  ;;  %5386 = vmatmul.msk.bf16.vlgmr.msrb.gmra.mxu2 %vm394_vm1, %v970_v49  ;;  %5716 = vpow2.f32 %v439_v2 }
 0x2ed   :  { %v6980_v8 = vpop.xlane.xlu0 %652 }
 0x2ee   :  { %1294 = vmatpush.bf16.msra.mxu3 %v1272_v17 }
 0x2f1   :  { %v5717_v17 = vpop.eup %5716 }
 0x2f2   :  { %1295 = vmatpush.bf16.msra.mxu3 %v1269_v29 }
 0x2f3   :  { %v6984_v63 = vpop.xlane.xlu2 %1507 }
 0x2f5   :  { %v6988_v61 = vpop.xlane.xlu0 %655 }
 0x2f6   :  { %1296 = vmatpush.bf16.msra.mxu3 %v1266_v20 }
 0x2fb   :  { %v418_v62 = vpop.xlane.xlu2 %417  ;;  %5387 = vmatmul.msk.bf16.gmra.mxu2 %vm394_vm1, %v971_v6 }
 0x2fc   :  { %v426_v59 = vsub.f32 %v6865_v14, %v418_v62  ;;  %v9347_v14 = vld [vmem:[#allocation20_spill] sm:$0xff]  ;;  %v7004_v62 = vpop.xlane.xlu1 %1501 }
 0x2fd   :  { %v939_v49 = vpop.xlane.xlu0 %938  ;;  %v663_v35 = vsub.f32 %v9347_v14, %v6919_v9  ;;  %v966_v9 = vmul.f32 1.442695, %v952_v55 }
 0x2fe   :  { %v441_v52 = vmul.f32 1.442695, %v426_v59  ;;  %v951_v0 = vsub.f32 %v6868_v27, %v939_v49  ;;  %v9348_v59 = vld [vmem:[#allocation16_spill] sm:$0xff] }
 0x2ff   :  { %v671_v2 = vmul.f32 1.442695, %v663_v35 }
 0x300   :  { %5718 = vpow2.f32 %v441_v52  ;;  %v964_v60 = vmul.f32 1.442695, %v951_v0 }
 0x301   :  { %5720 = vpow2.f32 %v962_v50  ;;  %v7010_v50 = vperm.slane %v9348_v59, 5 }
 0x302   :  { %5722 = vpow2.f32 %v964_v60 }
 0x303   :  { %5724 = vpow2.f32 %v673_v24 }
 0x304   :  { %5726 = vpow2.f32 %v671_v2  ;;  %v662_v52 = vpop.xlane.xlu1 %661 }
 0x305   :  { %v945_v15 = vpop.xlane.xlu2 %944  ;;  %v7002_v6 = vpop.xlane.xlu0 %658 }
 0x306   :  { %v5719_v37 = vpop.eup %5718  ;;  %v953_v27 = vsub.f32 %v6880_v30, %v945_v15 }
 0x307   :  { %v5721_v29 = vpop.eup %5720  ;;  %v446_v20 = vpack.c.bf16 %v5719_v37, %v5717_v17 }
 0x308   :  { %v5723_v51 = vpop.eup %5722  ;;  %v968_v54 = vmul.f32 1.442695, %v953_v27 }
 0x309   :  { %5381 = vmatmul.msk.bf16.gmra.mxu3 %vm394_vm1, %v446_v20  ;;  %v972_v19 = vpack.c.bf16 %v5723_v51, %v5721_v29  ;;  %v5725_v30 = vpop.eup %5724  ;;  %v665_v29 = vsub.f32 %v9349_v43, %v6935_v3  ;;  %v677_v20 = vmul.f32 1.442695, %v666_v34 }
 0x30a   :  { %5728 = vpow2.f32 %v968_v54  ;;  %v5727_v49 = vpop.eup %5726 }
 0x30b   :  { %5388 = vmatmul.msk.bf16.gmra.mxu2 %vm394_vm1, %v972_v19  ;;  %5730 = vpow2.f32 %v966_v9  ;;  %v687_v15 = vpack.c.bf16 %v5725_v30, %v5727_v49  ;;  %v675_v27 = vmul.f32 1.442695, %v665_v29  ;;  %v9350_v19 = vld [vmem:[#allocation19_spill] sm:$0xff] }
 0x30c   :  { %5732 = vpow2.f32 %v677_v20 }
 0x30d   :  { %v7007_v44 = vpop.permute.xlu2 %1542  ;;  %v7012_v41 = vpop.xlane.xlu0 %1224  ;;  %5734 = vpow2.f32 %v675_v27  ;;  %v669_v27 = vsub.f32 %v6877_v1, %v7002_v6 }
 0x30e   :  { %v7024_v23 = vpop.xlane.xlu1 %1227 }
 0x310   :  { %v5729_v60 = vpop.eup %5728 }
 0x311   :  { %v5731_v37 = vpop.eup %5730 }
 0x312   :  { %v973_v35 = vpack.c.bf16 %v5729_v60, %v5731_v37  ;;  %v5733_v30 = vpop.eup %5732  ;;  %v668_v60 = vsub.f32 %v6855_v32, %v6988_v61  ;;  %v667_v37 = vsub.f32 %v6832_v11, %v6980_v8  ;;  %v9352_v11 = vld [vmem:[#allocation22_spill] sm:$0xff] }
 0x313   :  { %v1512_v8 = vsub.f32 %v9352_v11, %v6932_v36 }
 0x314   :  { %v679_v29 = vmul.f32 1.442695, %v667_v37 }
 0x315   :  { %v1712_v0 = vpop.permute.xlu2 %1711  ;;  %v7026_v55 = vpop.xlane.xlu0 %1495 }
 0x316   :  { %v1740_v17 = vadd.f32 %v7010_v50, %v1712_v0  ;;  %v5735_v0 = vpop.eup %5734 }
 0x318   :  { %v1748_v14 = vmul.f32 0.2, %v1740_v17 }
 0x319   :  { %5382 = vmatmul.msk.bf16.vlgmr.msrb.gmra.mxu3 %vm394_vm1, %v687_v15  ;;  %v688_v15 = vpack.c.bf16 %v5733_v30, %v5735_v0 }
 0x31a   :  { %v1756_v51 = vmax.f32 %v1740_v17, %v1748_v14  ;;  %v7038_v17 = vpop.xlane.xlu1 %1510 }
 0x31b   :  { %5389 = vmatmul.msk.bf16.gmra.mxu2 %vm394_vm1, %v973_v35  ;;  %v9351_v35 = vld [vmem:[#allocation21_spill] sm:$0xff] }
 0x31c   :  { %v7022_v24 = vadd.f32 %v1756_v51, %v9350_v19  ;;  %v1513_v20 = vsub.f32 %v9351_v35, %v6930_v48  ;;  %v683_v48 = vmul.f32 1.442695, %v669_v27 }
 0x31d   :  { %v1724_v46 = vpop.permute.xlu2 %1723  ;;  %v7042_v43 = vpop.xlane.xlu0 %1504 }
 0x31e   :  { %v1743_v3 = vadd.f32 %v7010_v50, %v1724_v46  ;;  %v1774_v2 = vsel %vm394_vm1, %v7022_v24, -inf }
 0x31f   :  { %1775 = vmax.xlane.f32.xlu2 %v1774_v2 }
 0x320   :  { %v1751_v54 = vmul.f32 0.2, %v1743_v3 }
 0x322   :  { %v1759_v9 = vmax.f32 %v1743_v3, %v1751_v54  ;;  %v670_v3 = vsub.f32 %v6852_v7, %v662_v52  ;;  %v9353_v7 = vld [vmem:[#allocation17_spill] sm:$0xff] }
 0x324   :  { %v7032_v49 = vadd.f32 %v1759_v9, %v6732_v58  ;;  %v681_v58 = vmul.f32 1.442695, %v668_v60  ;;  %v1522_v9 = vmul.f32 1.442695, %v1513_v20  ;;  %v1520_v60 = vmul.f32 1.442695, %v1512_v8 }
 0x325   :  { %v685_v1 = vmul.f32 1.442695, %v670_v3  ;;  %v1732_v36 = vpop.permute.xlu2 %1731 }
 0x326   :  { %v1783_v34 = vsel %vm394_vm1, %v7032_v49, -inf  ;;  %5736 = vpow2.f32 %v681_v58  ;;  %v1745_v37 = vadd.f32 %v7010_v50, %v1732_v36 }
 0x327   :  { %1784 = vmax.xlane.f32.xlu2 %v1783_v34  ;;  %5738 = vpow2.f32 %v679_v29 }
 0x328   :  { %5740 = vpow2.f32 %v1522_v9  ;;  %v1753_v8 = vmul.f32 0.2, %v1745_v37  ;;  %v9354_v9 = vld [vmem:[#allocation24_spill] sm:$0xff] }
 0x329   :  { %5383 = vmatmul.msk.bf16.gmra.mxu3 %vm394_vm1, %v688_v15  ;;  %5742 = vpow2.f32 %v683_v48 }
 0x32a   :  { %5744 = vpow2.f32 %v1520_v60  ;;  %v1514_v60 = vsub.f32 %v6908_v31, %v7026_v55 }
 0x32b   :  { %5746 = vpow2.f32 %v685_v1 }
 0x32c   :  { %v5737_v61 = vpop.eup %5736 }
 0x32d   :  { %v5739_v51 = vpop.eup %5738 }
 0x32e   :  { %v689_v46 = vpack.c.bf16 %v5737_v61, %v5739_v51  ;;  %v5741_v51 = vpop.eup %5740 }
 0x32f   :  { %v1545_v14 = vpop.permute.xlu1 %1544  ;;  %v5743_v11 = vpop.eup %5742 }
 0x330   :  { %v1541_v32 = vpop.permute.xlu0 %1540  ;;  %v1555_v34 = vsel %vm447_vm0, %v1545_v14, 1065369472  ;;  %v1552_v14 = vsel %vm447_vm0, %v7007_v44, 1065369472  ;;  %v9355_v44 = vld [vmem:[#allocation18_spill] sm:$0xff] }
 0x337   :  { %v1708_v19 = vpop.permute.xlu1 %1707 }
 0x338   :  { %v1739_v2 = vadd.f32 %v7010_v50, %v1708_v19  ;;  %v1547_v54 = vpop.permute.xlu0 %1546 }
 0x339   :  { %5384 = vmatmul.msk.bf16.gmra.mxu3 %vm394_vm1, %v689_v46  ;;  %v1558_v30 = vsel %vm447_vm0, %v1547_v54, 1065369472  ;;  %v5745_v46 = vpop.eup %5744 }
 0x33a   :  { %v1747_v0 = vmul.f32 0.2, %v1739_v2  ;;  %1576 = vmatpush.bf16.msrb.mxu0 %v1558_v30  ;;  %v5747_v54 = vpop.eup %5746  ;;  %v1230_v30 = vsub.f32 %v9354_v9, %v6941_v56 }
 0x33c   :  { %v1755_v6 = vmax.f32 %v1739_v2, %v1747_v0  ;;  %v1549_v2 = vsel %vm447_vm0, %v1541_v32, 1065369472  ;;  %v1229_v0 = vsub.f32 %v9355_v44, %v6905_v22  ;;  %v1761_v32 = vmax.f32 %v1745_v37, %v1753_v8  ;;  %v9356_v8 = vld [vmem:[#allocation27_spill] sm:$0xff] }
 0x33d   :  { %v1239_v31 = vmul.f32 1.442695, %v1230_v30  ;;  %v1524_v37 = vmul.f32 1.442695, %v1514_v60  ;;  %v1516_v44 = vsub.f32 %v6829_v45, %v7004_v62  ;;  %v1519_v62 = vsub.f32 %v6914_v38, %v7038_v17 }
 0x33e   :  { %1577 = vmatpush.bf16.msrb.mxu0 %v1555_v34  ;;  %v7057_v52 = vadd.f32 %v1755_v6, %v9353_v7  ;;  %v690_v6 = vpack.c.bf16 %v5747_v54, %v5743_v11  ;;  %v9357_v54 = vld [vmem:[#allocation25_spill] sm:$0xff] }
 0x33f   :  { %v1720_v15 = vpop.permute.xlu1 %1719  ;;  %5748 = vpow2.f32 %v1239_v31  ;;  %v1232_v9 = vsub.f32 %v9357_v54, %v6950_v13  ;;  %v9358_v13 = vld [vmem:[#allocation28_spill] sm:$0xff] }
 0x340   :  { %v1742_v58 = vadd.f32 %v7010_v50, %v1720_v15  ;;  %v1716_v29 = vpop.permute.xlu0 %1715  ;;  %v1771_v61 = vsel %vm394_vm1, %v7057_v52, -inf  ;;  %v1515_v15 = vsub.f32 %v6826_v39, %v6975_v25  ;;  %5750 = vpow2.f32 %v1524_v37 }
 0x341   :  { %v1741_v35 = vadd.f32 %v7010_v50, %v1716_v29  ;;  %1772 = vmax.xlane.f32.xlu1 %v1771_v61  ;;  %v1237_v29 = vmul.f32 1.442695, %v1229_v0 }
 0x342   :  { %v1750_v20 = vmul.f32 0.2, %v1742_v58  ;;  %1578 = vmatpush.bf16.msrb.mxu0 %v1552_v14  ;;  %v1526_v39 = vmul.f32 1.442695, %v1515_v15  ;;  %v9360_v15 = vld [vmem:[#allocation29_spill] sm:$0xff] }
 0x343   :  { %v1749_v27 = vmul.f32 0.2, %v1741_v35  ;;  %5752 = vpow2.f32 %v1237_v29  ;;  %v9363_v29 = vld [vmem:[#allocation31_spill] sm:$0xff] }
 0x344   :  { %v1758_v19 = vmax.f32 %v1742_v58, %v1750_v20  ;;  %5754 = vpow2.f32 %v1526_v39  ;;  %v9364_v39 = vld [vmem:[#allocation10_spill] sm:$0xff] }
 0x345   :  { %v1757_v3 = vmax.f32 %v1741_v35, %v1749_v27  ;;  %v7090_v35 = vadd.f32 %v1761_v32, %v6781_v53  ;;  %v9295_v27 = vmov 6   ;;  %v5749_v53 = vpop.eup %5748  ;;  %v1234_v32 = vsub.f32 %v9358_v13, %v6964_v16 }
 0x346   :  { %1579 = vmatpush.bf16.msrb.mxu0 %v1549_v2  ;;  %v7070_v48 = vadd.f32 %v1758_v19, %v6703_v28  ;;  %v1536_v28 = vpack.c.bf16 %v5741_v51, %v5745_v46  ;;  %5622 = vset.pattern.permute.xlu2 %v9295_v27  ;;  %v1231_v19 = vsub.f32 %v9356_v8, %v6962_v4  ;;  %v1528_v4 = vmul.f32 1.442695, %v1516_v44  ;;  %v9368_v8 = vld [vmem:[#allocation13_spill] sm:$0xff] }
 0x347   :  { %v1728_v1 = vpop.permute.xlu1 %1727  ;;  %v7077_v36 = vadd.f32 %v1757_v3, %v6680_v21  ;;  %v1789_v20 = vsel %vm394_vm1, %v7090_v35, -inf  ;;  %5623 = vset.pattern.permute.xlu1 %v9295_v27  ;;  %5624 = vset.pattern.permute.xlu0 %v9295_v27  ;;  %v1517_v2 = vsub.f32 %v6922_v12, %v7042_v43  ;;  %v1534_v16 = vmul.f32 1.442695, %v1519_v62 }
 0x348   :  { %v1744_v34 = vadd.f32 %v7010_v50, %v1728_v1  ;;  %v1736_v7 = vpop.permute.xlu0 %1735  ;;  %v1780_v56 = vsel %vm394_vm1, %v7070_v48, -inf  ;;  %v1241_v0 = vmul.f32 1.442695, %v1231_v19  ;;  %v1243_v1 = vmul.f32 1.442695, %v1232_v9 }
 0x349   :  { %v1746_v22 = vadd.f32 %v7010_v50, %v1736_v7  ;;  %1781 = vmax.xlane.f32.xlu1 %v1780_v56  ;;  %5385 = vmatmul.msk.bf16.gmra.mxu3 %vm394_vm1, %v690_v6  ;;  %v1777_v21 = vsel %vm394_vm1, %v7077_v36, -inf  ;;  %v1530_v60 = vmul.f32 1.442695, %v1517_v2  ;;  %v9359_v7 = vld [vmem:[#allocation26_spill] sm:$0xff]  ;;  %v7153_v2 = vpop.f32.mrf.mxu2 }
 0x34a   :  { %v1752_v55 = vmul.f32 0.2, %v1744_v34  ;;  %5394 = vmatmul.msk.bf16.vlgmr.msrb.gmra.mxu0 %vm394_vm1, %v1536_v28  ;;  %1778 = vmax.xlane.f32.xlu0 %v1777_v21  ;;  %5756 = vpow2.f32 %v1241_v0  ;;  %v1233_v56 = vsub.f32 %v9359_v7, %v6973_v5  ;;  %v1247_v21 = vmul.f32 1.442695, %v1234_v32  ;;  %v9361_v5 = vld [vmem:[#allocation8_spill] sm:$0xff] }
 0x34b   :  { %v1754_v58 = vmul.f32 0.2, %v1746_v22  ;;  %5758 = vpow2.f32 %v1530_v60 }
 0x34c   :  { %v1760_v61 = vmax.f32 %v1744_v34, %v1752_v55  ;;  %5760 = vpow2.f32 %v1243_v1  ;;  %v1245_v38 = vmul.f32 1.442695, %v1233_v56  ;;  %v9362_v55 = vld [vmem:[#allocation30_spill] sm:$0xff] }
 0x34d   :  { %v1762_v25 = vmax.f32 %v1746_v22, %v1754_v58  ;;  %5762 = vpow2.f32 %v1528_v4  ;;  %v1518_v22 = vsub.f32 %v9360_v15, %v6984_v63  ;;  %v1235_v37 = vsub.f32 %v9362_v55, %v7012_v41  ;;  %v9367_v41 = vld [vmem:[#allocation14_spill] sm:$0xff] }
 0x34e   :  { %v7093_v50 = vadd.f32 %v1760_v61, %v6773_v10  ;;  %5764 = vpow2.f32 %v1247_v21  ;;  %v1236_v61 = vsub.f32 %v9363_v29, %v7024_v23 }
 0x34f   :  { %v7096_v14 = vadd.f32 %v1762_v25, %v6844_v42  ;;  %v5751_v42 = vpop.eup %5750  ;;  %v1532_v17 = vmul.f32 1.442695, %v1518_v22  ;;  %5766 = vpow2.f32 %v1534_v16 }
 0x350   :  { %v1786_v51 = vsel %vm394_vm1, %v7093_v50, -inf  ;;  %v5753_v11 = vpop.eup %5752  ;;  %5768 = vpow2.f32 %v1245_v38 }
 0x351   :  { %1790 = vmax.xlane.f32.xlu1 %v1789_v20  ;;  %v1792_v10 = vsel %vm394_vm1, %v7096_v14, -inf  ;;  %v5755_v46 = vpop.eup %5754  ;;  %v1253_v3 = vpack.c.bf16 %v5749_v53, %v5753_v11  ;;  %5770 = vpow2.f32 %v1532_v17  ;;  %v1251_v53 = vmul.f32 1.442695, %v1236_v61  ;;  %v9366_v11 = vld [vmem:[#allocation11_spill] sm:$0xff]  ;;  %v7158_v0 = vpop.f32.mrf.mxu2 }
 0x352   :  { %1787 = vmax.xlane.f32.xlu0 %v1786_v51  ;;  %1793 = vmax.xlane.f32.xlu2 %v1792_v10  ;;  %v1537_v30 = vpack.c.bf16 %v5755_v46, %v5751_v42  ;;  %v5757_v12 = vpop.eup %5756  ;;  %v1249_v10 = vmul.f32 1.442695, %v1235_v37  ;;  %v9365_v42 = vld [vmem:[#allocation12_spill] sm:$0xff] }
 0x353   :  { %v5759_v43 = vpop.eup %5758 }
 0x354   :  { %v5761_v6 = vpop.eup %5760  ;;  %5772 = vpow2.f32 %v1249_v10 }
 0x355   :  { %v5763_v45 = vpop.eup %5762  ;;  %v1254_v34 = vpack.c.bf16 %v5761_v6, %v5757_v12  ;;  %5774 = vpow2.f32 %v1251_v53 }
 0x356   :  { %v1538_v28 = vpack.c.bf16 %v5759_v43, %v5763_v45  ;;  %v5765_v63 = vpop.eup %5764 }
 0x357   :  { %v5767_v31 = vpop.eup %5766 }
 0x358   :  { %v5769_v58 = vpop.eup %5768 }
 0x359   :  { %5390 = vmatmul.msk.bf16.vlgmr.msra.gmra.mxu3 %vm394_vm1, %v1253_v3  ;;  %v5771_v25 = vpop.eup %5770  ;;  %v1255_v20 = vpack.c.bf16 %v5765_v63, %v5769_v58  ;;  %v9297_v3 = vmov 16  }
 0x35a   :  { %5395 = vmatmul.msk.bf16.gmra.mxu0 %vm394_vm1, %v1537_v30  ;;  %v1539_v51 = vpack.c.bf16 %v5767_v31, %v5771_v25  ;;  %v5773_v23 = vpop.eup %5772 }
 0x35b   :  { %v5775_v19 = vpop.eup %5774 }
 0x35c   :  { %v1256_v46 = vpack.c.bf16 %v5775_v19, %v5773_v23 }
 0x366   :  { %1823 = vrot.lane.b32.xlu0 %v6394_v26, %s6275_s17 }
 0x369   :  { %5391 = vmatmul.msk.bf16.gmra.mxu3 %vm394_vm1, %v1254_v34 }
 0x36a   :  { %5396 = vmatmul.msk.bf16.gmra.mxu0 %vm394_vm1, %v1538_v28  ;;  %1825 = vrot.lane.b32.xlu1 %v6403_v33, %s6275_s17 }
 0x36b   :  { %1827 = vrot.lane.b32.xlu2 %v6412_v40, %s6275_s17 }
 0x36e   :  { %1829 = vrot.lane.b32.xlu0 %v6421_v47, %s6275_s17 }
 0x372   :  { %1994 = vperm.xlu1 %5623, %v6445_v57  }
 0x373   :  { %1990 = vperm.xlu2 %5622, %v9361_v5  }
 0x376   :  { %1998 = vperm.xlu0 %5624, %v9364_v39  }
 0x379   :  { %5392 = vmatmul.msk.bf16.gmra.mxu3 %vm394_vm1, %v1255_v20 }
 0x37a   :  { %5397 = vmatmul.msk.bf16.gmra.mxu0 %vm394_vm1, %v1539_v51  ;;  %2006 = vperm.xlu1 %5623, %v9365_v42  }
 0x37b   :  { %2002 = vperm.xlu2 %5622, %v9366_v11  }
 0x37e   :  { %2018 = vperm.xlu0 %5624, %v6532_v18  }
 0x382   :  { %2014 = vperm.xlu1 %5623, %v9367_v41  }
 0x383   :  { %2010 = vperm.xlu2 %5622, %v9368_v8  }
 0x386   :  { %5627 = vset.pattern.permute.xlu0 %v9297_v3 }
 0x389   :  { %5393 = vmatmul.msk.bf16.gmra.mxu3 %vm394_vm1, %v1256_v46 }
 0x38a   :  { %5626 = vset.pattern.permute.xlu1 %v9297_v3 }
 0x38b   :  { %5625 = vset.pattern.permute.xlu2 %v9297_v3 }
 0x392   :  { %v1776_v54 = vpop.xlane.xlu2 %1775 }
 0x393   :  { %v1796_v7 = vsub.f32 %v7022_v24, %v1776_v54 }
 0x395   :  { %v1805_v21 = vmul.f32 1.442695, %v1796_v7 }
 0x39a   :  { %v1785_v4 = vpop.xlane.xlu2 %1784 }
 0x3b4   :  { %v1773_v44 = vpop.xlane.xlu1 %1772 }
 0x3b5   :  { %v1795_v62 = vsub.f32 %v7057_v52, %v1773_v44 }
 0x3b7   :  { %v1803_v15 = vmul.f32 1.442695, %v1795_v62 }
 0x3bc   :  { %v1782_v43 = vpop.xlane.xlu1 %1781 }
 0x3bd   :  { %v1779_v9 = vpop.xlane.xlu0 %1778  ;;  %v1798_v63 = vsub.f32 %v7070_v48, %v1782_v43  ;;  %v1799_v48 = vsub.f32 %v7032_v49, %v1785_v4 }
 0x3be   :  { %v1797_v55 = vsub.f32 %v7077_v36, %v1779_v9 }
 0x3bf   :  { %v1809_v58 = vmul.f32 1.442695, %v1798_v63  ;;  %v1811_v53 = vmul.f32 1.442695, %v1799_v48 }
 0x3c0   :  { %v1807_v29 = vmul.f32 1.442695, %v1797_v55 }
 0x3c4   :  { %v1791_v34 = vpop.xlane.xlu1 %1790 }
 0x3c5   :  { %v1788_v12 = vpop.xlane.xlu0 %1787  ;;  %v1794_v32 = vpop.xlane.xlu2 %1793  ;;  %v1801_v23 = vsub.f32 %v7090_v35, %v1791_v34 }
 0x3c6   :  { %v1800_v20 = vsub.f32 %v7093_v50, %v1788_v12  ;;  %v1802_v54 = vsub.f32 %v7096_v14, %v1794_v32  ;;  %v7190_v32 = vpop.f32.mrf.mxu3 }
 0x3c7   :  { %v7155_v30 = vpop.f32.mrf.mxu0  ;;  %v1815_v44 = vmul.f32 1.442695, %v1801_v23 }
 0x3c8   :  { %5776 = vrcp.f32 %v7155_v30  ;;  %v1813_v10 = vmul.f32 1.442695, %v1800_v20  ;;  %v1817_v50 = vmul.f32 1.442695, %v1802_v54 }
 0x3c9   :  { %5778 = vrcp.f32 %v7158_v0 }
 0x3cd   :  { %v1828_v22 = vpop.permute.xlu2 %1827 }
 0x3ce   :  { %v5777_v60 = vpop.eup %5776  ;;  %v1838_v16 = vsel %vm447_vm0, %v1828_v22, 1065369472  ;;  %v7194_v62 = vpop.f32.mrf.mxu3 }
 0x3cf   :  { %v7161_v1 = vpop.f32.mrf.mxu0  ;;  %1611 = vperm.xlu2 %5625, %v5777_v60   ;;  %v5779_v6 = vpop.eup %5778 }
 0x3d0   :  { %5780 = vrcp.f32 %v7161_v1 }
 0x3d1   :  { %5782 = vpow2.f32 %v1803_v15 }
 0x3d2   :  { %5784 = vpow2.f32 %v1805_v21 }
 0x3d3   :  { %5786 = vpow2.f32 %v1809_v58 }
 0x3d4   :  { %5788 = vpow2.f32 %v1807_v29 }
 0x3d5   :  { %5790 = vpow2.f32 %v1813_v10  ;;  %v7177_v19 = vpop.permute.xlu2 %1990 }
 0x3d6   :  { %v5781_v13 = vpop.eup %5780  ;;  %5792 = vpow2.f32 %v1811_v53  ;;  %v7198_v7 = vpop.f32.mrf.mxu3 }
 0x3d7   :  { %1616 = vperm.xlu0 %5627, %v5781_v13   ;;  %517 = vperm.xlu2 %5625, %v5779_v6   ;;  %v5783_v52 = vpop.eup %5782  ;;  %5794 = vpow2.f32 %v1815_v44  ;;  %v7196_v34 = vpop.f32.mrf.mxu0 }
 0x3d8   :  { %v1824_v45 = vpop.permute.xlu0 %1823  ;;  %v5785_v31 = vpop.eup %5784  ;;  %5796 = vpow2.f32 %v1817_v50 }
 0x3d9   :  { %v1832_v24 = vsel %vm447_vm0, %v1824_v45, 1065369472  ;;  %v1819_v37 = vpack.c.bf16 %v5785_v31, %v5783_v52  ;;  %v5787_v61 = vpop.eup %5786  ;;  %v7192_v45 = vpop.f32.mrf.mxu2 }
 0x3da   :  { %v5789_v25 = vpop.eup %5788 }
 0x3db   :  { %v1820_v51 = vpack.c.bf16 %v5787_v61, %v5789_v25  ;;  %v5791_v36 = vpop.eup %5790 }
 0x3dc   :  { %v1826_v38 = vpop.permute.xlu1 %1825  ;;  %v5793_v46 = vpop.eup %5792 }
 0x3dd   :  { %v1835_v17 = vsel %vm447_vm0, %v1826_v38, 1065369472  ;;  %v1821_v9 = vpack.c.bf16 %v5791_v36, %v5793_v46  ;;  %v7181_v49 = vpop.permute.xlu2 %2002  ;;  %v5795_v60 = vpop.eup %5794 }
 0x3de   :  { %v5797_v4 = vpop.eup %5796  ;;  %v7204_v15 = vpop.f32.mrf.mxu3 }
 0x3df   :  { %v1822_v12 = vpack.c.bf16 %v5797_v4, %v5795_v60 }
 0x3e0   :  { %v1830_v56 = vpop.permute.xlu0 %1829 }
 0x3e1   :  { %v1841_v28 = vsel %vm447_vm0, %v1830_v56, 1065369472  ;;  %v7200_v56 = vpop.f32.mrf.mxu2 }
 0x3e2   :  { %1859 = vmatpush.bf16.msrb.mxu1 %v1841_v28  ;;  %v7202_v28 = vpop.f32.mrf.mxu0 }
 0x3e5   :  { %v7183_v43 = vpop.permute.xlu2 %2010 }
 0x3e6   :  { %1860 = vmatpush.bf16.msrb.mxu1 %v1838_v16 }
 0x3e9   :  { %v7208_v22 = vpop.f32.mrf.mxu2 }
 0x3ea   :  { %1861 = vmatpush.bf16.msrb.mxu1 %v1835_v17  ;;  %v7211_v21 = vpop.f32.mrf.mxu0  ;;  %v7217_v17 = vpop.f32.mrf.mxu3 }
 0x3ee   :  { %1862 = vmatpush.bf16.msrb.mxu1 %v1832_v24 }
 0x3f1   :  { %5398 = vmatmul.msk.bf16.vlgmr.msrb.gmra.mxu1 %vm394_vm1, %v1819_v37  ;;  %v7219_v52 = vpop.f32.mrf.mxu2 }
 0x3f2   :  { %v7221_v63 = vpop.f32.mrf.mxu0  ;;  %v7228_v37 = vpop.f32.mrf.mxu3 }
 0x3f9   :  { %v7230_v29 = vpop.f32.mrf.mxu2 }
 0x3fa   :  { %v7232_v25 = vpop.f32.mrf.mxu0  ;;  %v7239_v10 = vpop.f32.mrf.mxu3 }
 0x401   :  { %5399 = vmatmul.msk.bf16.gmra.mxu1 %vm394_vm1, %v1820_v51  ;;  %v7241_v36 = vpop.f32.mrf.mxu2 }
 0x402   :  { %v7247_v44 = vpop.f32.mrf.mxu3 }
 0x409   :  { %v7251_v60 = vpop.f32.mrf.mxu2 }
 0x411   :  { %5400 = vmatmul.msk.bf16.gmra.mxu1 %vm394_vm1, %v1821_v9 }
 0x421   :  { %5401 = vmatmul.msk.bf16.gmra.mxu1 %vm394_vm1, %v1822_v12 }
 0x429   :  { %v7186_v35 = vpop.permute.xlu2 %1611 }
 0x431   :  { %v518_v6 = vpop.permute.xlu2 %517 }
 0x432   :  { %v551_v14 = vmul.f32 %v518_v6, %v7158_v0 }
 0x434   :  { %v559_v13 = vmax.f32 %v551_v14, 0.0  ;;  %v7259_v14 = vpop.f32.mrf.mxu3 }
 0x436   :  { %567 = vst.msk [vmem:[#allocation2 + $0x8] sm:$0xff] %vm447_vm0, %v559_v13  ;;  %v7262_v13 = vpop.f32.mrf.mxu2 }
 0x46e   :  { %v7206_v0 = vpop.f32.mrf.mxu1 }
 0x46f   :  { %5798 = vrcp.f32 %v7206_v0 }
 0x470   :  { %5800 = vrcp.f32 %v7153_v2 }
 0x475   :  { %v5799_v16 = vpop.eup %5798 }
 0x476   :  { %1894 = vperm.xlu1 %5626, %v5799_v16   ;;  %v7214_v38 = vpop.f32.mrf.mxu1  ;;  %v5801_v24 = vpop.eup %5800 }
 0x477   :  { %5802 = vrcp.f32 %v7214_v38 }
 0x478   :  { %5804 = vrcp.f32 %v7219_v52 }
 0x479   :  { %5806 = vrcp.f32 %v7196_v34 }
 0x47d   :  { %v5803_v31 = vpop.eup %5802 }
 0x47e   :  { %512 = vperm.xlu1 %5626, %v5801_v24   ;;  %1899 = vperm.xlu0 %5627, %v5803_v31   ;;  %v7225_v55 = vpop.f32.mrf.mxu1  ;;  %v5805_v58 = vpop.eup %5804 }
 0x47f   :  { %5808 = vrcp.f32 %v7225_v55  ;;  %v5807_v61 = vpop.eup %5806 }
 0x480   :  { %5810 = vrcp.f32 %v7192_v45 }
 0x481   :  { %5812 = vrcp.f32 %v7232_v25 }
 0x482   :  { %5814 = vrcp.f32 %v7202_v28 }
 0x485   :  { %v5809_v20 = vpop.eup %5808 }
 0x486   :  { %1621 = vperm.xlu1 %5626, %v5807_v61   ;;  %1050 = vperm.xlu0 %5627, %v5805_v58   ;;  %v7235_v51 = vpop.f32.mrf.mxu1  ;;  %v5811_v48 = vpop.eup %5810 }
 0x487   :  { %1904 = vperm.xlu2 %5625, %v5809_v20   ;;  %v5813_v53 = vpop.eup %5812  ;;  %5816 = vrcp.f32 %v7235_v51  ;;  %v7267_v58 = vpop.f32.mrf.mxu3 }
 0x488   :  { %v5815_v23 = vpop.eup %5814  ;;  %5818 = vrcp.f32 %v7200_v56  ;;  %v7269_v61 = vpop.f32.mrf.mxu2 }
 0x489   :  { %5820 = vrcp.f32 %v7211_v21  ;;  %v7271_v20 = vpop.permute.xlu0 %1998 }
 0x48d   :  { %v5817_v54 = vpop.eup %5816 }
 0x48e   :  { %522 = vperm.xlu1 %5626, %v5811_v48   ;;  %1641 = vperm.xlu0 %5627, %v5813_v53   ;;  %v7243_v46 = vpop.f32.mrf.mxu1  ;;  %v5819_v9 = vpop.eup %5818 }
 0x48f   :  { %1626 = vperm.xlu2 %5625, %v5815_v23   ;;  %5822 = vrcp.f32 %v7243_v46  ;;  %v5821_v4 = vpop.eup %5820 }
 0x490   :  { %5824 = vrcp.f32 %v7190_v32 }
 0x495   :  { %v5823_v12 = vpop.eup %5822 }
 0x496   :  { %1909 = vperm.xlu1 %5626, %v5817_v54   ;;  %v7249_v50 = vpop.f32.mrf.mxu1  ;;  %v5825_v16 = vpop.eup %5824 }
 0x497   :  { %527 = vperm.xlu2 %5625, %v5819_v9   ;;  %v7276_v9 = vpop.f32.mrf.mxu3 }
 0x49e   :  { %1631 = vperm.xlu1 %5626, %v5821_v4   ;;  %v7256_v6 = vpop.f32.mrf.mxu1 }
 0x49f   :  { %1914 = vperm.xlu2 %5625, %v5823_v12   ;;  %5826 = vrcp.f32 %v7256_v6  ;;  %v7278_v12 = vpop.permute.xlu0 %2018 }
 0x4a0   :  { %5828 = vrcp.f32 %v7221_v63 }
 0x4a1   :  { %5830 = vrcp.f32 %v7208_v22 }
 0x4a2   :  { %5832 = vrcp.f32 %v7228_v37 }
 0x4a3   :  { %5834 = vrcp.f32 %v7194_v62 }
 0x4a4   :  { %5836 = vrcp.f32 %v7269_v61 }
 0x4a5   :  { %v5827_v24 = vpop.eup %5826  ;;  %5838 = vrcp.f32 %v7249_v50 }
 0x4a6   :  { %v5829_v31 = vpop.eup %5828  ;;  %532 = vperm.xlu1 %5626, %v5825_v16   ;;  %1924 = vperm.xlu0 %5627, %v5827_v24   ;;  %5840 = vrcp.f32 %v7230_v29  ;;  %v7280_v16 = vpop.f32.mrf.mxu1 }
 0x4a7   :  { %1636 = vperm.xlu2 %5625, %v5829_v31   ;;  %v5831_v48 = vpop.eup %5830  ;;  %5842 = vrcp.f32 %v7198_v7 }
 0x4a8   :  { %v5833_v53 = vpop.eup %5832  ;;  %5844 = vrcp.f32 %v7276_v9 }
 0x4a9   :  { %v5835_v23 = vpop.eup %5834  ;;  %5846 = vrcp.f32 %v7280_v16 }
 0x4aa   :  { %v5837_v54 = vpop.eup %5836 }
 0x4ab   :  { %v5839_v4 = vpop.eup %5838 }
 0x4ac   :  { %v5841_v24 = vpop.eup %5840 }
 0x4ad   :  { %v5843_v31 = vpop.eup %5842 }
 0x4ae   :  { %1045 = vperm.xlu1 %5626, %v5831_v48   ;;  %767 = vperm.xlu0 %5627, %v5833_v53   ;;  %v7285_v48 = vpop.f32.mrf.mxu0  ;;  %v5845_v53 = vpop.eup %5844 }
 0x4af   :  { %537 = vperm.xlu2 %5625, %v5835_v23   ;;  %v1617_v23 = vpop.permute.xlu0 %1616  ;;  %v5847_v27 = vpop.eup %5846  ;;  %5848 = vrcp.f32 %v7285_v48 }
 0x4b0   :  { %5850 = vrcp.f32 %v7204_v15 }
 0x4b1   :  { %5852 = vrcp.f32 %v7241_v36 }
 0x4b2   :  { %5854 = vrcp.f32 %v7217_v17 }
 0x4b3   :  { %5856 = vrcp.f32 %v7262_v13 }
 0x4b4   :  { %5858 = vrcp.f32 %v7251_v60 }
 0x4b5   :  { %v5849_v3 = vpop.eup %5848  ;;  %5860 = vrcp.f32 %v7239_v10 }
 0x4b6   :  { %1919 = vperm.xlu1 %5626, %v5839_v4   ;;  %1075 = vperm.xlu0 %5627, %v5837_v54   ;;  %v1650_v54 = vmul.f32 %v1617_v23, %v7161_v1  ;;  %5862 = vrcp.f32 %v7247_v44 }
 0x4b7   :  { %1055 = vperm.xlu2 %5625, %v5841_v24   ;;  %v5851_v24 = vpop.eup %5850  ;;  %5864 = vrcp.f32 %v7259_v14 }
 0x4b8   :  { %v1658_v4 = vmax.f32 %v1650_v54, 0.0  ;;  %v7301_v54 = vpop.f32.mrf.mxu2 }
 0x4b9   :  { %5866 = vrcp.f32 %v7301_v54 }
 0x4ba   :  { %5868 = vrcp.f32 %v7267_v58 }
 0x4be   :  { %542 = vperm.xlu1 %5626, %v5843_v31   ;;  %792 = vperm.xlu0 %5627, %v5845_v53   ;;  %v7293_v31 = vpop.permute.xlu1 %1994  ;;  %v5853_v53 = vpop.eup %5852 }
 0x4bf   :  { %1929 = vperm.xlu2 %5625, %v5847_v27   ;;  %v5855_v18 = vpop.eup %5854 }
 0x4c0   :  { %v5857_v27 = vpop.eup %5856 }
 0x4c1   :  { %v5859_v1 = vpop.eup %5858 }
 0x4c2   :  { %v5861_v23 = vpop.eup %5860 }
 0x4c6   :  { %1646 = vperm.xlu1 %5626, %v5849_v3   ;;  %1675 = vrot.lane.b32.xlu0 %v1658_v4, %s6273_s16  ;;  %v7297_v3 = vpop.permute.xlu1 %2006  ;;  %v5863_v4 = vpop.eup %5862 }
 0x4c7   :  { %547 = vperm.xlu2 %5625, %v5851_v24  }
 0x4ce   :  { %1060 = vperm.xlu1 %5626, %v5853_v53   ;;  %v7307_v24 = vpop.permute.xlu1 %2014 }
 0x4cf   :  { %762 = vperm.xlu2 %5625, %v5855_v18   ;;  %v7304_v18 = vpop.f32.mrf.mxu3 }
 0x4d0   :  { %5870 = vrcp.f32 %v7304_v18 }
 0x4d6   :  { %1070 = vperm.xlu1 %5626, %v5857_v27   ;;  %v5865_v27 = vpop.eup %5864 }
 0x4d7   :  { %1065 = vperm.xlu2 %5625, %v5859_v1   ;;  %v5867_v41 = vpop.eup %5866  ;;  %v7310_v39 = vpop.f32.mrf.mxu3 }
 0x4d8   :  { %v5869_v8 = vpop.eup %5868 }
 0x4d9   :  { %v5871_v40 = vpop.eup %5870 }
 0x4de   :  { %772 = vperm.xlu1 %5626, %v5861_v23  }
 0x4df   :  { %777 = vperm.xlu2 %5625, %v5863_v4  }
 0x4e1   :  { %v1905_v53 = vpop.permute.xlu2 %1904 }
 0x4e6   :  { %782 = vperm.xlu1 %5626, %v5865_v27  }
 0x4e7   :  { %1080 = vperm.xlu2 %5625, %v5867_v41   ;;  %v1649_v41 = vmul.f32 %v7186_v35, %v7155_v30  ;;  %v1934_v35 = vmul.f32 %v1905_v53, %v7225_v55 }
 0x4e8   :  { %v1895_v1 = vpop.permute.xlu1 %1894 }
 0x4e9   :  { %v1932_v23 = vmul.f32 %v1895_v1, %v7206_v0  ;;  %v1627_v42 = vpop.permute.xlu2 %1626  ;;  %v7320_v1 = vpop.f32.mrf.mxu3  ;;  %v1657_v26 = vmax.f32 %v1649_v41, 0.0 }
 0x4ea   :  { %5872 = vrcp.f32 %v7320_v1  ;;  %v1652_v41 = vmul.f32 %v1627_v42, %v7202_v28 }
 0x4eb   :  { %v1940_v57 = vmax.f32 %v1932_v23, 0.0  ;;  %5874 = vrcp.f32 %v7310_v39 }
 0x4ee   :  { %1956 = vrot.lane.b32.xlu1 %v1940_v57, %s6264_s0 }
 0x4ef   :  { %787 = vperm.xlu2 %5625, %v5869_v8  }
 0x4f0   :  { %v513_v4 = vpop.permute.xlu1 %512  ;;  %v1900_v11 = vpop.permute.xlu0 %1899 }
 0x4f1   :  { %v550_v27 = vmul.f32 %v513_v4, %v7153_v2  ;;  %v528_v5 = vpop.permute.xlu2 %527  ;;  %v1933_v33 = vmul.f32 %v1900_v11, %v7214_v38  ;;  %v5873_v2 = vpop.eup %5872  ;;  %v1942_v4 = vmax.f32 %v1934_v35, 0.0 }
 0x4f2   :  { %v553_v0 = vmul.f32 %v528_v5, %v7200_v56  ;;  %v5875_v30 = vpop.eup %5874 }
 0x4f3   :  { %v558_v23 = vmax.f32 %v550_v27, 0.0  ;;  %v1941_v47 = vmax.f32 %v1933_v33, 0.0 }
 0x4f4   :  { %v561_v57 = vmax.f32 %v553_v0, 0.0 }
 0x4f5   :  { %566 = vst.msk [vmem:[#allocation2] sm:$0xff] %vm447_vm0, %v558_v23  ;;  %1958 = vrot.lane.b32.xlu0 %v1941_v47, %s6264_s0 }
 0x4f6   :  { %569 = vst.msk [vmem:[#allocation2 + $0x18] sm:$0xff] %vm447_vm0, %v561_v57  ;;  %797 = vperm.xlu1 %5626, %v5871_v40   ;;  %v1660_v57 = vmax.f32 %v1652_v41, 0.0 }
 0x4f7   :  { %1673 = vrot.lane.b32.xlu2 %v1657_v26, %s6273_s16  ;;  %v7332_v26 = vpop.f32.mrf.mxu3 }
 0x4f8   :  { %v1622_v5 = vpop.permute.xlu1 %1621  ;;  %5876 = vrcp.f32 %v7332_v26 }
 0x4f9   :  { %v1651_v11 = vmul.f32 %v1622_v5, %v7196_v34  ;;  %v1915_v33 = vpop.permute.xlu2 %1914 }
 0x4fb   :  { %v1659_v8 = vmax.f32 %v1651_v11, 0.0 }
 0x4fd   :  { %1333 = vperm.xlu0 %5627, %v5873_v2  }
 0x4fe   :  { %1677 = vrot.lane.b32.xlu1 %v1659_v8, %s6273_s16  ;;  %v5877_v5 = vpop.eup %5876  ;;  %v1936_v8 = vmul.f32 %v1915_v33, %v7243_v46 }
 0x4ff   :  { %1328 = vperm.xlu2 %5625, %v5875_v30  }
 0x500   :  { %v523_v47 = vpop.permute.xlu1 %522  ;;  %v1944_v35 = vmax.f32 %v1936_v8, 0.0 }
 0x501   :  { %v552_v40 = vmul.f32 %v523_v47, %v7192_v45  ;;  %v1637_v56 = vpop.permute.xlu2 %1636  ;;  %v7339_v45 = vpop.f32.mrf.mxu3 }
 0x502   :  { %5878 = vrcp.f32 %v7339_v45 }
 0x503   :  { %v560_v38 = vmax.f32 %v552_v40, 0.0 }
 0x505   :  { %568 = vst.msk [vmem:[#allocation2 + $0x10] sm:$0xff] %vm447_vm0, %v560_v38  ;;  %v1051_v38 = vpop.permute.xlu0 %1050 }
 0x507   :  { %1960 = vrot.lane.b32.xlu2 %v1942_v4, %s6264_s0 }
 0x508   :  { %v1910_v34 = vpop.permute.xlu1 %1909  ;;  %v5879_v11 = vpop.eup %5878 }
 0x509   :  { %v1935_v27 = vmul.f32 %v1910_v34, %v7235_v51  ;;  %v538_v0 = vpop.permute.xlu2 %537 }
 0x50a   :  { %v555_v23 = vmul.f32 %v538_v0, %v7194_v62 }
 0x50b   :  { %v1943_v55 = vmax.f32 %v1935_v27, 0.0 }
 0x50c   :  { %v563_v53 = vmax.f32 %v555_v23, 0.0 }
 0x50d   :  { %1962 = vrot.lane.b32.xlu1 %v1943_v55, %s6264_s0 }
 0x50e   :  { %571 = vst.msk [vmem:[#allocation2 + $0x28] sm:$0xff] %vm447_vm0, %v563_v53 }
 0x50f   :  { %1679 = vrot.lane.b32.xlu2 %v1660_v57, %s6273_s16  ;;  %v1642_v57 = vpop.permute.xlu0 %1641 }
 0x510   :  { %v1632_v42 = vpop.permute.xlu1 %1631 }
 0x511   :  { %v1653_v28 = vmul.f32 %v1632_v42, %v7211_v21  ;;  %v1056_v51 = vpop.permute.xlu2 %1055  ;;  %v1084_v21 = vmul.f32 %v1051_v38, %v7219_v52  ;;  %v1654_v52 = vmul.f32 %v1637_v56, %v7221_v63  ;;  %v1655_v42 = vmul.f32 %v1642_v57, %v7232_v25 }
 0x513   :  { %v1661_v62 = vmax.f32 %v1653_v28, 0.0  ;;  %v1092_v33 = vmax.f32 %v1084_v21, 0.0  ;;  %v1662_v53 = vmax.f32 %v1654_v52, 0.0 }
 0x515   :  { %1338 = vperm.xlu1 %5626, %v5877_v5   ;;  %1681 = vrot.lane.b32.xlu0 %v1661_v62, %s6273_s16  ;;  %v1663_v5 = vmax.f32 %v1655_v42, 0.0 }
 0x517   :  { %1343 = vperm.xlu2 %5625, %v5879_v11  }
 0x518   :  { %v533_v2 = vpop.permute.xlu1 %532  ;;  %v1925_v8 = vpop.permute.xlu0 %1924 }
 0x519   :  { %v554_v30 = vmul.f32 %v533_v2, %v7190_v32  ;;  %v1930_v47 = vpop.permute.xlu2 %1929  ;;  %v7357_v32 = vpop.f32.mrf.mxu3  ;;  %v1085_v2 = vmul.f32 %v1056_v51, %v7230_v29 }
 0x51a   :  { %5880 = vrcp.f32 %v7357_v32  ;;  %v1939_v29 = vmul.f32 %v1930_v47, %v7280_v16 }
 0x51b   :  { %v562_v40 = vmax.f32 %v554_v30, 0.0  ;;  %v1938_v30 = vmul.f32 %v1925_v8, %v7256_v6 }
 0x51d   :  { %570 = vst.msk [vmem:[#allocation2 + $0x20] sm:$0xff] %vm447_vm0, %v562_v40  ;;  %1964 = vrot.lane.b32.xlu0 %v1944_v35, %s6264_s0 }
 0x520   :  { %v1046_v4 = vpop.permute.xlu1 %1045  ;;  %v5881_v11 = vpop.eup %5880 }
 0x521   :  { %v1083_v34 = vmul.f32 %v1046_v4, %v7208_v22  ;;  %v548_v41 = vpop.permute.xlu2 %547  ;;  %v7366_v28 = vpop.f32.mrf.mxu3  ;;  %v1946_v4 = vmax.f32 %v1938_v30, 0.0 }
 0x522   :  { %v557_v46 = vmul.f32 %v548_v41, %v7204_v15  ;;  %5882 = vrcp.f32 %v7366_v28 }
 0x523   :  { %v1091_v27 = vmax.f32 %v1083_v34, 0.0 }
 0x524   :  { %v565_v0 = vmax.f32 %v557_v46, 0.0 }
 0x525   :  { %1107 = vrot.lane.b32.xlu1 %v1091_v27, %s6277_s18  ;;  %1109 = vrot.lane.b32.xlu0 %v1092_v33, %s6277_s18  ;;  %v768_v27 = vpop.permute.xlu0 %767 }
 0x526   :  { %573 = vst.msk [vmem:[#allocation2 + $0x38] sm:$0xff] %vm447_vm0, %v565_v0 }
 0x528   :  { %v1920_v23 = vpop.permute.xlu1 %1919  ;;  %v5883_v46 = vpop.eup %5882 }
 0x529   :  { %v1937_v22 = vmul.f32 %v1920_v23, %v7249_v50  ;;  %v763_v55 = vpop.permute.xlu2 %762  ;;  %v7374_v38 = vpop.f32.mrf.mxu3 }
 0x52a   :  { %5884 = vrcp.f32 %v7374_v38  ;;  %v800_v16 = vmul.f32 %v763_v55, %v7217_v17 }
 0x52b   :  { %v1945_v15 = vmax.f32 %v1937_v22, 0.0 }
 0x52d   :  { %1683 = vrot.lane.b32.xlu1 %v1662_v53, %s6273_s16  ;;  %1966 = vrot.lane.b32.xlu2 %v1945_v15, %s6264_s0 }
 0x530   :  { %v543_v62 = vpop.permute.xlu1 %542  ;;  %v5885_v0 = vpop.eup %5884 }
 0x531   :  { %v556_v63 = vmul.f32 %v543_v62, %v7198_v7  ;;  %v1066_v56 = vpop.permute.xlu2 %1065  ;;  %v1093_v7 = vmax.f32 %v1085_v2, 0.0  ;;  %v7382_v33 = vpop.f32.mrf.mxu3 }
 0x532   :  { %5886 = vrcp.f32 %v7382_v33  ;;  %v1087_v22 = vmul.f32 %v1066_v56, %v7251_v60  ;;  %v1076_v62 = vpop.permute.xlu0 %1075 }
 0x533   :  { %v564_v50 = vmax.f32 %v556_v63, 0.0  ;;  %v801_v63 = vmul.f32 %v768_v27, %v7228_v37 }
 0x534   :  { %v1095_v42 = vmax.f32 %v1087_v22, 0.0 }
 0x535   :  { %572 = vst.msk [vmem:[#allocation2 + $0x30] sm:$0xff] %vm447_vm0, %v564_v50  ;;  %1348 = vperm.xlu1 %5626, %v5881_v11   ;;  %1685 = vrot.lane.b32.xlu2 %v1663_v5, %s6273_s16  ;;  %v809_v56 = vmax.f32 %v801_v63, 0.0 }
 0x538   :  { %v1647_v25 = vpop.permute.xlu1 %1646  ;;  %v5887_v52 = vpop.eup %5886 }
 0x539   :  { %v1656_v35 = vmul.f32 %v1647_v25, %v7285_v48  ;;  %v778_v40 = vpop.permute.xlu2 %777  ;;  %v1947_v48 = vmax.f32 %v1939_v29, 0.0 }
 0x53a   :  { %v803_v5 = vmul.f32 %v778_v40, %v7247_v44 }
 0x53b   :  { %v1664_v21 = vmax.f32 %v1656_v35, 0.0 }
 0x53d   :  { %1687 = vrot.lane.b32.xlu0 %v1664_v21, %s6273_s16  ;;  %1111 = vrot.lane.b32.xlu2 %v1093_v7, %s6277_s18 }
 0x53e   :  { %1968 = vrot.lane.b32.xlu1 %v1946_v4, %s6264_s0 }
 0x540   :  { %v1061_v6 = vpop.permute.xlu1 %1060 }
 0x541   :  { %v1086_v51 = vmul.f32 %v1061_v6, %v7241_v36  ;;  %v1081_v41 = vpop.permute.xlu2 %1080  ;;  %v808_v36 = vmax.f32 %v800_v16, 0.0 }
 0x542   :  { %v1090_v11 = vmul.f32 %v1081_v41, %v7301_v54  ;;  %v7416_v54 = vpop.permute.xlu0 %792 }
 0x543   :  { %v1094_v34 = vmax.f32 %v1086_v51, 0.0 }
 0x544   :  { %v1098_v44 = vmax.f32 %v1090_v11, 0.0 }
 0x545   :  { %1970 = vrot.lane.b32.xlu0 %v1947_v48, %s6264_s0  ;;  %1353 = vperm.xlu2 %5625, %v5883_v46  }
 0x546   :  { %1113 = vrot.lane.b32.xlu1 %v1094_v34, %s6277_s18 }
 0x548   :  { %v1071_v47 = vpop.permute.xlu1 %1070 }
 0x549   :  { %v788_v23 = vpop.permute.xlu2 %787  ;;  %v1088_v53 = vmul.f32 %v1071_v47, %v7262_v13  ;;  %v1089_v13 = vmul.f32 %v1076_v62, %v7269_v61 }
 0x54a   :  { %v805_v37 = vmul.f32 %v788_v23, %v7267_v58  ;;  %v7419_v58 = vperm.slane %v9348_v59, 6 }
 0x54b   :  { %v1096_v17 = vmax.f32 %v1088_v53, 0.0  ;;  %v1097_v50 = vmax.f32 %v1089_v13, 0.0  ;;  %v7460_v53 = vld [vmem:[%s9248_s1 + $0x18] sm:$0xff] }
 0x54c   :  { %v813_v30 = vmax.f32 %v805_v37, 0.0  ;;  %v2022_v21 = vadd.f32 %v7419_v58, %v7177_v19  ;;  %v2025_v51 = vadd.f32 %v7419_v58, %v7181_v49  ;;  %v2023_v34 = vadd.f32 %v7419_v58, %v7293_v31  ;;  %v7442_v19 = vld [vmem:[%s9248_s1] sm:$0xff] }
 0x54d   :  { %1358 = vperm.xlu0 %5627, %v5885_v0   ;;  %824 = vrot.lane.b32.xlu2 %v808_v36, %s6278_s19  ;;  %v2024_v0 = vadd.f32 %v7419_v58, %v7271_v20  ;;  %v2026_v23 = vadd.f32 %v7419_v58, %v7297_v3  ;;  %v7468_v20 = vld [vmem:[%s9248_s1 + $0x8] sm:$0xff]  ;;  %v2027_v62 = vadd.f32 %v7419_v58, %v7183_v43  ;;  %v7488_v43 = vld [vmem:[%s9248_s1 + $0x10] sm:$0xff] }
 0x54e   :  { %1363 = vperm.xlu1 %5626, %v5887_v52   ;;  %v2030_v29 = vmul.f32 0.2, %v2022_v21  ;;  %v2033_v16 = vmul.f32 0.2, %v2025_v51  ;;  %v2031_v27 = vmul.f32 0.2, %v2023_v34  ;;  %v2029_v13 = vadd.f32 %v7419_v58, %v7278_v12 }
 0x54f   :  { %v2035_v11 = vmul.f32 0.2, %v2027_v62  ;;  %v7496_v12 = vld [vmem:[%s9248_s1 + $0x20] sm:$0xff] }
 0x550   :  { %v773_v15 = vpop.permute.xlu1 %772  ;;  %v2038_v6 = vmax.f32 %v2022_v21, %v2030_v29  ;;  %v2041_v49 = vmax.f32 %v2025_v51, %v2033_v16  ;;  %v2039_v52 = vmax.f32 %v2023_v34, %v2031_v27  ;;  %v7508_v34 = vld [vmem:[%s9248_s1 + $0x28] sm:$0xff]  ;;  %v7516_v27 = vld [vmem:[%s9248_s1 + $0x38] sm:$0xff] }
 0x551   :  { %v802_v57 = vmul.f32 %v773_v15, %v7239_v10  ;;  %v7398_v60 = vpop.permute.xlu2 %1673  ;;  %v811_v10 = vmax.f32 %v803_v5, 0.0 }
 0x552   :  { %v7445_v47 = vadd.f32 %v7442_v19, %v2038_v6  ;;  %v7463_v15 = vadd.f32 %v7460_v53, %v2041_v49  ;;  %v7471_v3 = vadd.f32 %v7468_v20, %v2039_v52 }
 0x553   :  { %v810_v55 = vmax.f32 %v802_v57, 0.0  ;;  %v2032_v57 = vmul.f32 0.2, %v2024_v0 }
 0x554   :  { %v2054_v31 = vsel %vm394_vm1, %v7445_v47, -inf }
 0x555   :  { %1115 = vrot.lane.b32.xlu0 %v1095_v42, %s6277_s18  ;;  %1117 = vrot.lane.b32.xlu2 %v1096_v17, %s6277_s18  ;;  %v2034_v17 = vmul.f32 0.2, %v2026_v23  ;;  %v2040_v63 = vmax.f32 %v2024_v0, %v2032_v57 }
 0x556   :  { %828 = vrot.lane.b32.xlu1 %v810_v55, %s6278_s19  ;;  %v2063_v55 = vsel %vm394_vm1, %v7463_v15, -inf }
 0x557   :  { %v2042_v5 = vmax.f32 %v2026_v23, %v2034_v17  ;;  %v7491_v37 = vadd.f32 %v7488_v43, %v2040_v63  ;;  %v806_v17 = vmul.f32 %v7416_v54, %v7276_v9 }
 0x558   :  { %v783_v8 = vpop.permute.xlu1 %782 }
 0x559   :  { %v7406_v2 = vpop.permute.xlu2 %1328  ;;  %v804_v61 = vmul.f32 %v783_v8, %v7259_v14  ;;  %v7427_v14 = vpop.permute.xlu0 %1675 }
 0x55b   :  { %v812_v35 = vmax.f32 %v804_v61, 0.0  ;;  %v2043_v61 = vmax.f32 %v2027_v62, %v2035_v11 }
 0x55d   :  { %830 = vrot.lane.b32.xlu2 %v811_v10, %s6278_s19  ;;  %826 = vrot.lane.b32.xlu0 %v809_v56, %s6278_s19  ;;  %v7511_v16 = vadd.f32 %v7508_v34, %v2043_v61 }
 0x55e   :  { %1119 = vrot.lane.b32.xlu1 %v1097_v50, %s6277_s18  ;;  %v2057_v50 = vsel %vm394_vm1, %v7471_v3, -inf }
 0x55f   :  { %v2069_v0 = vsel %vm394_vm1, %v7511_v16, -inf }
 0x560   :  { %v7411_v25 = vpop.permute.xlu1 %1956 }
 0x561   :  { %v7413_v40 = vpop.permute.xlu2 %1960 }
 0x565   :  { %1121 = vrot.lane.b32.xlu0 %v1098_v44, %s6277_s18  ;;  %v2037_v44 = vmul.f32 0.2, %v2029_v13 }
 0x566   :  { %834 = vrot.lane.b32.xlu1 %v813_v30, %s6278_s19  ;;  %v7499_v30 = vadd.f32 %v7496_v12, %v2042_v5 }
 0x567   :  { %v7437_v46 = vpop.permute.xlu0 %1958  ;;  %v2045_v21 = vmax.f32 %v2029_v13, %v2037_v44 }
 0x568   :  { %v7421_v7 = vpop.permute.xlu1 %797  ;;  %v2066_v51 = vsel %vm394_vm1, %v7499_v30, -inf }
 0x569   :  { %v7425_v4 = vpop.permute.xlu2 %1679  ;;  %v7519_v49 = vadd.f32 %v7516_v27, %v2045_v21  ;;  %v807_v13 = vmul.f32 %v7421_v7, %v7304_v18 }
 0x56b   :  { %v2075_v57 = vsel %vm394_vm1, %v7519_v49, -inf  ;;  %v815_v54 = vmax.f32 %v807_v13, 0.0 }
 0x56d   :  { %832 = vrot.lane.b32.xlu0 %v812_v35, %s6278_s19  ;;  %v2060_v35 = vsel %vm394_vm1, %v7491_v37, -inf }
 0x56f   :  { %v1334_v42 = vpop.permute.xlu0 %1333 }
 0x570   :  { %v7431_v48 = vpop.permute.xlu1 %1677  ;;  %v1367_v61 = vmul.f32 %v1334_v42, %v7320_v1 }
 0x571   :  { %v7435_v41 = vpop.permute.xlu2 %1343 }
 0x572   :  { %v1375_v18 = vmax.f32 %v1367_v61, 0.0 }
 0x57f   :  { %v7447_v36 = vpop.permute.xlu1 %1962 }
 0x586   :  { %2055 = vmax.xlane.f32.xlu2 %v2054_v31 }
 0x587   :  { %v7455_v22 = vpop.permute.xlu2 %1966  ;;  %v1339_v56 = vpop.permute.xlu1 %1338 }
 0x588   :  { %v7483_v8 = vpop.permute.xlu0 %1681  ;;  %v1368_v44 = vmul.f32 %v1339_v56, %v7332_v26  ;;  %v2028_v26 = vadd.f32 %v7419_v58, %v7307_v24  ;;  %v9370_v24 = vld [vmem:[#allocation6_spill] sm:$0xff] }
 0x589   :  { %v7567_v58 = vld [vmem:[%s9248_s1 + $0x30] sm:$0xff] }
 0x58e   :  { %2064 = vmax.xlane.f32.xlu2 %v2063_v55  ;;  %v814_v55 = vmax.f32 %v806_v17, 0.0 }
 0x58f   :  { %v7479_v10 = vpop.permute.xlu2 %1685 }
 0x590   :  { %2058 = vmax.xlane.f32.xlu1 %v2057_v50  ;;  %v7521_v31 = vpop.permute.xlu0 %1964 }
 0x597   :  { %v1108_v29 = vpop.permute.xlu1 %1107  ;;  %v1112_v6 = vpop.permute.xlu2 %1111  ;;  %2061 = vmax.xlane.f32.xlu0 %v2060_v35  ;;  %v1376_v35 = vmax.f32 %v1368_v44, 0.0 }
 0x598   :  { %2067 = vmax.xlane.f32.xlu1 %v2066_v51  ;;  %v1110_v62 = vpop.permute.xlu0 %1109 }
 0x59f   :  { %v7525_v52 = vpop.permute.xlu1 %1683  ;;  %v1354_v23 = vpop.permute.xlu2 %1353  ;;  %2070 = vmax.xlane.f32.xlu0 %v2069_v0  ;;  %v2036_v0 = vmul.f32 0.2, %v2028_v26 }
 0x5a0   :  { %2076 = vmax.xlane.f32.xlu1 %v2075_v57  ;;  %v1371_v7 = vmul.f32 %v1354_v23, %v7366_v28  ;;  %v9369_v57 = vld [vmem:[#allocation4_spill] sm:$0xff] }
 0x5a2   :  { %v1379_v1 = vmax.f32 %v1371_v7, 0.0  ;;  %v9372_v7 = vld [vmem:[#allocation5_spill] sm:$0xff] }
 0x5a6   :  { %836 = vrot.lane.b32.xlu2 %v814_v55, %s6278_s19  ;;  %v2044_v55 = vmax.f32 %v2028_v26, %v2036_v0 }
 0x5a7   :  { %v1349_v63 = vpop.permute.xlu1 %1348  ;;  %v825_v5 = vpop.permute.xlu2 %824 }
 0x5a8   :  { %849 = vst.msk [vmem:[#allocation2] sm:$0xff] %vm848_vm2, %v825_v5  ;;  %v1370_v17 = vmul.f32 %v1349_v63, %v7357_v32  ;;  %v7570_v13 = vadd.f32 %v7567_v58, %v2044_v55 }
 0x5a9   :  { %1132 = vst.msk [vmem:[#allocation2] sm:$0xff] %vm1131_vm3, %v1108_v29 }
 0x5aa   :  { %v1378_v5 = vmax.f32 %v1370_v17, 0.0  ;;  %v2072_v32 = vsel %vm394_vm1, %v7570_v13, -inf }
 0x5af   :  { %v1118_v50 = vpop.permute.xlu2 %1117  ;;  %v7536_v11 = vpop.permute.xlu0 %1687 }
 0x5b0   :  { %v7538_v9 = vpop.permute.xlu1 %1968 }
 0x5b3   :  { %838 = vrot.lane.b32.xlu0 %v815_v54, %s6278_s19 }
 0x5b7   :  { %v831_v21 = vpop.permute.xlu2 %830  ;;  %v7543_v51 = vpop.permute.xlu0 %1970 }
 0x5b8   :  { %852 = vst.msk [vmem:[#allocation2 + $0x18] sm:$0xff] %vm848_vm2, %v831_v21  ;;  %v1114_v29 = vpop.permute.xlu1 %1113  ;;  %v1366_v21 = vmul.f32 %v7406_v2, %v7310_v39 }
 0x5b9   :  { %1135 = vst.msk [vmem:[#allocation2 + $0x18] sm:$0xff] %vm1131_vm3, %v1114_v29  ;;  %1394 = vrot.lane.b32.xlu1 %v1376_v35, %s6275_s17 }
 0x5ba   :  { %v1374_v29 = vmax.f32 %v1366_v21, 0.0 }
 0x5bb   :  { %1392 = vrot.lane.b32.xlu0 %v1375_v18, %s6275_s17 }
 0x5bf   :  { %v7552_v42 = vpop.permute.xlu0 %1358 }
 0x5c0   :  { %v7554_v56 = vpop.permute.xlu1 %1363 }
 0x5c1   :  { %1400 = vrot.lane.b32.xlu1 %v1379_v1, %s6275_s17 }
 0x5c3   :  { %2106 = vrot.lane.b32.xlu0 %v9369_v57, %s6277_s18 }
 0x5c7   :  { %v1116_v28 = vpop.permute.xlu0 %1115 }
 0x5c8   :  { %v829_v23 = vpop.permute.xlu1 %828 }
 0x5c9   :  { %851 = vst.msk [vmem:[#allocation2 + $0x10] sm:$0xff] %vm848_vm2, %v829_v23  ;;  %2110 = vrot.lane.b32.xlu1 %v9370_v24, %s6277_s18 }
 0x5ca   :  { %1134 = vst.msk [vmem:[#allocation2 + $0x10] sm:$0xff] %vm1131_vm3, %v1112_v6  ;;  %v9371_v6 = vld [vmem:[#allocation7_spill] sm:$0xff] }
 0x5cb   :  { %1398 = vrot.lane.b32.xlu0 %v1378_v5, %s6275_s17 }
 0x5cf   :  { %2073 = vmax.xlane.f32.xlu2 %v2072_v32  ;;  %v827_v63 = vpop.permute.xlu0 %826 }
 0x5d0   :  { %v1120_v54 = vpop.permute.xlu1 %1119  ;;  %850 = vst.msk [vmem:[#allocation2 + $0x8] sm:$0xff] %vm848_vm2, %v827_v63 }
 0x5d1   :  { %1133 = vst.msk [vmem:[#allocation2 + $0x8] sm:$0xff] %vm1131_vm3, %v1110_v62  ;;  %v1369_v62 = vmul.f32 %v7435_v41, %v7339_v45 }
 0x5d3   :  { %2112 = vrot.lane.b32.xlu0 %v9371_v6, %s6277_s18  ;;  %v1377_v18 = vmax.f32 %v1369_v62, 0.0 }
 0x5d7   :  { %v1122_v44 = vpop.permute.xlu0 %1121 }
 0x5d8   :  { %v835_v61 = vpop.permute.xlu1 %834 }
 0x5d9   :  { %854 = vst.msk [vmem:[#allocation2 + $0x28] sm:$0xff] %vm848_vm2, %v835_v61 }
 0x5da   :  { %1137 = vst.msk [vmem:[#allocation2 + $0x28] sm:$0xff] %vm1131_vm3, %v1118_v50 }
 0x5df   :  { %v833_v35 = vpop.permute.xlu0 %832 }
 0x5e0   :  { %853 = vst.msk [vmem:[#allocation2 + $0x20] sm:$0xff] %vm848_vm2, %v833_v35 }
 0x5e1   :  { %1136 = vst.msk [vmem:[#allocation2 + $0x20] sm:$0xff] %vm1131_vm3, %v1116_v28 }
 0x5e7   :  { %1390 = vrot.lane.b32.xlu2 %v1374_v29, %s6275_s17 }
 0x5ef   :  { %1396 = vrot.lane.b32.xlu2 %v1377_v18, %s6275_s17 }
 0x5f7   :  { %2108 = vrot.lane.b32.xlu2 %v9372_v7, %s6277_s18 }
 0x5f9   :  { %v2056_v50 = vpop.xlane.xlu2 %2055 }
 0x601   :  { %v7591_v26 = vpop.xlane.xlu2 %2064 }
 0x603   :  { %v2059_v39 = vpop.xlane.xlu1 %2058 }
 0x609   :  { %v837_v1 = vpop.permute.xlu2 %836 }
 0x60a   :  { %855 = vst.msk [vmem:[#allocation2 + $0x30] sm:$0xff] %vm848_vm2, %v837_v1  ;;  %v2062_v2 = vpop.xlane.xlu0 %2061 }
 0x60b   :  { %1138 = vst.msk [vmem:[#allocation2 + $0x30] sm:$0xff] %vm1131_vm3, %v1120_v54  ;;  %v7595_v0 = vpop.xlane.xlu1 %2067  ;;  %v2080_v35 = vsub.f32 %v7491_v37, %v2062_v2 }
 0x60c   :  { %v2082_v37 = vsub.f32 %v7499_v30, %v7595_v0 }
 0x60e   :  { %v2094_v2 = vmul.f32 1.442695, %v2082_v37 }
 0x612   :  { %v7597_v17 = vpop.xlane.xlu0 %2070 }
 0x613   :  { %v7599_v45 = vpop.xlane.xlu1 %2076 }
 0x625   :  { %v839_v41 = vpop.permute.xlu0 %838 }
 0x626   :  { %856 = vst.msk [vmem:[#allocation2 + $0x38] sm:$0xff] %vm848_vm2, %v839_v41 }
 0x627   :  { %1139 = vst.msk [vmem:[#allocation2 + $0x38] sm:$0xff] %vm1131_vm3, %v1122_v44 }
 0x62b   :  { %v1395_v55 = vpop.permute.xlu1 %1394 }
 0x62c   :  { %1417 = vst.msk [vmem:[#allocation2 + $0x10] sm:$0xff] %vm1414_vm4, %v1395_v55 }
 0x62d   :  { %1700 = vst.msk [vmem:[#allocation2 + $0x10] sm:$0xff] %vm1697_vm5, %v7431_v48  ;;  %v1393_v28 = vpop.permute.xlu0 %1392 }
 0x62e   :  { %1416 = vst.msk [vmem:[#allocation2 + $0x8] sm:$0xff] %vm1414_vm4, %v1393_v28  ;;  %v2085_v28 = vsub.f32 %v7519_v49, %v7599_v45  ;;  %v1372_v49 = vmul.f32 %v7552_v42, %v7374_v38 }
 0x62f   :  { %1699 = vst.msk [vmem:[#allocation2 + $0x8] sm:$0xff] %vm1697_vm5, %v7427_v14 }
 0x630   :  { %1982 = vst.msk [vmem:[#allocation2 + $0x8] sm:$0xff] %vm1980_vm6, %v7437_v46  ;;  %v1380_v45 = vmax.f32 %v1372_v49, 0.0 }
 0x631   :  { %1983 = vst.msk [vmem:[#allocation2 + $0x10] sm:$0xff] %vm1980_vm6, %v7413_v40 }
 0x633   :  { %v1401_v23 = vpop.permute.xlu1 %1400 }
 0x634   :  { %1420 = vst.msk [vmem:[#allocation2 + $0x28] sm:$0xff] %vm1414_vm4, %v1401_v23 }
 0x635   :  { %1703 = vst.msk [vmem:[#allocation2 + $0x28] sm:$0xff] %vm1697_vm5, %v7525_v52  ;;  %v2107_v5 = vpop.permute.xlu0 %2106 }
 0x636   :  { %1986 = vst.msk [vmem:[#allocation2 + $0x28] sm:$0xff] %vm1980_vm6, %v7455_v22  ;;  %v2079_v22 = vsub.f32 %v7471_v3, %v2059_v39 }
 0x638   :  { %v2088_v54 = vmul.f32 1.442695, %v2079_v22 }
 0x63a   :  { %5888 = vpow2.f32 %v2088_v54 }
 0x63b   :  { %v2111_v46 = vpop.permute.xlu1 %2110 }
 0x63c   :  { %v2121_v40 = vsel %vm447_vm0, %v2111_v46, 1065369472 }
 0x63d   :  { %v1399_v48 = vpop.permute.xlu0 %1398 }
 0x63e   :  { %1419 = vst.msk [vmem:[#allocation2 + $0x20] sm:$0xff] %vm1414_vm4, %v1399_v48 }
 0x63f   :  { %1702 = vst.msk [vmem:[#allocation2 + $0x20] sm:$0xff] %vm1697_vm5, %v7483_v8  ;;  %v2078_v8 = vsub.f32 %v7445_v47, %v2056_v50  ;;  %v2115_v47 = vsel %vm447_vm0, %v2107_v5, 1065369472  ;;  %v2083_v50 = vsub.f32 %v7511_v16, %v7597_v17  ;;  %v2100_v17 = vmul.f32 1.442695, %v2085_v28 }
 0x640   :  { %1985 = vst.msk [vmem:[#allocation2 + $0x20] sm:$0xff] %vm1980_vm6, %v7521_v31  ;;  %v5889_v3 = vpop.eup %5888 }
 0x641   :  { %v2086_v44 = vmul.f32 1.442695, %v2078_v8  ;;  %v2096_v39 = vmul.f32 1.442695, %v2083_v50 }
 0x642   :  { %v2074_v14 = vpop.xlane.xlu2 %2073 }
 0x643   :  { %5890 = vpow2.f32 %v2086_v44  ;;  %v2084_v41 = vsub.f32 %v7570_v13, %v2074_v14 }
 0x645   :  { %v2113_v52 = vpop.permute.xlu0 %2112  ;;  %v2098_v16 = vmul.f32 1.442695, %v2084_v41  ;;  %v9373_v41 = vld [vmem:[#allocation8_spill] sm:$0xff] }
 0x646   :  { %v2124_v32 = vsel %vm447_vm0, %v2113_v52, 1065369472 }
 0x647   :  { %2142 = vmatpush.bf16.msra.mxu2 %v2124_v32  ;;  %v1373_v32 = vmul.f32 %v7554_v56, %v7382_v33 }
 0x649   :  { %v5891_v61 = vpop.eup %5890  ;;  %v1381_v46 = vmax.f32 %v1373_v32, 0.0 }
 0x64a   :  { %v1391_v63 = vpop.permute.xlu2 %1390  ;;  %v2102_v21 = vpack.c.bf16 %v5889_v3, %v5891_v61 }
 0x64b   :  { %1415 = vst.msk [vmem:[#allocation2] sm:$0xff] %vm1414_vm4, %v1391_v63  ;;  %2143 = vmatpush.bf16.msra.mxu2 %v2121_v40 }
 0x64c   :  { %1698 = vst.msk [vmem:[#allocation2] sm:$0xff] %vm1697_vm5, %v7398_v60 }
 0x64d   :  { %1981 = vst.msk [vmem:[#allocation2] sm:$0xff] %vm1980_vm6, %v7411_v25 }
 0x652   :  { %v1397_v31 = vpop.permute.xlu2 %1396 }
 0x653   :  { %1418 = vst.msk [vmem:[#allocation2 + $0x18] sm:$0xff] %vm1414_vm4, %v1397_v31 }
 0x654   :  { %1701 = vst.msk [vmem:[#allocation2 + $0x18] sm:$0xff] %vm1697_vm5, %v7425_v4  ;;  %v2081_v4 = vsub.f32 %v7463_v15, %v7591_v26 }
 0x655   :  { %1984 = vst.msk [vmem:[#allocation2 + $0x18] sm:$0xff] %vm1980_vm6, %v7447_v36  ;;  %v2090_v36 = vmul.f32 1.442695, %v2080_v35 }
 0x656   :  { %v2092_v29 = vmul.f32 1.442695, %v2081_v4  ;;  %v9309_v4 = vmov 7  }
 0x657   :  { %5892 = vpow2.f32 %v2090_v36 }
 0x658   :  { %5894 = vpow2.f32 %v2092_v29 }
 0x659   :  { %5896 = vpow2.f32 %v2096_v39 }
 0x65a   :  { %v2109_v60 = vpop.permute.xlu2 %2108  ;;  %5898 = vpow2.f32 %v2094_v2 }
 0x65b   :  { %v2118_v25 = vsel %vm447_vm0, %v2109_v60, 1065369472  ;;  %5900 = vpow2.f32 %v2098_v16 }
 0x65c   :  { %2144 = vmatpush.bf16.msra.mxu2 %v2118_v25  ;;  %5902 = vpow2.f32 %v2100_v17 }
 0x65d   :  { %v5893_v62 = vpop.eup %5892 }
 0x65e   :  { %v5895_v18 = vpop.eup %5894 }
 0x65f   :  { %v2103_v1 = vpack.c.bf16 %v5895_v18, %v5893_v62  ;;  %v5897_v15 = vpop.eup %5896 }
 0x660   :  { %2145 = vmatpush.bf16.msra.mxu2 %v2115_v47  ;;  %v5899_v26 = vpop.eup %5898 }
 0x661   :  { %v2104_v55 = vpack.c.bf16 %v5897_v15, %v5899_v26  ;;  %v5901_v30 = vpop.eup %5900 }
 0x662   :  { %v5903_v0 = vpop.eup %5902 }
 0x663   :  { %5402 = vmatmul.msk.bf16.vlgmr.msra.gmra.mxu2 %vm394_vm1, %v2102_v21  ;;  %v2105_v23 = vpack.c.bf16 %v5903_v0, %v5901_v30 }
 0x673   :  { %5403 = vmatmul.msk.bf16.gmra.mxu2 %vm394_vm1, %v2103_v1 }
 0x683   :  { %5404 = vmatmul.msk.bf16.gmra.mxu2 %vm394_vm1, %v2104_v55  ;;  %v9374_v55 = vld [vmem:[#allocation11_spill] sm:$0xff] }
 0x693   :  { %5405 = vmatmul.msk.bf16.gmra.mxu2 %vm394_vm1, %v2105_v23  ;;  %v9376_v23 = vld [vmem:[#allocation9_spill] sm:$0xff] }
 0x6e6   :  { %v2147_v5 = vpop.f32.mrf.mxu2 }
 0x6e7   :  { %5904 = vrcp.f32 %v2147_v5 }
 0x6ed   :  { %v5905_v48 = vpop.eup %5904 }
 0x6ee   :  { %2177 = vperm.xlu2 %5625, %v5905_v48   ;;  %v2149_v13 = vpop.f32.mrf.mxu2  ;;  %v9378_v48 = vld [vmem:[#allocation12_spill] sm:$0xff] }
 0x6ef   :  { %5906 = vrcp.f32 %v2149_v13 }
 0x6f5   :  { %v5907_v14 = vpop.eup %5906 }
 0x6f6   :  { %1402 = vrot.lane.b32.xlu2 %v1380_v45, %s6275_s17  ;;  %2182 = vperm.xlu0 %5627, %v5907_v14   ;;  %v2152_v52 = vpop.f32.mrf.mxu2  ;;  %v9380_v45 = vld [vmem:[#allocation14_spill] sm:$0xff]  ;;  %v9381_v14 = vld [vmem:[#allocation15_spill] sm:$0xff] }
 0x6f7   :  { %5908 = vrcp.f32 %v2152_v52 }
 0x6fd   :  { %v5909_v63 = vpop.eup %5908 }
 0x6fe   :  { %1404 = vrot.lane.b32.xlu0 %v1381_v46, %s6275_s17  ;;  %2187 = vperm.xlu1 %5626, %v5909_v63   ;;  %v2154_v40 = vpop.f32.mrf.mxu2 }
 0x6ff   :  { %5910 = vrcp.f32 %v2154_v40 }
 0x705   :  { %v5911_v22 = vpop.eup %5910 }
 0x706   :  { %2192 = vperm.xlu2 %5625, %v5911_v22   ;;  %v2157_v38 = vpop.f32.mrf.mxu2  ;;  %v2304_v22 = vperm.slane %v9348_v59, 7 }
 0x707   :  { %5912 = vrcp.f32 %v2157_v38 }
 0x70d   :  { %v5913_v42 = vpop.eup %5912 }
 0x70e   :  { %2197 = vperm.xlu1 %5626, %v5913_v42   ;;  %v2159_v8 = vpop.f32.mrf.mxu2 }
 0x70f   :  { %5914 = vrcp.f32 %v2159_v8 }
 0x715   :  { %v5915_v31 = vpop.eup %5914 }
 0x716   :  { %2202 = vperm.xlu2 %5625, %v5915_v31   ;;  %v2162_v54 = vpop.f32.mrf.mxu2 }
 0x717   :  { %5916 = vrcp.f32 %v2162_v54 }
 0x71d   :  { %v5917_v33 = vpop.eup %5916 }
 0x71e   :  { %2207 = vperm.xlu0 %5627, %v5917_v33   ;;  %v2164_v56 = vpop.f32.mrf.mxu2  ;;  %5629 = vset.pattern.permute.xlu2 %v9309_v4 }
 0x71f   :  { %5918 = vrcp.f32 %v2164_v56 }
 0x725   :  { %v5919_v44 = vpop.eup %5918 }
 0x726   :  { %2212 = vperm.xlu1 %5626, %v5919_v44   ;;  %5630 = vset.pattern.permute.xlu0 %v9309_v4 }
 0x72e   :  { %5628 = vset.pattern.permute.xlu1 %v9309_v4 }
 0x748   :  { %v2178_v60 = vpop.permute.xlu2 %2177 }
 0x749   :  { %v2215_v25 = vmul.f32 %v2178_v60, %v2147_v5  ;;  %v9377_v5 = vmov 16  }
 0x74b   :  { %v2223_v3 = vmax.f32 %v2215_v25, 0.0 }
 0x74d   :  { %2239 = vrot.lane.b32.xlu2 %v2223_v3, %s6266_s3 }
 0x750   :  { %v1403_v47 = vpop.permute.xlu2 %1402 }
 0x751   :  { %1421 = vst.msk [vmem:[#allocation2 + $0x30] sm:$0xff] %vm1414_vm4, %v1403_v47 }
 0x752   :  { %1704 = vst.msk [vmem:[#allocation2 + $0x30] sm:$0xff] %vm1697_vm5, %v7479_v10 }
 0x753   :  { %1987 = vst.msk [vmem:[#allocation2 + $0x30] sm:$0xff] %vm1980_vm6, %v7538_v9 }
 0x760   :  { %v2193_v61 = vpop.permute.xlu2 %2192 }
 0x761   :  { %v2218_v35 = vmul.f32 %v2193_v61, %v2154_v40 }
 0x763   :  { %v2226_v21 = vmax.f32 %v2218_v35, 0.0 }
 0x765   :  { %2245 = vrot.lane.b32.xlu2 %v2226_v21, %s6266_s3 }
 0x768   :  { %v2183_v36 = vpop.permute.xlu0 %2182 }
 0x769   :  { %v2216_v29 = vmul.f32 %v2183_v36, %v2149_v13  ;;  %v9379_v13 = vld [vmem:[#allocation10_spill] sm:$0xff] }
 0x76b   :  { %v2224_v62 = vmax.f32 %v2216_v29, 0.0 }
 0x76d   :  { %2241 = vrot.lane.b32.xlu0 %v2224_v62, %s6266_s3 }
 0x770   :  { %v1405_v10 = vpop.permute.xlu0 %1404  ;;  %v2188_v18 = vpop.permute.xlu1 %2187 }
 0x771   :  { %1422 = vst.msk [vmem:[#allocation2 + $0x38] sm:$0xff] %vm1414_vm4, %v1405_v10  ;;  %v2217_v9 = vmul.f32 %v2188_v18, %v2152_v52  ;;  %v2203_v1 = vpop.permute.xlu2 %2202 }
 0x772   :  { %1705 = vst.msk [vmem:[#allocation2 + $0x38] sm:$0xff] %vm1697_vm5, %v7536_v11  ;;  %v2220_v37 = vmul.f32 %v2203_v1, %v2159_v8 }
 0x773   :  { %v2225_v50 = vmax.f32 %v2217_v9, 0.0  ;;  %1988 = vst.msk [vmem:[#allocation2 + $0x38] sm:$0xff] %vm1980_vm6, %v7543_v51  ;;  %v9375_v51 = vld [vmem:[#allocation13_spill] sm:$0xff] }
 0x774   :  { %v2228_v39 = vmax.f32 %v2220_v37, 0.0 }
 0x775   :  { %2243 = vrot.lane.b32.xlu1 %v2225_v50, %s6266_s3 }
 0x77d   :  { %2249 = vrot.lane.b32.xlu1 %v2228_v39, %s6266_s3 }
 0x780   :  { %v2198_v2 = vpop.permute.xlu1 %2197 }
 0x781   :  { %v2219_v15 = vmul.f32 %v2198_v2, %v2157_v38 }
 0x783   :  { %v2227_v26 = vmax.f32 %v2219_v15, 0.0 }
 0x785   :  { %2247 = vrot.lane.b32.xlu0 %v2227_v26, %s6266_s3  ;;  %2273 = vperm.xlu1 %5628, %v9373_v41  }
 0x78d   :  { %2285 = vperm.xlu1 %5628, %v9374_v55  }
 0x790   :  { %v2208_v11 = vpop.permute.xlu0 %2207 }
 0x791   :  { %v2221_v28 = vmul.f32 %v2208_v11, %v2162_v54 }
 0x793   :  { %v2229_v16 = vmax.f32 %v2221_v28, 0.0 }
 0x795   :  { %2251 = vrot.lane.b32.xlu2 %v2229_v16, %s6266_s3  ;;  %2293 = vperm.xlu1 %5628, %v9375_v51  }
 0x798   :  { %v2213_v17 = vpop.permute.xlu1 %2212 }
 0x799   :  { %v2222_v30 = vmul.f32 %v2213_v17, %v2164_v56 }
 0x79b   :  { %v2230_v0 = vmax.f32 %v2222_v30, 0.0 }
 0x79d   :  { %2277 = vperm.xlu2 %5629, %v9376_v23   ;;  %2253 = vrot.lane.b32.xlu0 %v2230_v0, %s6266_s3 }
 0x79e   :  { %5631 = vset.pattern.permute.xlu1 %v9377_v5 }
 0x7a5   :  { %2289 = vperm.xlu2 %5629, %v9378_v48   ;;  %2281 = vperm.xlu0 %5630, %v9379_v13  }
 0x7a7   :  { %v2240_v49 = vpop.permute.xlu2 %2239 }
 0x7a8   :  { %2264 = vst.msk [vmem:[#allocation2] sm:$0xff] %vm2263_vm7, %v2240_v49 }
 0x7ad   :  { %2297 = vperm.xlu2 %5629, %v9380_v45   ;;  %2301 = vperm.xlu0 %5630, %v9381_v14  }
 0x7b5   :  { %5632 = vset.pattern.permute.xlu2 %v9377_v5  ;;  %5633 = vset.pattern.permute.xlu0 %v9377_v5 }
 0x7bf   :  { %v2246_v52 = vpop.permute.xlu2 %2245 }
 0x7c0   :  { %2267 = vst.msk [vmem:[#allocation2 + $0x18] sm:$0xff] %vm2263_vm7, %v2246_v52 }
 0x7df   :  { %v2242_v32 = vpop.permute.xlu0 %2241 }
 0x7e0   :  { %2265 = vst.msk [vmem:[#allocation2 + $0x8] sm:$0xff] %vm2263_vm7, %v2242_v32 }
 0x7e7   :  { %v2244_v46 = vpop.permute.xlu1 %2243 }
 0x7e8   :  { %2266 = vst.msk [vmem:[#allocation2 + $0x10] sm:$0xff] %vm2263_vm7, %v2244_v46 }
 0x7ef   :  { %v2252_v63 = vpop.permute.xlu2 %2251  ;;  %v2250_v40 = vpop.permute.xlu1 %2249 }
 0x7f0   :  { %2270 = vst.msk [vmem:[#allocation2 + $0x30] sm:$0xff] %vm2263_vm7, %v2252_v63 }
 0x7f1   :  { %2269 = vst.msk [vmem:[#allocation2 + $0x28] sm:$0xff] %vm2263_vm7, %v2250_v40 }
 0x7f7   :  { %v2278_v38 = vpop.permute.xlu2 %2277  ;;  %v2248_v42 = vpop.permute.xlu0 %2247 }
 0x7f8   :  { %v2306_v8 = vadd.f32 %v2304_v22, %v2278_v38  ;;  %2268 = vst.msk [vmem:[#allocation2 + $0x20] sm:$0xff] %vm2263_vm7, %v2248_v42  ;;  %v2274_v31 = vpop.permute.xlu1 %2273 }
 0x7f9   :  { %v2305_v54 = vadd.f32 %v2304_v22, %v2274_v31 }
 0x7fa   :  { %v2314_v33 = vmul.f32 0.2, %v2306_v8 }
 0x7fb   :  { %v2313_v56 = vmul.f32 0.2, %v2305_v54 }
 0x7fc   :  { %v2322_v44 = vmax.f32 %v2306_v8, %v2314_v33 }
 0x7fd   :  { %v2321_v60 = vmax.f32 %v2305_v54, %v2313_v56 }
 0x7fe   :  { %v7700_v25 = vadd.f32 %v7468_v20, %v2322_v44 }
 0x7ff   :  { %v2290_v3 = vpop.permute.xlu2 %2289  ;;  %v7703_v47 = vadd.f32 %v7442_v19, %v2321_v60 }
 0x800   :  { %v2309_v61 = vadd.f32 %v2304_v22, %v2290_v3  ;;  %v2286_v59 = vpop.permute.xlu1 %2285  ;;  %v2340_v35 = vsel %vm394_vm1, %v7700_v25, -inf }
 0x801   :  { %v2308_v21 = vadd.f32 %v2304_v22, %v2286_v59  ;;  %2341 = vmax.xlane.f32.xlu2 %v2340_v35  ;;  %v2337_v36 = vsel %vm394_vm1, %v7703_v47, -inf }
 0x802   :  { %v2317_v29 = vmul.f32 0.2, %v2309_v61  ;;  %2338 = vmax.xlane.f32.xlu1 %v2337_v36 }
 0x803   :  { %v2316_v62 = vmul.f32 0.2, %v2308_v21 }
 0x804   :  { %v2325_v10 = vmax.f32 %v2309_v61, %v2317_v29 }
 0x805   :  { %v2324_v20 = vmax.f32 %v2308_v21, %v2316_v62 }
 0x806   :  { %v7710_v18 = vadd.f32 %v7496_v12, %v2325_v10 }
 0x807   :  { %v2298_v19 = vpop.permute.xlu2 %2297  ;;  %v7713_v9 = vadd.f32 %v7460_v53, %v2324_v20 }
 0x808   :  { %v2311_v50 = vadd.f32 %v2304_v22, %v2298_v19  ;;  %v2349_v1 = vsel %vm394_vm1, %v7710_v18, -inf  ;;  %v2294_v26 = vpop.permute.xlu1 %2293 }
 0x809   :  { %2350 = vmax.xlane.f32.xlu2 %v2349_v1  ;;  %v2346_v37 = vsel %vm394_vm1, %v7713_v9, -inf  ;;  %v2310_v55 = vadd.f32 %v2304_v22, %v2294_v26 }
 0x80a   :  { %v2319_v39 = vmul.f32 0.2, %v2311_v50  ;;  %2347 = vmax.xlane.f32.xlu1 %v2346_v37 }
 0x80b   :  { %v2318_v16 = vmul.f32 0.2, %v2310_v55 }
 0x80c   :  { %v2327_v2 = vmax.f32 %v2311_v50, %v2319_v39 }
 0x80d   :  { %v2326_v0 = vmax.f32 %v2310_v55, %v2318_v16 }
 0x80e   :  { %v7720_v15 = vadd.f32 %v7567_v58, %v2327_v2 }
 0x80f   :  { %v2254_v12 = vpop.permute.xlu0 %2253  ;;  %v2334_v13 = vadd.f32 %v7508_v34, %v2326_v0 }
 0x810   :  { %2271 = vst.msk [vmem:[#allocation2 + $0x38] sm:$0xff] %vm2263_vm7, %v2254_v12  ;;  %v2355_v53 = vsel %vm394_vm1, %v7720_v15, -inf }
 0x811   :  { %v2352_v14 = vsel %vm394_vm1, %v2334_v13, -inf }
 0x812   :  { %2356 = vmax.xlane.f32.xlu1 %v2355_v53 }
 0x817   :  { %v2282_v41 = vpop.permute.xlu0 %2281 }
 0x818   :  { %v2307_v11 = vadd.f32 %v2304_v22, %v2282_v41 }
 0x81a   :  { %v2315_v28 = vmul.f32 0.2, %v2307_v11 }
 0x81c   :  { %v2323_v51 = vmax.f32 %v2307_v11, %v2315_v28 }
 0x81e   :  { %v2331_v17 = vadd.f32 %v7488_v43, %v2323_v51 }
 0x81f   :  { %v2302_v30 = vpop.permute.xlu0 %2301 }
 0x820   :  { %v2312_v58 = vadd.f32 %v2304_v22, %v2302_v30  ;;  %v2343_v23 = vsel %vm394_vm1, %v2331_v17, -inf }
 0x821   :  { %2344 = vmax.xlane.f32.xlu0 %v2343_v23 }
 0x822   :  { %v2320_v5 = vmul.f32 0.2, %v2312_v58 }
 0x824   :  { %v2328_v48 = vmax.f32 %v2312_v58, %v2320_v5 }
 0x826   :  { %v2336_v49 = vadd.f32 %v7516_v27, %v2328_v48 }
 0x828   :  { %v2358_v45 = vsel %vm394_vm1, %v2336_v49, -inf }
 0x829   :  { %2359 = vmax.xlane.f32.xlu2 %v2358_v45  ;;  %2353 = vmax.xlane.f32.xlu0 %v2352_v14  ;;  %v9383_v45 = vmov 3   ;;  %v9384_v14 = vmov 2  }
 0x82b   :  { %2391 = vrot.lane.b32.xlu1 %v9372_v7, %s6278_s19 }
 0x83d   :  { %2389 = vrot.lane.b32.xlu0 %v9369_v57, %s6278_s19 }
 0x841   :  { %2393 = vrot.lane.b32.xlu2 %v9370_v24, %s6278_s19 }
 0x845   :  { %2395 = vrot.lane.b32.xlu0 %v9371_v6, %s6278_s19 }
 0x874   :  { %v2342_v43 = vpop.xlane.xlu2 %2341 }
 0x875   :  { %v2339_v27 = vpop.xlane.xlu1 %2338  ;;  %v2362_v22 = vsub.f32 %v7700_v25, %v2342_v43 }
 0x876   :  { %v2361_v7 = vsub.f32 %v7703_v47, %v2339_v27 }
 0x877   :  { %v2371_v42 = vmul.f32 1.442695, %v2362_v22 }
 0x878   :  { %v2369_v8 = vmul.f32 1.442695, %v2361_v7 }
 0x879   :  { %5920 = vpow2.f32 %v2371_v42 }
 0x87a   :  { %5922 = vpow2.f32 %v2369_v8 }
 0x87c   :  { %v2351_v52 = vpop.xlane.xlu2 %2350 }
 0x87d   :  { %v2348_v46 = vpop.xlane.xlu1 %2347  ;;  %v2365_v62 = vsub.f32 %v7710_v18, %v2351_v52 }
 0x87e   :  { %v2364_v47 = vsub.f32 %v7713_v9, %v2348_v46 }
 0x87f   :  { %v5921_v56 = vpop.eup %5920  ;;  %v2377_v20 = vmul.f32 1.442695, %v2365_v62  ;;  %v5535_v62 = vld [vmem:[%s9249_s4 + $0x8] sm:$0xff] }
 0x880   :  { %v5923_v44 = vpop.eup %5922  ;;  %v2375_v59 = vmul.f32 1.442695, %v2364_v47 }
 0x881   :  { %v2385_v3 = vpack.c.bf16 %v5921_v56, %v5923_v44 }
 0x885   :  { %v2357_v38 = vpop.xlane.xlu1 %2356 }
 0x886   :  { %v2367_v37 = vsub.f32 %v7720_v15, %v2357_v38 }
 0x888   :  { %v2381_v2 = vmul.f32 1.442695, %v2367_v37 }
 0x894   :  { %v2345_v34 = vpop.xlane.xlu0 %2344 }
 0x895   :  { %v2363_v25 = vsub.f32 %v2331_v17, %v2345_v34 }
 0x897   :  { %v2373_v61 = vmul.f32 1.442695, %v2363_v25  ;;  %v5540_v25 = vld [vmem:[%s9249_s4 + $0x30] sm:$0xff] }
 0x899   :  { %5924 = vpow2.f32 %v2373_v61 }
 0x89a   :  { %5926 = vpow2.f32 %v2375_v59  ;;  %v5539_v59 = vld [vmem:[%s9249_s4 + $0x28] sm:$0xff] }
 0x89c   :  { %v2354_v32 = vpop.xlane.xlu0 %2353  ;;  %v2360_v63 = vpop.xlane.xlu2 %2359 }
 0x89d   :  { %v2392_v54 = vpop.permute.xlu1 %2391  ;;  %v2366_v36 = vsub.f32 %v2334_v13, %v2354_v32  ;;  %v2368_v50 = vsub.f32 %v2336_v49, %v2360_v63  ;;  %v9382_v13 = vmov 0  }
 0x89e   :  { %v2401_v33 = vsel %vm447_vm0, %v2392_v54, 1065369472 }
 0x89f   :  { %v5925_v35 = vpop.eup %5924  ;;  %v2379_v10 = vmul.f32 1.442695, %v2366_v36  ;;  %v2383_v39 = vmul.f32 1.442695, %v2368_v50 }
 0x8a0   :  { %v5927_v21 = vpop.eup %5926 }
 0x8a1   :  { %v2386_v29 = vpack.c.bf16 %v5927_v21, %v5925_v35  ;;  %5928 = vpow2.f32 %v2379_v10  ;;  %v5538_v35 = vld [vmem:[%s9249_s4 + $0x20] sm:$0xff]  ;;  %v5537_v21 = vld [vmem:[%s9249_s4 + $0x18] sm:$0xff] }
 0x8a2   :  { %5930 = vpow2.f32 %v2377_v20  ;;  %v5534_v10 = vld [vmem:[%s9249_s4] sm:$0xff] }
 0x8a3   :  { %5932 = vpow2.f32 %v2383_v39 }
 0x8a4   :  { %v2394_v31 = vpop.permute.xlu2 %2393  ;;  %5934 = vpow2.f32 %v2381_v2 }
 0x8a5   :  { %v2404_v6 = vsel %vm447_vm0, %v2394_v31, 1065369472 }
 0x8a7   :  { %v5929_v19 = vpop.eup %5928 }
 0x8a8   :  { %v5931_v9 = vpop.eup %5930 }
 0x8a9   :  { %v2387_v1 = vpack.c.bf16 %v5929_v19, %v5931_v9  ;;  %v5933_v12 = vpop.eup %5932 }
 0x8aa   :  { %v5935_v18 = vpop.eup %5934 }
 0x8ab   :  { %v2388_v53 = vpack.c.bf16 %v5933_v12, %v5935_v18 }
 0x8af   :  { %v2390_v40 = vpop.permute.xlu0 %2389 }
 0x8b0   :  { %v2398_v60 = vsel %vm447_vm0, %v2390_v40, 1065369472 }
 0x8b7   :  { %v2396_v57 = vpop.permute.xlu0 %2395 }
 0x8b8   :  { %v2407_v24 = vsel %vm447_vm0, %v2396_v57, 1065369472  ;;  %vm5012_vm0 = vcmask 523712  }
 0x8b9   :  { %2425 = vmatpush.bf16.msrb.mxu3 %v2407_v24 }
 0x8bd   :  { %2426 = vmatpush.bf16.msrb.mxu3 %v2404_v6 }
 0x8c1   :  { %2427 = vmatpush.bf16.msrb.mxu3 %v2401_v33 }
 0x8c5   :  { %2428 = vmatpush.bf16.msrb.mxu3 %v2398_v60  ;;  %v5541_v60 = vld [vmem:[%s9249_s4 + $0x38] sm:$0xff] }
 0x8c6   :  { %2639 = vmatpush.bf16.msra.mxu0 %v5541_v60 }
 0x8c8   :  { %5406 = vmatmul.msk.bf16.vlgmr.msrb.gmra.mxu3 %vm394_vm1, %v2385_v3 }
 0x8ca   :  { %2640 = vmatpush.bf16.msra.mxu0 %v5540_v25 }
 0x8ce   :  { %2641 = vmatpush.bf16.msra.mxu0 %v5539_v59 }
 0x8d2   :  { %2642 = vmatpush.bf16.msra.mxu0 %v5538_v35 }
 0x8d6   :  { %2643 = vmatpush.bf16.msra.mxu0 %v5537_v21 }
 0x8d8   :  { %5407 = vmatmul.msk.bf16.gmra.mxu3 %vm394_vm1, %v2386_v29  ;;  %v5536_v29 = vld [vmem:[%s9249_s4 + $0x10] sm:$0xff] }
 0x8da   :  { %2644 = vmatpush.bf16.msra.mxu0 %v5536_v29 }
 0x8de   :  { %2645 = vmatpush.bf16.msra.mxu0 %v5535_v62  ;;  %v9385_v62 = vmov 1  }
 0x8e2   :  { %2646 = vmatpush.bf16.msra.mxu0 %v5534_v10 }
 0x8e8   :  { %5408 = vmatmul.msk.bf16.gmra.mxu3 %vm394_vm1, %v2387_v1 }
 0x8f8   :  { %5409 = vmatmul.msk.bf16.gmra.mxu3 %vm394_vm1, %v2388_v53 }
 0x94b   :  { %v2430_v26 = vpop.f32.mrf.mxu3 }
 0x94c   :  { %5936 = vrcp.f32 %v2430_v26 }
 0x952   :  { %v5937_v41 = vpop.eup %5936 }
 0x953   :  { %2460 = vperm.xlu1 %5631, %v5937_v41   ;;  %v2432_v55 = vpop.f32.mrf.mxu3 }
 0x954   :  { %5938 = vrcp.f32 %v2432_v55 }
 0x95a   :  { %v5939_v11 = vpop.eup %5938 }
 0x95b   :  { %2465 = vperm.xlu2 %5632, %v5939_v11   ;;  %v2435_v15 = vpop.f32.mrf.mxu3 }
 0x95c   :  { %5940 = vrcp.f32 %v2435_v15 }
 0x962   :  { %v5941_v28 = vpop.eup %5940 }
 0x963   :  { %2470 = vperm.xlu0 %5633, %v5941_v28   ;;  %v2437_v16 = vpop.f32.mrf.mxu3 }
 0x964   :  { %5942 = vrcp.f32 %v2437_v16 }
 0x96a   :  { %v5943_v51 = vpop.eup %5942 }
 0x96b   :  { %2475 = vperm.xlu1 %5631, %v5943_v51   ;;  %v2440_v17 = vpop.f32.mrf.mxu3 }
 0x96c   :  { %5944 = vrcp.f32 %v2440_v17 }
 0x972   :  { %v5945_v30 = vpop.eup %5944 }
 0x973   :  { %2480 = vperm.xlu2 %5632, %v5945_v30   ;;  %v2442_v0 = vpop.f32.mrf.mxu3  ;;  %v5544_v30 = vld [vmem:[%s9250_s5 + $0x10] sm:$0xff] }
 0x974   :  { %5946 = vrcp.f32 %v2442_v0 }
 0x97a   :  { %v5947_v58 = vpop.eup %5946 }
 0x97b   :  { %2485 = vperm.xlu1 %5631, %v5947_v58   ;;  %v2445_v23 = vpop.f32.mrf.mxu3  ;;  %v5542_v58 = vld [vmem:[%s9250_s5] sm:$0xff] }
 0x97c   :  { %5948 = vrcp.f32 %v2445_v23 }
 0x982   :  { %v5949_v5 = vpop.eup %5948 }
 0x983   :  { %2490 = vperm.xlu2 %5632, %v5949_v5   ;;  %v2447_v48 = vpop.f32.mrf.mxu3  ;;  %5634 = vset.pattern.permute.xlu1 %v9382_v13 }
 0x984   :  { %5950 = vrcp.f32 %v2447_v48 }
 0x98a   :  { %v5951_v49 = vpop.eup %5950 }
 0x98b   :  { %2495 = vperm.xlu0 %5633, %v5951_v49   ;;  %5637 = vset.pattern.permute.xlu2 %v9383_v45 }
 0x993   :  { %5640 = vset.pattern.permute.xlu0 %v9384_v14 }
 0x9b5   :  { %v2466_v43 = vpop.permute.xlu2 %2465 }
 0x9b6   :  { %v2499_v34 = vmul.f32 %v2466_v43, %v2432_v55 }
 0x9b8   :  { %v2507_v27 = vmax.f32 %v2499_v34, 0.0 }
 0x9ba   :  { %2524 = vrot.lane.b32.xlu2 %v2507_v27, %s6265_s22 }
 0x9c5   :  { %v2461_v52 = vpop.permute.xlu1 %2460 }
 0x9c6   :  { %v2498_v32 = vmul.f32 %v2461_v52, %v2430_v26 }
 0x9c8   :  { %v2506_v46 = vmax.f32 %v2498_v32, 0.0 }
 0x9ca   :  { %2522 = vrot.lane.b32.xlu1 %v2506_v46, %s6265_s22 }
 0x9cd   :  { %v2481_v63 = vpop.permute.xlu2 %2480 }
 0x9ce   :  { %v2502_v40 = vmul.f32 %v2481_v63, %v2440_v17  ;;  %v5545_v17 = vld [vmem:[%s9250_s5 + $0x18] sm:$0xff] }
 0x9cf   :  { %2736 = vmatpush.bf16.msra.mxu1 %v5545_v17 }
 0x9d0   :  { %v2510_v22 = vmax.f32 %v2502_v40, 0.0 }
 0x9d2   :  { %2530 = vrot.lane.b32.xlu2 %v2510_v22, %s6265_s22 }
 0x9d3   :  { %2737 = vmatpush.bf16.msra.mxu1 %v5544_v30 }
 0x9d5   :  { %v2471_v7 = vpop.permute.xlu0 %2470 }
 0x9d6   :  { %v2500_v38 = vmul.f32 %v2471_v7, %v2435_v15 }
 0x9d8   :  { %v2508_v57 = vmax.f32 %v2500_v38, 0.0 }
 0x9da   :  { %2526 = vrot.lane.b32.xlu0 %v2508_v57, %s6265_s22 }
 0x9dd   :  { %v2476_v42 = vpop.permute.xlu1 %2475  ;;  %v2491_v31 = vpop.permute.xlu2 %2490 }
 0x9de   :  { %v2501_v24 = vmul.f32 %v2476_v42, %v2437_v16  ;;  %v2504_v6 = vmul.f32 %v2491_v31, %v2445_v23 }
 0x9e0   :  { %v2509_v8 = vmax.f32 %v2501_v24, 0.0  ;;  %v2512_v54 = vmax.f32 %v2504_v6, 0.0 }
 0x9e2   :  { %2528 = vrot.lane.b32.xlu1 %v2509_v8, %s6265_s22 }
 0x9ea   :  { %2534 = vrot.lane.b32.xlu1 %v2512_v54, %s6265_s22 }
 0x9ed   :  { %v2486_v33 = vpop.permute.xlu1 %2485 }
 0x9ee   :  { %v2503_v56 = vmul.f32 %v2486_v33, %v2442_v0  ;;  %v5543_v0 = vld [vmem:[%s9250_s5 + $0x8] sm:$0xff] }
 0x9ef   :  { %2738 = vmatpush.bf16.msra.mxu1 %v5543_v0 }
 0x9f0   :  { %v2511_v44 = vmax.f32 %v2503_v56, 0.0 }
 0x9f2   :  { %2532 = vrot.lane.b32.xlu0 %v2511_v44, %s6265_s22 }
 0x9f3   :  { %2739 = vmatpush.bf16.msra.mxu1 %v5542_v58 }
 0x9fd   :  { %v2496_v3 = vpop.permute.xlu0 %2495 }
 0x9fe   :  { %v2505_v47 = vmul.f32 %v2496_v3, %v2447_v48 }
 0xa00   :  { %v2513_v61 = vmax.f32 %v2505_v47, 0.0 }
 0xa02   :  { %2536 = vrot.lane.b32.xlu2 %v2513_v61, %s6265_s22 }
 0xa14   :  { %v2525_v36 = vpop.permute.xlu2 %2524 }
 0xa15   :  { %2548 = vst.msk [vmem:[#allocation2 + $0x8] sm:$0xff] %vm2546_vm8, %v2525_v36 }
 0xa1c   :  { %v2556_v50 = vld [vmem:[#allocation2 + $0x8] sm:$0xff] }
 0xa2c   :  { %v2531_v20 = vpop.permute.xlu2 %2530 }
 0xa2d   :  { %2551 = vst.msk [vmem:[#allocation2 + $0x20] sm:$0xff] %vm2546_vm8, %v2531_v20 }
 0xa34   :  { %v2559_v55 = vld [vmem:[#allocation2 + $0x20] sm:$0xff] }
 0xa3c   :  { %v2523_v19 = vpop.permute.xlu1 %2522 }
 0xa3d   :  { %2547 = vst.msk [vmem:[#allocation2] sm:$0xff] %vm2546_vm8, %v2523_v19 }
 0xa44   :  { %v2555_v9 = vld [vmem:[#allocation2] sm:$0xff] }
 0xa45   :  { %v2587_v1 = vpack.c.bf16 %v2556_v50, %v2555_v9 }
 0xa47   :  { %2647 = vmatmul.bf16.vlgmr.msra.gmra.mxu0 %v2587_v1 }
 0xa4c   :  { %v2527_v37 = vpop.permute.xlu0 %2526 }
 0xa4d   :  { %2549 = vst.msk [vmem:[#allocation2 + $0x10] sm:$0xff] %vm2546_vm8, %v2527_v37 }
 0xa54   :  { %v2529_v39 = vpop.permute.xlu1 %2528  ;;  %v2557_v18 = vld [vmem:[#allocation2 + $0x10] sm:$0xff] }
 0xa55   :  { %2550 = vst.msk [vmem:[#allocation2 + $0x18] sm:$0xff] %vm2546_vm8, %v2529_v39 }
 0xa5c   :  { %v2535_v2 = vpop.permute.xlu1 %2534  ;;  %v2537_v12 = vpop.permute.xlu2 %2536  ;;  %v2558_v53 = vld [vmem:[#allocation2 + $0x18] sm:$0xff] }
 0xa5d   :  { %2553 = vst.msk [vmem:[#allocation2 + $0x30] sm:$0xff] %vm2546_vm8, %v2535_v2  ;;  %v2588_v26 = vpack.c.bf16 %v2558_v53, %v2557_v18 }
 0xa5e   :  { %2554 = vst.msk [vmem:[#allocation2 + $0x38] sm:$0xff] %vm2546_vm8, %v2537_v12 }
 0xa5f   :  { %2652 = vmatmul.bf16.gmra.mxu0 %v2588_v26 }
 0xa64   :  { %v2533_v41 = vpop.permute.xlu0 %2532  ;;  %v2561_v28 = vld [vmem:[#allocation2 + $0x30] sm:$0xff] }
 0xa65   :  { %2552 = vst.msk [vmem:[#allocation2 + $0x28] sm:$0xff] %vm2546_vm8, %v2533_v41  ;;  %v2562_v16 = vld [vmem:[#allocation2 + $0x38] sm:$0xff] }
 0xa66   :  { %v2590_v51 = vpack.c.bf16 %v2562_v16, %v2561_v28 }
 0xa6c   :  { %v2560_v11 = vld [vmem:[#allocation2 + $0x28] sm:$0xff] }
 0xa6d   :  { %v2589_v15 = vpack.c.bf16 %v2560_v11, %v2559_v55 }
 0xa6f   :  { %2657 = vmatmul.bf16.gmra.mxu0 %v2589_v15 }
 0xa7f   :  { %2662 = vmatmul.bf16.gmra.mxu0 %v2590_v51 }
 0xac4   :  { %v2648_v23 = vpop.f32.mrf.mxu0 }
 0xac5   :  { %v2668_v5 = vpack.c.bf16 %v2648_v23, %v2648_v23 }
 0xac7   :  { %v2684_v43 = vunpack.c.l.b16 %v2668_v5 }
 0xacc   :  { %v2650_v48 = vpop.f32.mrf.mxu0 }
 0xacd   :  { %v2669_v49 = vpack.c.bf16 %v2650_v48, %v2650_v48 }
 0xacf   :  { %v2685_v34 = vunpack.c.l.b16 %v2669_v49 }
 0xad1   :  { %v7807_v27 = vpack.c.b16 %v2685_v34, %v2684_v43 }
 0xad3   :  { %3157 = vrot.lane.b32.xlu1 %v7807_v27, %s6280_s21  ;;  %5458 = vmatmul.msk.bf16.vlgmr.msra.gmra.mxu1 %vm394_vm1, %v7807_v27  ;;  %v2919_v35 = vsel %vm2918_vm9, %v7807_v27, 1065369472 }
 0xad4   :  { %3440 = vrot.lane.b32.xlu2 %v7807_v27, %s6265_s22 }
 0xadc   :  { %v2653_v52 = vpop.f32.mrf.mxu0 }
 0xadd   :  { %v2670_v32 = vpack.c.bf16 %v2653_v52, %v2653_v52 }
 0xadf   :  { %v2686_v40 = vunpack.c.l.b16 %v2670_v32 }
 0xae4   :  { %v2655_v46 = vpop.f32.mrf.mxu0 }
 0xae5   :  { %v2671_v63 = vpack.c.bf16 %v2655_v46, %v2655_v46 }
 0xae7   :  { %v2687_v22 = vunpack.c.l.b16 %v2671_v63 }
 0xae9   :  { %v7815_v7 = vpack.c.b16 %v2687_v22, %v2686_v40 }
 0xaeb   :  { %3442 = vrot.lane.b32.xlu1 %v7815_v7, %s6265_s22  ;;  %3159 = vrot.lane.b32.xlu2 %v7815_v7, %s6280_s21  ;;  %v2921_v59 = vsel %vm2918_vm9, %v7815_v7, 1065369472 }
 0xaec   :  { %5459 = vmatmul.msk.bf16.gmra.mxu1 %vm394_vm1, %v7815_v7  ;;  %v2658_v38 = vpop.f32.mrf.mxu0 }
 0xaed   :  { %v2672_v57 = vpack.c.bf16 %v2658_v38, %v2658_v38 }
 0xaef   :  { %v2688_v8 = vunpack.c.l.b16 %v2672_v57 }
 0xaf4   :  { %v2660_v42 = vpop.f32.mrf.mxu0 }
 0xaf5   :  { %v2673_v24 = vpack.c.bf16 %v2660_v42, %v2660_v42 }
 0xaf7   :  { %v2689_v31 = vunpack.c.l.b16 %v2673_v24 }
 0xaf9   :  { %v7823_v6 = vpack.c.b16 %v2689_v31, %v2688_v8 }
 0xafb   :  { %3161 = vrot.lane.b32.xlu0 %v7823_v6, %s6280_s21  ;;  %v2923_v61 = vsel %vm2918_vm9, %v7823_v6, 1065369472 }
 0xafc   :  { %5460 = vmatmul.msk.bf16.gmra.mxu1 %vm394_vm1, %v7823_v6  ;;  %v2663_v54 = vpop.f32.mrf.mxu0 }
 0xafd   :  { %v2674_v33 = vpack.c.bf16 %v2663_v54, %v2663_v54 }
 0xaff   :  { %v2690_v60 = vunpack.c.l.b16 %v2674_v33 }
 0xb03   :  { %3444 = vrot.lane.b32.xlu0 %v7823_v6, %s6265_s22 }
 0xb04   :  { %v2665_v56 = vpop.f32.mrf.mxu0 }
 0xb05   :  { %v2675_v44 = vpack.c.bf16 %v2665_v56, %v2665_v56 }
 0xb07   :  { %v2691_v25 = vunpack.c.l.b16 %v2675_v44 }
 0xb09   :  { %v7831_v3 = vpack.c.b16 %v2691_v25, %v2690_v60 }
 0xb0b   :  { %3446 = vrot.lane.b32.xlu2 %v7831_v3, %s6265_s22  ;;  %3163 = vrot.lane.b32.xlu1 %v7831_v3, %s6280_s21  ;;  %v2925_v47 = vsel %vm2918_vm9, %v7831_v3, 1065369472  ;;  %s6286_s21 = smov 72  }
 0xb0c   :  { %5461 = vmatmul.msk.bf16.gmra.mxu1 %vm394_vm1, %v7831_v3  ;;  %2943 = vmatpush.bf16.msrb.mxu2 %v2925_v47 }
 0xb10   :  { %2944 = vmatpush.bf16.msrb.mxu2 %v2923_v61 }
 0xb14   :  { %2945 = vmatpush.bf16.msrb.mxu2 %v2921_v59 }
 0xb18   :  { %2946 = vmatpush.bf16.msrb.mxu2 %v2919_v35 }
 0xb2e   :  { %v3441_v36 = vpop.permute.xlu2 %3440 }
 0xb2f   :  { %v3449_v55 = vsel %vm2918_vm9, %v3441_v36, 1065369472 }
 0xb45   :  { %v3160_v10 = vpop.permute.xlu2 %3159  ;;  %v3158_v50 = vpop.permute.xlu1 %3157 }
 0xb46   :  { %v3169_v28 = vsel %vm2918_vm9, %v3160_v10, 1065369472  ;;  %v3166_v51 = vsel %vm2918_vm9, %v3158_v50, 1065369472 }
 0xb50   :  { %v7847_v21 = vpop.f32.mrf.mxu1 }
 0xb51   :  { %3607 = vperm.xlu2 %5637, %v7847_v21   ;;  %2795 = vperm.xlu1 %5634, %v7847_v21  }
 0xb58   :  { %v7851_v29 = vpop.f32.mrf.mxu1 }
 0xb59   :  { %3328 = vperm.xlu0 %5640, %v7851_v29   ;;  %5638 = vset.pattern.permute.xlu2 %v9382_v13 }
 0xb5a   :  { %5635 = vset.pattern.permute.xlu1 %v9385_v62  ;;  %2800 = vperm.xlu2 %5638, %v7851_v29  }
 0xb5b   :  { %3041 = vperm.xlu1 %5635, %v7847_v21  }
 0xb5d   :  { %v3443_v39 = vpop.permute.xlu1 %3442 }
 0xb5e   :  { %v3452_v53 = vsel %vm2918_vm9, %v3443_v39, 1065369472 }
 0xb61   :  { %5641 = vset.pattern.permute.xlu0 %v9383_v45 }
 0xb62   :  { %3611 = vperm.xlu0 %5641, %v7851_v29   ;;  %5639 = vset.pattern.permute.xlu2 %v9385_v62 }
 0xb63   :  { %5636 = vset.pattern.permute.xlu1 %v9384_v14  ;;  %3045 = vperm.xlu2 %5639, %v7851_v29  }
 0xb64   :  { %3324 = vperm.xlu1 %5636, %v7847_v21  }
 0xb65   :  { %v3447_v20 = vpop.permute.xlu2 %3446 }
 0xb66   :  { %v3458_v19 = vsel %vm2918_vm9, %v3447_v20, 1065369472 }
 0xb67   :  { %3476 = vmatpush.bf16.msrb.mxu0 %v3458_v19 }
 0xb69   :  { %v7865_v9 = vpop.f32.mrf.mxu1 }
 0xb6a   :  { %5660 = vset.pattern.permute.xlu0 %v9384_v14 }
 0xb6b   :  { %5644 = vset.pattern.permute.xlu2 %v9384_v14 }
 0xb6c   :  { %5642 = vset.pattern.permute.xlu1 %v9382_v13  ;;  %3332 = vperm.xlu2 %5644, %v7865_v9  }
 0xb6d   :  { %2805 = vperm.xlu1 %5642, %v7865_v9   ;;  %v3162_v1 = vpop.permute.xlu0 %3161 }
 0xb6e   :  { %v3172_v15 = vsel %vm2918_vm9, %v3162_v1, 1065369472 }
 0xb71   :  { %v7872_v37 = vpop.f32.mrf.mxu1 }
 0xb74   :  { %5646 = vset.pattern.permute.xlu2 %v9382_v13 }
 0xb75   :  { %5643 = vset.pattern.permute.xlu1 %v9385_v62  ;;  %v3445_v2 = vpop.permute.xlu0 %3444  ;;  %2810 = vperm.xlu2 %5646, %v7872_v37  }
 0xb76   :  { %3049 = vperm.xlu1 %5643, %v7865_v9   ;;  %v3455_v12 = vsel %vm2918_vm9, %v3445_v2, 1065369472 }
 0xb77   :  { %3477 = vmatpush.bf16.msrb.mxu0 %v3455_v12 }
 0xb79   :  { %v7879_v18 = vpop.f32.mrf.mxu1 }
 0xb7b   :  { %3478 = vmatpush.bf16.msrb.mxu0 %v3452_v53 }
 0xb7d   :  { %5647 = vset.pattern.permute.xlu2 %v9385_v62  ;;  %v3164_v26 = vpop.permute.xlu1 %3163 }
 0xb7e   :  { %5645 = vset.pattern.permute.xlu1 %v9383_v45  ;;  %v3175_v41 = vsel %vm2918_vm9, %v3164_v26, 1065369472  ;;  %3053 = vperm.xlu2 %5647, %v7872_v37   ;;  %v7992_v26 = vld [vmem:[%s9248_s1] sm:$0xff] }
 0xb7f   :  { %3615 = vperm.xlu1 %5645, %v7865_v9   ;;  %3193 = vmatpush.bf16.msra.mxu3 %v3175_v41  ;;  %9389 = vst [vmem:[#allocation23_spill] sm:$0xff] %v7992_v26 }
 0xb80   :  { %3479 = vmatpush.bf16.msrb.mxu0 %v3449_v55  ;;  %v8000_v55 = vld [vmem:[%s9248_s1 + $0x8] sm:$0xff] }
 0xb81   :  { %v7888_v11 = vpop.f32.mrf.mxu1 }
 0xb83   :  { %3194 = vmatpush.bf16.msra.mxu3 %v3172_v15 }
 0xb86   :  { %5649 = vset.pattern.permute.xlu2 %v9383_v45 }
 0xb87   :  { %5648 = vset.pattern.permute.xlu1 %v9384_v14  ;;  %3619 = vperm.xlu2 %5649, %v7872_v37  }
 0xb88   :  { %3336 = vperm.xlu1 %5648, %v7872_v37   ;;  %3195 = vmatpush.bf16.msra.mxu3 %v3169_v28 }
 0xb89   :  { %v7896_v16 = vpop.f32.mrf.mxu1 }
 0xb8a   :  { %9386 = vst [vmem:[#allocation20_spill] sm:$0xff] %v7896_v16  ;;  %3348 = vperm.xlu0 %5660, %v7896_v16  }
 0xb8c   :  { %3196 = vmatpush.bf16.msra.mxu3 %v3166_v51 }
 0xb8f   :  { %5652 = vset.pattern.permute.xlu2 %v9384_v14 }
 0xb90   :  { %5650 = vset.pattern.permute.xlu1 %v9382_v13  ;;  %3340 = vperm.xlu2 %5652, %v7879_v18  }
 0xb91   :  { %2815 = vperm.xlu1 %5650, %v7879_v18   ;;  %v7918_v17 = vpop.f32.mrf.mxu1 }
 0xb92   :  { %5661 = vset.pattern.permute.xlu0 %v9383_v45 }
 0xb93   :  { %3631 = vperm.xlu0 %5661, %v7896_v16  }
 0xb98   :  { %5654 = vset.pattern.permute.xlu2 %v9382_v13 }
 0xb99   :  { %5651 = vset.pattern.permute.xlu1 %v9385_v62  ;;  %2820 = vperm.xlu2 %5654, %v7888_v11  }
 0xb9a   :  { %3057 = vperm.xlu1 %5651, %v7879_v18  }
 0xba1   :  { %5655 = vset.pattern.permute.xlu2 %v9385_v62 }
 0xba2   :  { %5653 = vset.pattern.permute.xlu1 %v9383_v45  ;;  %3061 = vperm.xlu2 %5655, %v7888_v11  }
 0xba3   :  { %3623 = vperm.xlu1 %5653, %v7879_v18  }
 0xbaa   :  { %5657 = vset.pattern.permute.xlu2 %v9383_v45 }
 0xbab   :  { %5656 = vset.pattern.permute.xlu1 %v9384_v14  ;;  %3627 = vperm.xlu2 %5657, %v7888_v11  }
 0xbac   :  { %3344 = vperm.xlu1 %5656, %v7888_v11  }
 0xbb3   :  { %5662 = vset.pattern.permute.xlu2 %v9382_v13 }
 0xbb4   :  { %5658 = vset.pattern.permute.xlu1 %v9382_v13  ;;  %2830 = vperm.xlu2 %5662, %v7918_v17   ;;  %v9387_v13 = vmov 4  }
 0xbb5   :  { %2761 = vxpose.xlu0.b32.start [1/8] (short) (narrow) %v7847_v21, 16  ;;  %2825 = vperm.xlu1 %5658, %v7896_v16  }
 0xbbc   :  { %5663 = vset.pattern.permute.xlu2 %v9385_v62 }
 0xbbd   :  { %2762 = vxpose.xlu0.b32.cont [2/8] (short) (narrow) %v7851_v29, 16  ;;  %5659 = vset.pattern.permute.xlu1 %v9385_v62 }
 0xbbe   :  { %3065 = vperm.xlu1 %5659, %v7896_v16   ;;  %3069 = vperm.xlu2 %5663, %v7918_v17  }
 0xbc5   :  { %2763 = vxpose.xlu0.b32.cont [3/8] (short) (narrow) %v7865_v9, 16 }
 0xbc6   :  { %5665 = vset.pattern.permute.xlu1 %v9383_v45  ;;  %5664 = vset.pattern.permute.xlu2 %v9384_v14  ;;  %v3608_v45 = vpop.permute.xlu2 %3607  ;;  %v2796_v14 = vpop.permute.xlu1 %2795 }
 0xbc7   :  { %3635 = vperm.xlu1 %5665, %v7918_v17   ;;  %3352 = vperm.xlu2 %5664, %v7918_v17  }
 0xbcb   :  { %v3329_v49 = vpop.permute.xlu0 %3328 }
 0xbcd   :  { %2764 = vxpose.xlu0.b32.cont [4/8] (short) (narrow) %v7872_v37, 16 }
 0xbce   :  { %v2801_v30 = vpop.permute.xlu2 %2800  ;;  %v3042_v0 = vpop.permute.xlu1 %3041 }
 0xbcf   :  { %5667 = vset.pattern.permute.xlu1 %v9387_v13  ;;  %5668 = vset.pattern.permute.xlu2 %v9387_v13 }
 0xbd4   :  { %v7948_v52 = vpop.permute.xlu0 %3611 }
 0xbd5   :  { %2765 = vxpose.xlu0.b32.cont [5/8] (short) (narrow) %v7879_v18, 16 }
 0xbd6   :  { %v3046_v58 = vpop.permute.xlu2 %3045  ;;  %v3325_v23 = vpop.permute.xlu1 %3324 }
 0xbdd   :  { %2766 = vxpose.xlu0.b32.cont [6/8] (short) (narrow) %v7888_v11, 16 }
 0xbde   :  { %v7942_v5 = vpop.permute.xlu2 %3332 }
 0xbdf   :  { %v7944_v48 = vpop.permute.xlu1 %2805 }
 0xbe5   :  { %2767 = vxpose.xlu0.b32.cont [7/8] (short) (narrow) %v7896_v16, 16 }
 0xbe6   :  { %v7946_v43 = vpop.permute.xlu2 %2810 }
 0xbe8   :  { %v3050_v34 = vpop.permute.xlu1 %3049 }
 0xbed   :  { %2768 = vxpose.xlu0.b32.end [8/8] (short) (narrow) %v7918_v17, 16 }
 0xbee   :  { %v3054_v32 = vpop.permute.xlu2 %3053 }
 0xbf1   :  { %v7950_v46 = vpop.permute.xlu1 %3615 }
 0xbf6   :  { %v7954_v40 = vpop.permute.xlu2 %3619 }
 0xbfa   :  { %v7956_v22 = vpop.permute.xlu1 %3336 }
 0xbfc   :  { %v7952_v63 = vpop.permute.xlu0 %3348 }
 0xbfe   :  { %v7961_v57 = vpop.permute.xlu2 %3340 }
 0xc03   :  { %v7963_v24 = vpop.permute.xlu1 %2815 }
 0xc05   :  { %v7958_v38 = vpop.permute.xlu0 %3631 }
 0xc06   :  { %v7965_v8 = vpop.permute.xlu2 %2820 }
 0xc0c   :  { %v3058_v60 = vpop.permute.xlu1 %3057 }
 0xc0e   :  { %v7987_v53 = vpop.permute.xlu2 %3061 }
 0xc54   :  { %5666 = vset.pattern.permute.xlu0 %v9387_v13 }
 0xc59   :  { %v2777_v42 = vpop.trf.xlu0 }
 0xc61   :  { %v7967_v31 = vpop.trf.xlu0 }
 0xc62   :  { %9388 = vst [vmem:[#allocation16_spill] sm:$0xff] %v7967_v31  ;;  %v7970_v54 = vperm.slane %v7967_v31, 0  ;;  %v7973_v33 = vperm.slane %v7967_v31, 1  ;;  %v7976_v56 = vperm.slane %v7967_v31, 2  ;;  %v7979_v44 = vperm.slane %v7967_v31, 3 }
 0xc64   :  { %v3639_v25 = vadd.f32 %v7979_v44, %v3608_v45  ;;  %v3357_v47 = vadd.f32 %v7976_v56, %v3329_v49  ;;  %v2834_v61 = vadd.f32 %v7970_v54, %v2796_v14  ;;  %v3075_v59 = vadd.f32 %v7973_v33, %v3050_v34 }
 0xc65   :  { %v2835_v35 = vadd.f32 %v7970_v54, %v2801_v30  ;;  %v3073_v36 = vadd.f32 %v7973_v33, %v3042_v0  ;;  %v3076_v13 = vadd.f32 %v7973_v33, %v3054_v32  ;;  %v3074_v45 = vadd.f32 %v7973_v33, %v3046_v58  ;;  %v8022_v58 = vld [vmem:[%s9248_s1 + $0x10] sm:$0xff] }
 0xc66   :  { %v3647_v62 = vmul.f32 0.2, %v3639_v25  ;;  %v3365_v10 = vmul.f32 0.2, %v3357_v47  ;;  %v2842_v20 = vmul.f32 0.2, %v2834_v61  ;;  %v3356_v42 = vadd.f32 %v7976_v56, %v3325_v23 }
 0xc67   :  { %v3083_v19 = vmul.f32 0.2, %v3075_v59  ;;  %v2843_v2 = vmul.f32 0.2, %v2835_v35  ;;  %v3081_v12 = vmul.f32 0.2, %v3073_v36  ;;  %v3362_v31 = vadd.f32 %v7976_v56, %v7952_v63 }
 0xc68   :  { %v3655_v50 = vmax.f32 %v3639_v25, %v3647_v62  ;;  %v3373_v1 = vmax.f32 %v3357_v47, %v3365_v10  ;;  %v2850_v39 = vmax.f32 %v2834_v61, %v2842_v20  ;;  %v8017_v25 = vpop.permute.xlu1 %3623  ;;  %v3084_v32 = vmul.f32 0.2, %v3076_v13  ;;  %v8034_v10 = vpop.permute.xlu2 %3627 }
 0xc69   :  { %v3091_v51 = vmax.f32 %v3075_v59, %v3083_v19  ;;  %v2851_v49 = vmax.f32 %v2835_v35, %v2843_v2  ;;  %v3089_v34 = vmax.f32 %v3073_v36, %v3081_v12  ;;  %v3082_v59 = vmul.f32 0.2, %v3074_v45  ;;  %v8049_v12 = vld [vmem:[%s9248_s1 + $0x18] sm:$0xff] }
 0xc6a   :  { %v7995_v41 = vadd.f32 %v7992_v26, %v3655_v50  ;;  %v8003_v15 = vadd.f32 %v8000_v55, %v3373_v1  ;;  %v8006_v28 = vadd.f32 %v7992_v26, %v2850_v39  ;;  %v3364_v23 = vmul.f32 0.2, %v3356_v42 }
 0xc6b   :  { %v8025_v47 = vadd.f32 %v8022_v58, %v3091_v51  ;;  %v8028_v61 = vadd.f32 %v8000_v55, %v2851_v49  ;;  %v8031_v35 = vadd.f32 %v7992_v26, %v3089_v34  ;;  %v3092_v36 = vmax.f32 %v3076_v13, %v3084_v32 }
 0xc6c   :  { %9390 = vst [vmem:[#allocation19_spill] sm:$0xff] %v7995_v41  ;;  %v3671_v14 = vsel %vm394_vm1, %v7995_v41, -inf  ;;  %v3391_v30 = vsel %vm394_vm1, %v8003_v15, -inf  ;;  %v2866_v0 = vsel %vm394_vm1, %v8006_v28, -inf  ;;  %v3077_v62 = vadd.f32 %v7973_v33, %v3058_v60 }
 0xc6d   :  { %3672 = vmax.xlane.f32.xlu2 %v3671_v14  ;;  %3392 = vmax.xlane.f32.xlu0 %v3391_v30  ;;  %v3111_v20 = vsel %vm394_vm1, %v8025_v47, -inf  ;;  %v2869_v19 = vsel %vm394_vm1, %v8028_v61, -inf  ;;  %v3090_v50 = vmax.f32 %v3074_v45, %v3082_v59  ;;  %v2836_v1 = vadd.f32 %v7970_v54, %v7944_v48 }
 0xc6e   :  { %2867 = vmax.xlane.f32.xlu1 %v2866_v0  ;;  %v3105_v39 = vsel %vm394_vm1, %v8031_v35, -inf  ;;  %v3372_v2 = vmax.f32 %v3356_v42, %v3364_v23  ;;  %v2837_v60 = vadd.f32 %v7970_v54, %v7946_v43  ;;  %v8052_v51 = vadd.f32 %v8049_v12, %v3092_v36 }
 0xc6f   :  { %v8055_v48 = vadd.f32 %v8000_v55, %v3090_v50  ;;  %v3085_v45 = vmul.f32 0.2, %v3077_v62  ;;  %v2844_v14 = vmul.f32 0.2, %v2836_v1  ;;  %v3360_v49 = vadd.f32 %v7976_v56, %v7961_v57 }
 0xc70   :  { %v3345_v13 = vpop.permute.xlu1 %3344  ;;  %v8058_v30 = vadd.f32 %v7992_v26, %v3372_v2  ;;  %v2845_v0 = vmul.f32 0.2, %v2837_v60  ;;  %v3114_v43 = vsel %vm394_vm1, %v8052_v51, -inf  ;;  %v3358_v59 = vadd.f32 %v7976_v56, %v7942_v5 }
 0xc71   :  { %v3108_v34 = vsel %vm394_vm1, %v8055_v48, -inf  ;;  %v3093_v42 = vmax.f32 %v3077_v62, %v3085_v45  ;;  %v2852_v32 = vmax.f32 %v2836_v1, %v2844_v14  ;;  %v3368_v57 = vmul.f32 0.2, %v3360_v49  ;;  %v8077_v62 = vld [vmem:[%s9248_s1 + $0x20] sm:$0xff] }
 0xc72   :  { %v3388_v23 = vsel %vm394_vm1, %v8058_v30, -inf  ;;  %v2853_v36 = vmax.f32 %v2837_v60, %v2845_v0  ;;  %v3366_v1 = vmul.f32 0.2, %v3358_v59 }
 0xc73   :  { %v8080_v5 = vadd.f32 %v8077_v62, %v3093_v42  ;;  %v8083_v50 = vadd.f32 %v8022_v58, %v2852_v32  ;;  %v3376_v60 = vmax.f32 %v3360_v49, %v3368_v57  ;;  %v2839_v49 = vadd.f32 %v7970_v54, %v7965_v8 }
 0xc75   :  { %3112 = vmax.xlane.f32.xlu0 %v3111_v20  ;;  %2870 = vmax.xlane.f32.xlu2 %v2869_v19  ;;  %v3359_v20 = vadd.f32 %v7976_v56, %v7956_v22  ;;  %v8072_v19 = vpop.permute.xlu2 %2830  ;;  %v3117_v14 = vsel %vm394_vm1, %v8080_v5, -inf  ;;  %v2872_v0 = vsel %vm394_vm1, %v8083_v50, -inf }
 0xc76   :  { %3106 = vmax.xlane.f32.xlu1 %v3105_v39  ;;  %v8086_v39 = vadd.f32 %v8049_v12, %v2853_v36 }
 0xc77   :  { %v3367_v22 = vmul.f32 0.2, %v3359_v20 }
 0xc78   :  { %v2826_v2 = vpop.permute.xlu1 %2825  ;;  %v2875_v42 = vsel %vm394_vm1, %v8086_v39, -inf }
 0xc79   :  { %v2840_v45 = vadd.f32 %v7970_v54, %v2826_v2  ;;  %v3375_v32 = vmax.f32 %v3359_v20, %v3367_v22  ;;  %v2847_v2 = vmul.f32 0.2, %v2839_v49 }
 0xc7b   :  { %v2848_v36 = vmul.f32 0.2, %v2840_v45 }
 0xc7d   :  { %3115 = vmax.xlane.f32.xlu0 %v3114_v43  ;;  %3109 = vmax.xlane.f32.xlu2 %v3108_v34  ;;  %v3374_v43 = vmax.f32 %v3358_v59, %v3366_v1  ;;  %v2838_v34 = vadd.f32 %v7970_v54, %v7963_v24  ;;  %v3070_v57 = vpop.permute.xlu2 %3069  ;;  %v8106_v24 = vadd.f32 %v8049_v12, %v3375_v32 }
 0xc7e   :  { %3389 = vmax.xlane.f32.xlu1 %v3388_v23  ;;  %v8100_v23 = vadd.f32 %v8077_v62, %v3376_v60  ;;  %v2856_v22 = vmax.f32 %v2840_v45, %v2848_v36  ;;  %v3080_v60 = vadd.f32 %v7973_v33, %v3070_v57  ;;  %v3078_v32 = vadd.f32 %v7973_v33, %v7987_v53  ;;  %v8121_v45 = vld [vmem:[%s9248_s1 + $0x30] sm:$0xff] }
 0xc7f   :  { %v8103_v59 = vadd.f32 %v8022_v58, %v3374_v43  ;;  %v2846_v1 = vmul.f32 0.2, %v2838_v34  ;;  %v3397_v43 = vsel %vm394_vm1, %v8106_v24, -inf }
 0xc80   :  { %v3400_v20 = vsel %vm394_vm1, %v8100_v23, -inf  ;;  %v3088_v36 = vmul.f32 0.2, %v3080_v60 }
 0xc81   :  { %v3394_v8 = vsel %vm394_vm1, %v8103_v59, -inf }
 0xc82   :  { %v3096_v4 = vmax.f32 %v3080_v60, %v3088_v36 }
 0xc85   :  { %3118 = vmax.xlane.f32.xlu0 %v3117_v14  ;;  %2873 = vmax.xlane.f32.xlu2 %v2872_v0  ;;  %v2854_v14 = vmax.f32 %v2838_v34, %v2846_v1  ;;  %v3361_v0 = vadd.f32 %v7976_v56, %v3345_v13  ;;  %v8124_v34 = vadd.f32 %v8121_v45, %v2856_v22  ;;  %v3086_v1 = vmul.f32 0.2, %v3078_v32 }
 0xc86   :  { %2876 = vmax.xlane.f32.xlu1 %v2875_v42  ;;  %v2855_v42 = vmax.f32 %v2839_v49, %v2847_v2  ;;  %v8132_v49 = vld [vmem:[%s9248_s1 + $0x28] sm:$0xff]  ;;  %v3353_v2 = vpop.permute.xlu2 %3352 }
 0xc87   :  { %v8127_v13 = vadd.f32 %v8077_v62, %v2854_v14  ;;  %v3369_v57 = vmul.f32 0.2, %v3361_v0  ;;  %v2884_v14 = vsel %vm394_vm1, %v8124_v34, -inf  ;;  %v3094_v41 = vmax.f32 %v3078_v32, %v3086_v1 }
 0xc88   :  { %v8135_v53 = vadd.f32 %v8132_v49, %v2855_v42  ;;  %v3370_v32 = vmul.f32 0.2, %v3362_v31 }
 0xc89   :  { %v3377_v26 = vmax.f32 %v3361_v0, %v3369_v57  ;;  %v8159_v36 = vadd.f32 %v8132_v49, %v3094_v41 }
 0xc8a   :  { %v2881_v42 = vsel %vm394_vm1, %v8135_v53, -inf  ;;  %v3378_v41 = vmax.f32 %v3362_v31, %v3370_v32  ;;  %v3643_v31 = vadd.f32 %v7979_v44, %v8017_v25 }
 0xc8b   :  { %v8156_v0 = vadd.f32 %v8132_v49, %v3377_v26  ;;  %v3120_v26 = vsel %vm394_vm1, %v8159_v36, -inf }
 0xc8d   :  { %3401 = vmax.xlane.f32.xlu0 %v3400_v20  ;;  %3395 = vmax.xlane.f32.xlu2 %v3394_v8  ;;  %v3066_v20 = vpop.permute.xlu1 %3065  ;;  %v3363_v8 = vadd.f32 %v7976_v56, %v3353_v2  ;;  %v3403_v1 = vsel %vm394_vm1, %v8156_v0, -inf }
 0xc8e   :  { %3398 = vmax.xlane.f32.xlu1 %v3397_v43  ;;  %v3079_v22 = vadd.f32 %v7973_v33, %v3066_v20  ;;  %v2878_v43 = vsel %vm394_vm1, %v8127_v13, -inf  ;;  %v8150_v20 = vld [vmem:[%s9248_s1 + $0x38] sm:$0xff] }
 0xc8f   :  { %v3371_v2 = vmul.f32 0.2, %v3363_v8  ;;  %v8153_v60 = vadd.f32 %v8150_v20, %v3096_v4  ;;  %v2841_v4 = vadd.f32 %v7970_v54, %v8072_v19  ;;  %v8180_v54 = vadd.f32 %v8121_v45, %v3378_v41 }
 0xc90   :  { %v3087_v33 = vmul.f32 0.2, %v3079_v22 }
 0xc91   :  { %v3379_v57 = vmax.f32 %v3363_v8, %v3371_v2  ;;  %v3126_v56 = vsel %vm394_vm1, %v8153_v60, -inf  ;;  %v3641_v8 = vadd.f32 %v7979_v44, %v7950_v46 }
 0xc92   :  { %v3095_v63 = vmax.f32 %v3079_v22, %v3087_v33 }
 0xc93   :  { %v8174_v22 = vadd.f32 %v8150_v20, %v3379_v57  ;;  %v3649_v19 = vmul.f32 0.2, %v3641_v8  ;;  %v3642_v57 = vadd.f32 %v7979_v44, %v7954_v40 }
 0xc95   :  { %2885 = vmax.xlane.f32.xlu0 %v2884_v14  ;;  %2879 = vmax.xlane.f32.xlu2 %v2878_v43  ;;  %v3640_v14 = vadd.f32 %v7979_v44, %v7948_v52  ;;  %v8177_v43 = vadd.f32 %v8121_v45, %v3095_v63  ;;  %v3409_v2 = vsel %vm394_vm1, %v8174_v22, -inf  ;;  %v3406_v63 = vsel %vm394_vm1, %v8180_v54, -inf }
 0xc96   :  { %2882 = vmax.xlane.f32.xlu1 %v2881_v42  ;;  %v2849_v42 = vmul.f32 0.2, %v2841_v4 }
 0xc97   :  { %v3648_v52 = vmul.f32 0.2, %v3640_v14  ;;  %v3123_v46 = vsel %vm394_vm1, %v8177_v43, -inf }
 0xc98   :  { %v2857_v32 = vmax.f32 %v2841_v4, %v2849_v42  ;;  %v3650_v4 = vmul.f32 0.2, %v3642_v57 }
 0xc99   :  { %v3656_v33 = vmax.f32 %v3640_v14, %v3648_v52  ;;  %v3636_v52 = vpop.permute.xlu1 %3635 }
 0xc9a   :  { %v8198_v14 = vadd.f32 %v8150_v20, %v2857_v32 }
 0xc9b   :  { %v8195_v25 = vadd.f32 %v8000_v55, %v3656_v33 }
 0xc9d   :  { %3127 = vmax.xlane.f32.xlu0 %v3126_v56  ;;  %3404 = vmax.xlane.f32.xlu2 %v3403_v1  ;;  %v3657_v56 = vmax.f32 %v3641_v8, %v3649_v19  ;;  %v3644_v1 = vadd.f32 %v7979_v44, %v8034_v10  ;;  %v3646_v8 = vadd.f32 %v7979_v44, %v3636_v52  ;;  %v3674_v10 = vsel %vm394_vm1, %v8195_v25, -inf }
 0xc9e   :  { %3121 = vmax.xlane.f32.xlu1 %v3120_v26  ;;  %v3651_v26 = vmul.f32 0.2, %v3643_v31  ;;  %v2887_v19 = vsel %vm394_vm1, %v8198_v14, -inf }
 0xc9f   :  { %v8201_v40 = vadd.f32 %v8022_v58, %v3657_v56  ;;  %v3652_v41 = vmul.f32 0.2, %v3644_v1  ;;  %v3654_v56 = vmul.f32 0.2, %v3646_v8 }
 0xca0   :  { %v3659_v42 = vmax.f32 %v3643_v31, %v3651_v26 }
 0xca1   :  { %v3677_v33 = vsel %vm394_vm1, %v8201_v40, -inf  ;;  %v3660_v32 = vmax.f32 %v3644_v1, %v3652_v41 }
 0xca2   :  { %v8213_v31 = vadd.f32 %v8077_v62, %v3659_v42 }
 0xca5   :  { %3410 = vmax.xlane.f32.xlu0 %v3409_v2  ;;  %3124 = vmax.xlane.f32.xlu2 %v3123_v46  ;;  %v3658_v2 = vmax.f32 %v3642_v57, %v3650_v4  ;;  %v3645_v46 = vadd.f32 %v7979_v44, %v7958_v38  ;;  %v8219_v57 = vadd.f32 %v8132_v49, %v3660_v32  ;;  %v3683_v38 = vsel %vm394_vm1, %v8213_v31, -inf }
 0xca6   :  { %3407 = vmax.xlane.f32.xlu1 %v3406_v63  ;;  %v3662_v4 = vmax.f32 %v3646_v8, %v3654_v56 }
 0xca7   :  { %v8216_v63 = vadd.f32 %v8049_v12, %v3658_v2  ;;  %v3653_v26 = vmul.f32 0.2, %v3645_v46  ;;  %v3686_v41 = vsel %vm394_vm1, %v8219_v57, -inf }
 0xca8   :  { %v8228_v52 = vadd.f32 %v8150_v20, %v3662_v4 }
 0xca9   :  { %v3680_v44 = vsel %vm394_vm1, %v8216_v63, -inf  ;;  %v3661_v1 = vmax.f32 %v3645_v46, %v3653_v26 }
 0xcab   :  { %v8231_v42 = vadd.f32 %v8121_v45, %v3661_v1 }
 0xcad   :  { %3675 = vmax.xlane.f32.xlu0 %v3674_v10  ;;  %2888 = vmax.xlane.f32.xlu2 %v2887_v19  ;;  %v3692_v10 = vsel %vm394_vm1, %v8228_v52, -inf  ;;  %v3689_v19 = vsel %vm394_vm1, %v8231_v42, -inf }
 0xcae   :  { %3678 = vmax.xlane.f32.xlu1 %v3677_v33 }
 0xcb5   :  { %3684 = vmax.xlane.f32.xlu0 %v3683_v38  ;;  %3681 = vmax.xlane.f32.xlu2 %v3680_v44 }
 0xcb6   :  { %3687 = vmax.xlane.f32.xlu1 %v3686_v41 }
 0xcbd   :  { %3693 = vmax.xlane.f32.xlu0 %v3692_v10  ;;  %3690 = vmax.xlane.f32.xlu2 %v3689_v19 }
 0xccf   :  { %3723 = vrot.lane.b32.xlu1 %v7807_v27, %s6281_s13 }
 0xcd1   :  { %3727 = vrot.lane.b32.xlu0 %v7823_v6, %s6281_s13 }
 0xcd5   :  { %3725 = vrot.lane.b32.xlu2 %v7815_v7, %s6281_s13 }
 0xcd7   :  { %3894 = vperm.xlu1 %5667, %v7851_v29  }
 0xcd9   :  { %3729 = vrot.lane.b32.xlu0 %v7831_v3, %s6281_s13 }
 0xcdd   :  { %3898 = vperm.xlu2 %5668, %v7865_v9  }
 0xcdf   :  { %3902 = vperm.xlu1 %5667, %v7872_v37  }
 0xce0   :  { %v8244_v8 = vpop.xlane.xlu2 %3672  ;;  %v3393_v2 = vpop.xlane.xlu0 %3392 }
 0xce1   :  { %v2868_v46 = vpop.xlane.xlu1 %2867  ;;  %3890 = vperm.xlu0 %5666, %v7847_v21   ;;  %v3413_v1 = vsub.f32 %v8003_v15, %v3393_v2 }
 0xce2   :  { %v2890_v33 = vsub.f32 %v8006_v28, %v2868_v46  ;;  %v9391_v28 = vmov 5  }
 0xce3   :  { %v3422_v10 = vmul.f32 1.442695, %v3413_v1 }
 0xce4   :  { %v2898_v26 = vmul.f32 1.442695, %v2890_v33 }
 0xce5   :  { %3906 = vperm.xlu2 %5668, %v7879_v18  }
 0xce6   :  { %5952 = vpow2.f32 %v2898_v26 }
 0xce7   :  { %3914 = vperm.xlu1 %5667, %v7896_v16   ;;  %v9392_v16 = vmov 6  }
 0xce8   :  { %v3113_v32 = vpop.xlane.xlu0 %3112  ;;  %v2871_v56 = vpop.xlane.xlu2 %2870 }
 0xce9   :  { %v2891_v38 = vsub.f32 %v8028_v61, %v2871_v56  ;;  %v3107_v44 = vpop.xlane.xlu1 %3106  ;;  %3910 = vperm.xlu0 %5666, %v7888_v11  }
 0xcea   :  { %v3129_v41 = vsub.f32 %v8031_v35, %v3107_v44 }
 0xceb   :  { %v2900_v4 = vmul.f32 1.442695, %v2891_v38 }
 0xcec   :  { %v3137_v33 = vmul.f32 1.442695, %v3129_v41  ;;  %v5953_v15 = vpop.eup %5952 }
 0xced   :  { %3918 = vperm.xlu2 %5668, %v7918_v17   ;;  %5954 = vpow2.f32 %v2900_v4 }
 0xcee   :  { %5956 = vpow2.f32 %v3422_v10 }
 0xcef   :  { %5670 = vset.pattern.permute.xlu1 %v9391_v28  ;;  %5958 = vpow2.f32 %v3137_v33 }
 0xcf0   :  { %v3116_v19 = vpop.xlane.xlu0 %3115  ;;  %v3110_v46 = vpop.xlane.xlu2 %3109 }
 0xcf1   :  { %v3130_v61 = vsub.f32 %v8055_v48, %v3110_v46  ;;  %v3390_v56 = vpop.xlane.xlu1 %3389  ;;  %5674 = vset.pattern.permute.xlu0 %v9392_v16 }
 0xcf2   :  { %v3412_v38 = vsub.f32 %v8058_v30, %v3390_v56 }
 0xcf3   :  { %v3139_v2 = vmul.f32 1.442695, %v3130_v61  ;;  %v5955_v26 = vpop.eup %5954 }
 0xcf4   :  { %v3420_v35 = vmul.f32 1.442695, %v3412_v38  ;;  %v2914_v44 = vpack.c.bf16 %v5955_v26, %v5953_v15  ;;  %v5957_v46 = vpop.eup %5956  ;;  %v3132_v38 = vsub.f32 %v8052_v51, %v3116_v19 }
 0xcf5   :  { %5669 = vset.pattern.permute.xlu2 %v9391_v28  ;;  %5960 = vpow2.f32 %v3139_v2  ;;  %v5959_v61 = vpop.eup %5958  ;;  %v3131_v2 = vsub.f32 %v8025_v47, %v3113_v32 }
 0xcf6   :  { %5962 = vpow2.f32 %v3420_v35  ;;  %5462 = vmatmul.msk.bf16.vlgmr.msrb.gmra.mxu2 %vm394_vm1, %v2914_v44 }
 0xcf8   :  { %v3119_v4 = vpop.xlane.xlu0 %3118  ;;  %v2874_v48 = vpop.xlane.xlu2 %2873 }
 0xcf9   :  { %v2892_v1 = vsub.f32 %v8083_v50, %v2874_v48  ;;  %v2877_v41 = vpop.xlane.xlu1 %2876  ;;  %v3143_v50 = vmul.f32 1.442695, %v3132_v38  ;;  %v3141_v48 = vmul.f32 1.442695, %v3131_v2 }
 0xcfa   :  { %v2893_v30 = vsub.f32 %v8086_v39, %v2877_v41 }
 0xcfb   :  { %v2902_v56 = vmul.f32 1.442695, %v2892_v1  ;;  %v5961_v10 = vpop.eup %5960 }
 0xcfc   :  { %v2904_v33 = vmul.f32 1.442695, %v2893_v30  ;;  %v5963_v15 = vpop.eup %5962  ;;  %v3153_v26 = vpack.c.bf16 %v5961_v10, %v5959_v61 }
 0xcfd   :  { %v3436_v35 = vpack.c.bf16 %v5957_v46, %v5963_v15  ;;  %5964 = vpow2.f32 %v2902_v56 }
 0xcfe   :  { %5966 = vpow2.f32 %v2904_v33  ;;  %5466 = vmatmul.msk.bf16.vlgmr.msra.gmra.mxu3 %vm394_vm1, %v3153_v26  ;;  %v3133_v26 = vsub.f32 %v8080_v5, %v3119_v4 }
 0xcff   :  { %5470 = vmatmul.msk.bf16.vlgmr.msrb.gmra.mxu0 %vm394_vm1, %v3436_v35  ;;  %5968 = vpow2.f32 %v3143_v50 }
 0xd00   :  { %v3402_v44 = vpop.xlane.xlu0 %3401  ;;  %v3396_v39 = vpop.xlane.xlu2 %3395  ;;  %5970 = vpow2.f32 %v3141_v48 }
 0xd01   :  { %v3414_v1 = vsub.f32 %v8103_v59, %v3396_v39  ;;  %v3399_v41 = vpop.xlane.xlu1 %3398  ;;  %v3416_v39 = vsub.f32 %v8100_v23, %v3402_v44 }
 0xd02   :  { %v3415_v51 = vsub.f32 %v8106_v24, %v3399_v41 }
 0xd03   :  { %v3424_v19 = vmul.f32 1.442695, %v3414_v1  ;;  %v5965_v30 = vpop.eup %5964 }
 0xd04   :  { %v3426_v47 = vmul.f32 1.442695, %v3415_v51  ;;  %v5967_v32 = vpop.eup %5966  ;;  %v3428_v51 = vmul.f32 1.442695, %v3416_v39 }
 0xd05   :  { %5972 = vpow2.f32 %v3424_v19  ;;  %v2915_v46 = vpack.c.bf16 %v5967_v32, %v5965_v30  ;;  %v5969_v59 = vpop.eup %5968 }
 0xd06   :  { %5974 = vpow2.f32 %v3426_v47  ;;  %v5971_v24 = vpop.eup %5970 }
 0xd07   :  { %5463 = vmatmul.msk.bf16.gmra.mxu2 %vm394_vm1, %v2915_v46  ;;  %v3154_v48 = vpack.c.bf16 %v5969_v59, %v5971_v24 }
 0xd08   :  { %v2886_v61 = vpop.xlane.xlu0 %2885  ;;  %v2880_v56 = vpop.xlane.xlu2 %2879 }
 0xd09   :  { %v2894_v10 = vsub.f32 %v8127_v13, %v2880_v56  ;;  %v2883_v38 = vpop.xlane.xlu1 %2882  ;;  %v3145_v13 = vmul.f32 1.442695, %v3133_v26 }
 0xd0a   :  { %v2895_v33 = vsub.f32 %v8135_v53, %v2883_v38  ;;  %v2896_v38 = vsub.f32 %v8124_v34, %v2886_v61 }
 0xd0b   :  { %v2906_v15 = vmul.f32 1.442695, %v2894_v10  ;;  %v5973_v2 = vpop.eup %5972 }
 0xd0c   :  { %v2908_v35 = vmul.f32 1.442695, %v2895_v33  ;;  %v5975_v50 = vpop.eup %5974 }
 0xd0d   :  { %5976 = vpow2.f32 %v2906_v15  ;;  %v3437_v1 = vpack.c.bf16 %v5975_v50, %v5973_v2 }
 0xd0e   :  { %5978 = vpow2.f32 %v2908_v35  ;;  %5467 = vmatmul.msk.bf16.gmra.mxu3 %vm394_vm1, %v3154_v48  ;;  %v2910_v35 = vmul.f32 1.442695, %v2896_v38  ;;  %v9393_v38 = vld [vmem:[#allocation16_spill] sm:$0xff] }
 0xd0f   :  { %5471 = vmatmul.msk.bf16.gmra.mxu0 %vm394_vm1, %v3437_v1  ;;  %5980 = vpow2.f32 %v3145_v13 }
 0xd10   :  { %v3128_v41 = vpop.xlane.xlu0 %3127  ;;  %v3405_v53 = vpop.xlane.xlu2 %3404  ;;  %5982 = vpow2.f32 %v3428_v51 }
 0xd11   :  { %v3417_v19 = vsub.f32 %v8156_v0, %v3405_v53  ;;  %v3122_v30 = vpop.xlane.xlu1 %3121  ;;  %v3136_v39 = vsub.f32 %v8153_v60, %v3128_v41 }
 0xd12   :  { %v3134_v5 = vsub.f32 %v8159_v36, %v3122_v30 }
 0xd13   :  { %v3430_v4 = vmul.f32 1.442695, %v3417_v19  ;;  %v5977_v47 = vpop.eup %5976 }
 0xd14   :  { %v3147_v23 = vmul.f32 1.442695, %v3134_v5  ;;  %v5979_v44 = vpop.eup %5978 }
 0xd15   :  { %5984 = vpow2.f32 %v3430_v4  ;;  %v2916_v32 = vpack.c.bf16 %v5979_v44, %v5977_v47  ;;  %v5981_v10 = vpop.eup %5980 }
 0xd16   :  { %5986 = vpow2.f32 %v3147_v23  ;;  %v5983_v59 = vpop.eup %5982 }
 0xd17   :  { %5464 = vmatmul.msk.bf16.gmra.mxu2 %vm394_vm1, %v2916_v32  ;;  %5988 = vpow2.f32 %v2910_v35 }
 0xd18   :  { %v3411_v46 = vpop.xlane.xlu0 %3410  ;;  %v3125_v56 = vpop.xlane.xlu2 %3124 }
 0xd19   :  { %v3408_v0 = vpop.xlane.xlu1 %3407  ;;  %v3419_v36 = vsub.f32 %v8174_v22, %v3411_v46  ;;  %v3135_v24 = vsub.f32 %v8177_v43, %v3125_v56  ;;  %v3151_v43 = vmul.f32 1.442695, %v3136_v39 }
 0xd1a   :  { %v3418_v2 = vsub.f32 %v8180_v54, %v3408_v0  ;;  %v3921_v0 = vperm.slane %v9393_v38, 4 }
 0xd1b   :  { %v5985_v33 = vpop.eup %5984  ;;  %v3434_v48 = vmul.f32 1.442695, %v3419_v36  ;;  %v3149_v1 = vmul.f32 1.442695, %v3135_v24 }
 0xd1c   :  { %v5987_v15 = vpop.eup %5986  ;;  %v3438_v26 = vpack.c.bf16 %v5985_v33, %v5983_v59  ;;  %v3432_v61 = vmul.f32 1.442695, %v3418_v2 }
 0xd1d   :  { %v3155_v50 = vpack.c.bf16 %v5987_v15, %v5981_v10  ;;  %5990 = vpow2.f32 %v3434_v48  ;;  %v5989_v60 = vpop.eup %5988 }
 0xd1e   :  { %5992 = vpow2.f32 %v3149_v1  ;;  %v9394_v1 = vld [vmem:[#allocation19_spill] sm:$0xff] }
 0xd1f   :  { %5468 = vmatmul.msk.bf16.gmra.mxu3 %vm394_vm1, %v3155_v50  ;;  %5472 = vmatmul.msk.bf16.gmra.mxu0 %vm394_vm1, %v3438_v26  ;;  %5994 = vpow2.f32 %v3432_v61 }
 0xd20   :  { %v2889_v34 = vpop.xlane.xlu2 %2888  ;;  %v3676_v54 = vpop.xlane.xlu0 %3675 }
 0xd21   :  { %v2897_v22 = vsub.f32 %v8198_v14, %v2889_v34  ;;  %v8289_v23 = vpop.xlane.xlu1 %3678  ;;  %v3696_v35 = vsub.f32 %v8195_v25, %v3676_v54  ;;  %v3695_v34 = vsub.f32 %v9394_v1, %v8244_v8 }
 0xd23   :  { %v2912_v13 = vmul.f32 1.442695, %v2897_v22  ;;  %v5991_v53 = vpop.eup %5990 }
 0xd24   :  { %v5993_v51 = vpop.eup %5992 }
 0xd25   :  { %5996 = vpow2.f32 %v2912_v13  ;;  %v5995_v19 = vpop.eup %5994  ;;  %v3705_v13 = vmul.f32 1.442695, %v3696_v35 }
 0xd26   :  { %5998 = vpow2.f32 %v3151_v43  ;;  %v3439_v14 = vpack.c.bf16 %v5991_v53, %v5995_v19 }
 0xd27   :  { %6000 = vpow2.f32 %v3705_v13 }
 0xd28   :  { %v8287_v41 = vpop.xlane.xlu2 %3681  ;;  %v8296_v32 = vpop.xlane.xlu0 %3684 }
 0xd29   :  { %v8298_v56 = vpop.xlane.xlu1 %3687 }
 0xd2b   :  { %v5997_v30 = vpop.eup %5996 }
 0xd2c   :  { %v5999_v5 = vpop.eup %5998  ;;  %v2917_v4 = vpack.c.bf16 %v5997_v30, %v5989_v60 }
 0xd2d   :  { %v3156_v47 = vpack.c.bf16 %v5999_v5, %v5993_v51 }
 0xd2e   :  { %5465 = vmatmul.msk.bf16.gmra.mxu2 %vm394_vm1, %v2917_v4 }
 0xd2f   :  { %5469 = vmatmul.msk.bf16.gmra.mxu3 %vm394_vm1, %v3156_v47  ;;  %5473 = vmatmul.msk.bf16.gmra.mxu0 %vm394_vm1, %v3439_v14 }
 0xd30   :  { %v8294_v44 = vpop.xlane.xlu2 %3690  ;;  %v8300_v10 = vpop.xlane.xlu0 %3693 }
 0xd38   :  { %v3726_v46 = vpop.permute.xlu2 %3725 }
 0xd39   :  { %v3735_v14 = vsel %vm2918_vm9, %v3726_v46, 1065369472 }
 0xd40   :  { %v3899_v59 = vpop.permute.xlu2 %3898 }
 0xd41   :  { %v3924_v36 = vadd.f32 %v3921_v0, %v3899_v59  ;;  %v3724_v33 = vpop.permute.xlu1 %3723 }
 0xd43   :  { %v3932_v24 = vmul.f32 0.2, %v3924_v36  ;;  %v3728_v15 = vpop.permute.xlu0 %3727 }
 0xd44   :  { %v3738_v25 = vsel %vm2918_vm9, %v3728_v15, 1065369472 }
 0xd45   :  { %v3940_v2 = vmax.f32 %v3924_v36, %v3932_v24 }
 0xd47   :  { %v8304_v26 = vadd.f32 %v8022_v58, %v3940_v2  ;;  %v3703_v58 = vmul.f32 1.442695, %v3695_v34  ;;  %v3732_v2 = vsel %vm2918_vm9, %v3724_v33, 1065369472  ;;  %v3697_v33 = vsub.f32 %v8201_v40, %v8289_v23 }
 0xd48   :  { %v3907_v53 = vpop.permute.xlu2 %3906 }
 0xd49   :  { %v3895_v50 = vpop.permute.xlu1 %3894  ;;  %v3960_v39 = vsel %vm394_vm1, %v8304_v26, -inf  ;;  %6002 = vpow2.f32 %v3703_v58  ;;  %v3926_v30 = vadd.f32 %v3921_v0, %v3907_v53 }
 0xd4a   :  { %v3923_v48 = vadd.f32 %v3921_v0, %v3895_v50  ;;  %3961 = vmax.xlane.f32.xlu2 %v3960_v39  ;;  %v3698_v39 = vsub.f32 %v8216_v63, %v8287_v41 }
 0xd4b   :  { %v3730_v61 = vpop.permute.xlu0 %3729  ;;  %v3934_v24 = vmul.f32 0.2, %v3926_v30 }
 0xd4c   :  { %v3931_v22 = vmul.f32 0.2, %v3923_v48  ;;  %v3741_v43 = vsel %vm2918_vm9, %v3730_v61, 1065369472  ;;  %v3709_v53 = vmul.f32 1.442695, %v3698_v39 }
 0xd4d   :  { %3759 = vmatpush.bf16.msrb.mxu1 %v3741_v43 }
 0xd4e   :  { %v3939_v60 = vmax.f32 %v3923_v48, %v3931_v22  ;;  %v9395_v22 = vld [vmem:[#allocation23_spill] sm:$0xff]  ;;  %6004 = vpow2.f32 %v3709_v53 }
 0xd50   :  { %v8314_v54 = vadd.f32 %v8000_v55, %v3939_v60  ;;  %v6001_v55 = vpop.eup %6000  ;;  %v3919_v48 = vpop.permute.xlu2 %3918 }
 0xd51   :  { %v3903_v51 = vpop.permute.xlu1 %3902  ;;  %3760 = vmatpush.bf16.msrb.mxu1 %v3738_v25  ;;  %v6003_v50 = vpop.eup %6002  ;;  %v3929_v60 = vadd.f32 %v3921_v0, %v3919_v48 }
 0xd52   :  { %v3925_v19 = vadd.f32 %v3921_v0, %v3903_v51  ;;  %v3957_v8 = vsel %vm394_vm1, %v8314_v54, -inf  ;;  %v3719_v34 = vpack.c.bf16 %v6001_v55, %v6003_v50 }
 0xd53   :  { %3958 = vmax.xlane.f32.xlu1 %v3957_v8  ;;  %v3891_v5 = vpop.permute.xlu0 %3890  ;;  %v3937_v8 = vmul.f32 0.2, %v3929_v60 }
 0xd54   :  { %v3933_v4 = vmul.f32 0.2, %v3925_v19  ;;  %v3922_v47 = vadd.f32 %v3921_v0, %v3891_v5 }
 0xd55   :  { %3761 = vmatpush.bf16.msrb.mxu1 %v3735_v14  ;;  %v3699_v14 = vsub.f32 %v8213_v31, %v8296_v32  ;;  %v3701_v32 = vsub.f32 %v8231_v42, %v8294_v44 }
 0xd56   :  { %v3941_v59 = vmax.f32 %v3925_v19, %v3933_v4  ;;  %v3930_v36 = vmul.f32 0.2, %v3922_v47  ;;  %v3707_v19 = vmul.f32 1.442695, %v3697_v33  ;;  %v3945_v4 = vmax.f32 %v3929_v60, %v3937_v8 }
 0xd57   :  { %v3715_v39 = vmul.f32 1.442695, %v3701_v32 }
 0xd58   :  { %v3938_v15 = vmax.f32 %v3922_v47, %v3930_v36  ;;  %v8321_v35 = vadd.f32 %v8049_v12, %v3941_v59  ;;  %v3942_v12 = vmax.f32 %v3926_v30, %v3934_v24  ;;  %6006 = vpow2.f32 %v3707_v19 }
 0xd59   :  { %v3915_v1 = vpop.permute.xlu1 %3914  ;;  %3762 = vmatpush.bf16.msrb.mxu1 %v3732_v2  ;;  %v8353_v59 = vadd.f32 %v8150_v20, %v3945_v4  ;;  %v3700_v36 = vsub.f32 %v8219_v57, %v8298_v56  ;;  %v3711_v24 = vmul.f32 1.442695, %v3699_v14  ;;  %v3702_v20 = vsub.f32 %v8228_v52, %v8300_v10 }
 0xd5a   :  { %v3928_v46 = vadd.f32 %v3921_v0, %v3915_v1  ;;  %v3963_v61 = vsel %vm394_vm1, %v8321_v35, -inf  ;;  %v8328_v43 = vadd.f32 %v9395_v22, %v3938_v15  ;;  %v8339_v23 = vadd.f32 %v8077_v62, %v3942_v12  ;;  %v6005_v62 = vpop.eup %6004 }
 0xd5b   :  { %3964 = vmax.xlane.f32.xlu2 %v3963_v61  ;;  %v3911_v13 = vpop.permute.xlu0 %3910  ;;  %v3975_v15 = vsel %vm394_vm1, %v8353_v59, -inf  ;;  %v3713_v2 = vmul.f32 1.442695, %v3700_v36  ;;  %6008 = vpow2.f32 %v3711_v24  ;;  %v3717_v56 = vmul.f32 1.442695, %v3702_v20 }
 0xd5c   :  { %v3936_v58 = vmul.f32 0.2, %v3928_v46  ;;  %v3927_v63 = vadd.f32 %v3921_v0, %v3911_v13  ;;  %5474 = vmatmul.msk.bf16.vlgmr.msrb.gmra.mxu1 %vm394_vm1, %v3719_v34  ;;  %v3954_v41 = vsel %vm394_vm1, %v8328_v43, -inf  ;;  %v3966_v47 = vsel %vm394_vm1, %v8339_v23, -inf }
 0xd5d   :  { %3955 = vmax.xlane.f32.xlu0 %v3954_v41  ;;  %6010 = vpow2.f32 %v3713_v2  ;;  %v9317_v34 = vmov 8  }
 0xd5e   :  { %v3944_v25 = vmax.f32 %v3928_v46, %v3936_v58  ;;  %v3935_v51 = vmul.f32 0.2, %v3927_v63  ;;  %6012 = vpow2.f32 %v3717_v56  ;;  %v9396_v46 = vmov 7  }
 0xd5f   :  { %6014 = vpow2.f32 %v3715_v39 }
 0xd60   :  { %v3943_v5 = vmax.f32 %v3927_v63, %v3935_v51  ;;  %v8336_v40 = vadd.f32 %v8121_v45, %v3944_v25 }
 0xd62   :  { %v3972_v0 = vsel %vm394_vm1, %v8336_v40, -inf  ;;  %v8344_v30 = vadd.f32 %v8132_v49, %v3943_v5  ;;  %v6007_v49 = vpop.eup %6006 }
 0xd63   :  { %3973 = vmax.xlane.f32.xlu2 %v3972_v0  ;;  %v3720_v55 = vpack.c.bf16 %v6005_v62, %v6007_v49  ;;  %v6009_v50 = vpop.eup %6008 }
 0xd64   :  { %v3969_v45 = vsel %vm394_vm1, %v8344_v30, -inf  ;;  %v6011_v31 = vpop.eup %6010 }
 0xd65   :  { %3967 = vmax.xlane.f32.xlu0 %v3966_v47  ;;  %3970 = vmax.xlane.f32.xlu1 %v3969_v45  ;;  %v3721_v57 = vpack.c.bf16 %v6011_v31, %v6009_v50  ;;  %v6013_v52 = vpop.eup %6012 }
 0xd66   :  { %v6015_v42 = vpop.eup %6014 }
 0xd67   :  { %v3722_v10 = vpack.c.bf16 %v6013_v52, %v6015_v42 }
 0xd6c   :  { %5475 = vmatmul.msk.bf16.gmra.mxu1 %vm394_vm1, %v3720_v55 }
 0xd6d   :  { %3976 = vmax.xlane.f32.xlu0 %v3975_v15 }
 0xd79   :  { %v8407_v58 = vpop.f32.mrf.mxu2 }
 0xd7b   :  { %4008 = vrot.lane.b32.xlu2 %v7815_v7, %s6266_s3 }
 0xd7c   :  { %5476 = vmatmul.msk.bf16.gmra.mxu1 %vm394_vm1, %v3721_v57  ;;  %v8374_v44 = vpop.f32.mrf.mxu0 }
 0xd7d   :  { %6016 = vrcp.f32 %v8374_v44 }
 0xd7e   :  { %4006 = vrot.lane.b32.xlu1 %v7807_v27, %s6266_s3 }
 0xd81   :  { %4010 = vrot.lane.b32.xlu0 %v7823_v6, %s6266_s3  ;;  %v8382_v48 = vpop.f32.mrf.mxu3  ;;  %v8420_v8 = vpop.f32.mrf.mxu2 }
 0xd82   :  { %6018 = vrcp.f32 %v8382_v48 }
 0xd83   :  { %4173 = vperm.xlu2 %5669, %v7847_v21   ;;  %v6017_v1 = vpop.eup %6016 }
 0xd84   :  { %v8397_v22 = vpop.f32.mrf.mxu0 }
 0xd86   :  { %4012 = vrot.lane.b32.xlu1 %v7831_v3, %s6266_s3  ;;  %s6283_s3 = smov 8  }
 0xd88   :  { %v6019_v61 = vpop.eup %6018 }
 0xd89   :  { %4468 = vperm.xlu0 %5674, %v7872_v37   ;;  %v8399_v33 = vpop.f32.mrf.mxu3 }
 0xd8a   :  { %v8437_v36 = vpop.f32.mrf.mxu2 }
 0xd8b   :  { %5671 = vset.pattern.permute.xlu2 %v9392_v16 }
 0xd8c   :  { %4456 = vperm.xlu2 %5671, %v7847_v21   ;;  %5477 = vmatmul.msk.bf16.gmra.mxu1 %vm394_vm1, %v3722_v10  ;;  %v8401_v12 = vpop.f32.mrf.mxu0 }
 0xd8e   :  { %4177 = vperm.xlu1 %5670, %v7851_v29  }
 0xd91   :  { %5677 = vset.pattern.permute.xlu0 %v9317_v34  ;;  %v8403_v13 = vpop.f32.mrf.mxu3 }
 0xd92   :  { %3511 = vperm.xlu0 %5677, %v6017_v1  }
 0xd94   :  { %5672 = vset.pattern.permute.xlu2 %v9396_v46 }
 0xd95   :  { %4743 = vperm.xlu2 %5672, %v7851_v29  }
 0xd96   :  { %4181 = vperm.xlu1 %5670, %v7865_v9  }
 0xd99   :  { %v8418_v19 = vpop.f32.mrf.mxu3 }
 0xd9a   :  { %3228 = vperm.xlu0 %5677, %v6019_v61  }
 0xd9d   :  { %5673 = vset.pattern.permute.xlu2 %v9391_v28 }
 0xd9e   :  { %4185 = vperm.xlu2 %5673, %v7872_v37   ;;  %5676 = vset.pattern.permute.xlu1 %v9396_v46 }
 0xd9f   :  { %4751 = vperm.xlu1 %5676, %v7872_v37   ;;  %v8410_v37 = vpop.f32.mrf.mxu0 }
 0xda2   :  { %v8435_v49 = vpop.f32.mrf.mxu3 }
 0xda6   :  { %5675 = vset.pattern.permute.xlu2 %v9396_v46 }
 0xda7   :  { %4747 = vperm.xlu2 %5675, %v7865_v9   ;;  %5678 = vset.pattern.permute.xlu1 %v9317_v34  ;;  %v8422_v5 = vpop.f32.mrf.mxu0 }
 0xdaa   :  { %v8451_v39 = vpop.f32.mrf.mxu3 }
 0xdaf   :  { %5679 = vset.pattern.permute.xlu2 %v9317_v34  ;;  %v8439_v24 = vpop.f32.mrf.mxu0 }
 0xdbd   :  { %v8415_v51 = vpop.xlane.xlu2 %3961 }
 0xdc6   :  { %v3959_v53 = vpop.xlane.xlu1 %3958 }
 0xdc7   :  { %v3979_v42 = vsub.f32 %v8314_v54, %v3959_v53 }
 0xdce   :  { %v8431_v14 = vpop.xlane.xlu2 %3964 }
 0xdd0   :  { %v3956_v63 = vpop.xlane.xlu0 %3955 }
 0xdd1   :  { %v3978_v57 = vsub.f32 %v8328_v43, %v3956_v63  ;;  %v3988_v63 = vmul.f32 1.442695, %v3979_v42 }
 0xdd6   :  { %v8448_v32 = vpop.xlane.xlu2 %3973 }
 0xdd8   :  { %v8424_v47 = vpop.xlane.xlu0 %3967  ;;  %v8426_v45 = vpop.xlane.xlu1 %3970 }
 0xdd9   :  { %v8405_v60 = vpop.f32.mrf.mxu1 }
 0xdda   :  { %6020 = vrcp.f32 %v8405_v60 }
 0xddb   :  { %6022 = vrcp.f32 %v8407_v58 }
 0xdde   :  { %v4009_v53 = vpop.permute.xlu2 %4008 }
 0xde0   :  { %v6021_v41 = vpop.eup %6020  ;;  %v8445_v20 = vpop.xlane.xlu0 %3976 }
 0xde1   :  { %v8413_v25 = vpop.f32.mrf.mxu1  ;;  %3794 = vperm.xlu1 %5678, %v6021_v41   ;;  %v6023_v0 = vpop.eup %6022 }
 0xde2   :  { %6024 = vrcp.f32 %v8413_v25 }
 0xde3   :  { %6026 = vrcp.f32 %v8397_v22 }
 0xde8   :  { %v6025_v4 = vpop.eup %6024 }
 0xde9   :  { %v8429_v62 = vpop.f32.mrf.mxu1  ;;  %2978 = vperm.xlu1 %5678, %v6023_v0   ;;  %3799 = vperm.xlu2 %5679, %v6025_v4   ;;  %v6027_v55 = vpop.eup %6026  ;;  %v3986_v0 = vmul.f32 1.442695, %v3978_v57  ;;  %v4018_v57 = vsel %vm2918_vm9, %v4009_v53, 1065369472 }
 0xdea   :  { %6028 = vrcp.f32 %v8429_v62 }
 0xdeb   :  { %6030 = vrcp.f32 %v8420_v8 }
 0xdec   :  { %6032 = vrcp.f32 %v8437_v36 }
 0xded   :  { %6034 = vrcp.f32 %v8439_v24 }
 0xdee   :  { %6036 = vrcp.f32 %v8399_v33 }
 0xdef   :  { %6038 = vrcp.f32 %v8403_v13 }
 0xdf0   :  { %v6029_v15 = vpop.eup %6028  ;;  %v4007_v2 = vpop.permute.xlu1 %4006  ;;  %6040 = vrcp.f32 %v8451_v39 }
 0xdf1   :  { %v6031_v50 = vpop.eup %6030  ;;  %3804 = vperm.xlu0 %5677, %v6029_v15   ;;  %v8442_v31 = vpop.f32.mrf.mxu1  ;;  %3516 = vperm.xlu1 %5678, %v6027_v55   ;;  %6042 = vrcp.f32 %v8401_v12  ;;  %v4015_v42 = vsel %vm2918_vm9, %v4007_v2, 1065369472 }
 0xdf2   :  { %2983 = vperm.xlu2 %5679, %v6031_v50   ;;  %v6033_v56 = vpop.eup %6032  ;;  %6044 = vpow2.f32 %v3986_v0  ;;  %v8461_v15 = vpop.f32.mrf.mxu2 }
 0xdf3   :  { %v6035_v52 = vpop.eup %6034  ;;  %v4011_v43 = vpop.permute.xlu0 %4010  ;;  %6046 = vpow2.f32 %v3988_v63  ;;  %v3980_v63 = vsub.f32 %v8304_v26, %v8415_v51 }
 0xdf4   :  { %v6037_v1 = vpop.eup %6036  ;;  %v4021_v54 = vsel %vm2918_vm9, %v4011_v43, 1065369472  ;;  %6048 = vrcp.f32 %v8410_v37  ;;  %v8485_v51 = vpop.permute.xlu2 %4173 }
 0xdf5   :  { %v6039_v4 = vpop.eup %6038  ;;  %6050 = vrcp.f32 %v8461_v15 }
 0xdf6   :  { %v6041_v55 = vpop.eup %6040  ;;  %6052 = vrcp.f32 %v8442_v31 }
 0xdf7   :  { %v6043_v50 = vpop.eup %6042  ;;  %6054 = vrcp.f32 %v8418_v19 }
 0xdf8   :  { %v4013_v10 = vpop.permute.xlu1 %4012 }
 0xdf9   :  { %v4024_v61 = vsel %vm2918_vm9, %v4013_v10, 1065369472  ;;  %3536 = vperm.xlu0 %5677, %v6035_v52   ;;  %v8456_v41 = vpop.f32.mrf.mxu1  ;;  %2988 = vperm.xlu1 %5678, %v6033_v56   ;;  %v6045_v52 = vpop.eup %6044 }
 0xdfa   :  { %3233 = vperm.xlu2 %5679, %v6037_v1   ;;  %4042 = vmatpush.bf16.msra.mxu2 %v4024_v61  ;;  %v6047_v10 = vpop.eup %6046  ;;  %v3981_v1 = vsub.f32 %v8321_v35, %v8431_v14  ;;  %v8478_v53 = vpop.f32.mrf.mxu2  ;;  %v3990_v35 = vmul.f32 1.442695, %v3980_v63 }
 0xdfb   :  { %v4002_v61 = vpack.c.bf16 %v6047_v10, %v6045_v52  ;;  %v6049_v0 = vpop.eup %6048  ;;  %v8489_v52 = vpop.permute.xlu0 %4468  ;;  %v3983_v10 = vsub.f32 %v8344_v30, %v8426_v45 }
 0xdfc   :  { %v6051_v43 = vpop.eup %6050  ;;  %v3992_v2 = vmul.f32 1.442695, %v3981_v1 }
 0xdfd   :  { %v6053_v14 = vpop.eup %6052  ;;  %v3996_v63 = vmul.f32 1.442695, %v3983_v10 }
 0xdfe   :  { %4043 = vmatpush.bf16.msra.mxu2 %v4021_v54  ;;  %6056 = vpow2.f32 %v3992_v2 }
 0xdff   :  { %6058 = vrcp.f32 %v8478_v53 }
 0xe00   :  { %6060 = vpow2.f32 %v3990_v35 }
 0xe01   :  { %3253 = vperm.xlu0 %5677, %v6041_v55   ;;  %v8463_v56 = vpop.f32.mrf.mxu1  ;;  %3238 = vperm.xlu1 %5678, %v6039_v4   ;;  %v6055_v4 = vpop.eup %6054 }
 0xe02   :  { %3521 = vperm.xlu2 %5679, %v6043_v50   ;;  %4044 = vmatpush.bf16.msra.mxu2 %v4018_v57  ;;  %v3982_v57 = vsub.f32 %v8339_v23, %v8424_v47  ;;  %v8496_v23 = vpop.permute.xlu2 %4456  ;;  %v8498_v30 = vpop.f32.mrf.mxu2 }
 0xe04   :  { %v6057_v55 = vpop.eup %6056  ;;  %v3512_v45 = vpop.permute.xlu0 %3511 }
 0xe05   :  { %v6059_v50 = vpop.eup %6058 }
 0xe06   :  { %4045 = vmatpush.bf16.msra.mxu2 %v4015_v42  ;;  %v6061_v42 = vpop.eup %6060 }
 0xe09   :  { %v8473_v54 = vpop.f32.mrf.mxu1  ;;  %3526 = vperm.xlu1 %5678, %v6049_v0   ;;  %5478 = vmatmul.msk.bf16.vlgmr.msra.gmra.mxu2 %vm394_vm1, %v4002_v61  ;;  %v4003_v61 = vpack.c.bf16 %v6057_v55, %v6061_v42  ;;  %v8505_v55 = vpop.f32.mrf.mxu0 }
 0xe0a   :  { %2993 = vperm.xlu2 %5679, %v6051_v43   ;;  %v3994_v43 = vmul.f32 1.442695, %v3982_v57  ;;  %v8509_v57 = vpop.permute.xlu2 %4743 }
 0xe11   :  { %v8481_v26 = vpop.f32.mrf.mxu1  ;;  %3809 = vperm.xlu1 %5678, %v6053_v14  }
 0xe12   :  { %6062 = vrcp.f32 %v8481_v26  ;;  %3243 = vperm.xlu2 %5679, %v6055_v4   ;;  %v3549_v4 = vmul.f32 %v3512_v45, %v8374_v44  ;;  %v8523_v45 = vpop.permute.xlu2 %4185 }
 0xe13   :  { %6064 = vrcp.f32 %v8422_v5 }
 0xe14   :  { %6066 = vrcp.f32 %v8435_v49 }
 0xe15   :  { %6068 = vrcp.f32 %v8456_v41 }
 0xe16   :  { %6070 = vpow2.f32 %v3994_v43  ;;  %v3229_v43 = vpop.permute.xlu0 %3228 }
 0xe17   :  { %6072 = vpow2.f32 %v3996_v63  ;;  %v8519_v63 = vpop.f32.mrf.mxu2 }
 0xe18   :  { %v6063_v1 = vpop.eup %6062  ;;  %6074 = vrcp.f32 %v8463_v56 }
 0xe19   :  { %v6065_v0 = vpop.eup %6064  ;;  %3829 = vperm.xlu0 %5677, %v6063_v1   ;;  %2998 = vperm.xlu1 %5678, %v6059_v50   ;;  %6076 = vrcp.f32 %v8498_v30  ;;  %v3985_v50 = vsub.f32 %v8353_v59, %v8445_v20  ;;  %v3266_v20 = vmul.f32 %v3229_v43, %v8382_v48 }
 0xe1a   :  { %3531 = vperm.xlu2 %5679, %v6065_v0   ;;  %5479 = vmatmul.msk.bf16.gmra.mxu2 %vm394_vm1, %v4003_v61  ;;  %v6067_v47 = vpop.eup %6066  ;;  %v3984_v61 = vsub.f32 %v8336_v40, %v8448_v32  ;;  %v3557_v0 = vmax.f32 %v3549_v4, 0.0  ;;  %6078 = vrcp.f32 %v8505_v55  ;;  %v8521_v32 = vpop.f32.mrf.mxu3 }
 0xe1b   :  { %v6069_v2 = vpop.eup %6068  ;;  %v4000_v44 = vmul.f32 1.442695, %v3985_v50  ;;  %6080 = vrcp.f32 %v8473_v54  ;;  %v8530_v50 = vpop.f32.mrf.mxu0 }
 0xe1c   :  { %v6071_v35 = vpop.eup %6070  ;;  %v3998_v59 = vmul.f32 1.442695, %v3984_v61 }
 0xe1d   :  { %v6073_v14 = vpop.eup %6072  ;;  %6082 = vpow2.f32 %v4000_v44 }
 0xe1e   :  { %v6075_v42 = vpop.eup %6074  ;;  %v4004_v10 = vpack.c.bf16 %v6073_v14, %v6071_v35  ;;  %6084 = vpow2.f32 %v3998_v59  ;;  %v8528_v14 = vpop.permute.xlu1 %4177 }
 0xe1f   :  { %v6077_v1 = vpop.eup %6076  ;;  %6086 = vrcp.f32 %v8519_v63  ;;  %v8536_v61 = vpop.f32.mrf.mxu2 }
 0xe20   :  { %v6079_v40 = vpop.eup %6078  ;;  %6088 = vrcp.f32 %v8521_v32 }
 0xe21   :  { %5682 = vset.pattern.permute.xlu0 %v9392_v16  ;;  %3248 = vperm.xlu1 %5678, %v6067_v47   ;;  %v6081_v47 = vpop.eup %6080  ;;  %6090 = vrcp.f32 %v8530_v50 }
 0xe22   :  { %3814 = vperm.xlu2 %5679, %v6069_v2   ;;  %4472 = vperm.xlu0 %5682, %v7879_v18   ;;  %v3274_v2 = vmax.f32 %v3266_v20, 0.0  ;;  %6092 = vrcp.f32 %v8536_v61  ;;  %v8543_v20 = vpop.f32.mrf.mxu3 }
 0xe23   :  { %v6083_v48 = vpop.eup %6082  ;;  %6094 = vrcp.f32 %v8543_v20 }
 0xe24   :  { %v6085_v35 = vpop.eup %6084 }
 0xe25   :  { %v6087_v4 = vpop.eup %6086 }
 0xe26   :  { %v8538_v43 = vpop.permute.xlu1 %4181 }
 0xe29   :  { %3819 = vperm.xlu1 %5678, %v6075_v42   ;;  %v4005_v42 = vpack.c.bf16 %v6083_v48, %v6085_v35 }
 0xe2a   :  { %3003 = vperm.xlu2 %5679, %v6077_v1   ;;  %5480 = vmatmul.msk.bf16.gmra.mxu2 %vm394_vm1, %v4004_v10  ;;  %v6089_v10 = vpop.eup %6088  ;;  %v8534_v1 = vpop.permute.xlu2 %4747 }
 0xe2b   :  { %3573 = vrot.lane.b32.xlu0 %v3557_v0, %s6278_s19  ;;  %9397 = vst [vmem:[#allocation21_spill] sm:$0xff] %v8534_v1  ;;  %v6091_v0 = vpop.eup %6090 }
 0xe2c   :  { %5690 = vset.pattern.permute.xlu0 %v9396_v46  ;;  %v6093_v59 = vpop.eup %6092 }
 0xe2d   :  { %v6095_v35 = vpop.eup %6094 }
 0xe31   :  { %3541 = vperm.xlu1 %5678, %v6079_v40   ;;  %v8546_v40 = vpop.permute.xlu1 %4751 }
 0xe32   :  { %3824 = vperm.xlu2 %5679, %v6081_v47  }
 0xe33   :  { %3290 = vrot.lane.b32.xlu0 %v3274_v2, %s6283_s3 }
 0xe39   :  { %3008 = vperm.xlu1 %5678, %v6087_v4  }
 0xe3a   :  { %3258 = vperm.xlu2 %5679, %v6089_v10   ;;  %5481 = vmatmul.msk.bf16.gmra.mxu2 %vm394_vm1, %v4005_v42 }
 0xe41   :  { %5681 = vset.pattern.permute.xlu1 %v9391_v28 }
 0xe42   :  { %3546 = vperm.xlu2 %5679, %v6091_v0   ;;  %4193 = vperm.xlu1 %5681, %v7888_v11  }
 0xe43   :  { %v3800_v44 = vpop.permute.xlu2 %3799 }
 0xe4a   :  { %3013 = vperm.xlu2 %5679, %v6093_v59   ;;  %5684 = vset.pattern.permute.xlu1 %v9396_v46  ;;  %v9398_v59 = vld [vmem:[#allocation20_spill] sm:$0xff] }
 0xe4b   :  { %4755 = vperm.xlu1 %5684, %v7879_v18  }
 0xe4c   :  { %v2984_v47 = vpop.permute.xlu2 %2983 }
 0xe4d   :  { %v3017_v2 = vmul.f32 %v2984_v47, %v8420_v8 }
 0xe4f   :  { %v3025_v48 = vmax.f32 %v3017_v2, 0.0 }
 0xe51   :  { %3033 = vst.msk [vmem:[#allocation3 + $0x8] sm:$0xff] %vm2918_vm9, %v3025_v48 }
 0xe52   :  { %5680 = vset.pattern.permute.xlu2 %v9391_v28 }
 0xe53   :  { %4189 = vperm.xlu2 %5680, %v7879_v18   ;;  %5685 = vset.pattern.permute.xlu1 %v9317_v34  ;;  %v8555_v4 = vpop.permute.xlu1 %3794 }
 0xe54   :  { %v3234_v42 = vpop.permute.xlu2 %3233  ;;  %3263 = vperm.xlu1 %5685, %v6095_v35  }
 0xe5b   :  { %5683 = vset.pattern.permute.xlu2 %v9392_v16  ;;  %v2979_v10 = vpop.permute.xlu1 %2978 }
 0xe5c   :  { %4476 = vperm.xlu2 %5683, %v7888_v11   ;;  %v3522_v8 = vpop.permute.xlu2 %3521  ;;  %v3016_v0 = vmul.f32 %v2979_v10, %v8407_v58  ;;  %5686 = vset.pattern.permute.xlu1 %v9391_v28 }
 0xe5d   :  { %4197 = vperm.xlu1 %5686, %v9398_v59  }
 0xe5e   :  { %v3024_v47 = vmax.f32 %v3016_v0, 0.0 }
 0xe60   :  { %3032 = vst.msk [vmem:[#allocation3] sm:$0xff] %vm2918_vm9, %v3024_v47 }
 0xe63   :  { %v3805_v18 = vpop.permute.xlu0 %3804  ;;  %v8563_v2 = vpop.permute.xlu1 %3516 }
 0xe64   :  { %v3834_v48 = vmul.f32 %v3805_v18, %v8429_v62  ;;  %4295 = vrot.lane.b32.xlu2 %v7831_v3, %s6284_s14  ;;  %v2994_v35 = vpop.permute.xlu2 %2993  ;;  %v3833_v18 = vmul.f32 %v3800_v44, %v8413_v25  ;;  %v3267_v25 = vmul.f32 %v3234_v42, %v8399_v33  ;;  %v8597_v33 = vld [vmem:[%s9248_s1] sm:$0xff] }
 0xe65   :  { %v3019_v34 = vmul.f32 %v2994_v35, %v8461_v15  ;;  %5687 = vset.pattern.permute.xlu2 %v9391_v28  ;;  %5688 = vset.pattern.permute.xlu1 %v9392_v16 }
 0xe66   :  { %v3842_v58 = vmax.f32 %v3834_v48, 0.0  ;;  %v3841_v28 = vmax.f32 %v3833_v18, 0.0 }
 0xe67   :  { %v3027_v10 = vmax.f32 %v3019_v34, 0.0  ;;  %v8580_v34 = vperm.slane %v9393_v38, 5 }
 0xe68   :  { %3860 = vrot.lane.b32.xlu0 %v3842_v58, %s6285_s15 }
 0xe69   :  { %3035 = vst.msk [vmem:[#allocation3 + $0x18] sm:$0xff] %vm2918_vm9, %v3027_v10  ;;  %v3275_v10 = vmax.f32 %v3267_v25, 0.0 }
 0xe6b   :  { %v2989_v0 = vpop.permute.xlu1 %2988  ;;  %v3537_v44 = vpop.permute.xlu0 %3536 }
 0xe6c   :  { %4201 = vperm.xlu2 %5687, %v7918_v17   ;;  %v3244_v62 = vpop.permute.xlu2 %3243  ;;  %v3018_v47 = vmul.f32 %v2989_v0, %v8437_v36  ;;  %v4205_v36 = vadd.f32 %v8580_v34, %v8485_v51 }
 0xe6d   :  { %v3269_v51 = vmul.f32 %v3244_v62, %v8418_v19 }
 0xe6e   :  { %v3026_v15 = vmax.f32 %v3018_v47, 0.0  ;;  %v4213_v58 = vmul.f32 0.2, %v4205_v36 }
 0xe70   :  { %3034 = vst.msk [vmem:[#allocation3 + $0x10] sm:$0xff] %vm2918_vm9, %v3026_v15  ;;  %v4221_v15 = vmax.f32 %v4205_v36, %v4213_v58 }
 0xe72   :  { %v8600_v42 = vadd.f32 %v8597_v33, %v4221_v15 }
 0xe73   :  { %v8577_v35 = vpop.permute.xlu1 %3238  ;;  %v8602_v25 = vpop.permute.xlu0 %3253 }
 0xe74   :  { %3858 = vrot.lane.b32.xlu2 %v3841_v28, %s6285_s15  ;;  %v8583_v48 = vpop.permute.xlu2 %3531  ;;  %v3551_v28 = vmul.f32 %v3522_v8, %v8401_v12  ;;  %v3277_v8 = vmax.f32 %v3269_v51, 0.0  ;;  %v4237_v62 = vsel %vm394_vm1, %v8600_v42, -inf }
 0xe75   :  { %5689 = vset.pattern.permute.xlu2 %v9392_v16 }
 0xe76   :  { %v3559_v16 = vmax.f32 %v3551_v28, 0.0 }
 0xe7b   :  { %v3527_v0 = vpop.permute.xlu1 %3526 }
 0xe7c   :  { %3292 = vrot.lane.b32.xlu2 %v3275_v10, %s6283_s3  ;;  %v3815_v47 = vpop.permute.xlu2 %3814  ;;  %v3552_v18 = vmul.f32 %v3527_v0, %v8410_v37 }
 0xe7d   :  { %v3836_v19 = vmul.f32 %v3815_v47, %v8456_v41 }
 0xe7e   :  { %v3560_v1 = vmax.f32 %v3552_v18, 0.0 }
 0xe7f   :  { %v3844_v58 = vmax.f32 %v3836_v19, 0.0 }
 0xe80   :  { %3579 = vrot.lane.b32.xlu0 %v3560_v1, %s6278_s19 }
 0xe83   :  { %v8604_v37 = vpop.permute.xlu1 %3809 }
 0xe84   :  { %3577 = vrot.lane.b32.xlu2 %v3559_v16, %s6278_s19  ;;  %v3004_v12 = vpop.permute.xlu2 %3003 }
 0xe85   :  { %v3021_v1 = vmul.f32 %v3004_v12, %v8498_v30  ;;  %v3832_v12 = vmul.f32 %v8555_v4, %v8405_v60  ;;  %v3550_v60 = vmul.f32 %v8563_v2, %v8397_v22  ;;  %v3268_v22 = vmul.f32 %v8577_v35, %v8403_v13 }
 0xe86   :  { %v3835_v13 = vmul.f32 %v8604_v37, %v8442_v31 }
 0xe87   :  { %v3029_v36 = vmax.f32 %v3021_v1, 0.0  ;;  %4238 = vmax.xlane.f32.xlu1 %v4237_v62  ;;  %v3554_v1 = vmul.f32 %v3537_v44, %v8439_v24 }
 0xe88   :  { %3296 = vrot.lane.b32.xlu0 %v3277_v8, %s6283_s3 }
 0xe89   :  { %3037 = vst.msk [vmem:[#allocation3 + $0x28] sm:$0xff] %vm2918_vm9, %v3029_v36  ;;  %v3840_v36 = vmax.f32 %v3832_v12, 0.0 }
 0xe8b   :  { %v3830_v10 = vpop.permute.xlu0 %3829  ;;  %v2999_v0 = vpop.permute.xlu1 %2998 }
 0xe8c   :  { %3864 = vrot.lane.b32.xlu2 %v3844_v58, %s6285_s15  ;;  %v8614_v18 = vpop.permute.xlu2 %3824  ;;  %v3020_v30 = vmul.f32 %v2999_v0, %v8478_v53  ;;  %v3562_v58 = vmax.f32 %v3554_v1, 0.0 }
 0xe8e   :  { %v3028_v15 = vmax.f32 %v3020_v30, 0.0  ;;  %v3558_v30 = vmax.f32 %v3550_v60, 0.0 }
 0xe90   :  { %3036 = vst.msk [vmem:[#allocation3 + $0x20] sm:$0xff] %vm2918_vm9, %v3028_v15 }
 0xe93   :  { %v3249_v41 = vpop.permute.xlu1 %3248 }
 0xe94   :  { %v3259_v47 = vpop.permute.xlu2 %3258  ;;  %v3270_v28 = vmul.f32 %v3249_v41, %v8435_v49  ;;  %v8619_v16 = vpop.permute.xlu0 %4472 }
 0xe96   :  { %v3278_v51 = vmax.f32 %v3270_v28, 0.0 }
 0xe98   :  { %3298 = vrot.lane.b32.xlu2 %v3278_v51, %s6283_s3  ;;  %v3276_v51 = vmax.f32 %v3268_v22, 0.0  ;;  %v9399_v22 = vmov 8  }
 0xe9b   :  { %v3820_v8 = vpop.permute.xlu1 %3819 }
 0xe9c   :  { %v8625_v19 = vpop.permute.xlu2 %3546  ;;  %v3837_v53 = vmul.f32 %v3820_v8, %v8463_v56  ;;  %v3839_v8 = vmul.f32 %v3830_v10, %v8481_v26  ;;  %v4206_v10 = vadd.f32 %v8580_v34, %v8528_v14 }
 0xe9d   :  { %v3574_v62 = vpop.permute.xlu0 %3573  ;;  %v3556_v14 = vmul.f32 %v8625_v19, %v8530_v50 }
 0xe9e   :  { %v3845_v0 = vmax.f32 %v3837_v53, 0.0  ;;  %v3847_v31 = vmax.f32 %v3839_v8, 0.0 }
 0xea0   :  { %3856 = vrot.lane.b32.xlu1 %v3840_v36, %s6285_s15  ;;  %3583 = vrot.lane.b32.xlu2 %v3562_v58, %s6278_s19  ;;  %v3271_v58 = vmul.f32 %v8602_v25, %v8451_v39  ;;  %v8684_v25 = vperm.slane %v9393_v38, 6 }
 0xea1   :  { %3866 = vrot.lane.b32.xlu0 %v3845_v0, %s6285_s15 }
 0xea2   :  { %v3279_v0 = vmax.f32 %v3271_v58, 0.0 }
 0xea3   :  { %v3542_v49 = vpop.permute.xlu1 %3541 }
 0xea4   :  { %v3014_v24 = vpop.permute.xlu2 %3013  ;;  %v3555_v4 = vmul.f32 %v3542_v49, %v8505_v55  ;;  %v3272_v55 = vmul.f32 %v3259_v47, %v8521_v32  ;;  %v3843_v32 = vmax.f32 %v3835_v13, 0.0  ;;  %v3553_v47 = vmul.f32 %v8583_v48, %v8422_v5 }
 0xea5   :  { %v3023_v56 = vmul.f32 %v3014_v24, %v8536_v61  ;;  %v3291_v44 = vpop.permute.xlu0 %3290  ;;  %v3838_v49 = vmul.f32 %v8614_v18, %v8473_v54  ;;  %v4214_v24 = vmul.f32 0.2, %v4206_v10  ;;  %v3564_v18 = vmax.f32 %v3556_v14, 0.0 }
 0xea6   :  { %v3563_v15 = vmax.f32 %v3555_v4, 0.0  ;;  %3315 = vst.msk [vmem:[#allocation3] sm:$0xff] %vm3314_vm10, %v3291_v44  ;;  %v3280_v1 = vmax.f32 %v3272_v55, 0.0 }
 0xea7   :  { %v3031_v41 = vmax.f32 %v3023_v56, 0.0  ;;  %3598 = vst.msk [vmem:[#allocation3] sm:$0xff] %vm3597_vm11, %v3574_v62  ;;  %v3561_v62 = vmax.f32 %v3553_v47, 0.0  ;;  %v3846_v4 = vmax.f32 %v3838_v49, 0.0  ;;  %v4222_v56 = vmax.f32 %v4206_v10, %v4214_v24 }
 0xea8   :  { %3575 = vrot.lane.b32.xlu1 %v3558_v30, %s6278_s19  ;;  %4293 = vrot.lane.b32.xlu2 %v7823_v6, %s6284_s14  ;;  %v8696_v30 = vld [vmem:[%s9248_s1 + $0x8] sm:$0xff] }
 0xea9   :  { %3039 = vst.msk [vmem:[#allocation3 + $0x38] sm:$0xff] %vm2918_vm9, %v3031_v41  ;;  %3585 = vrot.lane.b32.xlu0 %v3563_v15, %s6278_s19  ;;  %v8699_v15 = vadd.f32 %v8696_v30, %v4222_v56 }
 0xeab   :  { %v3009_v61 = vpop.permute.xlu1 %3008  ;;  %v4240_v50 = vsel %vm394_vm1, %v8699_v15, -inf }
 0xeac   :  { %v3022_v2 = vmul.f32 %v3009_v61, %v8519_v63 }
 0xead   :  { %v8645_v28 = vpop.permute.xlu2 %4189 }
 0xeae   :  { %v3030_v12 = vmax.f32 %v3022_v2, 0.0 }
 0xeb0   :  { %3038 = vst.msk [vmem:[#allocation3 + $0x30] sm:$0xff] %vm2918_vm9, %v3030_v12  ;;  %3294 = vrot.lane.b32.xlu1 %v3276_v51, %s6283_s3  ;;  %4578 = vrot.lane.b32.xlu2 %v7831_v3, %s6264_s0 }
 0xeb1   :  { %3302 = vrot.lane.b32.xlu0 %v3280_v1, %s6283_s3 }
 0xeb4   :  { %v8655_v63 = vpop.permute.xlu1 %4193 }
 0xeb6   :  { %v8657_v35 = vpop.permute.xlu2 %4476 }
 0xeb8   :  { %3862 = vrot.lane.b32.xlu1 %v3843_v32, %s6285_s15  ;;  %4291 = vrot.lane.b32.xlu2 %v7815_v7, %s6284_s14  ;;  %v8730_v32 = vperm.slane %v9393_v38, 7 }
 0xebd   :  { %v8665_v53 = vpop.permute.xlu1 %4755 }
 0xebe   :  { %v4296_v36 = vpop.permute.xlu2 %4295 }
 0xebf   :  { %v4307_v37 = vsel %vm2918_vm9, %v4296_v36, 1065369472 }
 0xec0   :  { %4325 = vmatpush.bf16.msrb.mxu3 %v4307_v37  ;;  %3581 = vrot.lane.b32.xlu1 %v3561_v62, %s6278_s19 }
 0xec1   :  { %3870 = vrot.lane.b32.xlu2 %v3847_v31, %s6285_s15 }
 0xec6   :  { %v8672_v60 = vpop.permute.xlu2 %4201  ;;  %v3264_v5 = vpop.permute.xlu1 %3263 }
 0xec7   :  { %v3273_v26 = vmul.f32 %v3264_v5, %v8543_v20  ;;  %v4488_v20 = vadd.f32 %v8684_v25, %v8496_v23 }
 0xec8   :  { %3300 = vrot.lane.b32.xlu1 %v3279_v0, %s6283_s3 }
 0xec9   :  { %v3281_v48 = vmax.f32 %v3273_v26, 0.0  ;;  %v4496_v54 = vmul.f32 0.2, %v4488_v20 }
 0xecb   :  { %3304 = vrot.lane.b32.xlu2 %v3281_v48, %s6283_s3  ;;  %v4504_v23 = vmax.f32 %v4488_v20, %v4496_v54 }
 0xece   :  { %v8681_v39 = vpop.permute.xlu2 %3858 }
 0xed0   :  { %3868 = vrot.lane.b32.xlu1 %v3846_v4, %s6285_s15 }
 0xed3   :  { %4861 = vrot.lane.b32.xlu2 %v7831_v3, %s6286_s21  ;;  %v8707_v3 = vadd.f32 %v8597_v33, %v4504_v23 }
 0xed5   :  { %v4520_v41 = vsel %vm394_vm1, %v8707_v3, -inf }
 0xed6   :  { %v3293_v44 = vpop.permute.xlu2 %3292 }
 0xed7   :  { %3316 = vst.msk [vmem:[#allocation3 + $0x8] sm:$0xff] %vm3314_vm10, %v3293_v44 }
 0xed8   :  { %3587 = vrot.lane.b32.xlu1 %v3564_v18, %s6278_s19 }
 0xeda   :  { %v3861_v55 = vpop.permute.xlu0 %3860 }
 0xedb   :  { %4241 = vmax.xlane.f32.xlu0 %v4240_v50  ;;  %4480 = vperm.xlu2 %5689, %v9398_v59  }
 0xede   :  { %v3578_v19 = vpop.permute.xlu2 %3577 }
 0xee0   :  { %4460 = vperm.xlu1 %5688, %v7851_v29  }
 0xee3   :  { %4521 = vmax.xlane.f32.xlu0 %v4520_v41  ;;  %5694 = vset.pattern.permute.xlu2 %v9399_v22 }
 0xee6   :  { %v3865_v61 = vpop.permute.xlu2 %3864 }
 0xee8   :  { %4464 = vperm.xlu1 %5688, %v7865_v9   ;;  %v8723_v9 = vpop.permute.xlu1 %4197 }
 0xef0   :  { %4484 = vperm.xlu1 %5688, %v7918_v17  }
 0xef2   :  { %v3580_v2 = vpop.permute.xlu0 %3579  ;;  %v3299_v51 = vpop.permute.xlu2 %3298 }
 0xef3   :  { %3319 = vst.msk [vmem:[#allocation3 + $0x20] sm:$0xff] %vm3314_vm10, %v3299_v51 }
 0xef7   :  { %4739 = vperm.xlu0 %5690, %v7847_v21  }
 0xef8   :  { %5691 = vset.pattern.permute.xlu1 %v9396_v46 }
 0xef9   :  { %4767 = vperm.xlu1 %5691, %v7918_v17  }
 0xefa   :  { %v3297_v29 = vpop.permute.xlu0 %3296  ;;  %v3584_v12 = vpop.permute.xlu2 %3583 }
 0xefb   :  { %3318 = vst.msk [vmem:[#allocation3 + $0x18] sm:$0xff] %vm3314_vm10, %v3297_v29  ;;  %v4239_v21 = vpop.xlane.xlu1 %4238 }
 0xefc   :  { %3601 = vst.msk [vmem:[#allocation3 + $0x18] sm:$0xff] %vm3597_vm11, %v3580_v2  ;;  %v4261_v56 = vsub.f32 %v8600_v42, %v4239_v21 }
 0xefe   :  { %v4269_v54 = vmul.f32 1.442695, %v4261_v56 }
 0xeff   :  { %4759 = vperm.xlu0 %5690, %v7888_v11   ;;  %v4772_v11 = vadd.f32 %v8730_v32, %v8509_v57 }
 0xf00   :  { %6096 = vpow2.f32 %v4269_v54 }
 0xf01   :  { %5693 = vset.pattern.permute.xlu1 %v9399_v22 }
 0xf02   :  { %v4294_v1 = vpop.permute.xlu2 %4293 }
 0xf03   :  { %v4304_v13 = vsel %vm2918_vm9, %v4294_v1, 1065369472 }
 0xf04   :  { %4326 = vmatpush.bf16.msrb.mxu3 %v4304_v13 }
 0xf07   :  { %4763 = vperm.xlu0 %5690, %v9398_v59   ;;  %v4780_v59 = vmul.f32 0.2, %v4772_v11 }
 0xf09   :  { %v4788_v31 = vmax.f32 %v4772_v11, %v4780_v59 }
 0xf0a   :  { %v4579_v17 = vpop.permute.xlu2 %4578 }
 0xf0b   :  { %v4590_v46 = vsel %vm2918_vm9, %v4579_v17, 1065369472  ;;  %v8740_v57 = vadd.f32 %v8696_v30, %v4788_v31 }
 0xf0c   :  { %4608 = vmatpush.bf16.msra.mxu0 %v4590_v46 }
 0xf0d   :  { %v4806_v5 = vsel %vm394_vm1, %v8740_v57, -inf }
 0xf0f   :  { %5692 = vset.pattern.permute.xlu0 %v9399_v22  ;;  %v8769_v22 = vpop.eup %6096 }
 0xf12   :  { %v4292_v47 = vpop.permute.xlu2 %4291  ;;  %v3857_v8 = vpop.permute.xlu1 %3856 }
 0xf13   :  { %v4301_v62 = vsel %vm2918_vm9, %v4292_v47, 1065369472  ;;  %v3867_v36 = vpop.permute.xlu0 %3866  ;;  %3881 = vst.msk [vmem:[#allocation3] sm:$0xff] %vm3880_vm12, %v3857_v8 }
 0xf14   :  { %4327 = vmatpush.bf16.msrb.mxu3 %v4301_v62 }
 0xf1a   :  { %v3576_v37 = vpop.permute.xlu1 %3575 }
 0xf1b   :  { %v3586_v58 = vpop.permute.xlu0 %3585  ;;  %3599 = vst.msk [vmem:[#allocation3 + $0x8] sm:$0xff] %vm3597_vm11, %v3576_v37  ;;  %v3871_v38 = vpop.permute.xlu2 %3870 }
 0xf1c   :  { %3882 = vst.msk [vmem:[#allocation3 + $0x8] sm:$0xff] %vm3880_vm12, %v8681_v39 }
 0xf22   :  { %v3295_v0 = vpop.permute.xlu1 %3294 }
 0xf23   :  { %v3303_v26 = vpop.permute.xlu0 %3302  ;;  %3317 = vst.msk [vmem:[#allocation3 + $0x10] sm:$0xff] %vm3314_vm10, %v3295_v0  ;;  %4807 = vmax.xlane.f32.xlu1 %v4806_v5 }
 0xf24   :  { %3321 = vst.msk [vmem:[#allocation3 + $0x30] sm:$0xff] %vm3314_vm10, %v3303_v26 }
 0xf25   :  { %3604 = vst.msk [vmem:[#allocation3 + $0x30] sm:$0xff] %vm3597_vm11, %v3586_v58  ;;  %v3305_v48 = vpop.permute.xlu2 %3304 }
 0xf26   :  { %3600 = vst.msk [vmem:[#allocation3 + $0x10] sm:$0xff] %vm3597_vm11, %v3578_v19 }
 0xf27   :  { %3883 = vst.msk [vmem:[#allocation3 + $0x10] sm:$0xff] %vm3880_vm12, %v3861_v55 }
 0xf28   :  { %3322 = vst.msk [vmem:[#allocation3 + $0x38] sm:$0xff] %vm3314_vm10, %v3305_v48 }
 0xf2a   :  { %v3863_v10 = vpop.permute.xlu1 %3862 }
 0xf2b   :  { %3884 = vst.msk [vmem:[#allocation3 + $0x18] sm:$0xff] %vm3880_vm12, %v3863_v10 }
 0xf2d   :  { %v4862_v49 = vpop.permute.xlu2 %4861 }
 0xf2e   :  { %v4873_v24 = vsel %vm2918_vm9, %v4862_v49, 1065369472  ;;  %v8820_v49 = vld [vmem:[%s9248_s1 + $0x38] sm:$0xff] }
 0xf2f   :  { %4891 = vmatpush.bf16.msra.mxu1 %v4873_v24 }
 0xf32   :  { %v3582_v4 = vpop.permute.xlu1 %3581 }
 0xf33   :  { %3602 = vst.msk [vmem:[#allocation3 + $0x20] sm:$0xff] %vm3597_vm11, %v3582_v4 }
 0xf34   :  { %3885 = vst.msk [vmem:[#allocation3 + $0x20] sm:$0xff] %vm3880_vm12, %v3865_v61 }
 0xf3a   :  { %v3301_v39 = vpop.permute.xlu1 %3300 }
 0xf3b   :  { %3320 = vst.msk [vmem:[#allocation3 + $0x28] sm:$0xff] %vm3314_vm10, %v3301_v39  ;;  %v8834_v39 = vld [vmem:[%s9248_s1 + $0x30] sm:$0xff] }
 0xf3c   :  { %3603 = vst.msk [vmem:[#allocation3 + $0x28] sm:$0xff] %vm3597_vm11, %v3584_v12  ;;  %4574 = vrot.lane.b32.xlu1 %v7815_v7, %s6264_s0 }
 0xf3d   :  { %3886 = vst.msk [vmem:[#allocation3 + $0x28] sm:$0xff] %vm3880_vm12, %v3867_v36  ;;  %v6258_v36 = vld [vmem:[%s9248_s1 + $0x10] sm:$0xff] }
 0xf42   :  { %v3869_v20 = vpop.permute.xlu1 %3868 }
 0xf43   :  { %3887 = vst.msk [vmem:[#allocation3 + $0x30] sm:$0xff] %vm3880_vm12, %v3869_v20 }
 0xf44   :  { %4572 = vrot.lane.b32.xlu1 %v7807_v27, %s6264_s0 }
 0xf4a   :  { %v3588_v14 = vpop.permute.xlu1 %3587 }
 0xf4b   :  { %3605 = vst.msk [vmem:[#allocation3 + $0x38] sm:$0xff] %vm3597_vm11, %v3588_v14  ;;  %v4208_v14 = vadd.f32 %v8580_v34, %v8523_v45 }
 0xf4c   :  { %3888 = vst.msk [vmem:[#allocation3 + $0x38] sm:$0xff] %vm3880_vm12, %v3871_v38  ;;  %4855 = vrot.lane.b32.xlu1 %v7807_v27, %s6286_s21  ;;  %v8807_v38 = vld [vmem:[%s9248_s1 + $0x20] sm:$0xff] }
 0xf4e   :  { %v4242_v18 = vpop.xlane.xlu0 %4241 }
 0xf4f   :  { %v4262_v44 = vsub.f32 %v8699_v15, %v4242_v18  ;;  %v4216_v18 = vmul.f32 0.2, %v4208_v14 }
 0xf51   :  { %v4271_v23 = vmul.f32 1.442695, %v4262_v44 }
 0xf52   :  { %v4461_v50 = vpop.permute.xlu1 %4460 }
 0xf53   :  { %6098 = vpow2.f32 %v4271_v23  ;;  %v4489_v19 = vadd.f32 %v8684_v25, %v4461_v50  ;;  %v4224_v50 = vmax.f32 %v4208_v14, %v4216_v18 }
 0xf55   :  { %v4497_v41 = vmul.f32 0.2, %v4489_v19 }
 0xf56   :  { %v8780_v51 = vpop.xlane.xlu0 %4521 }
 0xf57   :  { %v4505_v42 = vmax.f32 %v4489_v19, %v4497_v41  ;;  %v4774_v19 = vadd.f32 %v8730_v32, %v8546_v40  ;;  %v4210_v40 = vadd.f32 %v8580_v34, %v8655_v63 }
 0xf59   :  { %v8771_v55 = vpop.eup %6098  ;;  %v8774_v61 = vadd.f32 %v8696_v30, %v4505_v42  ;;  %v4775_v30 = vadd.f32 %v8730_v32, %v8665_v53  ;;  %v9400_v42 = vld [vmem:[#allocation21_spill] sm:$0xff] }
 0xf5a   :  { %v4285_v2 = vpack.c.bf16 %v8771_v55, %v8769_v22  ;;  %v4465_v29 = vpop.permute.xlu1 %4464 }
 0xf5b   :  { %v4523_v15 = vsel %vm394_vm1, %v8774_v61, -inf  ;;  %v4490_v12 = vadd.f32 %v8684_v25, %v4465_v29  ;;  %v4783_v8 = vmul.f32 0.2, %v4775_v30  ;;  %v4782_v29 = vmul.f32 0.2, %v4774_v19 }
 0xf5c   :  { %4524 = vmax.xlane.f32.xlu2 %v4523_v15  ;;  %v4773_v15 = vadd.f32 %v8730_v32, %v9400_v42 }
 0xf5d   :  { %v4498_v1 = vmul.f32 0.2, %v4490_v12  ;;  %v4791_v53 = vmax.f32 %v4775_v30, %v4783_v8 }
 0xf5f   :  { %v4506_v46 = vmax.f32 %v4490_v12, %v4498_v1  ;;  %v8810_v0 = vadd.f32 %v8807_v38, %v4791_v53  ;;  %v4781_v1 = vmul.f32 0.2, %v4773_v15 }
 0xf61   :  { %v8794_v59 = vadd.f32 %v6258_v36, %v4506_v46  ;;  %v4815_v48 = vsel %vm394_vm1, %v8810_v0, -inf  ;;  %v4789_v30 = vmax.f32 %v4773_v15, %v4781_v1  ;;  %v4209_v46 = vadd.f32 %v8580_v34, %v8645_v28 }
 0xf62   :  { %v4492_v28 = vadd.f32 %v8684_v25, %v8619_v16 }
 0xf63   :  { %v4526_v37 = vsel %vm394_vm1, %v8794_v59, -inf  ;;  %v8872_v53 = vadd.f32 %v6258_v36, %v4789_v30  ;;  %v4217_v63 = vmul.f32 0.2, %v4209_v46 }
 0xf69   :  { %v4740_v13 = vpop.permute.xlu0 %4739 }
 0xf6a   :  { %v4771_v21 = vadd.f32 %v8730_v32, %v4740_v13  ;;  %v4790_v13 = vmax.f32 %v4774_v19, %v4782_v29 }
 0xf6c   :  { %v4779_v17 = vmul.f32 0.2, %v4771_v21 }
 0xf6e   :  { %v4787_v11 = vmax.f32 %v4771_v21, %v4779_v17 }
 0xf70   :  { %v8787_v47 = vadd.f32 %v8597_v33, %v4787_v11  ;;  %v4212_v33 = vadd.f32 %v8580_v34, %v8672_v60  ;;  %v4218_v11 = vmul.f32 0.2, %v4210_v40 }
 0xf71   :  { %v8789_v62 = vpop.permute.xlu0 %4759 }
 0xf72   :  { %v4803_v31 = vsel %vm394_vm1, %v8787_v47, -inf  ;;  %v4220_v58 = vmul.f32 0.2, %v4212_v33 }
 0xf73   :  { %4804 = vmax.xlane.f32.xlu0 %v4803_v31 }
 0xf74   :  { %4576 = vrot.lane.b32.xlu2 %v7823_v6, %s6264_s0  ;;  %v4228_v26 = vmax.f32 %v4212_v33, %v4220_v58  ;;  %v4226_v33 = vmax.f32 %v4210_v40, %v4218_v11 }
 0xf76   :  { %4527 = vmax.xlane.f32.xlu1 %v4526_v37  ;;  %v8823_v24 = vadd.f32 %v8820_v49, %v4228_v26  ;;  %v4493_v37 = vadd.f32 %v8684_v25, %v8657_v35  ;;  %v4225_v26 = vmax.f32 %v4209_v46, %v4217_v63  ;;  %v4500_v35 = vmul.f32 0.2, %v4492_v28 }
 0xf78   :  { %v4258_v4 = vsel %vm394_vm1, %v8823_v24, -inf }
 0xf79   :  { %v4764_v5 = vpop.permute.xlu0 %4763 }
 0xf7a   :  { %v4777_v60 = vadd.f32 %v8730_v32, %v4764_v5  ;;  %v4485_v5 = vpop.permute.xlu1 %4484 }
 0xf7c   :  { %4289 = vrot.lane.b32.xlu2 %v7807_v27, %s6284_s14  ;;  %v4785_v10 = vmul.f32 0.2, %v4777_v60 }
 0xf7e   :  { %4816 = vmax.xlane.f32.xlu1 %v4815_v48  ;;  %v4793_v27 = vmax.f32 %v4777_v60, %v4785_v10  ;;  %v4501_v60 = vmul.f32 0.2, %v4493_v37  ;;  %v4809_v48 = vsel %vm394_vm1, %v8872_v53, -inf }
 0xf80   :  { %v8837_v20 = vadd.f32 %v8834_v39, %v4793_v27  ;;  %v4509_v27 = vmax.f32 %v4493_v37, %v4501_v60 }
 0xf82   :  { %v4821_v56 = vsel %vm394_vm1, %v8837_v20, -inf  ;;  %v4768_v14 = vpop.permute.xlu1 %4767 }
 0xf84   :  { %4857 = vrot.lane.b32.xlu2 %v7815_v7, %s6286_s21  ;;  %v4207_v7 = vadd.f32 %v8580_v34, %v8538_v43 }
 0xf86   :  { %4259 = vmax.xlane.f32.xlu1 %v4258_v4  ;;  %v4215_v54 = vmul.f32 0.2, %v4207_v7  ;;  %v4211_v4 = vadd.f32 %v8580_v34, %v8723_v9  ;;  %v4481_v34 = vpop.permute.xlu2 %4480 }
 0xf87   :  { %4859 = vrot.lane.b32.xlu0 %v7823_v6, %s6286_s21  ;;  %v4491_v6 = vadd.f32 %v8684_v25, %v8489_v52  ;;  %v6262_v52 = vld [vmem:[%s9248_s1 + $0x18] sm:$0xff] }
 0xf88   :  { %v4223_v44 = vmax.f32 %v4207_v7, %v4215_v54  ;;  %v8858_v12 = vadd.f32 %v6262_v52, %v4224_v50  ;;  %v8870_v31 = vadd.f32 %v6262_v52, %v4790_v13  ;;  %v4508_v7 = vmax.f32 %v4492_v28, %v4500_v35 }
 0xf89   :  { %v4499_v23 = vmul.f32 0.2, %v4491_v6  ;;  %v4219_v54 = vmul.f32 0.2, %v4211_v4  ;;  %v4495_v50 = vadd.f32 %v8684_v25, %v4485_v5 }
 0xf8a   :  { %v8849_v41 = vadd.f32 %v6258_v36, %v4223_v44  ;;  %v4246_v21 = vsel %vm394_vm1, %v8858_v12, -inf  ;;  %v4812_v58 = vsel %vm394_vm1, %v8870_v31, -inf  ;;  %v6263_v36 = vld [vmem:[%s9248_s1 + $0x28] sm:$0xff]  ;;  %v8901_v9 = vadd.f32 %v8807_v38, %v4508_v7  ;;  %v8941_v7 = vpop.f32.mrf.mxu2  ;;  %s6287_s1 = smov 40  }
 0xf8b   :  { %v4507_v43 = vmax.f32 %v4491_v6, %v4499_v23  ;;  %v8885_v10 = vadd.f32 %v6263_v36, %v4226_v33  ;;  %v4776_v6 = vadd.f32 %v8730_v32, %v8789_v62  ;;  %v8898_v44 = vadd.f32 %v6263_v36, %v4509_v27 }
 0xf8c   :  { %v4243_v45 = vsel %vm394_vm1, %v8849_v41, -inf  ;;  %v4227_v23 = vmax.f32 %v4211_v4, %v4219_v54  ;;  %v4532_v62 = vsel %vm394_vm1, %v8901_v9, -inf  ;;  %v4503_v29 = vmul.f32 0.2, %v4495_v50 }
 0xf8d   :  { %v8864_v17 = vadd.f32 %v6262_v52, %v4507_v43  ;;  %v4252_v16 = vsel %vm394_vm1, %v8885_v10, -inf  ;;  %v4784_v19 = vmul.f32 0.2, %v4776_v6  ;;  %v4535_v42 = vsel %vm394_vm1, %v8898_v44, -inf }
 0xf8e   :  { %4822 = vmax.xlane.f32.xlu1 %v4821_v56  ;;  %v8892_v56 = vadd.f32 %v8807_v38, %v4225_v26  ;;  %v4494_v43 = vadd.f32 %v8684_v25, %v4481_v34  ;;  %v8912_v38 = vadd.f32 %v8834_v39, %v4227_v23  ;;  %v4511_v13 = vmax.f32 %v4495_v50, %v4503_v29 }
 0xf8f   :  { %v4529_v8 = vsel %vm394_vm1, %v8864_v17, -inf  ;;  %v4544_v25 = vsub.f32 %v8707_v3, %v8780_v51 }
 0xf90   :  { %v4249_v18 = vsel %vm394_vm1, %v8892_v56, -inf  ;;  %v4502_v1 = vmul.f32 0.2, %v4494_v43  ;;  %v4255_v40 = vsel %vm394_vm1, %v8912_v38, -inf  ;;  %v8925_v33 = vadd.f32 %v8820_v49, %v4511_v13 }
 0xf92   :  { %v4510_v11 = vmax.f32 %v4494_v43, %v4502_v1  ;;  %v4541_v3 = vsel %vm394_vm1, %v8925_v33, -inf }
 0xf94   :  { %v8931_v51 = vadd.f32 %v8834_v39, %v4510_v11 }
 0xf96   :  { %v8906_v15 = vpop.xlane.xlu1 %4807  ;;  %v4538_v60 = vsel %vm394_vm1, %v8931_v51, -inf }
 0xf97   :  { %v4828_v55 = vsub.f32 %v8740_v57, %v8906_v15 }
 0xf99   :  { %v4837_v23 = vmul.f32 1.442695, %v4828_v55 }
 0xfad   :  { %4244 = vmax.xlane.f32.xlu2 %v4243_v45  ;;  %v4792_v45 = vmax.f32 %v4776_v6, %v4784_v19 }
 0xfae   :  { %v4575_v46 = vpop.permute.xlu1 %4574 }
 0xfaf   :  { %v4584_v26 = vsel %vm2918_vm9, %v4575_v46, 1065369472 }
 0xfb1   :  { %4247 = vmax.xlane.f32.xlu0 %v4246_v21  ;;  %v8916_v21 = vadd.f32 %v6263_v36, %v4792_v45 }
 0xfb3   :  { %v4818_v63 = vsel %vm394_vm1, %v8916_v21, -inf }
 0xfb5   :  { %4530 = vmax.xlane.f32.xlu2 %v4529_v8  ;;  %v4778_v8 = vadd.f32 %v8730_v32, %v4768_v14 }
 0xfb7   :  { %v4786_v28 = vmul.f32 0.2, %v4778_v8 }
 0xfb9   :  { %4813 = vmax.xlane.f32.xlu0 %v4812_v58  ;;  %v4552_v58 = vmul.f32 1.442695, %v4544_v25  ;;  %v4794_v32 = vmax.f32 %v4778_v8, %v4786_v28 }
 0xfbb   :  { %v8939_v4 = vadd.f32 %v8820_v49, %v4794_v32  ;;  %v8951_v49 = vpop.f32.mrf.mxu2 }
 0xfbd   :  { %4810 = vmax.xlane.f32.xlu2 %v4809_v48  ;;  %v4573_v48 = vpop.permute.xlu1 %4572  ;;  %v4824_v54 = vsel %vm394_vm1, %v8939_v4, -inf }
 0xfbe   :  { %v4581_v27 = vsel %vm2918_vm9, %v4573_v48, 1065369472 }
 0xfc1   :  { %4253 = vmax.xlane.f32.xlu0 %v4252_v16 }
 0xfc5   :  { %4250 = vmax.xlane.f32.xlu2 %v4249_v18  ;;  %v4856_v43 = vpop.permute.xlu1 %4855 }
 0xfc9   :  { %4536 = vmax.xlane.f32.xlu0 %v4535_v42 }
 0xfcd   :  { %4533 = vmax.xlane.f32.xlu2 %v4532_v62 }
 0xfcf   :  { %v4525_v52 = vpop.xlane.xlu2 %4524 }
 0xfd0   :  { %v4545_v30 = vsub.f32 %v8774_v61, %v4525_v52 }
 0xfd1   :  { %4256 = vmax.xlane.f32.xlu0 %v4255_v40 }
 0xfd2   :  { %v4554_v37 = vmul.f32 1.442695, %v4545_v30 }
 0xfd4   :  { %6100 = vpow2.f32 %v4554_v37 }
 0xfd5   :  { %4819 = vmax.xlane.f32.xlu2 %v4818_v63  ;;  %6102 = vpow2.f32 %v4552_v58 }
 0xfd6   :  { %6104 = vrcp.f32 %v8941_v7 }
 0xfd7   :  { %v4577_v5 = vpop.permute.xlu2 %4576  ;;  %6106 = vrcp.f32 %v8951_v49 }
 0xfd8   :  { %v4587_v61 = vsel %vm2918_vm9, %v4577_v5, 1065369472 }
 0xfd9   :  { %4542 = vmax.xlane.f32.xlu0 %v4541_v3  ;;  %4609 = vmatpush.bf16.msra.mxu0 %v4587_v61 }
 0xfda   :  { %v6101_v36 = vpop.eup %6100 }
 0xfdb   :  { %v6103_v16 = vpop.eup %6102 }
 0xfdc   :  { %v4568_v14 = vpack.c.bf16 %v6101_v36, %v6103_v16  ;;  %v6105_v6 = vpop.eup %6104 }
 0xfdd   :  { %4539 = vmax.xlane.f32.xlu2 %v4538_v60  ;;  %4610 = vmatpush.bf16.msra.mxu0 %v4584_v26  ;;  %v6107_v22 = vpop.eup %6106 }
 0xfdf   :  { %v4290_v35 = vpop.permute.xlu2 %4289 }
 0xfe0   :  { %v4298_v39 = vsel %vm2918_vm9, %v4290_v35, 1065369472 }
 0xfe1   :  { %4328 = vmatpush.bf16.msrb.mxu3 %v4298_v39  ;;  %4611 = vmatpush.bf16.msra.mxu0 %v4581_v27 }
 0xfe4   :  { %5482 = vmatmul.msk.bf16.vlgmr.msrb.gmra.mxu3 %vm394_vm1, %v4285_v2  ;;  %5486 = vmatmul.msk.bf16.vlgmr.msra.gmra.mxu0 %vm394_vm1, %v4568_v14 }
 0xfe5   :  { %4825 = vmax.xlane.f32.xlu2 %v4824_v54 }
 0xfe6   :  { %v4805_v18 = vpop.xlane.xlu0 %4804 }
 0xfe7   :  { %v4827_v34 = vsub.f32 %v8787_v47, %v4805_v18  ;;  %v4858_v42 = vpop.permute.xlu2 %4857  ;;  %v4864_v47 = vsel %vm2918_vm9, %v4856_v43, 1065369472 }
 0xfe8   :  { %v4867_v62 = vsel %vm2918_vm9, %v4858_v42, 1065369472 }
 0xfe9   :  { %v4835_v2 = vmul.f32 1.442695, %v4827_v34  ;;  %v4528_v52 = vpop.xlane.xlu1 %4527 }
 0xfea   :  { %v4546_v13 = vsub.f32 %v8794_v59, %v4528_v52 }
 0xfeb   :  { %6108 = vpow2.f32 %v4835_v2 }
 0xfec   :  { %6110 = vpow2.f32 %v4837_v23  ;;  %v4556_v11 = vmul.f32 1.442695, %v4546_v13 }
 0xfed   :  { %4077 = vperm.xlu0 %5692, %v6105_v6  }
 0xff1   :  { %v6109_v29 = vpop.eup %6108 }
 0xff2   :  { %v6111_v45 = vpop.eup %6110 }
 0xff3   :  { %v4851_v57 = vpack.c.bf16 %v6111_v45, %v6109_v29 }
 0xff5   :  { %4082 = vperm.xlu0 %5692, %v6107_v22  }
 0xff9   :  { %v4860_v50 = vpop.permute.xlu0 %4859 }
 0xffa   :  { %v4870_v19 = vsel %vm2918_vm9, %v4860_v50, 1065369472 }
 0xffb   :  { %4892 = vmatpush.bf16.msra.mxu1 %v4870_v19 }
 0xfff   :  { %4893 = vmatpush.bf16.msra.mxu1 %v4867_v62 }
0x1003   :  { %4894 = vmatpush.bf16.msra.mxu1 %v4864_v47 }
0x1006   :  { %5490 = vmatmul.msk.bf16.vlgmr.msra.gmra.mxu1 %vm394_vm1, %v4851_v57 }
0x1020   :  { %v4245_v15 = vpop.xlane.xlu2 %4244 }
0x1021   :  { %v4263_v1 = vsub.f32 %v8849_v41, %v4245_v15 }
0x1023   :  { %v4273_v40 = vmul.f32 1.442695, %v4263_v1 }
0x1024   :  { %v4248_v30 = vpop.xlane.xlu0 %4247 }
0x1025   :  { %v4264_v25 = vsub.f32 %v8858_v12, %v4248_v30  ;;  %6112 = vpow2.f32 %v4273_v40 }
0x1027   :  { %v4275_v46 = vmul.f32 1.442695, %v4264_v25 }
0x1028   :  { %v4531_v8 = vpop.xlane.xlu2 %4530 }
0x1029   :  { %6114 = vpow2.f32 %v4275_v46  ;;  %v4547_v63 = vsub.f32 %v8864_v17, %v4531_v8 }
0x102a   :  { %6116 = vpow2.f32 %v4556_v11 }
0x102b   :  { %v4558_v37 = vmul.f32 1.442695, %v4547_v63  ;;  %v6113_v41 = vpop.eup %6112 }
0x102c   :  { %v4814_v58 = vpop.xlane.xlu0 %4813 }
0x102d   :  { %6118 = vpow2.f32 %v4558_v37  ;;  %v4830_v5 = vsub.f32 %v8870_v31, %v4814_v58  ;;  %v4817_v31 = vpop.xlane.xlu1 %4816 }
0x102e   :  { %v4831_v23 = vsub.f32 %v8810_v0, %v4817_v31 }
0x102f   :  { %v6115_v28 = vpop.eup %6114  ;;  %v4841_v59 = vmul.f32 1.442695, %v4830_v5 }
0x1030   :  { %v4811_v61 = vpop.xlane.xlu2 %4810  ;;  %v4286_v3 = vpack.c.bf16 %v6115_v28, %v6113_v41  ;;  %v6117_v32 = vpop.eup %6116  ;;  %v4843_v43 = vmul.f32 1.442695, %v4831_v23 }
0x1031   :  { %v4829_v12 = vsub.f32 %v8872_v53, %v4811_v61  ;;  %6120 = vpow2.f32 %v4841_v59 }
0x1032   :  { %5483 = vmatmul.msk.bf16.gmra.mxu3 %vm394_vm1, %v4286_v3 }
0x1033   :  { %v6119_v26 = vpop.eup %6118  ;;  %v4839_v60 = vmul.f32 1.442695, %v4829_v12 }
0x1034   :  { %v4254_v17 = vpop.xlane.xlu0 %4253  ;;  %v4569_v48 = vpack.c.bf16 %v6119_v26, %v6117_v32 }
0x1035   :  { %6122 = vpow2.f32 %v4839_v60  ;;  %v4266_v36 = vsub.f32 %v8885_v10, %v4254_v17  ;;  %v4260_v22 = vpop.xlane.xlu1 %4259 }
0x1036   :  { %5487 = vmatmul.msk.bf16.gmra.mxu0 %vm394_vm1, %v4569_v48  ;;  %v4268_v19 = vsub.f32 %v8823_v24, %v4260_v22  ;;  %v8999_v48 = vpop.f32.mrf.mxu2 }
0x1037   :  { %v4279_v35 = vmul.f32 1.442695, %v4266_v36  ;;  %v6121_v16 = vpop.eup %6120 }
0x1038   :  { %v4251_v27 = vpop.xlane.xlu2 %4250  ;;  %v4283_v47 = vmul.f32 1.442695, %v4268_v19 }
0x1039   :  { %v4265_v39 = vsub.f32 %v8892_v56, %v4251_v27  ;;  %6124 = vpow2.f32 %v4279_v35 }
0x103b   :  { %v6123_v53 = vpop.eup %6122  ;;  %v4277_v14 = vmul.f32 1.442695, %v4265_v39 }
0x103c   :  { %v4537_v54 = vpop.xlane.xlu0 %4536  ;;  %v4852_v6 = vpack.c.bf16 %v6121_v16, %v6123_v53 }
0x103d   :  { %6126 = vpow2.f32 %v4277_v14  ;;  %v4549_v18 = vsub.f32 %v8898_v44, %v4537_v54  ;;  %v4823_v25 = vpop.xlane.xlu1 %4822 }
0x103e   :  { %5491 = vmatmul.msk.bf16.gmra.mxu1 %vm394_vm1, %v4852_v6  ;;  %v4833_v63 = vsub.f32 %v8837_v20, %v4823_v25  ;;  %v9006_v16 = vpop.f32.mrf.mxu2 }
0x103f   :  { %v4562_v34 = vmul.f32 1.442695, %v4549_v18  ;;  %v6125_v2 = vpop.eup %6124 }
0x1040   :  { %v4534_v10 = vpop.xlane.xlu2 %4533 }
0x1041   :  { %v4548_v55 = vsub.f32 %v8901_v9, %v4534_v10  ;;  %6128 = vpow2.f32 %v4562_v34 }
0x1043   :  { %v6127_v56 = vpop.eup %6126  ;;  %v4560_v50 = vmul.f32 1.442695, %v4548_v55 }
0x1044   :  { %v4257_v42 = vpop.xlane.xlu0 %4256  ;;  %v4287_v62 = vpack.c.bf16 %v6125_v2, %v6127_v56 }
0x1045   :  { %6130 = vpow2.f32 %v4560_v50  ;;  %v4267_v44 = vsub.f32 %v8912_v38, %v4257_v42 }
0x1046   :  { %5484 = vmatmul.msk.bf16.gmra.mxu3 %vm394_vm1, %v4287_v62  ;;  %6132 = vpow2.f32 %v4843_v43  ;;  %v9026_v56 = vpop.f32.mrf.mxu2 }
0x1047   :  { %v4281_v29 = vmul.f32 1.442695, %v4267_v44  ;;  %v6129_v57 = vpop.eup %6128 }
0x1048   :  { %v4820_v45 = vpop.xlane.xlu2 %4819 }
0x1049   :  { %v4832_v9 = vsub.f32 %v8916_v21, %v4820_v45  ;;  %6134 = vpow2.f32 %v4281_v29 }
0x104a   :  { %6136 = vpow2.f32 %v4283_v47 }
0x104b   :  { %v6131_v0 = vpop.eup %6130  ;;  %v4845_v15 = vmul.f32 1.442695, %v4832_v9 }
0x104c   :  { %v4543_v24 = vpop.xlane.xlu0 %4542  ;;  %v4570_v52 = vpack.c.bf16 %v6129_v57, %v6131_v0  ;;  %v6133_v38 = vpop.eup %6132 }
0x104d   :  { %6138 = vpow2.f32 %v4845_v15  ;;  %v4551_v1 = vsub.f32 %v8925_v33, %v4543_v24  ;;  %v4847_v33 = vmul.f32 1.442695, %v4833_v63 }
0x104e   :  { %5488 = vmatmul.msk.bf16.gmra.mxu0 %vm394_vm1, %v4570_v52  ;;  %v9035_v29 = vpop.f32.mrf.mxu2 }
0x104f   :  { %v4566_v13 = vmul.f32 1.442695, %v4551_v1  ;;  %v6135_v30 = vpop.eup %6134 }
0x1050   :  { %v4540_v40 = vpop.xlane.xlu2 %4539  ;;  %v6137_v46 = vpop.eup %6136 }
0x1051   :  { %v4550_v21 = vsub.f32 %v8931_v51, %v4540_v40  ;;  %6140 = vpow2.f32 %v4566_v13  ;;  %v4288_v37 = vpack.c.bf16 %v6137_v46, %v6135_v30 }
0x1053   :  { %v6139_v11 = vpop.eup %6138  ;;  %v4564_v8 = vmul.f32 1.442695, %v4550_v21 }
0x1054   :  { %v4853_v58 = vpack.c.bf16 %v6139_v11, %v6133_v38 }
0x1055   :  { %6142 = vpow2.f32 %v4564_v8 }
0x1056   :  { %5485 = vmatmul.msk.bf16.gmra.mxu3 %vm394_vm1, %v4288_v37  ;;  %5492 = vmatmul.msk.bf16.gmra.mxu1 %vm394_vm1, %v4853_v58  ;;  %6144 = vpow2.f32 %v4847_v33 }
0x1057   :  { %v6141_v28 = vpop.eup %6140 }
0x1058   :  { %v4826_v5 = vpop.xlane.xlu2 %4825 }
0x1059   :  { %v4834_v41 = vsub.f32 %v8939_v4, %v4826_v5  ;;  %v9058_v5 = vpop.f32.mrf.mxu2 }
0x105b   :  { %v6143_v59 = vpop.eup %6142  ;;  %v4849_v51 = vmul.f32 1.442695, %v4834_v41 }
0x105c   :  { %v4571_v61 = vpack.c.bf16 %v6141_v28, %v6143_v59  ;;  %v6145_v20 = vpop.eup %6144 }
0x105d   :  { %6146 = vpow2.f32 %v4849_v51 }
0x105e   :  { %5489 = vmatmul.msk.bf16.gmra.mxu0 %vm394_vm1, %v4571_v61 }
0x105f   :  { %v4078_v52 = vpop.permute.xlu0 %4077 }
0x1060   :  { %v4115_v25 = vmul.f32 %v4078_v52, %v8941_v7 }
0x1061   :  { %v8987_v3 = vpop.f32.mrf.mxu0 }
0x1062   :  { %v4123_v11 = vmax.f32 %v4115_v25, 0.0 }
0x1063   :  { %v6147_v12 = vpop.eup %6146 }
0x1064   :  { %v4854_v32 = vpack.c.bf16 %v6147_v12, %v6145_v20 }
0x1066   :  { %5493 = vmatmul.msk.bf16.gmra.mxu1 %vm394_vm1, %v4854_v32 }
0x1067   :  { %v8990_v26 = vpop.f32.mrf.mxu3  ;;  %v4083_v46 = vpop.permute.xlu0 %4082 }
0x1068   :  { %6148 = vrcp.f32 %v8990_v26  ;;  %v4116_v58 = vmul.f32 %v4083_v46, %v8951_v49 }
0x1069   :  { %v8993_v4 = vpop.f32.mrf.mxu0 }
0x106a   :  { %6150 = vrcp.f32 %v8993_v4  ;;  %v4124_v7 = vmax.f32 %v4116_v58, 0.0 }
0x106e   :  { %v6149_v60 = vpop.eup %6148 }
0x106f   :  { %v8996_v17 = vpop.f32.mrf.mxu3  ;;  %4360 = vperm.xlu1 %5693, %v6149_v60   ;;  %v9067_v60 = vpop.f32.mrf.mxu2 }
0x1070   :  { %6152 = vrcp.f32 %v8996_v17  ;;  %v6151_v36 = vpop.eup %6150 }
0x1071   :  { %6154 = vrcp.f32 %v8999_v48 }
0x1072   :  { %6156 = vrcp.f32 %v8987_v3 }
0x1076   :  { %v6153_v31 = vpop.eup %6152 }
0x1077   :  { %4365 = vperm.xlu2 %5694, %v6153_v31   ;;  %4648 = vperm.xlu1 %5693, %v6151_v36   ;;  %v6155_v35 = vpop.eup %6154 }
0x1078   :  { %v6157_v27 = vpop.eup %6156 }
0x107f   :  { %4643 = vperm.xlu2 %5694, %v6157_v27   ;;  %4087 = vperm.xlu1 %5693, %v6155_v35  }
0x1083   :  { %v9003_v39 = vpop.f32.mrf.mxu1 }
0x1084   :  { %6158 = vrcp.f32 %v9003_v39 }
0x1085   :  { %6160 = vrcp.f32 %v9006_v16 }
0x108a   :  { %v6159_v53 = vpop.eup %6158 }
0x108b   :  { %4926 = vperm.xlu2 %5694, %v6159_v53   ;;  %v9009_v14 = vpop.f32.mrf.mxu1  ;;  %v6161_v54 = vpop.eup %6160 }
0x108c   :  { %6162 = vrcp.f32 %v9009_v14 }
0x1092   :  { %v6163_v6 = vpop.eup %6162 }
0x1093   :  { %4092 = vperm.xlu2 %5694, %v6161_v54   ;;  %4931 = vperm.xlu0 %5692, %v6163_v6  }
0x10b3   :  { %v9012_v18 = vpop.f32.mrf.mxu0 }
0x10b4   :  { %6164 = vrcp.f32 %v9012_v18 }
0x10b5   :  { %v9015_v34 = vpop.f32.mrf.mxu3 }
0x10b6   :  { %6166 = vrcp.f32 %v9015_v34 }
0x10ba   :  { %v6165_v10 = vpop.eup %6164 }
0x10bb   :  { %v9018_v22 = vpop.f32.mrf.mxu1  ;;  %4653 = vperm.xlu2 %5694, %v6165_v10   ;;  %v9020_v55 = vpop.f32.mrf.mxu0 }
0x10bc   :  { %v6167_v2 = vpop.eup %6166  ;;  %6168 = vrcp.f32 %v9020_v55 }
0x10bd   :  { %v9023_v23 = vpop.f32.mrf.mxu3  ;;  %4370 = vperm.xlu0 %5692, %v6167_v2  }
0x10be   :  { %6170 = vrcp.f32 %v9023_v23 }
0x10c2   :  { %v6169_v50 = vpop.eup %6168 }
0x10c3   :  { %v9028_v19 = vpop.f32.mrf.mxu1 }
0x10c4   :  { %v6171_v42 = vpop.eup %6170  ;;  %6172 = vrcp.f32 %v9028_v19 }
0x10c5   :  { %6174 = vrcp.f32 %v9026_v56  ;;  %4375 = vperm.xlu1 %5693, %v6171_v42   ;;  %4658 = vperm.xlu0 %5692, %v6169_v50  }
0x10c6   :  { %6176 = vrcp.f32 %v9018_v22 }
0x10c9   :  { %v9033_v62 = vpop.f32.mrf.mxu3 }
0x10ca   :  { %v6173_v44 = vpop.eup %6172  ;;  %6178 = vrcp.f32 %v9033_v62 }
0x10cb   :  { %v6175_v43 = vpop.eup %6174  ;;  %4941 = vperm.xlu2 %5694, %v6173_v44   ;;  %v9037_v47 = vpop.f32.mrf.mxu0  ;;  %6180 = vrcp.f32 %v9035_v29 }
0x10cc   :  { %v6177_v45 = vpop.eup %6176 }
0x10cd   :  { %4936 = vperm.xlu1 %5693, %v6177_v45   ;;  %4097 = vperm.xlu0 %5692, %v6175_v43  }
0x10d0   :  { %v6179_v57 = vpop.eup %6178 }
0x10d1   :  { %v9041_v9 = vpop.f32.mrf.mxu3  ;;  %v6181_v24 = vpop.eup %6180 }
0x10d2   :  { %6182 = vrcp.f32 %v9041_v9  ;;  %v4366_v38 = vpop.permute.xlu2 %4365 }
0x10d3   :  { %4380 = vperm.xlu2 %5694, %v6179_v57   ;;  %v9044_v0 = vpop.f32.mrf.mxu0  ;;  %v9046_v15 = vpop.f32.mrf.mxu1  ;;  %v4399_v33 = vmul.f32 %v4366_v38, %v8996_v17 }
0x10d4   :  { %6184 = vrcp.f32 %v9044_v0 }
0x10d5   :  { %4102 = vperm.xlu1 %5693, %v6181_v24   ;;  %6186 = vrcp.f32 %v9037_v47  ;;  %v4407_v28 = vmax.f32 %v4399_v33, 0.0 }
0x10d6   :  { %6188 = vrcp.f32 %v9046_v15 }
0x10d8   :  { %v6183_v1 = vpop.eup %6182 }
0x10d9   :  { %4385 = vperm.xlu0 %5692, %v6183_v1  }
0x10da   :  { %v6185_v13 = vpop.eup %6184  ;;  %v4644_v8 = vpop.permute.xlu2 %4643 }
0x10db   :  { %4668 = vperm.xlu2 %5694, %v6185_v13   ;;  %v9051_v40 = vpop.f32.mrf.mxu1  ;;  %v6187_v30 = vpop.eup %6186  ;;  %v4681_v51 = vmul.f32 %v4644_v8, %v8987_v3 }
0x10dc   :  { %6190 = vrcp.f32 %v9051_v40  ;;  %v6189_v21 = vpop.eup %6188 }
0x10dd   :  { %4663 = vperm.xlu1 %5693, %v6187_v30   ;;  %v4689_v12 = vmax.f32 %v4681_v51, 0.0  ;;  %6192 = vrcp.f32 %v9067_v60 }
0x10de   :  { %6194 = vrcp.f32 %v9058_v5 }
0x10e1   :  { %4946 = vperm.xlu0 %5692, %v6189_v21   ;;  %v4361_v63 = vpop.permute.xlu1 %4360 }
0x10e2   :  { %v6191_v37 = vpop.eup %6190  ;;  %v4398_v41 = vmul.f32 %v4361_v63, %v8990_v26  ;;  %v9069_v26 = vpop.f32.mrf.mxu3 }
0x10e3   :  { %4139 = vrot.lane.b32.xlu2 %v4123_v11, %s6277_s18  ;;  %v9076_v36 = vpop.f32.mrf.mxu1  ;;  %v6193_v31 = vpop.eup %6192 }
0x10e4   :  { %v4406_v61 = vmax.f32 %v4398_v41, 0.0  ;;  %v6195_v27 = vpop.eup %6194 }
0x10e5   :  { %4951 = vperm.xlu1 %5693, %v6191_v37   ;;  %v4927_v59 = vpop.permute.xlu2 %4926 }
0x10e6   :  { %v4964_v20 = vmul.f32 %v4927_v59, %v9003_v39 }
0x10e8   :  { %v4972_v17 = vmax.f32 %v4964_v20, 0.0 }
0x10e9   :  { %4141 = vrot.lane.b32.xlu0 %v4124_v7, %s6277_s18  ;;  %v4649_v49 = vpop.permute.xlu1 %4648 }
0x10ea   :  { %v4682_v32 = vmul.f32 %v4649_v49, %v8993_v4  ;;  %v9078_v4 = vpop.f32.mrf.mxu0  ;;  %v9080_v35 = vpop.f32.mrf.mxu3 }
0x10eb   :  { %4424 = vrot.lane.b32.xlu2 %v4407_v28, %s6287_s1  ;;  %6196 = vrcp.f32 %v9078_v4  ;;  %v9084_v39 = vpop.f32.mrf.mxu1 }
0x10ec   :  { %v4690_v3 = vmax.f32 %v4682_v32, 0.0  ;;  %6198 = vrcp.f32 %v9080_v35 }
0x10ed   :  { %4422 = vrot.lane.b32.xlu1 %v4406_v61, %s6287_s1  ;;  %6200 = vrcp.f32 %v9084_v39  ;;  %v4093_v44 = vpop.permute.xlu2 %4092 }
0x10ee   :  { %6202 = vrcp.f32 %v9076_v36  ;;  %v4118_v43 = vmul.f32 %v4093_v44, %v9006_v16 }
0x10ef   :  { %6204 = vrcp.f32 %v9069_v26 }
0x10f0   :  { %v4126_v24 = vmax.f32 %v4118_v43, 0.0 }
0x10f1   :  { %4705 = vrot.lane.b32.xlu0 %v4689_v12, %s6275_s17  ;;  %v6197_v53 = vpop.eup %6196  ;;  %v4088_v38 = vpop.permute.xlu1 %4087 }
0x10f2   :  { %v6199_v54 = vpop.eup %6198  ;;  %v9092_v45 = vpop.f32.mrf.mxu0  ;;  %v4117_v30 = vmul.f32 %v4088_v38, %v8999_v48  ;;  %v5546_v38 = vld [vmem:[%s9251_s6] sm:$0xff] }
0x10f3   :  { %4988 = vrot.lane.b32.xlu2 %v4972_v17, %s6288_s10  ;;  %v6201_v50 = vpop.eup %6200  ;;  %6206 = vrcp.f32 %v9092_v45 }
0x10f4   :  { %v6203_v42 = vpop.eup %6202  ;;  %v4125_v16 = vmax.f32 %v4117_v30, 0.0 }
0x10f5   :  { %4707 = vrot.lane.b32.xlu1 %v4690_v3, %s6275_s17  ;;  %v6205_v57 = vpop.eup %6204 }
0x10f9   :  { %v6207_v1 = vpop.eup %6206 }
0x10fb   :  { %4112 = vperm.xlu2 %5694, %v6193_v31  }
0x10fd   :  { %4107 = vperm.xlu1 %5693, %v6195_v27  }
0x1103   :  { %4673 = vperm.xlu2 %5694, %v6197_v53  }
0x1105   :  { %v4932_v6 = vpop.permute.xlu0 %4931  ;;  %4395 = vperm.xlu1 %5693, %v6199_v54  }
0x1106   :  { %v4965_v10 = vmul.f32 %v4932_v6, %v9009_v14 }
0x1108   :  { %v4973_v2 = vmax.f32 %v4965_v10, 0.0 }
0x110a   :  { %4990 = vrot.lane.b32.xlu0 %v4973_v2, %s6288_s10 }
0x110b   :  { %4961 = vperm.xlu2 %5694, %v6201_v50  }
0x110d   :  { %4956 = vperm.xlu1 %5693, %v6203_v42  }
0x1112   :  { %4390 = vperm.xlu0 %5692, %v6205_v57  }
0x1115   :  { %4145 = vrot.lane.b32.xlu1 %v4126_v24, %s6277_s18  ;;  %v4654_v14 = vpop.permute.xlu2 %4653 }
0x1116   :  { %v4683_v52 = vmul.f32 %v4654_v14, %v9012_v18 }
0x1118   :  { %v4691_v13 = vmax.f32 %v4683_v52, 0.0  ;;  %v5547_v52 = vld [vmem:[%s9251_s6 + $0x8] sm:$0xff] }
0x111a   :  { %4678 = vperm.xlu0 %5692, %v6207_v1  }
0x111d   :  { %4709 = vrot.lane.b32.xlu1 %v4691_v13, %s6275_s17 }
0x1122   :  { %4143 = vrot.lane.b32.xlu0 %v4125_v16, %s6277_s18 }
0x1125   :  { %v4942_v25 = vpop.permute.xlu2 %4941 }
0x1126   :  { %v4967_v21 = vmul.f32 %v4942_v25, %v9028_v19 }
0x1128   :  { %v4975_v46 = vmax.f32 %v4967_v21, 0.0 }
0x112a   :  { %4994 = vrot.lane.b32.xlu1 %v4975_v46, %s6288_s10 }
0x112d   :  { %v4381_v11 = vpop.permute.xlu2 %4380 }
0x112e   :  { %v4402_v18 = vmul.f32 %v4381_v11, %v9033_v62 }
0x112f   :  { %v4371_v8 = vpop.permute.xlu0 %4370 }
0x1130   :  { %v4410_v63 = vmax.f32 %v4402_v18, 0.0  ;;  %v4400_v37 = vmul.f32 %v4371_v8, %v9015_v34 }
0x1132   :  { %v4408_v58 = vmax.f32 %v4400_v37, 0.0  ;;  %4430 = vrot.lane.b32.xlu1 %v4410_v63, %s6287_s1 }
0x1134   :  { %4426 = vrot.lane.b32.xlu2 %v4408_v58, %s6287_s1 }
0x1135   :  { %v4669_v48 = vpop.permute.xlu2 %4668 }
0x1136   :  { %v4686_v33 = vmul.f32 %v4669_v48, %v9044_v0 }
0x1137   :  { %v4659_v7 = vpop.permute.xlu0 %4658  ;;  %v4376_v19 = vpop.permute.xlu1 %4375 }
0x1138   :  { %v4694_v41 = vmax.f32 %v4686_v33, 0.0  ;;  %v4684_v28 = vmul.f32 %v4659_v7, %v9020_v55  ;;  %v4401_v59 = vmul.f32 %v4376_v19, %v9023_v23 }
0x113a   :  { %v4692_v62 = vmax.f32 %v4684_v28, 0.0  ;;  %v4409_v51 = vmax.f32 %v4401_v59, 0.0  ;;  %4715 = vrot.lane.b32.xlu1 %v4694_v41, %s6275_s17 }
0x113c   :  { %4711 = vrot.lane.b32.xlu2 %v4692_v62, %s6275_s17  ;;  %4428 = vrot.lane.b32.xlu0 %v4409_v51, %s6287_s1 }
0x113d   :  { %v4140_v34 = vpop.permute.xlu2 %4139 }
0x113e   :  { %4164 = vst.msk [vmem:[#allocation3] sm:$0xff] %vm4163_vm13, %v4140_v34 }
0x113f   :  { %v4098_v0 = vpop.permute.xlu0 %4097  ;;  %v4937_v61 = vpop.permute.xlu1 %4936 }
0x1140   :  { %v4119_v49 = vmul.f32 %v4098_v0, %v9026_v56  ;;  %v4966_v55 = vmul.f32 %v4937_v61, %v9018_v22 }
0x1142   :  { %v4127_v20 = vmax.f32 %v4119_v49, 0.0  ;;  %v4974_v23 = vmax.f32 %v4966_v55, 0.0 }
0x1144   :  { %4147 = vrot.lane.b32.xlu2 %v4127_v20, %s6277_s18  ;;  %4992 = vrot.lane.b32.xlu0 %v4974_v23, %s6288_s10 }
0x1145   :  { %v4425_v12 = vpop.permute.xlu2 %4424 }
0x1147   :  { %v4103_v32 = vpop.permute.xlu1 %4102 }
0x1148   :  { %v4120_v17 = vmul.f32 %v4103_v32, %v9035_v29 }
0x114a   :  { %v4128_v3 = vmax.f32 %v4120_v17, 0.0 }
0x114b   :  { %v4386_v31 = vpop.permute.xlu0 %4385 }
0x114c   :  { %v4403_v27 = vmul.f32 %v4386_v31, %v9041_v9  ;;  %4149 = vrot.lane.b32.xlu0 %v4128_v3, %s6277_s18 }
0x114d   :  { %v4989_v53 = vpop.permute.xlu2 %4988 }
0x114e   :  { %v4411_v56 = vmax.f32 %v4403_v27, 0.0 }
0x114f   :  { %v4664_v54 = vpop.permute.xlu1 %4663 }
0x1150   :  { %v4685_v22 = vmul.f32 %v4664_v54, %v9037_v47  ;;  %4432 = vrot.lane.b32.xlu2 %v4411_v56, %s6287_s1  ;;  %v5549_v47 = vld [vmem:[%s9251_s6 + $0x18] sm:$0xff] }
0x1151   :  { %5085 = vmatpush.bf16.msrb.mxu2 %v5549_v47  ;;  %v5695_v47 = vld [vmem:[%s9252_s7] ss:$0 sm:$0xff] }
0x1152   :  { %v4693_v6 = vmax.f32 %v4685_v22, 0.0 }
0x1153   :  { %v4947_v10 = vpop.permute.xlu0 %4946 }
0x1154   :  { %v4968_v2 = vmul.f32 %v4947_v10, %v9046_v15  ;;  %4713 = vrot.lane.b32.xlu0 %v4693_v6, %s6275_s17  ;;  %v5548_v15 = vld [vmem:[%s9251_s6 + $0x10] sm:$0xff] }
0x1155   :  { %v4113_v29 = vpop.permute.xlu2 %4112  ;;  %5086 = vmatpush.bf16.msrb.mxu2 %v5548_v15 }
0x1156   :  { %v4976_v50 = vmax.f32 %v4968_v2, 0.0  ;;  %v4122_v44 = vmul.f32 %v4113_v29, %v9067_v60 }
0x1157   :  { %v4952_v42 = vpop.permute.xlu1 %4951 }
0x1158   :  { %v4969_v9 = vmul.f32 %v4952_v42, %v9051_v40  ;;  %4996 = vrot.lane.b32.xlu2 %v4976_v50, %s6288_s10  ;;  %v4130_v60 = vmax.f32 %v4122_v44, 0.0 }
0x1159   :  { %5087 = vmatpush.bf16.msrb.mxu2 %v5547_v52 }
0x115a   :  { %v4977_v43 = vmax.f32 %v4969_v9, 0.0 }
0x115b   :  { %v4142_v57 = vpop.permute.xlu0 %4141 }
0x115c   :  { %4165 = vst.msk [vmem:[#allocation3 + $0x8] sm:$0xff] %vm4163_vm13, %v4142_v57  ;;  %4998 = vrot.lane.b32.xlu0 %v4977_v43, %s6288_s10 }
0x115d   :  { %v4674_v40 = vpop.permute.xlu2 %4673  ;;  %4448 = vst.msk [vmem:[#allocation3 + $0x8] sm:$0xff] %vm4446_vm14, %v4425_v12  ;;  %5088 = vmatpush.bf16.msrb.mxu2 %v5546_v38 }
0x115e   :  { %v4687_v14 = vmul.f32 %v4674_v40, %v9078_v4 }
0x115f   :  { %v4423_v24 = vpop.permute.xlu1 %4422 }
0x1160   :  { %4447 = vst.msk [vmem:[#allocation3] sm:$0xff] %vm4446_vm14, %v4423_v24  ;;  %4153 = vrot.lane.b32.xlu2 %v4130_v60, %s6277_s18  ;;  %v4695_v13 = vmax.f32 %v4687_v14, 0.0 }
0x1163   :  { %v4706_v1 = vpop.permute.xlu0 %4705 }
0x1164   :  { %4730 = vst.msk [vmem:[#allocation3] sm:$0xff] %vm4729_vm15, %v4706_v1 }
0x1165   :  { %5013 = vst.msk [vmem:[#allocation3] sm:$0xff] %vm5012_vm0, %v4989_v53  ;;  %v4962_v30 = vpop.permute.xlu2 %4961 }
0x1166   :  { %v4971_v4 = vmul.f32 %v4962_v30, %v9084_v39 }
0x1167   :  { %v4708_v16 = vpop.permute.xlu1 %4707 }
0x1168   :  { %4731 = vst.msk [vmem:[#allocation3 + $0x8] sm:$0xff] %vm4729_vm15, %v4708_v16  ;;  %4717 = vrot.lane.b32.xlu2 %v4695_v13, %s6275_s17  ;;  %v4979_v25 = vmax.f32 %v4971_v4, 0.0 }
0x116f   :  { %v4108_v21 = vpop.permute.xlu1 %4107 }
0x1170   :  { %v4121_v46 = vmul.f32 %v4108_v21, %v9058_v5  ;;  %5002 = vrot.lane.b32.xlu2 %v4979_v25, %s6288_s10  ;;  %v5021_v5 = vld [vmem:[#allocation3] sm:$0xff] }
0x1172   :  { %v4129_v11 = vmax.f32 %v4121_v46, 0.0 }
0x1174   :  { %4151 = vrot.lane.b32.xlu1 %v4129_v11, %s6277_s18 }
0x1177   :  { %v4396_v18 = vpop.permute.xlu1 %4395 }
0x1178   :  { %v4405_v8 = vmul.f32 %v4396_v18, %v9080_v35 }
0x117a   :  { %v4413_v63 = vmax.f32 %v4405_v8, 0.0 }
0x117c   :  { %v4991_v37 = vpop.permute.xlu0 %4990  ;;  %4436 = vrot.lane.b32.xlu1 %v4413_v63, %s6287_s1 }
0x117d   :  { %5014 = vst.msk [vmem:[#allocation3 + $0x8] sm:$0xff] %vm5012_vm0, %v4991_v37 }
0x117f   :  { %v4957_v58 = vpop.permute.xlu1 %4956 }
0x1180   :  { %v4970_v39 = vmul.f32 %v4957_v58, %v9076_v36 }
0x1182   :  { %v4978_v48 = vmax.f32 %v4970_v39, 0.0 }
0x1184   :  { %v4391_v33 = vpop.permute.xlu0 %4390  ;;  %5000 = vrot.lane.b32.xlu1 %v4978_v48, %s6288_s10  ;;  %v5022_v7 = vld [vmem:[#allocation3 + $0x8] sm:$0xff] }
0x1185   :  { %v4404_v19 = vmul.f32 %v4391_v33, %v9069_v26  ;;  %v5029_v41 = vpack.c.bf16 %v5022_v7, %v5021_v5 }
0x1187   :  { %v4412_v28 = vmax.f32 %v4404_v19, 0.0  ;;  %5510 = vmatmul.msk.bf16.vlgmr.msrb.gmra.mxu2 %vm394_vm1, %v5029_v41  ;;  %v4146_v35 = vpop.permute.xlu1 %4145 }
0x1188   :  { %4167 = vst.msk [vmem:[#allocation3 + $0x18] sm:$0xff] %vm4163_vm13, %v4146_v35 }
0x1189   :  { %4434 = vrot.lane.b32.xlu0 %v4412_v28, %s6287_s1 }
0x118c   :  { %v4679_v59 = vpop.permute.xlu0 %4678 }
0x118d   :  { %v4688_v36 = vmul.f32 %v4679_v59, %v9092_v45 }
0x118e   :  { %v4427_v62 = vpop.permute.xlu2 %4426 }
0x118f   :  { %v4696_v51 = vmax.f32 %v4688_v36, 0.0  ;;  %v4710_v34 = vpop.permute.xlu1 %4709 }
0x1191   :  { %4719 = vrot.lane.b32.xlu0 %v4696_v51, %s6275_s17 }
0x1194   :  { %v4144_v0 = vpop.permute.xlu0 %4143 }
0x1195   :  { %4166 = vst.msk [vmem:[#allocation3 + $0x10] sm:$0xff] %vm4163_vm13, %v4144_v0 }
0x1196   :  { %4449 = vst.msk [vmem:[#allocation3 + $0x10] sm:$0xff] %vm4446_vm14, %v4427_v62  ;;  %v4712_v26 = vpop.permute.xlu2 %4711 }
0x1197   :  { %4732 = vst.msk [vmem:[#allocation3 + $0x10] sm:$0xff] %vm4729_vm15, %v4710_v34 }
0x119c   :  { %v4995_v61 = vpop.permute.xlu1 %4994 }
0x119e   :  { %v4148_v49 = vpop.permute.xlu2 %4147 }
0x119f   :  { %4168 = vst.msk [vmem:[#allocation3 + $0x20] sm:$0xff] %vm4163_vm13, %v4148_v49 }
0x11a4   :  { %v4431_v55 = vpop.permute.xlu1 %4430 }
0x11a5   :  { %4451 = vst.msk [vmem:[#allocation3 + $0x20] sm:$0xff] %vm4446_vm14, %v4431_v55 }
0x11aa   :  { %v4433_v45 = vpop.permute.xlu2 %4432 }
0x11ac   :  { %v4716_v53 = vpop.permute.xlu1 %4715 }
0x11ae   :  { %v4429_v20 = vpop.permute.xlu0 %4428 }
0x11af   :  { %4450 = vst.msk [vmem:[#allocation3 + $0x18] sm:$0xff] %vm4446_vm14, %v4429_v20 }
0x11b0   :  { %4733 = vst.msk [vmem:[#allocation3 + $0x18] sm:$0xff] %vm4729_vm15, %v4712_v26 }
0x11b1   :  { %5016 = vst.msk [vmem:[#allocation3 + $0x18] sm:$0xff] %vm5012_vm0, %v4995_v61 }
0x11b2   :  { %v4997_v23 = vpop.permute.xlu2 %4996 }
0x11b6   :  { %v4993_v12 = vpop.permute.xlu0 %4992 }
0x11b7   :  { %5015 = vst.msk [vmem:[#allocation3 + $0x10] sm:$0xff] %vm5012_vm0, %v4993_v12 }
0x11b8   :  { %v5024_v31 = vld [vmem:[#allocation3 + $0x18] sm:$0xff] }
0x11ba   :  { %v4154_v32 = vpop.permute.xlu2 %4153 }
0x11bb   :  { %4171 = vst.msk [vmem:[#allocation3 + $0x38] sm:$0xff] %vm4163_vm13, %v4154_v32 }
0x11be   :  { %v4150_v17 = vpop.permute.xlu0 %4149  ;;  %v5023_v3 = vld [vmem:[#allocation3 + $0x10] sm:$0xff] }
0x11bf   :  { %4169 = vst.msk [vmem:[#allocation3 + $0x28] sm:$0xff] %vm4163_vm13, %v4150_v17  ;;  %v5030_v27 = vpack.c.bf16 %v5024_v31, %v5023_v3 }
0x11c0   :  { %4452 = vst.msk [vmem:[#allocation3 + $0x28] sm:$0xff] %vm4446_vm14, %v4433_v45 }
0x11c1   :  { %4735 = vst.msk [vmem:[#allocation3 + $0x28] sm:$0xff] %vm4729_vm15, %v4716_v53  ;;  %5511 = vmatmul.msk.bf16.gmra.mxu2 %vm394_vm1, %v5030_v27 }
0x11c2   :  { %v4718_v50 = vpop.permute.xlu2 %4717 }
0x11c6   :  { %v4714_v56 = vpop.permute.xlu0 %4713 }
0x11c7   :  { %4734 = vst.msk [vmem:[#allocation3 + $0x20] sm:$0xff] %vm4729_vm15, %v4714_v56 }
0x11c8   :  { %5017 = vst.msk [vmem:[#allocation3 + $0x20] sm:$0xff] %vm5012_vm0, %v4997_v23 }
0x11ca   :  { %v5003_v43 = vpop.permute.xlu2 %5002 }
0x11ce   :  { %v4999_v54 = vpop.permute.xlu0 %4998 }
0x11cf   :  { %5018 = vst.msk [vmem:[#allocation3 + $0x28] sm:$0xff] %vm5012_vm0, %v4999_v54  ;;  %v5025_v22 = vld [vmem:[#allocation3 + $0x20] sm:$0xff] }
0x11d6   :  { %v5026_v6 = vld [vmem:[#allocation3 + $0x28] sm:$0xff] }
0x11d7   :  { %v5031_v10 = vpack.c.bf16 %v5026_v6, %v5025_v22 }
0x11d9   :  { %5512 = vmatmul.msk.bf16.gmra.mxu2 %vm394_vm1, %v5031_v10 }
0x11e6   :  { %v4152_v2 = vpop.permute.xlu1 %4151 }
0x11e7   :  { %4170 = vst.msk [vmem:[#allocation3 + $0x30] sm:$0xff] %vm4163_vm13, %v4152_v2 }
0x11ee   :  { %v4437_v29 = vpop.permute.xlu1 %4436 }
0x11ef   :  { %4454 = vst.msk [vmem:[#allocation3 + $0x38] sm:$0xff] %vm4446_vm14, %v4437_v29 }
0x11f6   :  { %v5001_v9 = vpop.permute.xlu1 %5000 }
0x11fb   :  { %v4435_v42 = vpop.permute.xlu0 %4434 }
0x11fc   :  { %4453 = vst.msk [vmem:[#allocation3 + $0x30] sm:$0xff] %vm4446_vm14, %v4435_v42 }
0x11fd   :  { %4736 = vst.msk [vmem:[#allocation3 + $0x30] sm:$0xff] %vm4729_vm15, %v4718_v50 }
0x11fe   :  { %5019 = vst.msk [vmem:[#allocation3 + $0x30] sm:$0xff] %vm5012_vm0, %v5001_v9 }
0x1203   :  { %v4720_v44 = vpop.permute.xlu0 %4719 }
0x1204   :  { %4737 = vst.msk [vmem:[#allocation3 + $0x38] sm:$0xff] %vm4729_vm15, %v4720_v44 }
0x1205   :  { %5020 = vst.msk [vmem:[#allocation3 + $0x38] sm:$0xff] %vm5012_vm0, %v5003_v43  ;;  %v5027_v40 = vld [vmem:[#allocation3 + $0x30] sm:$0xff] }
0x120a   :  { %v5090_v57 = vpop.f32.mrf.mxu2 }
0x120b   :  { %v5091_v15 = vadd.f32 %v5695_v47, %v5090_v57 }
0x120c   :  { %v5028_v60 = vld [vmem:[#allocation3 + $0x38] sm:$0xff] }
0x120d   :  { %5110 = vmax.xlane.f32.xlu0 %v5091_v15  ;;  %v5032_v24 = vpack.c.bf16 %v5028_v60, %v5027_v40 }
0x120f   :  { %5513 = vmatmul.msk.bf16.gmra.mxu2 %vm394_vm1, %v5032_v24 }
0x1212   :  { %v5092_v14 = vpop.f32.mrf.mxu2 }
0x1213   :  { %v5093_v52 = vadd.f32 %v5695_v47, %v5092_v14 }
0x1215   :  { %5112 = vmax.xlane.f32.xlu1 %v5093_v52 }
0x1244   :  { %v5095_v1 = vpop.f32.mrf.mxu2 }
0x1245   :  { %v5096_v38 = vadd.f32 %v5695_v47, %v5095_v1 }
0x1247   :  { %5114 = vmax.xlane.f32.xlu2 %v5096_v38 }
0x124c   :  { %v5097_v13 = vpop.f32.mrf.mxu2 }
0x124d   :  { %v5098_v30 = vadd.f32 %v5695_v47, %v5097_v13 }
0x124f   :  { %5116 = vmax.xlane.f32.xlu0 %v5098_v30 }
0x125c   :  { %v5100_v16 = vpop.f32.mrf.mxu2 }
0x125d   :  { %v5101_v4 = vadd.f32 %v5695_v47, %v5100_v16 }
0x125f   :  { %5118 = vmax.xlane.f32.xlu1 %v5101_v4 }
0x1264   :  { %v5102_v25 = vpop.f32.mrf.mxu2 }
0x1265   :  { %v5103_v21 = vadd.f32 %v5695_v47, %v5102_v25 }
0x1267   :  { %5120 = vmax.xlane.f32.xlu2 %v5103_v21 }
0x1280   :  { %v5111_v46 = vpop.xlane.xlu0 %5110 }
0x1281   :  { %v5126_v11 = vsub.f32 %v5091_v15, %v5111_v46 }
0x1283   :  { %v5134_v18 = vmul.f32 1.442695, %v5126_v11 }
0x1285   :  { %6208 = vpow2.f32 %v5134_v18 }
0x1288   :  { %v5113_v63 = vpop.xlane.xlu1 %5112 }
0x1289   :  { %v5127_v37 = vsub.f32 %v5093_v52, %v5113_v63 }
0x128b   :  { %v6209_v8 = vpop.eup %6208  ;;  %v5136_v58 = vmul.f32 1.442695, %v5127_v37 }
0x128c   :  { %5150 = vadd.xlane.f32.xlu2 %v6209_v8 }
0x128d   :  { %6210 = vpow2.f32 %v5136_v58 }
0x1292   :  { %v5105_v39 = vpop.f32.mrf.mxu2 }
0x1293   :  { %v5106_v48 = vadd.f32 %v5695_v47, %v5105_v39  ;;  %v9193_v7 = vpop.eup %6210 }
0x1295   :  { %5122 = vmax.xlane.f32.xlu0 %v5106_v48 }
0x129a   :  { %v5107_v33 = vpop.f32.mrf.mxu2 }
0x129b   :  { %v5108_v5 = vadd.f32 %v5695_v47, %v5107_v33 }
0x129d   :  { %5124 = vmax.xlane.f32.xlu1 %v5108_v5  ;;  %5152 = vadd.xlane.f32.xlu0 %v9193_v7 }
0x12ba   :  { %v5115_v19 = vpop.xlane.xlu2 %5114 }
0x12bb   :  { %v5128_v41 = vsub.f32 %v5096_v38, %v5115_v19 }
0x12bd   :  { %v5138_v28 = vmul.f32 1.442695, %v5128_v41 }
0x12bf   :  { %6212 = vpow2.f32 %v5138_v28 }
0x12c2   :  { %v5117_v35 = vpop.xlane.xlu0 %5116 }
0x12c3   :  { %v5129_v59 = vsub.f32 %v5098_v30, %v5117_v35 }
0x12c5   :  { %v9196_v36 = vpop.eup %6212  ;;  %v5140_v62 = vmul.f32 1.442695, %v5129_v59 }
0x12c6   :  { %5154 = vadd.xlane.f32.xlu1 %v9196_v36 }
0x12c7   :  { %6214 = vpow2.f32 %v5140_v62 }
0x12cd   :  { %v9199_v51 = vpop.eup %6214 }
0x12ce   :  { %5156 = vadd.xlane.f32.xlu2 %v9199_v51 }
0x12d2   :  { %v5119_v34 = vpop.xlane.xlu1 %5118 }
0x12d3   :  { %v5130_v0 = vsub.f32 %v5101_v4, %v5119_v34 }
0x12d5   :  { %v5142_v26 = vmul.f32 1.442695, %v5130_v0 }
0x12d7   :  { %6216 = vpow2.f32 %v5142_v26 }
0x12da   :  { %v5121_v61 = vpop.xlane.xlu2 %5120 }
0x12db   :  { %v5131_v49 = vsub.f32 %v5103_v21, %v5121_v61 }
0x12dd   :  { %v9202_v55 = vpop.eup %6216  ;;  %v5144_v45 = vmul.f32 1.442695, %v5131_v49 }
0x12de   :  { %5158 = vadd.xlane.f32.xlu0 %v9202_v55 }
0x12df   :  { %6218 = vpow2.f32 %v5144_v45 }
0x12e5   :  { %v9205_v20 = vpop.eup %6218 }
0x12e6   :  { %5160 = vadd.xlane.f32.xlu1 %v9205_v20 }
0x12ff   :  { %v5151_v23 = vpop.xlane.xlu2 %5150 }
0x1300   :  { %6220 = vrcp.f32 %v5151_v23  ;;  %v5177_v27 = vand.u32 2147483648, %v5151_v23  ;;  %v5175_v56 = vand.u32 2147483647, %v5151_v23  ;;  %vm5171_vm2 = vweird.f32 %v5151_v23 }
0x1302   :  { %v5178_v6 = vor.u32 1.1754944e-38, %v5177_v27  ;;  %vm5176_vm4 = vcmp.eq.f32.partialorder %v5175_v56, 8.507059e+37 }
0x1306   :  { %v6221_v12 = vpop.eup %6220 }
0x1307   :  { %v5167_v32 = vmul.f32 %v6221_v12, %v5151_v23  ;;  %vm5172_vm1 = vweird.f32 %v6221_v12 }
0x1308   :  { %v5123_v17 = vpop.xlane.xlu0 %5122  ;;  %vm5173_vm3 = vmor %vm5171_vm2, %vm5172_vm1 }
0x1309   :  { %v5168_v3 = vsub.f32 1.0, %v5167_v32  ;;  %v5132_v31 = vsub.f32 %v5106_v48, %v5123_v17 }
0x130b   :  { %v5169_v53 = vmul.f32 %v6221_v12, %v5168_v3  ;;  %v5146_v54 = vmul.f32 1.442695, %v5132_v31 }
0x130d   :  { %v5170_v22 = vadd.f32 %v6221_v12, %v5169_v53  ;;  %6222 = vpow2.f32 %v5146_v54 }
0x130f   :  { %v5174_v10 = vsel %vm5173_vm3, %v6221_v12, %v5170_v22 }
0x1310   :  { %v5179_v2 = vsel %vm5176_vm4, %v5178_v6, %v5174_v10  ;;  %v5153_v29 = vpop.xlane.xlu0 %5152  ;;  %v5125_v50 = vpop.xlane.xlu1 %5124 }
0x1311   :  { %v5180_v42 = vmul.f32 %v6209_v8, %v5179_v2  ;;  %6224 = vrcp.f32 %v5153_v29  ;;  %v5133_v9 = vsub.f32 %v5108_v5, %v5125_v50  ;;  %v5192_v40 = vand.u32 2147483648, %v5153_v29 }
0x1312   :  { %v5190_v14 = vand.u32 2147483647, %v5153_v29  ;;  %vm5186_vm6 = vweird.f32 %v5153_v29 }
0x1313   :  { %v9208_v44 = vpop.eup %6222  ;;  %5286 = vst [vmem:[%s9253_s8] sm:$0xff] %v5180_v42  ;;  %v5148_v43 = vmul.f32 1.442695, %v5133_v9  ;;  %v5193_v1 = vor.u32 1.1754944e-38, %v5192_v40 }
0x1314   :  { %5162 = vadd.xlane.f32.xlu2 %v9208_v44  ;;  %vm5191_vm8 = vcmp.eq.f32.partialorder %v5190_v14, 8.507059e+37 }
0x1315   :  { %6226 = vpow2.f32 %v5148_v43 }
0x1317   :  { %v6225_v47 = vpop.eup %6224 }
0x1318   :  { %v5182_v57 = vmul.f32 %v6225_v47, %v5153_v29  ;;  %vm5187_vm5 = vweird.f32 %v6225_v47 }
0x1319   :  { %vm5188_vm7 = vmor %vm5186_vm6, %vm5187_vm5 }
0x131a   :  { %v5183_v15 = vsub.f32 1.0, %v5182_v57 }
0x131b   :  { %v9214_v60 = vpop.eup %6226 }
0x131c   :  { %v5184_v24 = vmul.f32 %v6225_v47, %v5183_v15  ;;  %5164 = vadd.xlane.f32.xlu0 %v9214_v60 }
0x131e   :  { %v5185_v52 = vadd.f32 %v6225_v47, %v5184_v24 }
0x1320   :  { %v5189_v38 = vsel %vm5188_vm7, %v6225_v47, %v5185_v52 }
0x1321   :  { %v5194_v13 = vsel %vm5191_vm8, %v5193_v1, %v5189_v38 }
0x1322   :  { %v5195_v30 = vmul.f32 %v9193_v7, %v5194_v13 }
0x1324   :  { %5287 = vst [vmem:[%s9253_s8 + $0x8] sm:$0xff] %v5195_v30 }
0x1339   :  { %v5155_v16 = vpop.xlane.xlu1 %5154 }
0x133a   :  { %6228 = vrcp.f32 %v5155_v16  ;;  %v5207_v11 = vand.u32 2147483648, %v5155_v16  ;;  %v5205_v8 = vand.u32 2147483647, %v5155_v16  ;;  %vm5201_vm10 = vweird.f32 %v5155_v16 }
0x133c   :  { %v5208_v58 = vor.u32 1.1754944e-38, %v5207_v11  ;;  %vm5206_vm12 = vcmp.eq.f32.partialorder %v5205_v8, 8.507059e+37 }
0x1340   :  { %v6229_v4 = vpop.eup %6228 }
0x1341   :  { %v5197_v25 = vmul.f32 %v6229_v4, %v5155_v16  ;;  %v5157_v21 = vpop.xlane.xlu2 %5156  ;;  %vm5202_vm9 = vweird.f32 %v6229_v4 }
0x1342   :  { %6230 = vrcp.f32 %v5157_v21  ;;  %vm5203_vm11 = vmor %vm5201_vm10, %vm5202_vm9  ;;  %v5222_v19 = vand.u32 2147483648, %v5157_v21  ;;  %v5220_v28 = vand.u32 2147483647, %v5157_v21  ;;  %vm5216_vm14 = vweird.f32 %v5157_v21 }
0x1343   :  { %v5198_v46 = vsub.f32 1.0, %v5197_v25 }
0x1344   :  { %v5223_v59 = vor.u32 1.1754944e-38, %v5222_v19  ;;  %vm5221_vm0 = vcmp.eq.f32.partialorder %v5220_v28, 8.507059e+37 }
0x1345   :  { %v5199_v18 = vmul.f32 %v6229_v4, %v5198_v46 }
0x1347   :  { %v5200_v63 = vadd.f32 %v6229_v4, %v5199_v18 }
0x1348   :  { %v6231_v37 = vpop.eup %6230 }
0x1349   :  { %v5204_v39 = vsel %vm5203_vm11, %v6229_v4, %v5200_v63  ;;  %v5212_v48 = vmul.f32 %v6231_v37, %v5157_v21  ;;  %vm5217_vm13 = vweird.f32 %v6231_v37 }
0x134a   :  { %v5209_v33 = vsel %vm5206_vm12, %v5208_v58, %v5204_v39  ;;  %vm5218_vm15 = vmor %vm5216_vm14, %vm5217_vm13 }
0x134b   :  { %v5210_v5 = vmul.f32 %v9196_v36, %v5209_v33  ;;  %v5213_v7 = vsub.f32 1.0, %v5212_v48 }
0x134d   :  { %5288 = vst [vmem:[%s9253_s8 + $0x10] sm:$0xff] %v5210_v5  ;;  %v5214_v41 = vmul.f32 %v6231_v37, %v5213_v7 }
0x134f   :  { %v5215_v35 = vadd.f32 %v6231_v37, %v5214_v41 }
0x1351   :  { %v5219_v62 = vsel %vm5218_vm15, %v6231_v37, %v5215_v35  ;;  %v5159_v34 = vpop.xlane.xlu0 %5158 }
0x1352   :  { %v5224_v0 = vsel %vm5221_vm0, %v5223_v59, %v5219_v62  ;;  %6232 = vrcp.f32 %v5159_v34  ;;  %v5237_v23 = vand.u32 2147483648, %v5159_v34  ;;  %v5235_v32 = vand.u32 2147483647, %v5159_v34 }
0x1353   :  { %v5225_v36 = vmul.f32 %v9199_v51, %v5224_v0  ;;  %vm5231_vm2 = vweird.f32 %v5159_v34 }
0x1354   :  { %v5238_v31 = vor.u32 1.1754944e-38, %v5237_v23  ;;  %vm5236_vm4 = vcmp.eq.f32.partialorder %v5235_v32, 8.507059e+37 }
0x1355   :  { %5289 = vst [vmem:[%s9253_s8 + $0x18] sm:$0xff] %v5225_v36 }
0x1358   :  { %v6233_v26 = vpop.eup %6232 }
0x1359   :  { %v5227_v61 = vmul.f32 %v6233_v26, %v5159_v34  ;;  %v5161_v49 = vpop.xlane.xlu1 %5160  ;;  %vm5232_vm1 = vweird.f32 %v6233_v26 }
0x135a   :  { %6234 = vrcp.f32 %v5161_v49  ;;  %vm5233_vm3 = vmor %vm5231_vm2, %vm5232_vm1  ;;  %v5252_v22 = vand.u32 2147483648, %v5161_v49  ;;  %v5250_v10 = vand.u32 2147483647, %v5161_v49  ;;  %vm5246_vm6 = vweird.f32 %v5161_v49 }
0x135b   :  { %v5228_v45 = vsub.f32 1.0, %v5227_v61 }
0x135c   :  { %v5253_v29 = vor.u32 1.1754944e-38, %v5252_v22  ;;  %vm5251_vm8 = vcmp.eq.f32.partialorder %v5250_v10, 8.507059e+37 }
0x135d   :  { %v5229_v12 = vmul.f32 %v6233_v26, %v5228_v45 }
0x135f   :  { %v5230_v17 = vadd.f32 %v6233_v26, %v5229_v12 }
0x1360   :  { %v6235_v3 = vpop.eup %6234 }
0x1361   :  { %v5234_v27 = vsel %vm5233_vm3, %v6233_v26, %v5230_v17  ;;  %v5242_v51 = vmul.f32 %v6235_v3, %v5161_v49  ;;  %vm5247_vm5 = vweird.f32 %v6235_v3 }
0x1362   :  { %v5239_v53 = vsel %vm5236_vm4, %v5238_v31, %v5234_v27  ;;  %vm5248_vm7 = vmor %vm5246_vm6, %vm5247_vm5 }
0x1363   :  { %v5240_v56 = vmul.f32 %v9202_v55, %v5239_v53  ;;  %v5243_v54 = vsub.f32 1.0, %v5242_v51 }
0x1365   :  { %5290 = vst [vmem:[%s9253_s8 + $0x20] sm:$0xff] %v5240_v56  ;;  %v5244_v6 = vmul.f32 %v6235_v3, %v5243_v54 }
0x1367   :  { %v5245_v2 = vadd.f32 %v6235_v3, %v5244_v6 }
0x1369   :  { %v5249_v50 = vsel %vm5248_vm7, %v6235_v3, %v5245_v2 }
0x136a   :  { %v5254_v42 = vsel %vm5251_vm8, %v5253_v29, %v5249_v50 }
0x136b   :  { %v5255_v9 = vmul.f32 %v9205_v20, %v5254_v42 }
0x136d   :  { %5291 = vst [vmem:[%s9253_s8 + $0x28] sm:$0xff] %v5255_v9 }
0x1387   :  { %v5163_v55 = vpop.xlane.xlu2 %5162 }
0x1388   :  { %6236 = vrcp.f32 %v5163_v55  ;;  %v5267_v40 = vand.u32 2147483648, %v5163_v55  ;;  %v5265_v14 = vand.u32 2147483647, %v5163_v55  ;;  %vm5261_vm10 = vweird.f32 %v5163_v55 }
0x138a   :  { %v5268_v1 = vor.u32 1.1754944e-38, %v5267_v40  ;;  %vm5266_vm12 = vcmp.eq.f32.partialorder %v5265_v14, 8.507059e+37 }
0x138e   :  { %v6237_v43 = vpop.eup %6236 }
0x138f   :  { %v5257_v47 = vmul.f32 %v6237_v43, %v5163_v55  ;;  %v5165_v57 = vpop.xlane.xlu0 %5164  ;;  %vm5262_vm9 = vweird.f32 %v6237_v43 }
0x1390   :  { %6238 = vrcp.f32 %v5165_v57  ;;  %vm5263_vm11 = vmor %vm5261_vm10, %vm5262_vm9  ;;  %v5282_v25 = vand.u32 2147483648, %v5165_v57  ;;  %v5280_v46 = vand.u32 2147483647, %v5165_v57  ;;  %vm5276_vm14 = vweird.f32 %v5165_v57 }
0x1391   :  { %v5258_v15 = vsub.f32 1.0, %v5257_v47 }
0x1392   :  { %v5283_v18 = vor.u32 1.1754944e-38, %v5282_v25  ;;  %vm5281_vm0 = vcmp.eq.f32.partialorder %v5280_v46, 8.507059e+37 }
0x1393   :  { %v5259_v24 = vmul.f32 %v6237_v43, %v5258_v15 }
0x1395   :  { %v5260_v52 = vadd.f32 %v6237_v43, %v5259_v24 }
0x1396   :  { %v6239_v20 = vpop.eup %6238 }
0x1397   :  { %v5264_v38 = vsel %vm5263_vm11, %v6237_v43, %v5260_v52  ;;  %v5272_v30 = vmul.f32 %v6239_v20, %v5165_v57  ;;  %vm5277_vm13 = vweird.f32 %v6239_v20 }
0x1398   :  { %v5269_v13 = vsel %vm5266_vm12, %v5268_v1, %v5264_v38  ;;  %vm5278_vm15 = vmor %vm5276_vm14, %vm5277_vm13 }
0x1399   :  { %v5270_v16 = vmul.f32 %v9208_v44, %v5269_v13  ;;  %v5273_v4 = vsub.f32 1.0, %v5272_v30 }
0x139b   :  { %5292 = vst [vmem:[%s9253_s8 + $0x30] sm:$0xff] %v5270_v16  ;;  %v5274_v21 = vmul.f32 %v6239_v20, %v5273_v4 }
0x139d   :  { %v5275_v11 = vadd.f32 %v6239_v20, %v5274_v21 }
0x139f   :  { %v5279_v8 = vsel %vm5278_vm15, %v6239_v20, %v5275_v11 }
0x13a0   :  { %v5284_v63 = vsel %vm5281_vm0, %v5283_v18, %v5279_v8 }
0x13a1   :  { %v5285_v37 = vmul.f32 %v9214_v60, %v5284_v63 }
0x13a3   :  { %5293 = vst [vmem:[%s9253_s8 + $0x38] sm:$0xff] %v5285_v37 }

</bundles_post_ra>
